<compile_context>
chip_gen: v6e
topology: v6e:2x2x1
jax: 0.10.0
libtpu: 0.0.40
codegen_flags: <defaults>
</compile_context>

<pallas_src>
import jax
import jax.numpy as jnp
from jax.experimental import pallas as pl
from jax.experimental.pallas import tpu as pltpu

# Padded dims fixed by the module: 3072 -> 1000 -> 1000 -> 10.
_K1 = 3072   # 3*32*32, already a multiple of 128
_N1 = 1024   # 1000 padded to a multiple of 128
_N2 = 1024
_N3 = 128    # 10 padded to 128
_TM = 8      # padded batch rows (batch=2 -> 8)


def _fused_mlp_kernel(x_ref, w1_ref, b1_ref, w2_ref, b2_ref, w3_ref, b3_ref,
                      o_ref):
    """Single grid step: all (bf16) weights resident in VMEM, three fused
    matmul+bias+relu layers.  Matmul inputs are bf16, accumulation and all
    element-wise math are f32."""
    x = x_ref[...].astype(jnp.bfloat16)                       # (8, 3072)

    h1 = jnp.dot(x, w1_ref[...], preferred_element_type=jnp.float32)
    h1 = jnp.maximum(h1 + b1_ref[...], 0.0)                   # (8, 1024) f32

    h2 = jnp.dot(h1.astype(jnp.bfloat16), w2_ref[...],
                 preferred_element_type=jnp.float32)
    h2 = jnp.maximum(h2 + b2_ref[...], 0.0)                   # (8, 1024) f32

    h3 = jnp.dot(h2.astype(jnp.bfloat16), w3_ref[...],
                 preferred_element_type=jnp.float32)
    o_ref[...] = jnp.maximum(h3 + b3_ref[...], 0.0).astype(o_ref.dtype)


def _pad2d(a, rows, cols):
    r, c = a.shape
    return jnp.pad(a, ((0, rows - r), (0, cols - c)))


def init_params(key):
    """nn.Linear-style init; weights stored transposed as (in, out)."""
    sizes = [(3072, 1000), (1000, 1000), (1000, 10)]
    params = []
    for idx, (fan_in, fan_out) in enumerate(sizes):
        kw, kb = jax.random.split(jax.random.fold_in(key, idx))
        bound = 1.0 / jnp.sqrt(float(fan_in))
        w = jax.random.uniform(kw, (fan_in, fan_out), jnp.float32,
                               minval=-bound, maxval=bound)
        b = jax.random.uniform(kb, (fan_out,), jnp.float32,
                               minval=-bound, maxval=bound)
        params.append((w, b))
    return params


def prepare_params(params):
    """One-time (outside the jitted forward) zero-pad to tile shapes and cast
    weights to bf16.  Biases stay f32 so the post-matmul add/ReLU is f32."""
    (w1, b1), (w2, b2), (w3, b3) = params
    return (
        _pad2d(w1, _K1, _N1).astype(jnp.bfloat16),
        _pad2d(b1.reshape(1, -1), 1, _N1),
        _pad2d(w2, _N1, _N2).astype(jnp.bfloat16),
        _pad2d(b2.reshape(1, -1), 1, _N2),
        _pad2d(w3, _N2, _N3).astype(jnp.bfloat16),
        _pad2d(b3.reshape(1, -1), 1, _N3),
    )


@jax.jit
def part2_forward(x_nchw, padded_params):
    """Forward pass: flatten -> relu(L1) -> relu(L2) -> relu(L3)."""
    w1p, b1p, w2p, b2p, w3p, b3p = padded_params
    batch = x_nchw.shape[0]
    x = x_nchw.reshape(batch, -1)                  # nn.Flatten() on NCHW -> (B, 3072)
    xp = jnp.pad(x, ((0, _TM - batch), (0, 0)))    # pad batch rows to 8 (tiny, 96 KB)

    out = pl.pallas_call(
        _fused_mlp_kernel,
        out_shape=jax.ShapeDtypeStruct((_TM, _N3), jnp.float32),
        grid_spec=pltpu.PrefetchScalarGridSpec(
            num_scalar_prefetch=0,
            grid=(1,),                                        # single fused step
            in_specs=[
                pl.BlockSpec((_TM, _K1), lambda i: (0, 0)),   # x      (96 KB f32)
                pl.BlockSpec((_K1, _N1), lambda i: (0, 0)),   # w1     (6 MB bf16, contiguous)
                pl.BlockSpec((1, _N1), lambda i: (0, 0)),     # b1     (f32)
                pl.BlockSpec((_N1, _N2), lambda i: (0, 0)),   # w2     (2 MB bf16)
                pl.BlockSpec((1, _N2), lambda i: (0, 0)),     # b2     (f32)
                pl.BlockSpec((_N2, _N3), lambda i: (0, 0)),   # w3     (256 KB bf16)
                pl.BlockSpec((1, _N3), lambda i: (0, 0)),     # b3     (f32)
            ],
            out_specs=pl.BlockSpec((_TM, _N3), lambda i: (0, 0)),
        ),
        compiler_params=pltpu.CompilerParams(
            dimension_semantics=("arbitrary",),
            # ~8.6 MB live (<=~17 MB with default double buffers); 32 MiB
            # leaves headroom on v7x (64 MiB physical) and raises v5e's
            # 16 MiB default scoped limit.
            vmem_limit_bytes=32 * 1024 * 1024,
        ),
    )(xp, w1p, b1p, w2p, b2p, w3p, b3p)

    return out[:batch, :10]


if __name__ == "__main__":
    key = jax.random.PRNGKey(0)
    k_x, k_p = jax.random.split(key)

    # Spatial dims are fixed by the module: layer1 expects 3072 = 3*32*32.
    x = jax.random.normal(k_x, (2, 3, 32, 32), dtype=jnp.float32)
    params = init_params(k_p)
    padded_params = prepare_params(params)   # done once, outside the jitted forward

    out = part2_forward(x, padded_params)
    out = jax.block_until_ready(out)

    # Sanity check against a plain-JAX f32 reference (unpadded params).
    # Tolerance loosened because weights / matmul inputs are bf16 in the
    # kernel (f32 accumulation); observed error is ~1e-3 on outputs ~0.1.
    ref = x.reshape(2, -1)
    for w, b in params:
        ref = jnp.maximum(ref @ w + b, 0.0)
    assert out.shape == (2, 10), out.shape
    assert jnp.allclose(out, ref, atol=2e-2, rtol=2e-2), "mismatch vs reference"

    print("KERNEL_OK")
</pallas_src>

<mosaic_0001>
module attributes {stable_mosaic.version = 11 : i64} {
  func.func @_fused_mlp_kernel(%arg0: i32, %arg1: memref<8x3072xf32, #tpu.memory_space<vmem>>, %arg2: memref<3072x1024xbf16, #tpu.memory_space<vmem>>, %arg3: memref<1x1024xf32, #tpu.memory_space<vmem>>, %arg4: memref<1024x1024xbf16, #tpu.memory_space<vmem>>, %arg5: memref<1x1024xf32, #tpu.memory_space<vmem>>, %arg6: memref<1024x128xbf16, #tpu.memory_space<vmem>>, %arg7: memref<1x128xf32, #tpu.memory_space<vmem>>, %arg8: memref<8x128xf32, #tpu.memory_space<vmem>>) attributes {dimension_semantics = [#tpu.dimension_semantics<arbitrary>], iteration_bounds = array<i64: 1>, scalar_prefetch = 0 : i64, scratch_operands = 0 : i64, tpu.core_type = #tpu.core_type<tc>, window_params = [{pipeline_mode = #tpu.pipeline_mode<synchronous>, transform_indices = @transform_0, window_bounds = array<i64: 8, 3072>}, {pipeline_mode = #tpu.pipeline_mode<synchronous>, transform_indices = @transform_1, window_bounds = array<i64: 3072, 1024>}, {pipeline_mode = #tpu.pipeline_mode<synchronous>, transform_indices = @transform_2, window_bounds = array<i64: 1, 1024>}, {pipeline_mode = #tpu.pipeline_mode<synchronous>, transform_indices = @transform_3, window_bounds = array<i64: 1024, 1024>}, {pipeline_mode = #tpu.pipeline_mode<synchronous>, transform_indices = @transform_4, window_bounds = array<i64: 1, 1024>}, {pipeline_mode = #tpu.pipeline_mode<synchronous>, transform_indices = @transform_5, window_bounds = array<i64: 1024, 128>}, {pipeline_mode = #tpu.pipeline_mode<synchronous>, transform_indices = @transform_6, window_bounds = array<i64: 1, 128>}, {pipeline_mode = #tpu.pipeline_mode<synchronous>, transform_indices = @transform_7, window_bounds = array<i64: 8, 128>}]} {
    %c0 = arith.constant 0 : index
    %c0_0 = arith.constant 0 : index
    %0 = vector.load %arg1[%c0, %c0_0] : memref<8x3072xf32, #tpu.memory_space<vmem>>, vector<8x3072xf32>
    %1 = arith.truncf %0 : vector<8x3072xf32> to vector<8x3072xbf16>
    %c0_1 = arith.constant 0 : index
    %c0_2 = arith.constant 0 : index
    %2 = vector.load %arg2[%c0_1, %c0_2] : memref<3072x1024xbf16, #tpu.memory_space<vmem>>, vector<3072x1024xbf16>
    %cst = arith.constant dense<0.000000e+00> : vector<8x1024xf32>
    %3 = tpu.matmul %1, %2, %cst {dimension_numbers = #tpu.dot_dimension_numbers<[1], [0], [0], [1], [0, 0, 1, 1], [], []>} : vector<8x3072xbf16>, vector<3072x1024xbf16>, vector<8x1024xf32> -> vector<8x1024xf32>
    %c0_3 = arith.constant 0 : index
    %c0_4 = arith.constant 0 : index
    %4 = vector.load %arg3[%c0_3, %c0_4] : memref<1x1024xf32, #tpu.memory_space<vmem>>, vector<1x1024xf32>
    %5 = vector.broadcast %4 : vector<1x1024xf32> to vector<8x1024xf32>
    %6 = arith.addf %3, %5 : vector<8x1024xf32>
    %cst_5 = arith.constant 0.000000e+00 : f32
    %7 = vector.broadcast %cst_5 : f32 to vector<8x1024xf32>
    %8 = arith.maximumf %6, %7 : vector<8x1024xf32>
    %9 = arith.truncf %8 : vector<8x1024xf32> to vector<8x1024xbf16>
    %c0_6 = arith.constant 0 : index
    %c0_7 = arith.constant 0 : index
    %10 = vector.load %arg4[%c0_6, %c0_7] : memref<1024x1024xbf16, #tpu.memory_space<vmem>>, vector<1024x1024xbf16>
    %cst_8 = arith.constant dense<0.000000e+00> : vector<8x1024xf32>
    %11 = tpu.matmul %9, %10, %cst_8 {dimension_numbers = #tpu.dot_dimension_numbers<[1], [0], [0], [1], [0, 0, 1, 1], [], []>} : vector<8x1024xbf16>, vector<1024x1024xbf16>, vector<8x1024xf32> -> vector<8x1024xf32>
    %c0_9 = arith.constant 0 : index
    %c0_10 = arith.constant 0 : index
    %12 = vector.load %arg5[%c0_9, %c0_10] : memref<1x1024xf32, #tpu.memory_space<vmem>>, vector<1x1024xf32>
    %13 = vector.broadcast %12 : vector<1x1024xf32> to vector<8x1024xf32>
    %14 = arith.addf %11, %13 : vector<8x1024xf32>
    %cst_11 = arith.constant 0.000000e+00 : f32
    %15 = vector.broadcast %cst_11 : f32 to vector<8x1024xf32>
    %16 = arith.maximumf %14, %15 : vector<8x1024xf32>
    %17 = arith.truncf %16 : vector<8x1024xf32> to vector<8x1024xbf16>
    %c0_12 = arith.constant 0 : index
    %c0_13 = arith.constant 0 : index
    %18 = vector.load %arg6[%c0_12, %c0_13] : memref<1024x128xbf16, #tpu.memory_space<vmem>>, vector<1024x128xbf16>
    %cst_14 = arith.constant dense<0.000000e+00> : vector<8x128xf32>
    %19 = tpu.matmul %17, %18, %cst_14 {dimension_numbers = #tpu.dot_dimension_numbers<[1], [0], [0], [1], [0, 0, 1, 1], [], []>} : vector<8x1024xbf16>, vector<1024x128xbf16>, vector<8x128xf32> -> vector<8x128xf32>
    %c0_15 = arith.constant 0 : index
    %c0_16 = arith.constant 0 : index
    %20 = vector.load %arg7[%c0_15, %c0_16] : memref<1x128xf32, #tpu.memory_space<vmem>>, vector<1x128xf32>
    %21 = vector.broadcast %20 : vector<1x128xf32> to vector<8x128xf32>
    %22 = arith.addf %19, %21 : vector<8x128xf32>
    %cst_17 = arith.constant 0.000000e+00 : f32
    %23 = vector.broadcast %cst_17 : f32 to vector<8x128xf32>
    %24 = arith.maximumf %22, %23 : vector<8x128xf32>
    %c0_18 = arith.constant 0 : index
    %c0_19 = arith.constant 0 : index
    %25 = vector.load %arg8[%c0_18, %c0_19] : memref<8x128xf32, #tpu.memory_space<vmem>>, vector<8x128xf32>
    tpu.vector_store %arg8[%c0_18, %c0_19], %24 {strides = array<i32>} : memref<8x128xf32, #tpu.memory_space<vmem>>, vector<8x128xf32>,
    return
  }
  func.func @transform_0(%arg0: i32) -> (i32, i32) {
    %c0_i32 = arith.constant 0 : i32
    %c0_i32_0 = arith.constant 0 : i32
    %c0_i32_1 = arith.constant 0 : i32
    return %c0_i32, %c0_i32_0 : i32, i32
  }
  func.func @transform_1(%arg0: i32) -> (i32, i32) {
    %c0_i32 = arith.constant 0 : i32
    %c0_i32_0 = arith.constant 0 : i32
    %c0_i32_1 = arith.constant 0 : i32
    return %c0_i32, %c0_i32_0 : i32, i32
  }
  func.func @transform_2(%arg0: i32) -> (i32, i32) {
    %c0_i32 = arith.constant 0 : i32
    %c0_i32_0 = arith.constant 0 : i32
    %c0_i32_1 = arith.constant 0 : i32
    return %c0_i32, %c0_i32_0 : i32, i32
  }
  func.func @transform_3(%arg0: i32) -> (i32, i32) {
    %c0_i32 = arith.constant 0 : i32
    %c0_i32_0 = arith.constant 0 : i32
    %c0_i32_1 = arith.constant 0 : i32
    return %c0_i32, %c0_i32_0 : i32, i32
  }
  func.func @transform_4(%arg0: i32) -> (i32, i32) {
    %c0_i32 = arith.constant 0 : i32
    %c0_i32_0 = arith.constant 0 : i32
    %c0_i32_1 = arith.constant 0 : i32
    return %c0_i32, %c0_i32_0 : i32, i32
  }
  func.func @transform_5(%arg0: i32) -> (i32, i32) {
    %c0_i32 = arith.constant 0 : i32
    %c0_i32_0 = arith.constant 0 : i32
    %c0_i32_1 = arith.constant 0 : i32
    return %c0_i32, %c0_i32_0 : i32, i32
  }
  func.func @transform_6(%arg0: i32) -> (i32, i32) {
    %c0_i32 = arith.constant 0 : i32
    %c0_i32_0 = arith.constant 0 : i32
    %c0_i32_1 = arith.constant 0 : i32
    return %c0_i32, %c0_i32_0 : i32, i32
  }
  func.func @transform_7(%arg0: i32) -> (i32, i32) {
    %c0_i32 = arith.constant 0 : i32
    %c0_i32_0 = arith.constant 0 : i32
    %c0_i32_1 = arith.constant 0 : i32
    return %c0_i32, %c0_i32_0 : i32, i32
  }
}

</mosaic_0001>

<bundles_post_ra>
// kernel: part2_forward.1
= control target key start
LH: loop header
LB: loop body
LE: loop exit
PB: predicated region body
PF: predicated region fallthrough
CT: control target
= control target key end

     0   :  { %12 = vsyncpa [#allocation3], 0  ;;  %s18857_s0 = inlined_call_operand.vmem [shape: f32[8,3072], index: 0, kind: input, shape index: {}]   ;;  %s18858_s1 = inlined_call_operand.hbm [shape: bf16[3072,1024], index: 1, kind: input, shape index: {}]   ;;  %s18859_s2 = inlined_call_operand.hbm [shape: f32[1,1024], index: 2, kind: input, shape index: {}]   ;;  %s18860_s3 = inlined_call_operand.hbm [shape: bf16[1024,1024], index: 3, kind: input, shape index: {}]   ;;  %s18861_s4 = inlined_call_operand.hbm [shape: f32[1,1024], index: 4, kind: input, shape index: {}]   ;;  %s18862_s5 = inlined_call_operand.hbm [shape: bf16[1024,128], index: 5, kind: input, shape index: {}]   ;;  %s18863_s6 = inlined_call_operand.hbm [shape: f32[1,128], index: 6, kind: input, shape index: {}]   ;;  %s18864_s7 = inlined_call_operand.vmem [shape: f32[8,128], index: 7, kind: output, shape index: {}]  }
   0x1   :  { %13 = vsyncpa [#allocation5], 0 }
   0x2   :  { %14 = vsyncpa [#allocation8], 0 }
   0x3   :  { %15 = vsyncpa [#allocation11], 0  ;;  %s18275_s24 = smov [#allocation4]   ;;  %s18276_s26 = smov [#allocation7]  }
   0x4   :  { %s36_s25 = sshll.u32 %s18275_s24, 4  ;;  %s58_s27 = sshll.u32 %s18276_s26, 4  ;;  %s37_s25 = int_to_ptr.vmem [resolvable:$true] %s36_s25  ;;  %s59_s27 = int_to_ptr.vmem [resolvable:$true] %s58_s27 }
   0x5   :  { %s18155_s28 = scalar_lea.vmem %s37_s25, 128  ;;  %p18160_p1 = scmp.lt.s32.totalorder %s37_s25, %s37_s25 }
   0x6   :  { %p18156_p0 = scmp.ne.s32.totalorder %s37_s25, %s18155_s28  ;;  %p18161_p2 = scmp.lt.s32.totalorder %s18155_s28, %s18155_s28 }
   0x8   :  { %p18162_p3 = por %p18161_p2, %p18160_p1 }
   0xa   :  { %p18163_p4 = pnand %p18162_p3, %p18156_p0 }
   0xc   :  { %18166 = shalt.err (!%p18163_p4)
}
   0xd   :  { %39 = dma.hbm_to_vmem [thread:$0]  %s18859_s2, 128, %s37_s25, [#allocation5]  }
   0xe   :  { %s18175_s8 = scalar_lea.vmem %s59_s27, 128  ;;  %p18180_p6 = scmp.lt.s32.totalorder %s59_s27, %s59_s27 }
   0xf   :  { %p18176_p5 = scmp.ne.s32.totalorder %s59_s27, %s18175_s8  ;;  %p18181_p7 = scmp.lt.s32.totalorder %s18175_s8, %s18175_s8 }
  0x11   :  { %p18182_p8 = por %p18181_p7, %p18180_p6 }
  0x13   :  { %p18183_p9 = pnand %p18182_p8, %p18176_p5 }
  0x15   :  { %18186 = shalt.err (!%p18183_p9)
}
  0x16   :  { %61 = dma.hbm_to_vmem [thread:$0]  %s18861_s4, 128, %s59_s27, [#allocation8]  }
  0x17   :  { %s18277_s11 = smov [#allocation2]  }
  0x18   :  { %s23_s12 = sshll.u32 %s18277_s11, 4  ;;  %s24_s12 = int_to_ptr.vmem [resolvable:$true] %s23_s12 }
  0x19   :  { %s18195_s13 = scalar_lea.vmem %s24_s12, 196608  ;;  %p18200_p11 = scmp.lt.s32.totalorder %s24_s12, %s24_s12 }
  0x1a   :  { %p18196_p10 = scmp.ne.s32.totalorder %s24_s12, %s18195_s13  ;;  %p18201_p12 = scmp.lt.s32.totalorder %s18195_s13, %s18195_s13 }
  0x1c   :  { %p18202_p13 = por %p18201_p12, %p18200_p11 }
  0x1e   :  { %p18203_p0 = pnand %p18202_p13, %p18196_p10 }
  0x20   :  { %18206 = shalt.err (!%p18203_p0)
}
  0x21   :  { %s18278_s2 = smov 512   ;;  %s18279_s14 = smov 32  }
  0x22   :  { %29 = dma.hbm_to_vmem [thread:$0]  %s18858_s1, 196608, %s24_s12, [#allocation3], %s18278_s2, %s18278_s2, %s18279_s14  }
  0x23   :  { %s18280_s17 = smov [#allocation6]   ;;  %s18281_s4 = smov [#allocation9]  }
  0x24   :  { %s45_s18 = sshll.u32 %s18280_s17, 4  ;;  %s67_s19 = sshll.u32 %s18281_s4, 4  ;;  %s46_s18 = int_to_ptr.vmem [resolvable:$true] %s45_s18  ;;  %s68_s19 = int_to_ptr.vmem [resolvable:$true] %s67_s19 }
  0x25   :  { %s18215_s20 = scalar_lea.vmem %s46_s18, 65536  ;;  %p18220_p2 = scmp.lt.s32.totalorder %s46_s18, %s46_s18 }
  0x26   :  { %p18216_p1 = scmp.ne.s32.totalorder %s46_s18, %s18215_s20  ;;  %p18221_p3 = scmp.lt.s32.totalorder %s18215_s20, %s18215_s20 }
  0x28   :  { %p18222_p4 = por %p18221_p3, %p18220_p2 }
  0x2a   :  { %p18223_p5 = pnand %p18222_p4, %p18216_p1 }
  0x2c   :  { %18226 = shalt.err (!%p18223_p5)
}
  0x2d   :  { %51 = dma.hbm_to_vmem [thread:$0]  %s18860_s3, 65536, %s46_s18, [#allocation5], %s18278_s2, %s18278_s2, %s18279_s14  }
  0x2e   :  { %s18235_s23 = scalar_lea.vmem %s68_s19, 8192  ;;  %p18240_p7 = scmp.lt.s32.totalorder %s68_s19, %s68_s19 }
  0x2f   :  { %p18236_p6 = scmp.ne.s32.totalorder %s68_s19, %s18235_s23  ;;  %p18241_p8 = scmp.lt.s32.totalorder %s18235_s23, %s18235_s23 }
  0x31   :  { %p18242_p9 = por %p18241_p8, %p18240_p7 }
  0x33   :  { %p18243_p10 = pnand %p18242_p9, %p18236_p6 }
  0x35   :  { %18246 = shalt.err (!%p18243_p10)
}
  0x36   :  { %s18282_s1 = smov 64   ;;  %s18283_s24 = smov 4  }
  0x37   :  { %73 = dma.hbm_to_vmem [thread:$0]  %s18862_s5, 8192, %s68_s19, [#allocation8], %s18282_s1, %s18282_s1, %s18283_s24  }
  0x38   :  { %s18284_s27 = smov [#allocation10]  }
  0x39   :  { %s80_s28 = sshll.u32 %s18284_s27, 4  ;;  %s81_s28 = int_to_ptr.vmem [resolvable:$true] %s80_s28 }
  0x3a   :  { %s18255_s29 = scalar_lea.vmem %s81_s28, 16  ;;  %s18259_s3 = scalar_lea.vmem %s81_s28, 32 }
  0x3b   :  { %p18256_p11 = scmp.ne.s32.totalorder %s81_s28, %s18255_s29  ;;  %p18260_p12 = scmp.lt.s32.totalorder %s81_s28, %s81_s28 }
  0x3c   :  { %p18261_p13 = scmp.lt.s32.totalorder %s18259_s3, %s18255_s29 }
  0x3e   :  { %p18262_p0 = por %p18261_p13, %p18260_p12 }
  0x40   :  { %p18263_p1 = pnand %p18262_p0, %p18256_p11 }
  0x42   :  { %18266 = shalt.err (!%p18263_p1)
}
  0x43   :  { %83 = dma.hbm_to_vmem [thread:$0]  %s18863_s6, 16, %s81_s28, [#allocation11]  }
  0x44   :  { %18267 = dma.done.wait [#allocation3], 196608  }
  0x45   :  { %18268 = vsyncadd [#allocation3], 4294770688 }
  0x46   :  { %18269 = dma.done.wait [#allocation5], 65664  }
  0x47   :  { %18270 = vsyncadd [#allocation5], 4294901632 }
  0x48   :  { %18271 = dma.done.wait [#allocation8], 8320  }
  0x49   :  { %18272 = vsyncadd [#allocation8], 4294958976 }
  0x4a   :  { %18273 = dma.done.wait [#allocation11], 16  }
  0x4b   :  { %18274 = vsyncadd [#allocation11], 4294967280  ;;  %v207_v0 = vld [vmem:[#allocation2 + $0x1c0] sm:$0xff]  ;;  %v104_v53 = vld [vmem:[%s18857_s0 + $0x8] sm:$0xff] }
  0x4c   :  { %v211_v1 = vld [vmem:[#allocation2 + $0x1e0] sm:$0xff]  ;;  %v106_v54 = vld [vmem:[%s18857_s0 + $0x18] sm:$0xff]  ;;  %v18349_v58 = vpack.c.bf16 %v104_v53, %v104_v53 }
  0x4d   :  { %v335_v2 = vld [vmem:[#allocation2 + $0x5c0] sm:$0xff]  ;;  %v15925_v3 = vcombine.high %v207_v0, %v211_v1  ;;  %v15924_v5 = vcombine.low %v207_v0, %v211_v1  ;;  %v18351_v59 = vpack.c.bf16 %v106_v54, %v106_v54 }
  0x4e   :  { %v339_v4 = vld [vmem:[#allocation2 + $0x5e0] sm:$0xff]  ;;  %9441 = vmatprep.mubr.bf16.mxu0 %v18349_v58 }
  0x4f   :  { %v199_v6 = vld [vmem:[#allocation2 + $0x180] sm:$0xff]  ;;  %v16053_v8 = vcombine.high %v335_v2, %v339_v4  ;;  %v16052_v9 = vcombine.low %v335_v2, %v339_v4  ;;  %9409 = vmatprep.subr.bf16.mxu0 %v15925_v3  ;;  %9482 = vmatprep.mubr.bf16.mxu1 %v18351_v59 }
  0x50   :  { %v203_v7 = vld [vmem:[#allocation2 + $0x1a0] sm:$0xff]  ;;  %9410 = vmatpush1.bf16.msra.mxu0 %v15924_v5 }
  0x51   :  { %v15917_v10 = vcombine.high %v199_v6, %v203_v7  ;;  %v327_v11 = vld [vmem:[#allocation2 + $0x580] sm:$0xff]  ;;  %9450 = vmatprep.subr.bf16.mxu1 %v16053_v8  ;;  %v15916_v18 = vcombine.low %v199_v6, %v203_v7 }
  0x52   :  { %v331_v12 = vld [vmem:[#allocation2 + $0x5a0] sm:$0xff]  ;;  %9451 = vmatpush1.bf16.msra.mxu1 %v16052_v9 }
  0x53   :  { %v191_v13 = vld [vmem:[#allocation2 + $0x140] sm:$0xff]  ;;  %v16045_v14 = vcombine.high %v327_v11, %v331_v12  ;;  %9411 = vmatprep.subr.bf16.mxu0 %v15917_v10  ;;  %v16044_v19 = vcombine.low %v327_v11, %v331_v12 }
  0x54   :  { %v195_v15 = vld [vmem:[#allocation2 + $0x160] sm:$0xff]  ;;  %9412 = vmatpush1.bf16.msra.mxu0 %v15916_v18 }
  0x55   :  { %v319_v16 = vld [vmem:[#allocation2 + $0x540] sm:$0xff]  ;;  %v15909_v20 = vcombine.high %v191_v13, %v195_v15  ;;  %9452 = vmatprep.subr.bf16.mxu1 %v16045_v14  ;;  %v15908_v26 = vcombine.low %v191_v13, %v195_v15 }
  0x56   :  { %v323_v17 = vld [vmem:[#allocation2 + $0x560] sm:$0xff]  ;;  %9453 = vmatpush1.bf16.msra.mxu1 %v16044_v19 }
  0x57   :  { %v16037_v21 = vcombine.high %v319_v16, %v323_v17  ;;  %v183_v22 = vld [vmem:[#allocation2 + $0x100] sm:$0xff]  ;;  %9413 = vmatprep.subr.bf16.mxu0 %v15909_v20  ;;  %v16036_v27 = vcombine.low %v319_v16, %v323_v17 }
  0x58   :  { %v187_v23 = vld [vmem:[#allocation2 + $0x120] sm:$0xff]  ;;  %9414 = vmatpush1.bf16.msra.mxu0 %v15908_v26 }
  0x59   :  { %v311_v24 = vld [vmem:[#allocation2 + $0x500] sm:$0xff]  ;;  %v15901_v28 = vcombine.high %v183_v22, %v187_v23  ;;  %9454 = vmatprep.subr.bf16.mxu1 %v16037_v21  ;;  %v15900_v34 = vcombine.low %v183_v22, %v187_v23 }
  0x5a   :  { %v315_v25 = vld [vmem:[#allocation2 + $0x520] sm:$0xff]  ;;  %9455 = vmatpush1.bf16.msra.mxu1 %v16036_v27 }
  0x5b   :  { %v16029_v29 = vcombine.high %v311_v24, %v315_v25  ;;  %v175_v30 = vld [vmem:[#allocation2 + $0xc0] sm:$0xff]  ;;  %9415 = vmatprep.subr.bf16.mxu0 %v15901_v28  ;;  %v16028_v35 = vcombine.low %v311_v24, %v315_v25 }
  0x5c   :  { %v179_v31 = vld [vmem:[#allocation2 + $0xe0] sm:$0xff]  ;;  %9416 = vmatpush1.bf16.msra.mxu0 %v15900_v34 }
  0x5d   :  { %v303_v32 = vld [vmem:[#allocation2 + $0x4c0] sm:$0xff]  ;;  %v15893_v36 = vcombine.high %v175_v30, %v179_v31  ;;  %9456 = vmatprep.subr.bf16.mxu1 %v16029_v29  ;;  %v15892_v42 = vcombine.low %v175_v30, %v179_v31 }
  0x5e   :  { %v307_v33 = vld [vmem:[#allocation2 + $0x4e0] sm:$0xff]  ;;  %9457 = vmatpush1.bf16.msra.mxu1 %v16028_v35 }
  0x5f   :  { %v16021_v37 = vcombine.high %v303_v32, %v307_v33  ;;  %v167_v38 = vld [vmem:[#allocation2 + $0x80] sm:$0xff]  ;;  %9417 = vmatprep.subr.bf16.mxu0 %v15893_v36  ;;  %v16020_v43 = vcombine.low %v303_v32, %v307_v33 }
  0x60   :  { %v171_v39 = vld [vmem:[#allocation2 + $0xa0] sm:$0xff]  ;;  %9418 = vmatpush1.bf16.msra.mxu0 %v15892_v42 }
  0x61   :  { %v295_v40 = vld [vmem:[#allocation2 + $0x480] sm:$0xff]  ;;  %v15885_v44 = vcombine.high %v167_v38, %v171_v39  ;;  %9458 = vmatprep.subr.bf16.mxu1 %v16021_v37  ;;  %v15884_v50 = vcombine.low %v167_v38, %v171_v39 }
  0x62   :  { %v299_v41 = vld [vmem:[#allocation2 + $0x4a0] sm:$0xff]  ;;  %9459 = vmatpush1.bf16.msra.mxu1 %v16020_v43 }
  0x63   :  { %v16013_v45 = vcombine.high %v295_v40, %v299_v41  ;;  %v159_v46 = vld [vmem:[#allocation2 + $0x40] sm:$0xff]  ;;  %9419 = vmatprep.subr.bf16.mxu0 %v15885_v44  ;;  %v16012_v51 = vcombine.low %v295_v40, %v299_v41 }
  0x64   :  { %v163_v47 = vld [vmem:[#allocation2 + $0x60] sm:$0xff]  ;;  %9420 = vmatpush1.bf16.msra.mxu0 %v15884_v50 }
  0x65   :  { %v287_v48 = vld [vmem:[#allocation2 + $0x440] sm:$0xff]  ;;  %v15877_v52 = vcombine.high %v159_v46, %v163_v47  ;;  %9460 = vmatprep.subr.bf16.mxu1 %v16013_v45  ;;  %v15876_v62 = vcombine.low %v159_v46, %v163_v47 }
  0x66   :  { %v291_v49 = vld [vmem:[#allocation2 + $0x460] sm:$0xff]  ;;  %9461 = vmatpush1.bf16.msra.mxu1 %v16012_v51 }
  0x67   :  { %v16005_v55 = vcombine.high %v287_v48, %v291_v49  ;;  %v151_v56 = vld [vmem:[#allocation2] sm:$0xff]  ;;  %9421 = vmatprep.subr.bf16.mxu0 %v15877_v52  ;;  %v16004_v63 = vcombine.low %v287_v48, %v291_v49 }
  0x68   :  { %v155_v57 = vld [vmem:[#allocation2 + $0x20] sm:$0xff]  ;;  %9422 = vmatpush1.bf16.msra.mxu0 %v15876_v62 }
  0x69   :  { %v279_v60 = vld [vmem:[#allocation2 + $0x400] sm:$0xff]  ;;  %v15869_v0 = vcombine.high %v151_v56, %v155_v57  ;;  %9462 = vmatprep.subr.bf16.mxu1 %v16005_v55  ;;  %v15868_v6 = vcombine.low %v151_v56, %v155_v57 }
  0x6a   :  { %v283_v61 = vld [vmem:[#allocation2 + $0x420] sm:$0xff]  ;;  %9463 = vmatpush1.bf16.msra.mxu1 %v16004_v63 }
  0x6b   :  { %v15997_v1 = vcombine.high %v279_v60, %v283_v61  ;;  %v271_v2 = vld [vmem:[#allocation2 + $0x3c0] sm:$0xff]  ;;  %9423 = vmatprep.subr.bf16.mxu0 %v15869_v0  ;;  %v15996_v7 = vcombine.low %v279_v60, %v283_v61 }
  0x6c   :  { %v275_v3 = vld [vmem:[#allocation2 + $0x3e0] sm:$0xff]  ;;  %9424 = vmatpush1.bf16.msra.mxu0 %v15868_v6 }
  0x6d   :  { %v399_v4 = vld [vmem:[#allocation2 + $0x7c0] sm:$0xff]  ;;  %v15989_v8 = vcombine.high %v271_v2, %v275_v3  ;;  %9464 = vmatprep.subr.bf16.mxu1 %v15997_v1  ;;  %v15988_v14 = vcombine.low %v271_v2, %v275_v3 }
  0x6e   :  { %v403_v5 = vld [vmem:[#allocation2 + $0x7e0] sm:$0xff]  ;;  %9465 = vmatpush1.bf16.msra.mxu1 %v15996_v7 }
  0x6f   :  { %v16117_v9 = vcombine.high %v399_v4, %v403_v5  ;;  %v263_v10 = vld [vmem:[#allocation2 + $0x380] sm:$0xff]  ;;  %9425 = vmatprep.subr.bf16.mxu0 %v15989_v8  ;;  %v16116_v15 = vcombine.low %v399_v4, %v403_v5 }
  0x70   :  { %v267_v11 = vld [vmem:[#allocation2 + $0x3a0] sm:$0xff]  ;;  %9426 = vmatpush2.bf16.msra.mxu0 %v15988_v14 }
  0x71   :  { %v391_v12 = vld [vmem:[#allocation2 + $0x780] sm:$0xff]  ;;  %v15981_v16 = vcombine.high %v263_v10, %v267_v11  ;;  %9466 = vmatprep.subr.bf16.mxu1 %v16117_v9  ;;  %v15980_v22 = vcombine.low %v263_v10, %v267_v11  ;;  %v105_v11 = vld [vmem:[%s18857_s0 + $0x10] sm:$0xff] }
  0x72   :  { %v395_v13 = vld [vmem:[#allocation2 + $0x7a0] sm:$0xff]  ;;  %9467 = vmatpush2.bf16.msra.mxu1 %v16116_v15 }
  0x73   :  { %v16109_v17 = vcombine.high %v391_v12, %v395_v13  ;;  %v255_v18 = vld [vmem:[#allocation2 + $0x340] sm:$0xff]  ;;  %9427 = vmatprep.subr.bf16.mxu0 %v15981_v16  ;;  %v16108_v23 = vcombine.low %v391_v12, %v395_v13 }
  0x74   :  { %v259_v19 = vld [vmem:[#allocation2 + $0x360] sm:$0xff]  ;;  %9428 = vmatpush2.bf16.msra.mxu0 %v15980_v22  ;;  %v110_v22 = vld [vmem:[%s18857_s0 + $0x38] sm:$0xff] }
  0x75   :  { %v383_v20 = vld [vmem:[#allocation2 + $0x740] sm:$0xff]  ;;  %v15973_v24 = vcombine.high %v255_v18, %v259_v19  ;;  %9468 = vmatprep.subr.bf16.mxu1 %v16109_v17  ;;  %v15972_v30 = vcombine.low %v255_v18, %v259_v19  ;;  %v108_v19 = vld [vmem:[%s18857_s0 + $0x28] sm:$0xff] }
  0x76   :  { %v387_v21 = vld [vmem:[#allocation2 + $0x760] sm:$0xff]  ;;  %9469 = vmatpush2.bf16.msra.mxu1 %v16108_v23 }
  0x77   :  { %v16101_v25 = vcombine.high %v383_v20, %v387_v21  ;;  %v247_v26 = vld [vmem:[#allocation2 + $0x300] sm:$0xff]  ;;  %9429 = vmatprep.subr.bf16.mxu0 %v15973_v24  ;;  %v16100_v31 = vcombine.low %v383_v20, %v387_v21  ;;  %v18366_v20 = vpack.c.bf16 %v105_v11, %v105_v11 }
  0x78   :  { %v251_v27 = vld [vmem:[#allocation2 + $0x320] sm:$0xff]  ;;  %9430 = vmatpush2.bf16.msra.mxu0 %v15972_v30 }
  0x79   :  { %v375_v28 = vld [vmem:[#allocation2 + $0x700] sm:$0xff]  ;;  %v15965_v32 = vcombine.high %v247_v26, %v251_v27  ;;  %9470 = vmatprep.subr.bf16.mxu1 %v16101_v25  ;;  %v15964_v38 = vcombine.low %v247_v26, %v251_v27 }
  0x7a   :  { %v379_v29 = vld [vmem:[#allocation2 + $0x720] sm:$0xff]  ;;  %9471 = vmatpush2.bf16.msra.mxu1 %v16100_v31  ;;  %v18374_v31 = vpack.c.bf16 %v110_v22, %v110_v22 }
  0x7b   :  { %v16093_v33 = vcombine.high %v375_v28, %v379_v29  ;;  %v239_v34 = vld [vmem:[#allocation2 + $0x2c0] sm:$0xff]  ;;  %9431 = vmatprep.subr.bf16.mxu0 %v15965_v32  ;;  %v16092_v39 = vcombine.low %v375_v28, %v379_v29  ;;  %v18371_v28 = vpack.c.bf16 %v108_v19, %v108_v19 }
  0x7c   :  { %v243_v35 = vld [vmem:[#allocation2 + $0x2e0] sm:$0xff]  ;;  %9432 = vmatpush2.bf16.msra.mxu0 %v15964_v38 }
  0x7d   :  { %v367_v36 = vld [vmem:[#allocation2 + $0x6c0] sm:$0xff]  ;;  %v15957_v40 = vcombine.high %v239_v34, %v243_v35  ;;  %9472 = vmatprep.subr.bf16.mxu1 %v16093_v33  ;;  %v15956_v46 = vcombine.low %v239_v34, %v243_v35 }
  0x7e   :  { %v371_v37 = vld [vmem:[#allocation2 + $0x6e0] sm:$0xff]  ;;  %9473 = vmatpush2.bf16.msra.mxu1 %v16092_v39 }
  0x7f   :  { %v16085_v41 = vcombine.high %v367_v36, %v371_v37  ;;  %v231_v42 = vld [vmem:[#allocation2 + $0x280] sm:$0xff]  ;;  %9433 = vmatprep.subr.bf16.mxu0 %v15957_v40  ;;  %v16084_v47 = vcombine.low %v367_v36, %v371_v37 }
  0x80   :  { %v235_v43 = vld [vmem:[#allocation2 + $0x2a0] sm:$0xff]  ;;  %9434 = vmatpush2.bf16.msra.mxu0 %v15956_v46 }
  0x81   :  { %v359_v44 = vld [vmem:[#allocation2 + $0x680] sm:$0xff]  ;;  %v15949_v48 = vcombine.high %v231_v42, %v235_v43  ;;  %9474 = vmatprep.subr.bf16.mxu1 %v16085_v41  ;;  %v15948_v54 = vcombine.low %v231_v42, %v235_v43 }
  0x82   :  { %v363_v45 = vld [vmem:[#allocation2 + $0x6a0] sm:$0xff]  ;;  %9475 = vmatpush2.bf16.msra.mxu1 %v16084_v47 }
  0x83   :  { %v16077_v49 = vcombine.high %v359_v44, %v363_v45  ;;  %v223_v50 = vld [vmem:[#allocation2 + $0x240] sm:$0xff]  ;;  %9435 = vmatprep.subr.bf16.mxu0 %v15949_v48  ;;  %v16076_v55 = vcombine.low %v359_v44, %v363_v45 }
  0x84   :  { %v227_v51 = vld [vmem:[#allocation2 + $0x260] sm:$0xff]  ;;  %9436 = vmatpush2.bf16.msra.mxu0 %v15948_v54 }
  0x85   :  { %v351_v52 = vld [vmem:[#allocation2 + $0x640] sm:$0xff]  ;;  %v15941_v56 = vcombine.high %v223_v50, %v227_v51  ;;  %9476 = vmatprep.subr.bf16.mxu1 %v16077_v49  ;;  %v15940_v0 = vcombine.low %v223_v50, %v227_v51 }
  0x86   :  { %v355_v53 = vld [vmem:[#allocation2 + $0x660] sm:$0xff]  ;;  %9477 = vmatpush2.bf16.msra.mxu1 %v16076_v55 }
  0x87   :  { %v16069_v57 = vcombine.high %v351_v52, %v355_v53  ;;  %v215_v60 = vld [vmem:[#allocation2 + $0x200] sm:$0xff]  ;;  %9437 = vmatprep.subr.bf16.mxu0 %v15941_v56  ;;  %v16068_v1 = vcombine.low %v351_v52, %v355_v53 }
  0x88   :  { %v219_v61 = vld [vmem:[#allocation2 + $0x220] sm:$0xff]  ;;  %9438 = vmatpush2.bf16.msra.mxu0 %v15940_v0 }
  0x89   :  { %v343_v62 = vld [vmem:[#allocation2 + $0x600] sm:$0xff]  ;;  %v15933_v2 = vcombine.high %v215_v60, %v219_v61  ;;  %9478 = vmatprep.subr.bf16.mxu1 %v16069_v57  ;;  %v15932_v8 = vcombine.low %v215_v60, %v219_v61 }
  0x8a   :  { %v347_v63 = vld [vmem:[#allocation2 + $0x620] sm:$0xff]  ;;  %9479 = vmatpush2.bf16.msra.mxu1 %v16068_v1 }
  0x8b   :  { %v16061_v3 = vcombine.high %v343_v62, %v347_v63  ;;  %v463_v4 = vld [vmem:[#allocation2 + $0x9c0] sm:$0xff]  ;;  %9439 = vmatprep.subr.bf16.mxu0 %v15933_v2  ;;  %v16060_v10 = vcombine.low %v343_v62, %v347_v63 }
  0x8c   :  { %v467_v5 = vld [vmem:[#allocation2 + $0x9e0] sm:$0xff]  ;;  %9440 = vmatpush2.bf16.msra.mxu0 %v15932_v8 }
  0x8d   :  { %v591_v6 = vld [vmem:[#allocation2 + $0xdc0] sm:$0xff]  ;;  %v16181_v12 = vcombine.high %v463_v4, %v467_v5  ;;  %9480 = vmatprep.subr.bf16.mxu1 %v16061_v3  ;;  %v16180_v21 = vcombine.low %v463_v4, %v467_v5 }
  0x8e   :  { %v595_v7 = vld [vmem:[#allocation2 + $0xde0] sm:$0xff]  ;;  %9481 = vmatpush2.bf16.msra.mxu1 %v16060_v10 }
  0x8f   :  { %v103_v9 = vld [vmem:[%s18857_s0] sm:$0xff]  ;;  %v16309_v13 = vcombine.high %v591_v6, %v595_v7  ;;  %9491 = vmatprep.subr.bf16.mxu0 %v16181_v12  ;;  %v16308_v23 = vcombine.low %v591_v6, %v595_v7 }
  0x90   :  { %v455_v14 = vld [vmem:[#allocation2 + $0x980] sm:$0xff]  ;;  %v18361_v16 = vpack.c.bf16 %v103_v9, %v103_v9 }
  0x91   :  { %v459_v15 = vld [vmem:[#allocation2 + $0x9a0] sm:$0xff]  ;;  %9532 = vmatprep.subr.bf16.mxu1 %v16309_v13  ;;  %9483 = vmatmul.mubr.bf16.vlgmr.msra.gmra.mxu1 %v18366_v20 }
  0x92   :  { %v583_v17 = vld [vmem:[#allocation2 + $0xd80] sm:$0xff]  ;;  %v16173_v24 = vcombine.high %v455_v14, %v459_v15  ;;  %9442 = vmatmul.mubr.bf16.vlgmr.msra.gmra.mxu0 %v18361_v16  ;;  %v16172_v32 = vcombine.low %v455_v14, %v459_v15  ;;  %9533 = vmatpush1.bf16.msra.mxu1 %v16308_v23 }
  0x93   :  { %v587_v18 = vld [vmem:[#allocation2 + $0xda0] sm:$0xff]  ;;  %9492 = vmatpush1.bf16.msra.mxu0 %v16180_v21  ;;  %9523 = vmatprep.mubr.bf16.mxu0 %v18371_v28 }
  0x94   :  { %v16301_v25 = vcombine.high %v583_v17, %v587_v18  ;;  %v447_v26 = vld [vmem:[#allocation2 + $0x940] sm:$0xff]  ;;  %9493 = vmatprep.subr.bf16.mxu0 %v16173_v24  ;;  %v16300_v33 = vcombine.low %v583_v17, %v587_v18  ;;  %9564 = vmatprep.mubr.bf16.mxu1 %v18374_v31 }
  0x95   :  { %v451_v27 = vld [vmem:[#allocation2 + $0x960] sm:$0xff] }
  0x96   :  { %v575_v29 = vld [vmem:[#allocation2 + $0xd40] sm:$0xff]  ;;  %v16165_v34 = vcombine.high %v447_v26, %v451_v27  ;;  %9534 = vmatprep.subr.bf16.mxu1 %v16301_v25  ;;  %v16164_v40 = vcombine.low %v447_v26, %v451_v27 }
  0x97   :  { %v579_v30 = vld [vmem:[#allocation2 + $0xd60] sm:$0xff]  ;;  %9494 = vmatpush1.bf16.msra.mxu0 %v16172_v32  ;;  %9535 = vmatpush1.bf16.msra.mxu1 %v16300_v33 }
  0x98   :  { %v439_v35 = vld [vmem:[#allocation2 + $0x900] sm:$0xff]  ;;  %v16293_v37 = vcombine.high %v575_v29, %v579_v30  ;;  %9495 = vmatprep.subr.bf16.mxu0 %v16165_v34  ;;  %v16292_v41 = vcombine.low %v575_v29, %v579_v30 }
  0x99   :  { %v443_v36 = vld [vmem:[#allocation2 + $0x920] sm:$0xff] }
  0x9a   :  { %v567_v38 = vld [vmem:[#allocation2 + $0xd00] sm:$0xff]  ;;  %v16157_v42 = vcombine.high %v439_v35, %v443_v36  ;;  %9536 = vmatprep.subr.bf16.mxu1 %v16293_v37  ;;  %v16156_v48 = vcombine.low %v439_v35, %v443_v36 }
  0x9b   :  { %v571_v39 = vld [vmem:[#allocation2 + $0xd20] sm:$0xff]  ;;  %9496 = vmatpush1.bf16.msra.mxu0 %v16164_v40  ;;  %9537 = vmatpush1.bf16.msra.mxu1 %v16292_v41 }
  0x9c   :  { %v431_v43 = vld [vmem:[#allocation2 + $0x8c0] sm:$0xff]  ;;  %v16285_v46 = vcombine.high %v567_v38, %v571_v39  ;;  %9497 = vmatprep.subr.bf16.mxu0 %v16157_v42  ;;  %v16284_v49 = vcombine.low %v567_v38, %v571_v39 }
  0x9d   :  { %v435_v44 = vld [vmem:[#allocation2 + $0x8e0] sm:$0xff] }
  0x9e   :  { %v559_v45 = vld [vmem:[#allocation2 + $0xcc0] sm:$0xff]  ;;  %v16149_v50 = vcombine.high %v431_v43, %v435_v44  ;;  %9538 = vmatprep.subr.bf16.mxu1 %v16285_v46  ;;  %v16148_v56 = vcombine.low %v431_v43, %v435_v44 }
  0x9f   :  { %v563_v47 = vld [vmem:[#allocation2 + $0xce0] sm:$0xff]  ;;  %9498 = vmatpush1.bf16.msra.mxu0 %v16156_v48  ;;  %9539 = vmatpush1.bf16.msra.mxu1 %v16284_v49 }
  0xa0   :  { %v423_v51 = vld [vmem:[#allocation2 + $0x880] sm:$0xff]  ;;  %v16277_v54 = vcombine.high %v559_v45, %v563_v47  ;;  %9499 = vmatprep.subr.bf16.mxu0 %v16149_v50  ;;  %v16276_v57 = vcombine.low %v559_v45, %v563_v47 }
  0xa1   :  { %v427_v52 = vld [vmem:[#allocation2 + $0x8a0] sm:$0xff] }
  0xa2   :  { %v551_v53 = vld [vmem:[#allocation2 + $0xc80] sm:$0xff]  ;;  %v16141_v60 = vcombine.high %v423_v51, %v427_v52  ;;  %9540 = vmatprep.subr.bf16.mxu1 %v16277_v54  ;;  %v16140_v2 = vcombine.low %v423_v51, %v427_v52 }
  0xa3   :  { %v555_v55 = vld [vmem:[#allocation2 + $0xca0] sm:$0xff]  ;;  %9500 = vmatpush1.bf16.msra.mxu0 %v16148_v56  ;;  %9541 = vmatpush1.bf16.msra.mxu1 %v16276_v57 }
  0xa4   :  { %v415_v61 = vld [vmem:[#allocation2 + $0x840] sm:$0xff]  ;;  %v16269_v0 = vcombine.high %v551_v53, %v555_v55  ;;  %9501 = vmatprep.subr.bf16.mxu0 %v16141_v60  ;;  %v16268_v3 = vcombine.low %v551_v53, %v555_v55 }
  0xa5   :  { %v419_v62 = vld [vmem:[#allocation2 + $0x860] sm:$0xff] }
  0xa6   :  { %v543_v63 = vld [vmem:[#allocation2 + $0xc40] sm:$0xff]  ;;  %v16133_v4 = vcombine.high %v415_v61, %v419_v62  ;;  %9542 = vmatprep.subr.bf16.mxu1 %v16269_v0  ;;  %v16132_v10 = vcombine.low %v415_v61, %v419_v62 }
  0xa7   :  { %v547_v1 = vld [vmem:[#allocation2 + $0xc60] sm:$0xff]  ;;  %9502 = vmatpush1.bf16.msra.mxu0 %v16140_v2  ;;  %9543 = vmatpush1.bf16.msra.mxu1 %v16268_v3 }
  0xa8   :  { %v407_v5 = vld [vmem:[#allocation2 + $0x800] sm:$0xff]  ;;  %v16261_v8 = vcombine.high %v543_v63, %v547_v1  ;;  %9503 = vmatprep.subr.bf16.mxu0 %v16133_v4  ;;  %v16260_v11 = vcombine.low %v543_v63, %v547_v1 }
  0xa9   :  { %v411_v6 = vld [vmem:[#allocation2 + $0x820] sm:$0xff] }
  0xaa   :  { %v535_v7 = vld [vmem:[#allocation2 + $0xc00] sm:$0xff]  ;;  %v16125_v12 = vcombine.high %v407_v5, %v411_v6  ;;  %9544 = vmatprep.subr.bf16.mxu1 %v16261_v8  ;;  %v16124_v19 = vcombine.low %v407_v5, %v411_v6 }
  0xab   :  { %v539_v9 = vld [vmem:[#allocation2 + $0xc20] sm:$0xff]  ;;  %9504 = vmatpush1.bf16.msra.mxu0 %v16132_v10  ;;  %9545 = vmatpush1.bf16.msra.mxu1 %v16260_v11 }
  0xac   :  { %v527_v13 = vld [vmem:[#allocation2 + $0xbc0] sm:$0xff]  ;;  %v16253_v17 = vcombine.high %v535_v7, %v539_v9  ;;  %9505 = vmatprep.subr.bf16.mxu0 %v16125_v12  ;;  %v16252_v21 = vcombine.low %v535_v7, %v539_v9 }
  0xad   :  { %v531_v14 = vld [vmem:[#allocation2 + $0xbe0] sm:$0xff] }
  0xae   :  { %v655_v15 = vld [vmem:[#allocation2 + $0xfc0] sm:$0xff]  ;;  %v16245_v22 = vcombine.high %v527_v13, %v531_v14  ;;  %9546 = vmatprep.subr.bf16.mxu1 %v16253_v17  ;;  %v16244_v29 = vcombine.low %v527_v13, %v531_v14 }
  0xaf   :  { %v659_v18 = vld [vmem:[#allocation2 + $0xfe0] sm:$0xff]  ;;  %9506 = vmatpush1.bf16.msra.mxu0 %v16124_v19  ;;  %9547 = vmatpush1.bf16.msra.mxu1 %v16252_v21 }
  0xb0   :  { %v519_v23 = vld [vmem:[#allocation2 + $0xb80] sm:$0xff]  ;;  %v16373_v26 = vcombine.high %v655_v15, %v659_v18  ;;  %9507 = vmatprep.subr.bf16.mxu0 %v16245_v22  ;;  %v16372_v30 = vcombine.low %v655_v15, %v659_v18 }
  0xb1   :  { %v523_v24 = vld [vmem:[#allocation2 + $0xba0] sm:$0xff] }
  0xb2   :  { %v647_v25 = vld [vmem:[#allocation2 + $0xf80] sm:$0xff]  ;;  %v16237_v32 = vcombine.high %v519_v23, %v523_v24  ;;  %9548 = vmatprep.subr.bf16.mxu1 %v16373_v26  ;;  %v16236_v38 = vcombine.low %v519_v23, %v523_v24 }
  0xb3   :  { %v651_v27 = vld [vmem:[#allocation2 + $0xfa0] sm:$0xff]  ;;  %9508 = vmatpush2.bf16.msra.mxu0 %v16244_v29  ;;  %9549 = vmatpush2.bf16.msra.mxu1 %v16372_v30 }
  0xb4   :  { %v511_v33 = vld [vmem:[#allocation2 + $0xb40] sm:$0xff]  ;;  %v16365_v36 = vcombine.high %v647_v25, %v651_v27  ;;  %9509 = vmatprep.subr.bf16.mxu0 %v16237_v32  ;;  %v16364_v39 = vcombine.low %v647_v25, %v651_v27  ;;  %v109_v27 = vld [vmem:[%s18857_s0 + $0x30] sm:$0xff] }
  0xb5   :  { %v515_v34 = vld [vmem:[#allocation2 + $0xb60] sm:$0xff] }
  0xb6   :  { %v639_v35 = vld [vmem:[#allocation2 + $0xf40] sm:$0xff]  ;;  %v16229_v40 = vcombine.high %v511_v33, %v515_v34  ;;  %9550 = vmatprep.subr.bf16.mxu1 %v16365_v36  ;;  %v16228_v46 = vcombine.low %v511_v33, %v515_v34 }
  0xb7   :  { %v643_v37 = vld [vmem:[#allocation2 + $0xf60] sm:$0xff]  ;;  %9510 = vmatpush2.bf16.msra.mxu0 %v16236_v38  ;;  %9551 = vmatpush2.bf16.msra.mxu1 %v16364_v39  ;;  %v112_v38 = vld [vmem:[%s18857_s0 + $0x48] sm:$0xff] }
  0xb8   :  { %v503_v41 = vld [vmem:[#allocation2 + $0xb00] sm:$0xff]  ;;  %v16357_v44 = vcombine.high %v639_v35, %v643_v37  ;;  %9511 = vmatprep.subr.bf16.mxu0 %v16229_v40  ;;  %v16356_v47 = vcombine.low %v639_v35, %v643_v37  ;;  %v18390_v40 = vpack.c.bf16 %v109_v27, %v109_v27 }
  0xb9   :  { %v507_v42 = vld [vmem:[#allocation2 + $0xb20] sm:$0xff] }
  0xba   :  { %v631_v43 = vld [vmem:[#allocation2 + $0xf00] sm:$0xff]  ;;  %v16221_v48 = vcombine.high %v503_v41, %v507_v42  ;;  %9552 = vmatprep.subr.bf16.mxu1 %v16357_v44  ;;  %v16220_v54 = vcombine.low %v503_v41, %v507_v42  ;;  %v114_v42 = vld [vmem:[%s18857_s0 + $0x58] sm:$0xff] }
  0xbb   :  { %v635_v45 = vld [vmem:[#allocation2 + $0xf20] sm:$0xff]  ;;  %9512 = vmatpush2.bf16.msra.mxu0 %v16228_v46  ;;  %9553 = vmatpush2.bf16.msra.mxu1 %v16356_v47 }
  0xbc   :  { %v495_v49 = vld [vmem:[#allocation2 + $0xac0] sm:$0xff]  ;;  %v16349_v52 = vcombine.high %v631_v43, %v635_v45  ;;  %9513 = vmatprep.subr.bf16.mxu0 %v16221_v48  ;;  %v16348_v55 = vcombine.low %v631_v43, %v635_v45 }
  0xbd   :  { %v499_v50 = vld [vmem:[#allocation2 + $0xae0] sm:$0xff] }
  0xbe   :  { %v623_v51 = vld [vmem:[#allocation2 + $0xec0] sm:$0xff]  ;;  %v16213_v56 = vcombine.high %v495_v49, %v499_v50  ;;  %9554 = vmatprep.subr.bf16.mxu1 %v16349_v52  ;;  %v16212_v0 = vcombine.low %v495_v49, %v499_v50  ;;  %v18395_v49 = vpack.c.bf16 %v112_v38, %v112_v38 }
  0xbf   :  { %v627_v53 = vld [vmem:[#allocation2 + $0xee0] sm:$0xff]  ;;  %9514 = vmatpush2.bf16.msra.mxu0 %v16220_v54  ;;  %9555 = vmatpush2.bf16.msra.mxu1 %v16348_v55 }
  0xc0   :  { %v487_v57 = vld [vmem:[#allocation2 + $0xa80] sm:$0xff]  ;;  %v16341_v62 = vcombine.high %v623_v51, %v627_v53  ;;  %9515 = vmatprep.subr.bf16.mxu0 %v16213_v56  ;;  %v16340_v1 = vcombine.low %v623_v51, %v627_v53  ;;  %v18398_v51 = vpack.c.bf16 %v114_v42, %v114_v42 }
  0xc1   :  { %v491_v60 = vld [vmem:[#allocation2 + $0xaa0] sm:$0xff] }
  0xc2   :  { %v615_v61 = vld [vmem:[#allocation2 + $0xe80] sm:$0xff]  ;;  %v16205_v2 = vcombine.high %v487_v57, %v491_v60  ;;  %9556 = vmatprep.subr.bf16.mxu1 %v16341_v62  ;;  %v16204_v8 = vcombine.low %v487_v57, %v491_v60 }
  0xc3   :  { %v619_v63 = vld [vmem:[#allocation2 + $0xea0] sm:$0xff]  ;;  %9516 = vmatpush2.bf16.msra.mxu0 %v16212_v0  ;;  %9557 = vmatpush2.bf16.msra.mxu1 %v16340_v1 }
  0xc4   :  { %v479_v3 = vld [vmem:[#allocation2 + $0xa40] sm:$0xff]  ;;  %v16333_v6 = vcombine.high %v615_v61, %v619_v63  ;;  %9517 = vmatprep.subr.bf16.mxu0 %v16205_v2  ;;  %v16332_v9 = vcombine.low %v615_v61, %v619_v63 }
  0xc5   :  { %v483_v4 = vld [vmem:[#allocation2 + $0xa60] sm:$0xff] }
  0xc6   :  { %v607_v5 = vld [vmem:[#allocation2 + $0xe40] sm:$0xff]  ;;  %v16197_v10 = vcombine.high %v479_v3, %v483_v4  ;;  %9558 = vmatprep.subr.bf16.mxu1 %v16333_v6  ;;  %v16196_v17 = vcombine.low %v479_v3, %v483_v4 }
  0xc7   :  { %v611_v7 = vld [vmem:[#allocation2 + $0xe60] sm:$0xff]  ;;  %9518 = vmatpush2.bf16.msra.mxu0 %v16204_v8  ;;  %9559 = vmatpush2.bf16.msra.mxu1 %v16332_v9 }
  0xc8   :  { %v471_v11 = vld [vmem:[#allocation2 + $0xa00] sm:$0xff]  ;;  %v16325_v14 = vcombine.high %v607_v5, %v611_v7  ;;  %9519 = vmatprep.subr.bf16.mxu0 %v16197_v10  ;;  %v16324_v18 = vcombine.low %v607_v5, %v611_v7 }
  0xc9   :  { %v475_v12 = vld [vmem:[#allocation2 + $0xa20] sm:$0xff] }
  0xca   :  { %v599_v13 = vld [vmem:[#allocation2 + $0xe00] sm:$0xff]  ;;  %v16189_v19 = vcombine.high %v471_v11, %v475_v12  ;;  %9560 = vmatprep.subr.bf16.mxu1 %v16325_v14  ;;  %v16188_v29 = vcombine.low %v471_v11, %v475_v12 }
  0xcb   :  { %v603_v15 = vld [vmem:[#allocation2 + $0xe20] sm:$0xff]  ;;  %9520 = vmatpush2.bf16.msra.mxu0 %v16196_v17  ;;  %9561 = vmatpush2.bf16.msra.mxu1 %v16324_v18 }
  0xcc   :  { %v719_v21 = vld [vmem:[#allocation2 + $0x11c0] sm:$0xff]  ;;  %v16317_v24 = vcombine.high %v599_v13, %v603_v15  ;;  %9521 = vmatprep.subr.bf16.mxu0 %v16189_v19  ;;  %v16316_v32 = vcombine.low %v599_v13, %v603_v15 }
  0xcd   :  { %v723_v22 = vld [vmem:[#allocation2 + $0x11e0] sm:$0xff] }
  0xce   :  { %v847_v23 = vld [vmem:[#allocation2 + $0x15c0] sm:$0xff]  ;;  %v16437_v33 = vcombine.high %v719_v21, %v723_v22  ;;  %9562 = vmatprep.subr.bf16.mxu1 %v16317_v24  ;;  %v16436_v41 = vcombine.low %v719_v21, %v723_v22 }
  0xcf   :  { %v107_v25 = vld [vmem:[%s18857_s0 + $0x20] sm:$0xff]  ;;  %9522 = vmatpush2.bf16.msra.mxu0 %v16188_v29  ;;  %9563 = vmatpush2.bf16.msra.mxu1 %v16316_v32 }
  0xd0   :  { %v851_v26 = vld [vmem:[#allocation2 + $0x15e0] sm:$0xff]  ;;  %v18388_v39 = vpack.c.bf16 %v107_v25, %v107_v25  ;;  %9573 = vmatprep.subr.bf16.mxu0 %v16437_v33 }
  0xd1   :  { %v711_v30 = vld [vmem:[#allocation2 + $0x1180] sm:$0xff]  ;;  %v16565_v37 = vcombine.high %v847_v23, %v851_v26  ;;  %v16564_v43 = vcombine.low %v847_v23, %v851_v26 }
  0xd2   :  { %v715_v34 = vld [vmem:[#allocation2 + $0x11a0] sm:$0xff]  ;;  %9524 = vmatmul.mubr.bf16.vlgmr.msra.gmra.mxu0 %v18388_v39  ;;  %9565 = vmatmul.mubr.bf16.vlgmr.msra.gmra.mxu1 %v18390_v40 }
  0xd3   :  { %v839_v35 = vld [vmem:[#allocation2 + $0x1580] sm:$0xff]  ;;  %v16429_v44 = vcombine.high %v711_v30, %v715_v34  ;;  %9614 = vmatprep.subr.bf16.mxu1 %v16565_v37  ;;  %9574 = vmatpush1.bf16.msra.mxu0 %v16436_v41  ;;  %v16428_v52 = vcombine.low %v711_v30, %v715_v34 }
  0xd4   :  { %v843_v36 = vld [vmem:[#allocation2 + $0x15a0] sm:$0xff]  ;;  %9615 = vmatpush1.bf16.msra.mxu1 %v16564_v43  ;;  %9605 = vmatprep.mubr.bf16.mxu0 %v18395_v49 }
  0xd5   :  { %v16557_v45 = vcombine.high %v839_v35, %v843_v36  ;;  %v703_v46 = vld [vmem:[#allocation2 + $0x1140] sm:$0xff]  ;;  %9575 = vmatprep.subr.bf16.mxu0 %v16429_v44  ;;  %v16556_v53 = vcombine.low %v839_v35, %v843_v36  ;;  %9646 = vmatprep.mubr.bf16.mxu1 %v18398_v51 }
  0xd6   :  { %v707_v47 = vld [vmem:[#allocation2 + $0x1160] sm:$0xff] }
  0xd7   :  { %v831_v48 = vld [vmem:[#allocation2 + $0x1540] sm:$0xff]  ;;  %v16421_v54 = vcombine.high %v703_v46, %v707_v47  ;;  %9616 = vmatprep.subr.bf16.mxu1 %v16557_v45  ;;  %9576 = vmatpush1.bf16.msra.mxu0 %v16428_v52  ;;  %v16420_v62 = vcombine.low %v703_v46, %v707_v47 }
  0xd8   :  { %v835_v50 = vld [vmem:[#allocation2 + $0x1560] sm:$0xff]  ;;  %9617 = vmatpush1.bf16.msra.mxu1 %v16556_v53 }
  0xd9   :  { %v695_v55 = vld [vmem:[#allocation2 + $0x1100] sm:$0xff]  ;;  %v16549_v60 = vcombine.high %v831_v48, %v835_v50  ;;  %9577 = vmatprep.subr.bf16.mxu0 %v16421_v54  ;;  %v16548_v63 = vcombine.low %v831_v48, %v835_v50 }
  0xda   :  { %v699_v56 = vld [vmem:[#allocation2 + $0x1120] sm:$0xff] }
  0xdb   :  { %v823_v57 = vld [vmem:[#allocation2 + $0x1500] sm:$0xff]  ;;  %v16413_v0 = vcombine.high %v695_v55, %v699_v56  ;;  %9618 = vmatprep.subr.bf16.mxu1 %v16549_v60  ;;  %9578 = vmatpush1.bf16.msra.mxu0 %v16420_v62  ;;  %v16412_v6 = vcombine.low %v695_v55, %v699_v56 }
  0xdc   :  { %v827_v61 = vld [vmem:[#allocation2 + $0x1520] sm:$0xff]  ;;  %9619 = vmatpush1.bf16.msra.mxu1 %v16548_v63 }
  0xdd   :  { %v16541_v1 = vcombine.high %v823_v57, %v827_v61  ;;  %v687_v2 = vld [vmem:[#allocation2 + $0x10c0] sm:$0xff]  ;;  %9579 = vmatprep.subr.bf16.mxu0 %v16413_v0  ;;  %v16540_v7 = vcombine.low %v823_v57, %v827_v61 }
  0xde   :  { %v691_v3 = vld [vmem:[#allocation2 + $0x10e0] sm:$0xff] }
  0xdf   :  { %v815_v4 = vld [vmem:[#allocation2 + $0x14c0] sm:$0xff]  ;;  %v16405_v8 = vcombine.high %v687_v2, %v691_v3  ;;  %9620 = vmatprep.subr.bf16.mxu1 %v16541_v1  ;;  %9580 = vmatpush1.bf16.msra.mxu0 %v16412_v6  ;;  %v16404_v14 = vcombine.low %v687_v2, %v691_v3 }
  0xe0   :  { %v819_v5 = vld [vmem:[#allocation2 + $0x14e0] sm:$0xff]  ;;  %9621 = vmatpush1.bf16.msra.mxu1 %v16540_v7 }
  0xe1   :  { %v16533_v9 = vcombine.high %v815_v4, %v819_v5  ;;  %v679_v10 = vld [vmem:[#allocation2 + $0x1080] sm:$0xff]  ;;  %9581 = vmatprep.subr.bf16.mxu0 %v16405_v8  ;;  %v16532_v15 = vcombine.low %v815_v4, %v819_v5 }
  0xe2   :  { %v683_v11 = vld [vmem:[#allocation2 + $0x10a0] sm:$0xff] }
  0xe3   :  { %v807_v12 = vld [vmem:[#allocation2 + $0x1480] sm:$0xff]  ;;  %v16397_v17 = vcombine.high %v679_v10, %v683_v11  ;;  %9622 = vmatprep.subr.bf16.mxu1 %v16533_v9  ;;  %9582 = vmatpush1.bf16.msra.mxu0 %v16404_v14  ;;  %v16396_v24 = vcombine.low %v679_v10, %v683_v11 }
  0xe4   :  { %v811_v13 = vld [vmem:[#allocation2 + $0x14a0] sm:$0xff]  ;;  %9623 = vmatpush1.bf16.msra.mxu1 %v16532_v15 }
  0xe5   :  { %v16525_v18 = vcombine.high %v807_v12, %v811_v13  ;;  %v671_v19 = vld [vmem:[#allocation2 + $0x1040] sm:$0xff]  ;;  %9583 = vmatprep.subr.bf16.mxu0 %v16397_v17  ;;  %v16524_v25 = vcombine.low %v807_v12, %v811_v13 }
  0xe6   :  { %v675_v21 = vld [vmem:[#allocation2 + $0x1060] sm:$0xff] }
  0xe7   :  { %v799_v22 = vld [vmem:[#allocation2 + $0x1440] sm:$0xff]  ;;  %v16389_v26 = vcombine.high %v671_v19, %v675_v21  ;;  %9624 = vmatprep.subr.bf16.mxu1 %v16525_v18  ;;  %9584 = vmatpush1.bf16.msra.mxu0 %v16396_v24  ;;  %v16388_v34 = vcombine.low %v671_v19, %v675_v21 }
  0xe8   :  { %v803_v23 = vld [vmem:[#allocation2 + $0x1460] sm:$0xff]  ;;  %9625 = vmatpush1.bf16.msra.mxu1 %v16524_v25 }
  0xe9   :  { %v16517_v27 = vcombine.high %v799_v22, %v803_v23  ;;  %v663_v29 = vld [vmem:[#allocation2 + $0x1000] sm:$0xff]  ;;  %9585 = vmatprep.subr.bf16.mxu0 %v16389_v26  ;;  %v16516_v35 = vcombine.low %v799_v22, %v803_v23 }
  0xea   :  { %v667_v30 = vld [vmem:[#allocation2 + $0x1020] sm:$0xff] }
  0xeb   :  { %v791_v32 = vld [vmem:[#allocation2 + $0x1400] sm:$0xff]  ;;  %v16381_v36 = vcombine.high %v663_v29, %v667_v30  ;;  %9626 = vmatprep.subr.bf16.mxu1 %v16517_v27  ;;  %9586 = vmatpush1.bf16.msra.mxu0 %v16388_v34  ;;  %v16380_v44 = vcombine.low %v663_v29, %v667_v30 }
  0xec   :  { %v795_v33 = vld [vmem:[#allocation2 + $0x1420] sm:$0xff]  ;;  %9627 = vmatpush1.bf16.msra.mxu1 %v16516_v35 }
  0xed   :  { %v16509_v37 = vcombine.high %v791_v32, %v795_v33  ;;  %v783_v38 = vld [vmem:[#allocation2 + $0x13c0] sm:$0xff]  ;;  %9587 = vmatprep.subr.bf16.mxu0 %v16381_v36  ;;  %v16508_v45 = vcombine.low %v791_v32, %v795_v33 }
  0xee   :  { %v787_v41 = vld [vmem:[#allocation2 + $0x13e0] sm:$0xff] }
  0xef   :  { %v911_v42 = vld [vmem:[#allocation2 + $0x17c0] sm:$0xff]  ;;  %v16501_v46 = vcombine.high %v783_v38, %v787_v41  ;;  %9628 = vmatprep.subr.bf16.mxu1 %v16509_v37  ;;  %9588 = vmatpush1.bf16.msra.mxu0 %v16380_v44  ;;  %v16500_v54 = vcombine.low %v783_v38, %v787_v41 }
  0xf0   :  { %v915_v43 = vld [vmem:[#allocation2 + $0x17e0] sm:$0xff]  ;;  %9629 = vmatpush1.bf16.msra.mxu1 %v16508_v45 }
  0xf1   :  { %v16629_v47 = vcombine.high %v911_v42, %v915_v43  ;;  %v775_v48 = vld [vmem:[#allocation2 + $0x1380] sm:$0xff]  ;;  %9589 = vmatprep.subr.bf16.mxu0 %v16501_v46  ;;  %v16628_v55 = vcombine.low %v911_v42, %v915_v43 }
  0xf2   :  { %v779_v50 = vld [vmem:[#allocation2 + $0x13a0] sm:$0xff] }
  0xf3   :  { %v903_v52 = vld [vmem:[#allocation2 + $0x1780] sm:$0xff]  ;;  %v16493_v56 = vcombine.high %v775_v48, %v779_v50  ;;  %9630 = vmatprep.subr.bf16.mxu1 %v16629_v47  ;;  %9590 = vmatpush2.bf16.msra.mxu0 %v16500_v54  ;;  %v16492_v0 = vcombine.low %v775_v48, %v779_v50 }
  0xf4   :  { %v907_v53 = vld [vmem:[#allocation2 + $0x17a0] sm:$0xff]  ;;  %9631 = vmatpush2.bf16.msra.mxu1 %v16628_v55 }
  0xf5   :  { %v16621_v57 = vcombine.high %v903_v52, %v907_v53  ;;  %v767_v60 = vld [vmem:[#allocation2 + $0x1340] sm:$0xff]  ;;  %9591 = vmatprep.subr.bf16.mxu0 %v16493_v56  ;;  %v16620_v1 = vcombine.low %v903_v52, %v907_v53 }
  0xf6   :  { %v771_v61 = vld [vmem:[#allocation2 + $0x1360] sm:$0xff] }
  0xf7   :  { %v895_v62 = vld [vmem:[#allocation2 + $0x1740] sm:$0xff]  ;;  %v16485_v2 = vcombine.high %v767_v60, %v771_v61  ;;  %9632 = vmatprep.subr.bf16.mxu1 %v16621_v57  ;;  %9592 = vmatpush2.bf16.msra.mxu0 %v16492_v0  ;;  %v16484_v8 = vcombine.low %v767_v60, %v771_v61  ;;  %v113_v61 = vld [vmem:[%s18857_s0 + $0x50] sm:$0xff] }
  0xf8   :  { %v899_v63 = vld [vmem:[#allocation2 + $0x1760] sm:$0xff]  ;;  %9633 = vmatpush2.bf16.msra.mxu1 %v16620_v1 }
  0xf9   :  { %v16613_v3 = vcombine.high %v895_v62, %v899_v63  ;;  %v759_v4 = vld [vmem:[#allocation2 + $0x1300] sm:$0xff]  ;;  %9593 = vmatprep.subr.bf16.mxu0 %v16485_v2  ;;  %v16612_v9 = vcombine.low %v895_v62, %v899_v63 }
  0xfa   :  { %v763_v5 = vld [vmem:[#allocation2 + $0x1320] sm:$0xff] }
  0xfb   :  { %v887_v6 = vld [vmem:[#allocation2 + $0x1700] sm:$0xff]  ;;  %v16477_v10 = vcombine.high %v759_v4, %v763_v5  ;;  %9634 = vmatprep.subr.bf16.mxu1 %v16613_v3  ;;  %9594 = vmatpush2.bf16.msra.mxu0 %v16484_v8  ;;  %v16476_v17 = vcombine.low %v759_v4, %v763_v5  ;;  %v116_v5 = vld [vmem:[%s18857_s0 + $0x68] sm:$0xff]  ;;  %v118_v8 = vld [vmem:[%s18857_s0 + $0x78] sm:$0xff] }
  0xfc   :  { %v891_v7 = vld [vmem:[#allocation2 + $0x1720] sm:$0xff]  ;;  %9635 = vmatpush2.bf16.msra.mxu1 %v16612_v9 }
  0xfd   :  { %v16605_v11 = vcombine.high %v887_v6, %v891_v7  ;;  %v751_v12 = vld [vmem:[#allocation2 + $0x12c0] sm:$0xff]  ;;  %9595 = vmatprep.subr.bf16.mxu0 %v16477_v10  ;;  %v16604_v18 = vcombine.low %v887_v6, %v891_v7  ;;  %v18414_v6 = vpack.c.bf16 %v113_v61, %v113_v61 }
  0xfe   :  { %v755_v13 = vld [vmem:[#allocation2 + $0x12e0] sm:$0xff] }
  0xff   :  { %v879_v14 = vld [vmem:[#allocation2 + $0x16c0] sm:$0xff]  ;;  %v16469_v19 = vcombine.high %v751_v12, %v755_v13  ;;  %9636 = vmatprep.subr.bf16.mxu1 %v16605_v11  ;;  %9596 = vmatpush2.bf16.msra.mxu0 %v16476_v17  ;;  %v16468_v26 = vcombine.low %v751_v12, %v755_v13 }
 0x100   :  { %v883_v15 = vld [vmem:[#allocation2 + $0x16e0] sm:$0xff]  ;;  %9637 = vmatpush2.bf16.msra.mxu1 %v16604_v18  ;;  %v18422_v18 = vpack.c.bf16 %v118_v8, %v118_v8 }
 0x101   :  { %v16597_v21 = vcombine.high %v879_v14, %v883_v15  ;;  %v743_v22 = vld [vmem:[#allocation2 + $0x1280] sm:$0xff]  ;;  %9597 = vmatprep.subr.bf16.mxu0 %v16469_v19  ;;  %v16596_v27 = vcombine.low %v879_v14, %v883_v15  ;;  %v18419_v14 = vpack.c.bf16 %v116_v5, %v116_v5 }
 0x102   :  { %v747_v23 = vld [vmem:[#allocation2 + $0x12a0] sm:$0xff] }
 0x103   :  { %v871_v24 = vld [vmem:[#allocation2 + $0x1680] sm:$0xff]  ;;  %v16461_v29 = vcombine.high %v743_v22, %v747_v23  ;;  %9638 = vmatprep.subr.bf16.mxu1 %v16597_v21  ;;  %9598 = vmatpush2.bf16.msra.mxu0 %v16468_v26  ;;  %v16460_v36 = vcombine.low %v743_v22, %v747_v23 }
 0x104   :  { %v875_v25 = vld [vmem:[#allocation2 + $0x16a0] sm:$0xff]  ;;  %9639 = vmatpush2.bf16.msra.mxu1 %v16596_v27 }
 0x105   :  { %v16589_v30 = vcombine.high %v871_v24, %v875_v25  ;;  %v735_v32 = vld [vmem:[#allocation2 + $0x1240] sm:$0xff]  ;;  %9599 = vmatprep.subr.bf16.mxu0 %v16461_v29  ;;  %v16588_v37 = vcombine.low %v871_v24, %v875_v25 }
 0x106   :  { %v739_v33 = vld [vmem:[#allocation2 + $0x1260] sm:$0xff] }
 0x107   :  { %v863_v34 = vld [vmem:[#allocation2 + $0x1640] sm:$0xff]  ;;  %v16453_v38 = vcombine.high %v735_v32, %v739_v33  ;;  %9640 = vmatprep.subr.bf16.mxu1 %v16589_v30  ;;  %9600 = vmatpush2.bf16.msra.mxu0 %v16460_v36  ;;  %v16452_v46 = vcombine.low %v735_v32, %v739_v33 }
 0x108   :  { %v867_v35 = vld [vmem:[#allocation2 + $0x1660] sm:$0xff]  ;;  %9641 = vmatpush2.bf16.msra.mxu1 %v16588_v37 }
 0x109   :  { %v16581_v41 = vcombine.high %v863_v34, %v867_v35  ;;  %v727_v42 = vld [vmem:[#allocation2 + $0x1200] sm:$0xff]  ;;  %9601 = vmatprep.subr.bf16.mxu0 %v16453_v38  ;;  %v16580_v47 = vcombine.low %v863_v34, %v867_v35 }
 0x10a   :  { %v731_v43 = vld [vmem:[#allocation2 + $0x1220] sm:$0xff] }
 0x10b   :  { %v855_v44 = vld [vmem:[#allocation2 + $0x1600] sm:$0xff]  ;;  %v16445_v48 = vcombine.high %v727_v42, %v731_v43  ;;  %9642 = vmatprep.subr.bf16.mxu1 %v16581_v41  ;;  %9602 = vmatpush2.bf16.msra.mxu0 %v16452_v46  ;;  %v16444_v56 = vcombine.low %v727_v42, %v731_v43 }
 0x10c   :  { %v859_v45 = vld [vmem:[#allocation2 + $0x1620] sm:$0xff]  ;;  %9643 = vmatpush2.bf16.msra.mxu1 %v16580_v47 }
 0x10d   :  { %v16573_v50 = vcombine.high %v855_v44, %v859_v45  ;;  %v975_v52 = vld [vmem:[#allocation2 + $0x19c0] sm:$0xff]  ;;  %9603 = vmatprep.subr.bf16.mxu0 %v16445_v48  ;;  %v16572_v60 = vcombine.low %v855_v44, %v859_v45 }
 0x10e   :  { %v979_v53 = vld [vmem:[#allocation2 + $0x19e0] sm:$0xff] }
 0x10f   :  { %v1103_v54 = vld [vmem:[#allocation2 + $0x1dc0] sm:$0xff]  ;;  %v16693_v62 = vcombine.high %v975_v52, %v979_v53  ;;  %9644 = vmatprep.subr.bf16.mxu1 %v16573_v50  ;;  %9604 = vmatpush2.bf16.msra.mxu0 %v16444_v56  ;;  %v16692_v7 = vcombine.low %v975_v52, %v979_v53 }
 0x110   :  { %v1107_v55 = vld [vmem:[#allocation2 + $0x1de0] sm:$0xff]  ;;  %9645 = vmatpush2.bf16.msra.mxu1 %v16572_v60 }
 0x111   :  { %v111_v57 = vld [vmem:[%s18857_s0 + $0x40] sm:$0xff]  ;;  %v16821_v63 = vcombine.high %v1103_v54, %v1107_v55  ;;  %9655 = vmatprep.subr.bf16.mxu0 %v16693_v62  ;;  %v16820_v9 = vcombine.low %v1103_v54, %v1107_v55 }
 0x112   :  { %v967_v0 = vld [vmem:[#allocation2 + $0x1980] sm:$0xff]  ;;  %v18409_v2 = vpack.c.bf16 %v111_v57, %v111_v57 }
 0x113   :  { %v971_v1 = vld [vmem:[#allocation2 + $0x19a0] sm:$0xff]  ;;  %9696 = vmatprep.subr.bf16.mxu1 %v16821_v63  ;;  %9647 = vmatmul.mubr.bf16.vlgmr.msra.gmra.mxu1 %v18414_v6 }
 0x114   :  { %v1095_v3 = vld [vmem:[#allocation2 + $0x1d80] sm:$0xff]  ;;  %v16685_v10 = vcombine.high %v967_v0, %v971_v1  ;;  %9606 = vmatmul.mubr.bf16.vlgmr.msra.gmra.mxu0 %v18409_v2  ;;  %v16684_v19 = vcombine.low %v967_v0, %v971_v1  ;;  %9697 = vmatpush1.bf16.msra.mxu1 %v16820_v9 }
 0x115   :  { %v1099_v4 = vld [vmem:[#allocation2 + $0x1da0] sm:$0xff]  ;;  %9656 = vmatpush1.bf16.msra.mxu0 %v16692_v7  ;;  %9687 = vmatprep.mubr.bf16.mxu0 %v18419_v14 }
 0x116   :  { %v16813_v11 = vcombine.high %v1095_v3, %v1099_v4  ;;  %v959_v12 = vld [vmem:[#allocation2 + $0x1940] sm:$0xff]  ;;  %9657 = vmatprep.subr.bf16.mxu0 %v16685_v10  ;;  %v16812_v21 = vcombine.low %v1095_v3, %v1099_v4  ;;  %9728 = vmatprep.mubr.bf16.mxu1 %v18422_v18 }
 0x117   :  { %v963_v13 = vld [vmem:[#allocation2 + $0x1960] sm:$0xff] }
 0x118   :  { %v1087_v15 = vld [vmem:[#allocation2 + $0x1d40] sm:$0xff]  ;;  %v16677_v22 = vcombine.high %v959_v12, %v963_v13  ;;  %9698 = vmatprep.subr.bf16.mxu1 %v16813_v11  ;;  %v16676_v29 = vcombine.low %v959_v12, %v963_v13 }
 0x119   :  { %v1091_v17 = vld [vmem:[#allocation2 + $0x1d60] sm:$0xff]  ;;  %9658 = vmatpush1.bf16.msra.mxu0 %v16684_v19  ;;  %9699 = vmatpush1.bf16.msra.mxu1 %v16812_v21 }
 0x11a   :  { %v16805_v23 = vcombine.high %v1087_v15, %v1091_v17  ;;  %v951_v24 = vld [vmem:[#allocation2 + $0x1900] sm:$0xff]  ;;  %9659 = vmatprep.subr.bf16.mxu0 %v16677_v22  ;;  %v16804_v30 = vcombine.low %v1087_v15, %v1091_v17 }
 0x11b   :  { %v955_v25 = vld [vmem:[#allocation2 + $0x1920] sm:$0xff] }
 0x11c   :  { %v1079_v26 = vld [vmem:[#allocation2 + $0x1d00] sm:$0xff]  ;;  %v16669_v32 = vcombine.high %v951_v24, %v955_v25  ;;  %9700 = vmatprep.subr.bf16.mxu1 %v16805_v23  ;;  %v16668_v38 = vcombine.low %v951_v24, %v955_v25 }
 0x11d   :  { %v1083_v27 = vld [vmem:[#allocation2 + $0x1d20] sm:$0xff]  ;;  %9660 = vmatpush1.bf16.msra.mxu0 %v16676_v29  ;;  %9701 = vmatpush1.bf16.msra.mxu1 %v16804_v30 }
 0x11e   :  { %v16797_v33 = vcombine.high %v1079_v26, %v1083_v27  ;;  %v943_v34 = vld [vmem:[#allocation2 + $0x18c0] sm:$0xff]  ;;  %9661 = vmatprep.subr.bf16.mxu0 %v16669_v32  ;;  %v16796_v41 = vcombine.low %v1079_v26, %v1083_v27 }
 0x11f   :  { %v947_v35 = vld [vmem:[#allocation2 + $0x18e0] sm:$0xff] }
 0x120   :  { %v1071_v36 = vld [vmem:[#allocation2 + $0x1cc0] sm:$0xff]  ;;  %v16661_v42 = vcombine.high %v943_v34, %v947_v35  ;;  %9702 = vmatprep.subr.bf16.mxu1 %v16797_v33  ;;  %v16660_v48 = vcombine.low %v943_v34, %v947_v35 }
 0x121   :  { %v1075_v37 = vld [vmem:[#allocation2 + $0x1ce0] sm:$0xff]  ;;  %9662 = vmatpush1.bf16.msra.mxu0 %v16668_v38  ;;  %9703 = vmatpush1.bf16.msra.mxu1 %v16796_v41 }
 0x122   :  { %v16789_v43 = vcombine.high %v1071_v36, %v1075_v37  ;;  %v935_v44 = vld [vmem:[#allocation2 + $0x1880] sm:$0xff]  ;;  %9663 = vmatprep.subr.bf16.mxu0 %v16661_v42  ;;  %v16788_v50 = vcombine.low %v1071_v36, %v1075_v37 }
 0x123   :  { %v939_v45 = vld [vmem:[#allocation2 + $0x18a0] sm:$0xff] }
 0x124   :  { %v1063_v46 = vld [vmem:[#allocation2 + $0x1c80] sm:$0xff]  ;;  %v16653_v52 = vcombine.high %v935_v44, %v939_v45  ;;  %9704 = vmatprep.subr.bf16.mxu1 %v16789_v43  ;;  %v16652_v60 = vcombine.low %v935_v44, %v939_v45 }
 0x125   :  { %v1067_v47 = vld [vmem:[#allocation2 + $0x1ca0] sm:$0xff]  ;;  %9664 = vmatpush1.bf16.msra.mxu0 %v16660_v48  ;;  %9705 = vmatpush1.bf16.msra.mxu1 %v16788_v50 }
 0x126   :  { %v16781_v53 = vcombine.high %v1063_v46, %v1067_v47  ;;  %v927_v54 = vld [vmem:[#allocation2 + $0x1840] sm:$0xff]  ;;  %9665 = vmatprep.subr.bf16.mxu0 %v16653_v52  ;;  %v16780_v61 = vcombine.low %v1063_v46, %v1067_v47 }
 0x127   :  { %v931_v55 = vld [vmem:[#allocation2 + $0x1860] sm:$0xff] }
 0x128   :  { %v1055_v56 = vld [vmem:[#allocation2 + $0x1c40] sm:$0xff]  ;;  %v16645_v62 = vcombine.high %v927_v54, %v931_v55  ;;  %9706 = vmatprep.subr.bf16.mxu1 %v16781_v53  ;;  %v16644_v5 = vcombine.low %v927_v54, %v931_v55 }
 0x129   :  { %v1059_v57 = vld [vmem:[#allocation2 + $0x1c60] sm:$0xff]  ;;  %9666 = vmatpush1.bf16.msra.mxu0 %v16652_v60  ;;  %9707 = vmatpush1.bf16.msra.mxu1 %v16780_v61 }
 0x12a   :  { %v16773_v63 = vcombine.high %v1055_v56, %v1059_v57  ;;  %v919_v0 = vld [vmem:[#allocation2 + $0x1800] sm:$0xff]  ;;  %9667 = vmatprep.subr.bf16.mxu0 %v16645_v62  ;;  %v16772_v7 = vcombine.low %v1055_v56, %v1059_v57 }
 0x12b   :  { %v923_v1 = vld [vmem:[#allocation2 + $0x1820] sm:$0xff] }
 0x12c   :  { %v1047_v3 = vld [vmem:[#allocation2 + $0x1c00] sm:$0xff]  ;;  %v16637_v8 = vcombine.high %v919_v0, %v923_v1  ;;  %9708 = vmatprep.subr.bf16.mxu1 %v16773_v63  ;;  %v16636_v15 = vcombine.low %v919_v0, %v923_v1 }
 0x12d   :  { %v1051_v4 = vld [vmem:[#allocation2 + $0x1c20] sm:$0xff]  ;;  %9668 = vmatpush1.bf16.msra.mxu0 %v16644_v5  ;;  %9709 = vmatpush1.bf16.msra.mxu1 %v16772_v7 }
 0x12e   :  { %v16765_v9 = vcombine.high %v1047_v3, %v1051_v4  ;;  %v1039_v10 = vld [vmem:[#allocation2 + $0x1bc0] sm:$0xff]  ;;  %9669 = vmatprep.subr.bf16.mxu0 %v16637_v8  ;;  %v16764_v17 = vcombine.low %v1047_v3, %v1051_v4 }
 0x12f   :  { %v1043_v11 = vld [vmem:[#allocation2 + $0x1be0] sm:$0xff] }
 0x130   :  { %v1167_v12 = vld [vmem:[#allocation2 + $0x1fc0] sm:$0xff]  ;;  %v16757_v19 = vcombine.high %v1039_v10, %v1043_v11  ;;  %9710 = vmatprep.subr.bf16.mxu1 %v16765_v9  ;;  %v16756_v26 = vcombine.low %v1039_v10, %v1043_v11 }
 0x131   :  { %v1171_v13 = vld [vmem:[#allocation2 + $0x1fe0] sm:$0xff]  ;;  %9670 = vmatpush1.bf16.msra.mxu0 %v16636_v15  ;;  %9711 = vmatpush1.bf16.msra.mxu1 %v16764_v17 }
 0x132   :  { %v16885_v21 = vcombine.high %v1167_v12, %v1171_v13  ;;  %v1031_v22 = vld [vmem:[#allocation2 + $0x1b80] sm:$0xff]  ;;  %9671 = vmatprep.subr.bf16.mxu0 %v16757_v19  ;;  %v16884_v27 = vcombine.low %v1167_v12, %v1171_v13  ;;  %v1689_v13 = vlaneseq }
 0x133   :  { %v1035_v23 = vld [vmem:[#allocation2 + $0x1ba0] sm:$0xff] }
 0x134   :  { %v1159_v24 = vld [vmem:[#allocation2 + $0x1f80] sm:$0xff]  ;;  %v16749_v29 = vcombine.high %v1031_v22, %v1035_v23  ;;  %9712 = vmatprep.subr.bf16.mxu1 %v16885_v21  ;;  %v16748_v36 = vcombine.low %v1031_v22, %v1035_v23 }
 0x135   :  { %v1163_v25 = vld [vmem:[#allocation2 + $0x1fa0] sm:$0xff]  ;;  %9672 = vmatpush2.bf16.msra.mxu0 %v16756_v26  ;;  %9713 = vmatpush2.bf16.msra.mxu1 %v16884_v27  ;;  %v18427_v26 = vshrl.u32 %v1689_v13, 7 }
 0x136   :  { %v16877_v30 = vcombine.high %v1159_v24, %v1163_v25  ;;  %v1023_v32 = vld [vmem:[#allocation2 + $0x1b40] sm:$0xff]  ;;  %9673 = vmatprep.subr.bf16.mxu0 %v16749_v29  ;;  %v16876_v37 = vcombine.low %v1159_v24, %v1163_v25 }
 0x137   :  { %v1027_v33 = vld [vmem:[#allocation2 + $0x1b60] sm:$0xff] }
 0x138   :  { %v1151_v34 = vld [vmem:[#allocation2 + $0x1f40] sm:$0xff]  ;;  %v16741_v38 = vcombine.high %v1023_v32, %v1027_v33  ;;  %9714 = vmatprep.subr.bf16.mxu1 %v16877_v30  ;;  %v16740_v46 = vcombine.low %v1023_v32, %v1027_v33 }
 0x139   :  { %v1155_v35 = vld [vmem:[#allocation2 + $0x1f60] sm:$0xff]  ;;  %9674 = vmatpush2.bf16.msra.mxu0 %v16748_v36  ;;  %9715 = vmatpush2.bf16.msra.mxu1 %v16876_v37  ;;  %v1691_v37 = vsub.s32 0, %v18427_v26 }
 0x13a   :  { %v16869_v41 = vcombine.high %v1151_v34, %v1155_v35  ;;  %v1015_v42 = vld [vmem:[#allocation2 + $0x1b00] sm:$0xff]  ;;  %9675 = vmatprep.subr.bf16.mxu0 %v16741_v38  ;;  %v16868_v47 = vcombine.low %v1151_v34, %v1155_v35 }
 0x13b   :  { %v1019_v43 = vld [vmem:[#allocation2 + $0x1b20] sm:$0xff] }
 0x13c   :  { %v1143_v44 = vld [vmem:[#allocation2 + $0x1f00] sm:$0xff]  ;;  %v16733_v48 = vcombine.high %v1015_v42, %v1019_v43  ;;  %9716 = vmatprep.subr.bf16.mxu1 %v16869_v41  ;;  %v16732_v56 = vcombine.low %v1015_v42, %v1019_v43  ;;  %v117_v43 = vld [vmem:[%s18857_s0 + $0x70] sm:$0xff] }
 0x13d   :  { %v1147_v45 = vld [vmem:[#allocation2 + $0x1f20] sm:$0xff]  ;;  %9676 = vmatpush2.bf16.msra.mxu0 %v16740_v46  ;;  %9717 = vmatpush2.bf16.msra.mxu1 %v16868_v47  ;;  %v1695_v46 = vsub.s32 1, %v18427_v26 }
 0x13e   :  { %v16861_v50 = vcombine.high %v1143_v44, %v1147_v45  ;;  %v1007_v52 = vld [vmem:[#allocation2 + $0x1ac0] sm:$0xff]  ;;  %9677 = vmatprep.subr.bf16.mxu0 %v16733_v48  ;;  %v16860_v57 = vcombine.low %v1143_v44, %v1147_v45 }
 0x13f   :  { %v1011_v53 = vld [vmem:[#allocation2 + $0x1ae0] sm:$0xff] }
 0x140   :  { %v1135_v54 = vld [vmem:[#allocation2 + $0x1ec0] sm:$0xff]  ;;  %v16725_v60 = vcombine.high %v1007_v52, %v1011_v53  ;;  %9718 = vmatprep.subr.bf16.mxu1 %v16861_v50  ;;  %v16724_v3 = vcombine.low %v1007_v52, %v1011_v53 }
 0x141   :  { %v1139_v55 = vld [vmem:[#allocation2 + $0x1ee0] sm:$0xff]  ;;  %9678 = vmatpush2.bf16.msra.mxu0 %v16732_v56  ;;  %9719 = vmatpush2.bf16.msra.mxu1 %v16860_v57  ;;  %v18444_v56 = vpack.c.bf16 %v117_v43, %v117_v43 }
 0x142   :  { %v16853_v61 = vcombine.high %v1135_v54, %v1139_v55  ;;  %v999_v62 = vld [vmem:[#allocation2 + $0x1a80] sm:$0xff]  ;;  %9679 = vmatprep.subr.bf16.mxu0 %v16725_v60  ;;  %v16852_v4 = vcombine.low %v1135_v54, %v1139_v55  ;;  %v120_v54 = vld [vmem:[%s18857_s0 + $0x88] sm:$0xff]  ;;  %v122_v60 = vld [vmem:[%s18857_s0 + $0x98] sm:$0xff] }
 0x143   :  { %v1003_v63 = vld [vmem:[#allocation2 + $0x1aa0] sm:$0xff] }
 0x144   :  { %v1127_v0 = vld [vmem:[#allocation2 + $0x1e80] sm:$0xff]  ;;  %v16717_v5 = vcombine.high %v999_v62, %v1003_v63  ;;  %9720 = vmatprep.subr.bf16.mxu1 %v16853_v61  ;;  %v16716_v12 = vcombine.low %v999_v62, %v1003_v63 }
 0x145   :  { %v1131_v1 = vld [vmem:[#allocation2 + $0x1ea0] sm:$0xff]  ;;  %9680 = vmatpush2.bf16.msra.mxu0 %v16724_v3  ;;  %9721 = vmatpush2.bf16.msra.mxu1 %v16852_v4  ;;  %v18451_v4 = vpack.c.bf16 %v120_v54, %v120_v54 }
 0x146   :  { %v16845_v7 = vcombine.high %v1127_v0, %v1131_v1  ;;  %v991_v8 = vld [vmem:[#allocation2 + $0x1a40] sm:$0xff]  ;;  %9681 = vmatprep.subr.bf16.mxu0 %v16717_v5  ;;  %v16844_v15 = vcombine.low %v1127_v0, %v1131_v1 }
 0x147   :  { %v995_v9 = vld [vmem:[#allocation2 + $0x1a60] sm:$0xff] }
 0x148   :  { %v1119_v10 = vld [vmem:[#allocation2 + $0x1e40] sm:$0xff]  ;;  %v16709_v17 = vcombine.high %v991_v8, %v995_v9  ;;  %9722 = vmatprep.subr.bf16.mxu1 %v16845_v7  ;;  %v16708_v25 = vcombine.low %v991_v8, %v995_v9  ;;  %v18454_v9 = vpack.c.bf16 %v122_v60, %v122_v60 }
 0x149   :  { %v1123_v11 = vld [vmem:[#allocation2 + $0x1e60] sm:$0xff]  ;;  %9682 = vmatpush2.bf16.msra.mxu0 %v16716_v12  ;;  %9723 = vmatpush2.bf16.msra.mxu1 %v16844_v15 }
 0x14a   :  { %v16837_v19 = vcombine.high %v1119_v10, %v1123_v11  ;;  %v983_v21 = vld [vmem:[#allocation2 + $0x1a00] sm:$0xff]  ;;  %9683 = vmatprep.subr.bf16.mxu0 %v16709_v17  ;;  %v16836_v27 = vcombine.low %v1119_v10, %v1123_v11 }
 0x14b   :  { %v987_v22 = vld [vmem:[#allocation2 + $0x1a20] sm:$0xff] }
 0x14c   :  { %v1111_v23 = vld [vmem:[#allocation2 + $0x1e00] sm:$0xff]  ;;  %v16701_v29 = vcombine.high %v983_v21, %v987_v22  ;;  %9724 = vmatprep.subr.bf16.mxu1 %v16837_v19  ;;  %v16700_v36 = vcombine.low %v983_v21, %v987_v22 }
 0x14d   :  { %v1115_v24 = vld [vmem:[#allocation2 + $0x1e20] sm:$0xff]  ;;  %9684 = vmatpush2.bf16.msra.mxu0 %v16708_v25  ;;  %9725 = vmatpush2.bf16.msra.mxu1 %v16836_v27 }
 0x14e   :  { %v16829_v30 = vcombine.high %v1111_v23, %v1115_v24  ;;  %v1231_v32 = vld [vmem:[#allocation2 + $0x21c0] sm:$0xff]  ;;  %9685 = vmatprep.subr.bf16.mxu0 %v16701_v29  ;;  %v16828_v41 = vcombine.low %v1111_v23, %v1115_v24 }
 0x14f   :  { %v1235_v33 = vld [vmem:[#allocation2 + $0x21e0] sm:$0xff] }
 0x150   :  { %v1359_v34 = vld [vmem:[#allocation2 + $0x25c0] sm:$0xff]  ;;  %v16949_v44 = vcombine.high %v1231_v32, %v1235_v33  ;;  %9726 = vmatprep.subr.bf16.mxu1 %v16829_v30  ;;  %v16948_v57 = vcombine.low %v1231_v32, %v1235_v33 }
 0x151   :  { %v1363_v35 = vld [vmem:[#allocation2 + $0x25e0] sm:$0xff]  ;;  %9686 = vmatpush2.bf16.msra.mxu0 %v16700_v36  ;;  %9727 = vmatpush2.bf16.msra.mxu1 %v16828_v41  ;;  %v9484_v11 = vpop.f32.mrf.mxu1 }
 0x152   :  { %v115_v38 = vld [vmem:[%s18857_s0 + $0x60] sm:$0xff]  ;;  %v17077_v45 = vcombine.high %v1359_v34, %v1363_v35  ;;  %9737 = vmatprep.subr.bf16.mxu0 %v16949_v44  ;;  %v17076_v61 = vcombine.low %v1359_v34, %v1363_v35  ;;  %v9443_v5 = vpop.f32.mrf.mxu0 }
 0x153   :  { %v1687_v42 = vld [vmem:[#allocation4] sm:$0xff]  ;;  %v18437_v50 = vpack.c.bf16 %v115_v38, %v115_v38  ;;  %v9486_v22 = vpop.f32.mrf.mxu1 }
 0x154   :  { %v1223_v47 = vld [vmem:[#allocation2 + $0x2180] sm:$0xff]  ;;  %v1692_v55 = vrot.slane %v1687_v42, %v1691_v37  ;;  %9778 = vmatprep.subr.bf16.mxu1 %v17077_v45  ;;  %v1696_v63 = vrot.slane %v1687_v42, %v1695_v46  ;;  %9729 = vmatmul.mubr.bf16.vlgmr.msra.gmra.mxu1 %v18444_v56  ;;  %v9445_v13 = vpop.f32.mrf.mxu0 }
 0x155   :  { %v1227_v48 = vld [vmem:[#allocation2 + $0x21a0] sm:$0xff]  ;;  %9688 = vmatmul.mubr.bf16.vlgmr.msra.gmra.mxu0 %v18437_v50  ;;  %9779 = vmatpush1.bf16.msra.mxu1 %v17076_v61  ;;  %v9488_v33 = vpop.f32.mrf.mxu1 }
 0x156   :  { %v1351_v52 = vld [vmem:[#allocation2 + $0x2580] sm:$0xff]  ;;  %v16941_v62 = vcombine.high %v1223_v47, %v1227_v48  ;;  %v9444_v10 = vadd.f32 %v9443_v5, %v1692_v55  ;;  %9738 = vmatpush1.bf16.msra.mxu0 %v16948_v57  ;;  %v16940_v12 = vcombine.low %v1223_v47, %v1227_v48  ;;  %v9446_v21 = vadd.f32 %v9445_v13, %v1696_v63  ;;  %v9447_v27 = vpop.f32.mrf.mxu0 }
 0x157   :  { %v1355_v53 = vld [vmem:[#allocation2 + $0x25a0] sm:$0xff]  ;;  %9769 = vmatprep.mubr.bf16.mxu0 %v18451_v4  ;;  %9810 = vmatprep.mubr.bf16.mxu1 %v18454_v9  ;;  %v9489_v41 = vpop.f32.mrf.mxu1 }
 0x158   :  { %v17069_v0 = vcombine.high %v1351_v52, %v1355_v53  ;;  %v1215_v1 = vld [vmem:[#allocation2 + $0x2140] sm:$0xff]  ;;  %9739 = vmatprep.subr.bf16.mxu0 %v16941_v62  ;;  %v17068_v15 = vcombine.low %v1351_v52, %v1355_v53  ;;  %v18457_v19 = vadd.f32 %v9484_v11, %v9444_v10  ;;  %v18461_v32 = vadd.f32 %v9486_v22, %v9446_v21  ;;  %v9448_v35 = vpop.f32.mrf.mxu0 }
 0x159   :  { %v1219_v3 = vld [vmem:[#allocation2 + $0x2160] sm:$0xff] }
 0x15a   :  { %v1343_v7 = vld [vmem:[#allocation2 + $0x2540] sm:$0xff]  ;;  %v16933_v17 = vcombine.high %v1215_v1, %v1219_v3  ;;  %9780 = vmatprep.subr.bf16.mxu1 %v17069_v0  ;;  %9740 = vmatpush1.bf16.msra.mxu0 %v16940_v12  ;;  %v16932_v34 = vcombine.low %v1215_v1, %v1219_v3 }
 0x15b   :  { %v1347_v8 = vld [vmem:[#allocation2 + $0x2560] sm:$0xff]  ;;  %9781 = vmatpush1.bf16.msra.mxu1 %v17068_v15 }
 0x15c   :  { %v17061_v23 = vcombine.high %v1343_v7, %v1347_v8  ;;  %v1207_v24 = vld [vmem:[#allocation2 + $0x2100] sm:$0xff]  ;;  %9741 = vmatprep.subr.bf16.mxu0 %v16933_v17  ;;  %v17060_v36 = vcombine.low %v1343_v7, %v1347_v8 }
 0x15d   :  { %v1211_v25 = vld [vmem:[#allocation2 + $0x2120] sm:$0xff] }
 0x15e   :  { %v1335_v29 = vld [vmem:[#allocation2 + $0x2500] sm:$0xff]  ;;  %v16925_v38 = vcombine.high %v1207_v24, %v1211_v25  ;;  %9782 = vmatprep.subr.bf16.mxu1 %v17061_v23  ;;  %9742 = vmatpush1.bf16.msra.mxu0 %v16932_v34  ;;  %v16924_v48 = vcombine.low %v1207_v24, %v1211_v25 }
 0x15f   :  { %v1339_v30 = vld [vmem:[#allocation2 + $0x2520] sm:$0xff]  ;;  %9783 = vmatpush1.bf16.msra.mxu1 %v17060_v36 }
 0x160   :  { %v17053_v42 = vcombine.high %v1335_v29, %v1339_v30  ;;  %v1199_v43 = vld [vmem:[#allocation2 + $0x20c0] sm:$0xff]  ;;  %9743 = vmatprep.subr.bf16.mxu0 %v16925_v38  ;;  %v17052_v52 = vcombine.low %v1335_v29, %v1339_v30 }
 0x161   :  { %v1203_v44 = vld [vmem:[#allocation2 + $0x20e0] sm:$0xff] }
 0x162   :  { %v1327_v45 = vld [vmem:[#allocation2 + $0x24c0] sm:$0xff]  ;;  %v16917_v53 = vcombine.high %v1199_v43, %v1203_v44  ;;  %9784 = vmatprep.subr.bf16.mxu1 %v17053_v42  ;;  %9744 = vmatpush1.bf16.msra.mxu0 %v16924_v48  ;;  %v16916_v62 = vcombine.low %v1199_v43, %v1203_v44 }
 0x163   :  { %v1331_v47 = vld [vmem:[#allocation2 + $0x24e0] sm:$0xff]  ;;  %9785 = vmatpush1.bf16.msra.mxu1 %v17052_v52 }
 0x164   :  { %v17045_v54 = vcombine.high %v1327_v45, %v1331_v47  ;;  %v1191_v55 = vld [vmem:[#allocation2 + $0x2080] sm:$0xff]  ;;  %9745 = vmatprep.subr.bf16.mxu0 %v16917_v53  ;;  %v17044_v63 = vcombine.low %v1327_v45, %v1331_v47 }
 0x165   :  { %v1195_v57 = vld [vmem:[#allocation2 + $0x20a0] sm:$0xff] }
 0x166   :  { %v1319_v60 = vld [vmem:[#allocation2 + $0x2480] sm:$0xff]  ;;  %v16909_v0 = vcombine.high %v1191_v55, %v1195_v57  ;;  %9786 = vmatprep.subr.bf16.mxu1 %v17045_v54  ;;  %9746 = vmatpush1.bf16.msra.mxu0 %v16916_v62  ;;  %v16908_v10 = vcombine.low %v1191_v55, %v1195_v57 }
 0x167   :  { %v1323_v61 = vld [vmem:[#allocation2 + $0x24a0] sm:$0xff]  ;;  %9787 = vmatpush1.bf16.msra.mxu1 %v17044_v63 }
 0x168   :  { %v17037_v1 = vcombine.high %v1319_v60, %v1323_v61  ;;  %v1183_v3 = vld [vmem:[#allocation2 + $0x2040] sm:$0xff]  ;;  %9747 = vmatprep.subr.bf16.mxu0 %v16909_v0  ;;  %v17036_v11 = vcombine.low %v1319_v60, %v1323_v61 }
 0x169   :  { %v1187_v5 = vld [vmem:[#allocation2 + $0x2060] sm:$0xff] }
 0x16a   :  { %v1311_v7 = vld [vmem:[#allocation2 + $0x2440] sm:$0xff]  ;;  %v16901_v12 = vcombine.high %v1183_v3, %v1187_v5  ;;  %9788 = vmatprep.subr.bf16.mxu1 %v17037_v1  ;;  %9748 = vmatpush1.bf16.msra.mxu0 %v16908_v10  ;;  %v16900_v23 = vcombine.low %v1183_v3, %v1187_v5 }
 0x16b   :  { %v1315_v8 = vld [vmem:[#allocation2 + $0x2460] sm:$0xff]  ;;  %9789 = vmatpush1.bf16.msra.mxu1 %v17036_v11 }
 0x16c   :  { %v17029_v13 = vcombine.high %v1311_v7, %v1315_v8  ;;  %v1175_v15 = vld [vmem:[#allocation2 + $0x2000] sm:$0xff]  ;;  %9749 = vmatprep.subr.bf16.mxu0 %v16901_v12  ;;  %v17028_v24 = vcombine.low %v1311_v7, %v1315_v8 }
 0x16d   :  { %v1179_v17 = vld [vmem:[#allocation2 + $0x2020] sm:$0xff] }
 0x16e   :  { %v1303_v21 = vld [vmem:[#allocation2 + $0x2400] sm:$0xff]  ;;  %v16893_v25 = vcombine.high %v1175_v15, %v1179_v17  ;;  %9790 = vmatprep.subr.bf16.mxu1 %v17029_v13  ;;  %9750 = vmatpush1.bf16.msra.mxu0 %v16900_v23  ;;  %v16892_v35 = vcombine.low %v1175_v15, %v1179_v17 }
 0x16f   :  { %v1307_v22 = vld [vmem:[#allocation2 + $0x2420] sm:$0xff]  ;;  %9791 = vmatpush1.bf16.msra.mxu1 %v17028_v24 }
 0x170   :  { %v17021_v27 = vcombine.high %v1303_v21, %v1307_v22  ;;  %v1295_v29 = vld [vmem:[#allocation2 + $0x23c0] sm:$0xff]  ;;  %9751 = vmatprep.subr.bf16.mxu0 %v16893_v25  ;;  %v17020_v36 = vcombine.low %v1303_v21, %v1307_v22 }
 0x171   :  { %v1299_v30 = vld [vmem:[#allocation2 + $0x23e0] sm:$0xff] }
 0x172   :  { %v1423_v33 = vld [vmem:[#allocation2 + $0x27c0] sm:$0xff]  ;;  %v17013_v38 = vcombine.high %v1295_v29, %v1299_v30  ;;  %9792 = vmatprep.subr.bf16.mxu1 %v17021_v27  ;;  %9752 = vmatpush1.bf16.msra.mxu0 %v16892_v35  ;;  %v17012_v47 = vcombine.low %v1295_v29, %v1299_v30 }
 0x173   :  { %v1427_v34 = vld [vmem:[#allocation2 + $0x27e0] sm:$0xff]  ;;  %9793 = vmatpush1.bf16.msra.mxu1 %v17020_v36 }
 0x174   :  { %v17141_v41 = vcombine.high %v1423_v33, %v1427_v34  ;;  %v1287_v42 = vld [vmem:[#allocation2 + $0x2380] sm:$0xff]  ;;  %9753 = vmatprep.subr.bf16.mxu0 %v17013_v38  ;;  %v17140_v48 = vcombine.low %v1423_v33, %v1427_v34 }
 0x175   :  { %v1291_v43 = vld [vmem:[#allocation2 + $0x23a0] sm:$0xff] }
 0x176   :  { %v1415_v44 = vld [vmem:[#allocation2 + $0x2780] sm:$0xff]  ;;  %v17005_v52 = vcombine.high %v1287_v42, %v1291_v43  ;;  %9794 = vmatprep.subr.bf16.mxu1 %v17141_v41  ;;  %9754 = vmatpush2.bf16.msra.mxu0 %v17012_v47  ;;  %v17004_v61 = vcombine.low %v1287_v42, %v1291_v43 }
 0x177   :  { %v1419_v45 = vld [vmem:[#allocation2 + $0x27a0] sm:$0xff]  ;;  %9795 = vmatpush2.bf16.msra.mxu1 %v17140_v48 }
 0x178   :  { %v17133_v53 = vcombine.high %v1415_v44, %v1419_v45  ;;  %v1279_v54 = vld [vmem:[#allocation2 + $0x2340] sm:$0xff]  ;;  %9755 = vmatprep.subr.bf16.mxu0 %v17005_v52  ;;  %v17132_v62 = vcombine.low %v1415_v44, %v1419_v45 }
 0x179   :  { %v1283_v55 = vld [vmem:[#allocation2 + $0x2360] sm:$0xff] }
 0x17a   :  { %v1407_v57 = vld [vmem:[#allocation2 + $0x2740] sm:$0xff]  ;;  %v16997_v63 = vcombine.high %v1279_v54, %v1283_v55  ;;  %9796 = vmatprep.subr.bf16.mxu1 %v17133_v53  ;;  %9756 = vmatpush2.bf16.msra.mxu0 %v17004_v61  ;;  %v16996_v8 = vcombine.low %v1279_v54, %v1283_v55 }
 0x17b   :  { %v1411_v60 = vld [vmem:[#allocation2 + $0x2760] sm:$0xff]  ;;  %9797 = vmatpush2.bf16.msra.mxu1 %v17132_v62 }
 0x17c   :  { %v17125_v0 = vcombine.high %v1407_v57, %v1411_v60  ;;  %v1271_v1 = vld [vmem:[#allocation2 + $0x2300] sm:$0xff]  ;;  %9757 = vmatprep.subr.bf16.mxu0 %v16997_v63  ;;  %v17124_v10 = vcombine.low %v1407_v57, %v1411_v60 }
 0x17d   :  { %v1275_v3 = vld [vmem:[#allocation2 + $0x2320] sm:$0xff] }
 0x17e   :  { %v1399_v5 = vld [vmem:[#allocation2 + $0x2700] sm:$0xff]  ;;  %v16989_v11 = vcombine.high %v1271_v1, %v1275_v3  ;;  %9798 = vmatprep.subr.bf16.mxu1 %v17125_v0  ;;  %9758 = vmatpush2.bf16.msra.mxu0 %v16996_v8  ;;  %v16988_v22 = vcombine.low %v1271_v1, %v1275_v3 }
 0x17f   :  { %v1403_v7 = vld [vmem:[#allocation2 + $0x2720] sm:$0xff]  ;;  %9799 = vmatpush2.bf16.msra.mxu1 %v17124_v10 }
 0x180   :  { %v17117_v12 = vcombine.high %v1399_v5, %v1403_v7  ;;  %v1263_v13 = vld [vmem:[#allocation2 + $0x22c0] sm:$0xff]  ;;  %9759 = vmatprep.subr.bf16.mxu0 %v16989_v11  ;;  %v17116_v23 = vcombine.low %v1399_v5, %v1403_v7  ;;  %v121_v11 = vld [vmem:[%s18857_s0 + $0x90] sm:$0xff] }
 0x181   :  { %v1267_v15 = vld [vmem:[#allocation2 + $0x22e0] sm:$0xff] }
 0x182   :  { %v1391_v17 = vld [vmem:[#allocation2 + $0x26c0] sm:$0xff]  ;;  %v16981_v24 = vcombine.high %v1263_v13, %v1267_v15  ;;  %9800 = vmatprep.subr.bf16.mxu1 %v17117_v12  ;;  %9760 = vmatpush2.bf16.msra.mxu0 %v16988_v22  ;;  %v16980_v34 = vcombine.low %v1263_v13, %v1267_v15 }
 0x183   :  { %v1395_v21 = vld [vmem:[#allocation2 + $0x26e0] sm:$0xff]  ;;  %9801 = vmatpush2.bf16.msra.mxu1 %v17116_v23 }
 0x184   :  { %v17109_v25 = vcombine.high %v1391_v17, %v1395_v21  ;;  %v1255_v27 = vld [vmem:[#allocation2 + $0x2280] sm:$0xff]  ;;  %9761 = vmatprep.subr.bf16.mxu0 %v16981_v24  ;;  %v17108_v35 = vcombine.low %v1391_v17, %v1395_v21  ;;  %v124_v24 = vld [vmem:[%s18857_s0 + $0xa8] sm:$0xff] }
 0x185   :  { %v1259_v29 = vld [vmem:[#allocation2 + $0x22a0] sm:$0xff] }
 0x186   :  { %v1383_v30 = vld [vmem:[#allocation2 + $0x2680] sm:$0xff]  ;;  %v16973_v36 = vcombine.high %v1255_v27, %v1259_v29  ;;  %9802 = vmatprep.subr.bf16.mxu1 %v17109_v25  ;;  %9762 = vmatpush2.bf16.msra.mxu0 %v16980_v34  ;;  %v16972_v45 = vcombine.low %v1255_v27, %v1259_v29  ;;  %v18474_v25 = vpack.c.bf16 %v121_v11, %v121_v11  ;;  %v126_v29 = vld [vmem:[%s18857_s0 + $0xb8] sm:$0xff] }
 0x187   :  { %v1387_v33 = vld [vmem:[#allocation2 + $0x26a0] sm:$0xff]  ;;  %9803 = vmatpush2.bf16.msra.mxu1 %v17108_v35 }
 0x188   :  { %v17101_v38 = vcombine.high %v1383_v30, %v1387_v33  ;;  %v1247_v41 = vld [vmem:[#allocation2 + $0x2240] sm:$0xff]  ;;  %9763 = vmatprep.subr.bf16.mxu0 %v16973_v36  ;;  %v17100_v47 = vcombine.low %v1383_v30, %v1387_v33 }
 0x189   :  { %v1251_v42 = vld [vmem:[#allocation2 + $0x2260] sm:$0xff] }
 0x18a   :  { %v1375_v43 = vld [vmem:[#allocation2 + $0x2640] sm:$0xff]  ;;  %v16965_v48 = vcombine.high %v1247_v41, %v1251_v42  ;;  %9804 = vmatprep.subr.bf16.mxu1 %v17101_v38  ;;  %9764 = vmatpush2.bf16.msra.mxu0 %v16972_v45  ;;  %v16964_v60 = vcombine.low %v1247_v41, %v1251_v42  ;;  %v18479_v38 = vpack.c.bf16 %v124_v24, %v124_v24 }
 0x18b   :  { %v1379_v44 = vld [vmem:[#allocation2 + $0x2660] sm:$0xff]  ;;  %9805 = vmatpush2.bf16.msra.mxu1 %v17100_v47 }
 0x18c   :  { %v17093_v52 = vcombine.high %v1375_v43, %v1379_v44  ;;  %v1239_v53 = vld [vmem:[#allocation2 + $0x2200] sm:$0xff]  ;;  %9765 = vmatprep.subr.bf16.mxu0 %v16965_v48  ;;  %v17092_v61 = vcombine.low %v1375_v43, %v1379_v44  ;;  %v18482_v44 = vpack.c.bf16 %v126_v29, %v126_v29 }
 0x18d   :  { %v1243_v54 = vld [vmem:[#allocation2 + $0x2220] sm:$0xff] }
 0x18e   :  { %v1367_v55 = vld [vmem:[#allocation2 + $0x2600] sm:$0xff]  ;;  %v16957_v62 = vcombine.high %v1239_v53, %v1243_v54  ;;  %9806 = vmatprep.subr.bf16.mxu1 %v17093_v52  ;;  %9766 = vmatpush2.bf16.msra.mxu0 %v16964_v60  ;;  %v16956_v7 = vcombine.low %v1239_v53, %v1243_v54 }
 0x18f   :  { %v1371_v57 = vld [vmem:[#allocation2 + $0x2620] sm:$0xff]  ;;  %9807 = vmatpush2.bf16.msra.mxu1 %v17092_v61 }
 0x190   :  { %v17085_v63 = vcombine.high %v1367_v55, %v1371_v57  ;;  %v1487_v0 = vld [vmem:[#allocation2 + $0x29c0] sm:$0xff]  ;;  %9767 = vmatprep.subr.bf16.mxu0 %v16957_v62  ;;  %v17084_v10 = vcombine.low %v1367_v55, %v1371_v57 }
 0x191   :  { %v1491_v1 = vld [vmem:[#allocation2 + $0x29e0] sm:$0xff] }
 0x192   :  { %v1615_v3 = vld [vmem:[#allocation2 + $0x2dc0] sm:$0xff]  ;;  %v17205_v12 = vcombine.high %v1487_v0, %v1491_v1  ;;  %9808 = vmatprep.subr.bf16.mxu1 %v17085_v63  ;;  %9768 = vmatpush2.bf16.msra.mxu0 %v16956_v7  ;;  %v17204_v27 = vcombine.low %v1487_v0, %v1491_v1  ;;  %v9525_v41 = vpop.f32.mrf.mxu0  ;;  %v9566_v47 = vpop.f32.mrf.mxu1 }
 0x193   :  { %v1619_v5 = vld [vmem:[#allocation2 + $0x2de0] sm:$0xff]  ;;  %9809 = vmatpush2.bf16.msra.mxu1 %v17084_v10  ;;  %v9526_v45 = vadd.f32 %v9525_v41, %v18457_v19 }
 0x194   :  { %v119_v8 = vld [vmem:[%s18857_s0 + $0x80] sm:$0xff]  ;;  %v17333_v13 = vcombine.high %v1615_v3, %v1619_v5  ;;  %9819 = vmatprep.subr.bf16.mxu0 %v17205_v12  ;;  %v17332_v30 = vcombine.low %v1615_v3, %v1619_v5  ;;  %v9527_v52 = vpop.f32.mrf.mxu0  ;;  %v9568_v60 = vpop.f32.mrf.mxu1 }
 0x195   :  { %v1479_v15 = vld [vmem:[#allocation2 + $0x2980] sm:$0xff]  ;;  %v18469_v21 = vpack.c.bf16 %v119_v8, %v119_v8  ;;  %v18486_v55 = vadd.f32 %v9566_v47, %v9526_v45  ;;  %v9528_v57 = vadd.f32 %v9527_v52, %v18461_v32 }
 0x196   :  { %v1483_v17 = vld [vmem:[#allocation2 + $0x29a0] sm:$0xff]  ;;  %9860 = vmatprep.subr.bf16.mxu1 %v17333_v13  ;;  %9811 = vmatmul.mubr.bf16.vlgmr.msra.gmra.mxu1 %v18474_v25  ;;  %v9529_v19 = vpop.f32.mrf.mxu0  ;;  %v9570_v5 = vpop.f32.mrf.mxu1 }
 0x197   :  { %v1607_v22 = vld [vmem:[#allocation2 + $0x2d80] sm:$0xff]  ;;  %v17197_v33 = vcombine.high %v1479_v15, %v1483_v17  ;;  %9770 = vmatmul.mubr.bf16.vlgmr.msra.gmra.mxu0 %v18469_v21  ;;  %v17196_v48 = vcombine.low %v1479_v15, %v1483_v17  ;;  %9861 = vmatpush1.bf16.msra.mxu1 %v17332_v30  ;;  %v18491_v3 = vadd.f32 %v9568_v60, %v9528_v57 }
 0x198   :  { %v1611_v23 = vld [vmem:[#allocation2 + $0x2da0] sm:$0xff]  ;;  %9820 = vmatpush1.bf16.msra.mxu0 %v17204_v27  ;;  %9851 = vmatprep.mubr.bf16.mxu0 %v18479_v38  ;;  %v9530_v8 = vpop.f32.mrf.mxu0  ;;  %v9571_v11 = vpop.f32.mrf.mxu1 }
 0x199   :  { %v17325_v34 = vcombine.high %v1607_v22, %v1611_v23  ;;  %v1471_v35 = vld [vmem:[#allocation2 + $0x2940] sm:$0xff]  ;;  %9821 = vmatprep.subr.bf16.mxu0 %v17197_v33  ;;  %v17324_v53 = vcombine.low %v1607_v22, %v1611_v23  ;;  %9892 = vmatprep.mubr.bf16.mxu1 %v18482_v44 }
 0x19a   :  { %v1475_v36 = vld [vmem:[#allocation2 + $0x2960] sm:$0xff] }
 0x19b   :  { %v1599_v42 = vld [vmem:[#allocation2 + $0x2d40] sm:$0xff]  ;;  %v17189_v54 = vcombine.high %v1471_v35, %v1475_v36  ;;  %9862 = vmatprep.subr.bf16.mxu1 %v17325_v34  ;;  %v17188_v7 = vcombine.low %v1471_v35, %v1475_v36 }
 0x19c   :  { %v1603_v43 = vld [vmem:[#allocation2 + $0x2d60] sm:$0xff]  ;;  %9822 = vmatpush1.bf16.msra.mxu0 %v17196_v48  ;;  %9863 = vmatpush1.bf16.msra.mxu1 %v17324_v53 }
 0x19d   :  { %v17317_v61 = vcombine.high %v1599_v42, %v1603_v43  ;;  %v1463_v62 = vld [vmem:[#allocation2 + $0x2900] sm:$0xff]  ;;  %9823 = vmatprep.subr.bf16.mxu0 %v17189_v54  ;;  %v17316_v32 = vcombine.low %v1599_v42, %v1603_v43 }
 0x19e   :  { %v1467_v63 = vld [vmem:[#allocation2 + $0x2920] sm:$0xff] }
 0x19f   :  { %v1591_v0 = vld [vmem:[#allocation2 + $0x2d00] sm:$0xff]  ;;  %v17181_v10 = vcombine.high %v1463_v62, %v1467_v63  ;;  %9864 = vmatprep.subr.bf16.mxu1 %v17317_v61  ;;  %v17180_v23 = vcombine.low %v1463_v62, %v1467_v63 }
 0x1a0   :  { %v1595_v1 = vld [vmem:[#allocation2 + $0x2d20] sm:$0xff]  ;;  %9824 = vmatpush1.bf16.msra.mxu0 %v17188_v7  ;;  %9865 = vmatpush1.bf16.msra.mxu1 %v17316_v32 }
 0x1a1   :  { %v17309_v12 = vcombine.high %v1591_v0, %v1595_v1  ;;  %v1455_v13 = vld [vmem:[#allocation2 + $0x28c0] sm:$0xff]  ;;  %9825 = vmatprep.subr.bf16.mxu0 %v17181_v10  ;;  %v17308_v24 = vcombine.low %v1591_v0, %v1595_v1 }
 0x1a2   :  { %v1459_v15 = vld [vmem:[#allocation2 + $0x28e0] sm:$0xff] }
 0x1a3   :  { %v1583_v17 = vld [vmem:[#allocation2 + $0x2cc0] sm:$0xff]  ;;  %v17173_v27 = vcombine.high %v1455_v13, %v1459_v15  ;;  %9866 = vmatprep.subr.bf16.mxu1 %v17309_v12  ;;  %v17172_v36 = vcombine.low %v1455_v13, %v1459_v15 }
 0x1a4   :  { %v1587_v22 = vld [vmem:[#allocation2 + $0x2ce0] sm:$0xff]  ;;  %9826 = vmatpush1.bf16.msra.mxu0 %v17180_v23  ;;  %9867 = vmatpush1.bf16.msra.mxu1 %v17308_v24 }
 0x1a5   :  { %v17301_v29 = vcombine.high %v1583_v17, %v1587_v22  ;;  %v1447_v30 = vld [vmem:[#allocation2 + $0x2880] sm:$0xff]  ;;  %9827 = vmatprep.subr.bf16.mxu0 %v17173_v27  ;;  %v17300_v41 = vcombine.low %v1583_v17, %v1587_v22 }
 0x1a6   :  { %v1451_v33 = vld [vmem:[#allocation2 + $0x28a0] sm:$0xff] }
 0x1a7   :  { %v1575_v34 = vld [vmem:[#allocation2 + $0x2c80] sm:$0xff]  ;;  %v17165_v42 = vcombine.high %v1447_v30, %v1451_v33  ;;  %9868 = vmatprep.subr.bf16.mxu1 %v17301_v29  ;;  %v17164_v53 = vcombine.low %v1447_v30, %v1451_v33 }
 0x1a8   :  { %v1579_v35 = vld [vmem:[#allocation2 + $0x2ca0] sm:$0xff]  ;;  %9828 = vmatpush1.bf16.msra.mxu0 %v17172_v36  ;;  %9869 = vmatpush1.bf16.msra.mxu1 %v17300_v41 }
 0x1a9   :  { %v17293_v43 = vcombine.high %v1575_v34, %v1579_v35  ;;  %v1439_v45 = vld [vmem:[#allocation2 + $0x2840] sm:$0xff]  ;;  %9829 = vmatprep.subr.bf16.mxu0 %v17165_v42  ;;  %v17292_v54 = vcombine.low %v1575_v34, %v1579_v35 }
 0x1aa   :  { %v1443_v47 = vld [vmem:[#allocation2 + $0x2860] sm:$0xff] }
 0x1ab   :  { %v1567_v48 = vld [vmem:[#allocation2 + $0x2c40] sm:$0xff]  ;;  %v17157_v57 = vcombine.high %v1439_v45, %v1443_v47  ;;  %9870 = vmatprep.subr.bf16.mxu1 %v17293_v43  ;;  %v17156_v0 = vcombine.low %v1439_v45, %v1443_v47 }
 0x1ac   :  { %v1571_v52 = vld [vmem:[#allocation2 + $0x2c60] sm:$0xff]  ;;  %9830 = vmatpush1.bf16.msra.mxu0 %v17164_v53  ;;  %9871 = vmatpush1.bf16.msra.mxu1 %v17292_v54 }
 0x1ad   :  { %v17285_v60 = vcombine.high %v1567_v48, %v1571_v52  ;;  %v1431_v61 = vld [vmem:[#allocation2 + $0x2800] sm:$0xff]  ;;  %9831 = vmatprep.subr.bf16.mxu0 %v17157_v57  ;;  %v17284_v1 = vcombine.low %v1567_v48, %v1571_v52 }
 0x1ae   :  { %v1435_v62 = vld [vmem:[#allocation2 + $0x2820] sm:$0xff] }
 0x1af   :  { %v1559_v63 = vld [vmem:[#allocation2 + $0x2c00] sm:$0xff]  ;;  %v17149_v5 = vcombine.high %v1431_v61, %v1435_v62  ;;  %9872 = vmatprep.subr.bf16.mxu1 %v17285_v60  ;;  %v17148_v12 = vcombine.low %v1431_v61, %v1435_v62 }
 0x1b0   :  { %v1563_v19 = vld [vmem:[#allocation2 + $0x2c20] sm:$0xff]  ;;  %9832 = vmatpush1.bf16.msra.mxu0 %v17156_v0  ;;  %9873 = vmatpush1.bf16.msra.mxu1 %v17284_v1 }
 0x1b1   :  { %v17277_v7 = vcombine.high %v1559_v63, %v1563_v19  ;;  %v1551_v8 = vld [vmem:[#allocation2 + $0x2bc0] sm:$0xff]  ;;  %9833 = vmatprep.subr.bf16.mxu0 %v17149_v5  ;;  %v17276_v13 = vcombine.low %v1559_v63, %v1563_v19 }
 0x1b2   :  { %v1555_v32 = vld [vmem:[#allocation2 + $0x2be0] sm:$0xff] }
 0x1b3   :  { %v1679_v10 = vld [vmem:[#allocation2 + $0x2fc0] sm:$0xff]  ;;  %v17269_v15 = vcombine.high %v1551_v8, %v1555_v32  ;;  %9874 = vmatprep.subr.bf16.mxu1 %v17277_v7  ;;  %v17268_v29 = vcombine.low %v1551_v8, %v1555_v32 }
 0x1b4   :  { %v1683_v11 = vld [vmem:[#allocation2 + $0x2fe0] sm:$0xff]  ;;  %9834 = vmatpush1.bf16.msra.mxu0 %v17148_v12  ;;  %9875 = vmatpush1.bf16.msra.mxu1 %v17276_v13 }
 0x1b5   :  { %v17397_v17 = vcombine.high %v1679_v10, %v1683_v11  ;;  %v1543_v22 = vld [vmem:[#allocation2 + $0x2b80] sm:$0xff]  ;;  %9835 = vmatprep.subr.bf16.mxu0 %v17269_v15  ;;  %v17396_v30 = vcombine.low %v1679_v10, %v1683_v11 }
 0x1b6   :  { %v1547_v23 = vld [vmem:[#allocation2 + $0x2ba0] sm:$0xff] }
 0x1b7   :  { %v1671_v24 = vld [vmem:[#allocation2 + $0x2f80] sm:$0xff]  ;;  %v17261_v33 = vcombine.high %v1543_v22, %v1547_v23  ;;  %9876 = vmatprep.subr.bf16.mxu1 %v17397_v17  ;;  %v17260_v43 = vcombine.low %v1543_v22, %v1547_v23 }
 0x1b8   :  { %v1675_v27 = vld [vmem:[#allocation2 + $0x2fa0] sm:$0xff]  ;;  %9836 = vmatpush2.bf16.msra.mxu0 %v17268_v29  ;;  %9877 = vmatpush2.bf16.msra.mxu1 %v17396_v30 }
 0x1b9   :  { %v17389_v34 = vcombine.high %v1671_v24, %v1675_v27  ;;  %v1535_v35 = vld [vmem:[#allocation2 + $0x2b40] sm:$0xff]  ;;  %9837 = vmatprep.subr.bf16.mxu0 %v17261_v33  ;;  %v17388_v45 = vcombine.low %v1671_v24, %v1675_v27 }
 0x1ba   :  { %v1539_v36 = vld [vmem:[#allocation2 + $0x2b60] sm:$0xff] }
 0x1bb   :  { %v1663_v41 = vld [vmem:[#allocation2 + $0x2f40] sm:$0xff]  ;;  %v17253_v47 = vcombine.high %v1535_v35, %v1539_v36  ;;  %9878 = vmatprep.subr.bf16.mxu1 %v17389_v34  ;;  %v17252_v60 = vcombine.low %v1535_v35, %v1539_v36 }
 0x1bc   :  { %v1667_v42 = vld [vmem:[#allocation2 + $0x2f60] sm:$0xff]  ;;  %9838 = vmatpush2.bf16.msra.mxu0 %v17260_v43  ;;  %9879 = vmatpush2.bf16.msra.mxu1 %v17388_v45 }
 0x1bd   :  { %v17381_v48 = vcombine.high %v1663_v41, %v1667_v42  ;;  %v1527_v52 = vld [vmem:[#allocation2 + $0x2b00] sm:$0xff]  ;;  %9839 = vmatprep.subr.bf16.mxu0 %v17253_v47  ;;  %v17380_v61 = vcombine.low %v1663_v41, %v1667_v42 }
 0x1be   :  { %v1531_v53 = vld [vmem:[#allocation2 + $0x2b20] sm:$0xff] }
 0x1bf   :  { %v1655_v54 = vld [vmem:[#allocation2 + $0x2f00] sm:$0xff]  ;;  %v17245_v62 = vcombine.high %v1527_v52, %v1531_v53  ;;  %9880 = vmatprep.subr.bf16.mxu1 %v17381_v48  ;;  %v17244_v7 = vcombine.low %v1527_v52, %v1531_v53 }
 0x1c0   :  { %v1659_v57 = vld [vmem:[#allocation2 + $0x2f20] sm:$0xff]  ;;  %9840 = vmatpush2.bf16.msra.mxu0 %v17252_v60  ;;  %9881 = vmatpush2.bf16.msra.mxu1 %v17380_v61  ;;  %v212_v60 = vld [vmem:[#allocation2 + $0x1e8] sm:$0xff] }
 0x1c1   :  { %v17373_v63 = vcombine.high %v1655_v54, %v1659_v57  ;;  %v1519_v19 = vld [vmem:[#allocation2 + $0x2ac0] sm:$0xff]  ;;  %9841 = vmatprep.subr.bf16.mxu0 %v17245_v62  ;;  %v17372_v8 = vcombine.low %v1655_v54, %v1659_v57  ;;  %v208_v57 = vld [vmem:[#allocation2 + $0x1c8] sm:$0xff] }
 0x1c2   :  { %v1523_v0 = vld [vmem:[#allocation2 + $0x2ae0] sm:$0xff]  ;;  %v336_v61 = vld [vmem:[#allocation2 + $0x5c8] sm:$0xff] }
 0x1c3   :  { %v1647_v1 = vld [vmem:[#allocation2 + $0x2ec0] sm:$0xff]  ;;  %v17237_v32 = vcombine.high %v1519_v19, %v1523_v0  ;;  %9882 = vmatprep.subr.bf16.mxu1 %v17373_v63  ;;  %v17236_v17 = vcombine.low %v1519_v19, %v1523_v0  ;;  %v340_v62 = vld [vmem:[#allocation2 + $0x5e8] sm:$0xff] }
 0x1c4   :  { %v1651_v5 = vld [vmem:[#allocation2 + $0x2ee0] sm:$0xff]  ;;  %9842 = vmatpush2.bf16.msra.mxu0 %v17244_v7  ;;  %9883 = vmatpush2.bf16.msra.mxu1 %v17372_v8  ;;  %v16055_v7 = vcombine.high %v336_v61, %v340_v62  ;;  %v200_v8 = vld [vmem:[#allocation2 + $0x188] sm:$0xff] }
 0x1c5   :  { %v17365_v10 = vcombine.high %v1647_v1, %v1651_v5  ;;  %v1511_v11 = vld [vmem:[#allocation2 + $0x2a80] sm:$0xff]  ;;  %9843 = vmatprep.subr.bf16.mxu0 %v17237_v32  ;;  %v17364_v22 = vcombine.low %v1647_v1, %v1651_v5  ;;  %v125_v1 = vld [vmem:[%s18857_s0 + $0xb0] sm:$0xff]  ;;  %v15927_v5 = vcombine.high %v208_v57, %v212_v60  ;;  %v204_v32 = vld [vmem:[#allocation2 + $0x1a8] sm:$0xff] }
 0x1c6   :  { %v1515_v12 = vld [vmem:[#allocation2 + $0x2aa0] sm:$0xff] }
 0x1c7   :  { %v1639_v13 = vld [vmem:[#allocation2 + $0x2e80] sm:$0xff]  ;;  %v17229_v23 = vcombine.high %v1511_v11, %v1515_v12  ;;  %9884 = vmatprep.subr.bf16.mxu1 %v17365_v10  ;;  %v17228_v34 = vcombine.low %v1511_v11, %v1515_v12  ;;  %v328_v11 = vld [vmem:[#allocation2 + $0x588] sm:$0xff] }
 0x1c8   :  { %v1643_v15 = vld [vmem:[#allocation2 + $0x2ea0] sm:$0xff]  ;;  %9844 = vmatpush2.bf16.msra.mxu0 %v17236_v17  ;;  %9885 = vmatpush2.bf16.msra.mxu1 %v17364_v22  ;;  %v332_v12 = vld [vmem:[#allocation2 + $0x5a8] sm:$0xff]  ;;  %v16054_v17 = vcombine.low %v336_v61, %v340_v62  ;;  %v15919_v22 = vcombine.high %v200_v8, %v204_v32 }
 0x1c9   :  { %v17357_v24 = vcombine.high %v1639_v13, %v1643_v15  ;;  %v1503_v27 = vld [vmem:[#allocation2 + $0x2a40] sm:$0xff]  ;;  %9845 = vmatprep.subr.bf16.mxu0 %v17229_v23  ;;  %v17356_v35 = vcombine.low %v1639_v13, %v1643_v15  ;;  %v18501_v13 = vpack.c.bf16 %v125_v1, %v125_v1  ;;  %v15926_v15 = vcombine.low %v208_v57, %v212_v60  ;;  %v312_v57 = vld [vmem:[#allocation2 + $0x508] sm:$0xff] }
 0x1ca   :  { %v1507_v29 = vld [vmem:[#allocation2 + $0x2a60] sm:$0xff]  ;;  %v16047_v23 = vcombine.high %v328_v11, %v332_v12  ;;  %v316_v60 = vld [vmem:[#allocation2 + $0x528] sm:$0xff] }
 0x1cb   :  { %v1631_v30 = vld [vmem:[#allocation2 + $0x2e40] sm:$0xff]  ;;  %v17221_v36 = vcombine.high %v1503_v27, %v1507_v29  ;;  %9886 = vmatprep.subr.bf16.mxu1 %v17357_v24  ;;  %v17220_v48 = vcombine.low %v1503_v27, %v1507_v29  ;;  %v192_v24 = vld [vmem:[#allocation2 + $0x148] sm:$0xff] }
 0x1cc   :  { %v1635_v33 = vld [vmem:[#allocation2 + $0x2e60] sm:$0xff]  ;;  %9846 = vmatpush2.bf16.msra.mxu0 %v17228_v34  ;;  %9887 = vmatpush2.bf16.msra.mxu1 %v17356_v35  ;;  %v196_v27 = vld [vmem:[#allocation2 + $0x168] sm:$0xff] }
 0x1cd   :  { %v17349_v41 = vcombine.high %v1631_v30, %v1635_v33  ;;  %v1495_v42 = vld [vmem:[#allocation2 + $0x2a00] sm:$0xff]  ;;  %9847 = vmatprep.subr.bf16.mxu0 %v17221_v36  ;;  %v17348_v52 = vcombine.low %v1631_v30, %v1635_v33  ;;  %v320_v30 = vld [vmem:[#allocation2 + $0x548] sm:$0xff]  ;;  %v15918_v36 = vcombine.low %v200_v8, %v204_v32 }
 0x1ce   :  { %v1499_v43 = vld [vmem:[#allocation2 + $0x2a20] sm:$0xff]  ;;  %v324_v33 = vld [vmem:[#allocation2 + $0x568] sm:$0xff] }
 0x1cf   :  { %v1623_v45 = vld [vmem:[#allocation2 + $0x2e00] sm:$0xff]  ;;  %v17213_v53 = vcombine.high %v1495_v42, %v1499_v43  ;;  %9888 = vmatprep.subr.bf16.mxu1 %v17349_v41  ;;  %v17212_v63 = vcombine.low %v1495_v42, %v1499_v43  ;;  %v16046_v42 = vcombine.low %v328_v11, %v332_v12  ;;  %v15911_v43 = vcombine.high %v192_v24, %v196_v27  ;;  %v180_v8 = vld [vmem:[#allocation2 + $0xe8] sm:$0xff] }
 0x1d0   :  { %v1627_v47 = vld [vmem:[#allocation2 + $0x2e20] sm:$0xff]  ;;  %9848 = vmatpush2.bf16.msra.mxu0 %v17220_v48  ;;  %9889 = vmatpush2.bf16.msra.mxu1 %v17348_v52  ;;  %v16039_v52 = vcombine.high %v320_v30, %v324_v33  ;;  %v304_v32 = vld [vmem:[#allocation2 + $0x4c8] sm:$0xff] }
 0x1d1   :  { %v17341_v54 = vcombine.high %v1623_v45, %v1627_v47  ;;  %v123_v19 = vld [vmem:[%s18857_s0 + $0xa0] sm:$0xff]  ;;  %9849 = vmatprep.subr.bf16.mxu0 %v17213_v53  ;;  %v17340_v0 = vcombine.low %v1623_v45, %v1627_v47  ;;  %v184_v53 = vld [vmem:[#allocation2 + $0x108] sm:$0xff] }
 0x1d2   :  { %v18499_v10 = vpack.c.bf16 %v123_v19, %v123_v19  ;;  %v308_v11 = vld [vmem:[#allocation2 + $0x4e8] sm:$0xff] }
 0x1d3   :  { %9890 = vmatprep.subr.bf16.mxu1 %v17341_v54  ;;  %v9648_v35 = vpop.f32.mrf.mxu1  ;;  %v188_v54 = vld [vmem:[#allocation2 + $0x128] sm:$0xff] }
 0x1d4   :  { %9850 = vmatpush2.bf16.msra.mxu0 %v17212_v63  ;;  %9891 = vmatpush2.bf16.msra.mxu1 %v17340_v0  ;;  %v9607_v29 = vpop.f32.mrf.mxu0  ;;  %v15910_v63 = vcombine.low %v192_v24, %v196_v27  ;;  %v15903_v0 = vcombine.high %v184_v53, %v188_v54  ;;  %v15902_v12 = vcombine.low %v184_v53, %v188_v54  ;;  %v172_v24 = vld [vmem:[#allocation2 + $0xa8] sm:$0xff] }
 0x1d5   :  { %9901 = vmatprep.subr.bf16.mxu0 %v15927_v5  ;;  %9942 = vmatprep.subr.bf16.mxu1 %v16055_v7  ;;  %v9608_v34 = vadd.f32 %v9607_v29, %v18486_v55  ;;  %v9650_v48 = vpop.f32.mrf.mxu1  ;;  %v16031_v5 = vcombine.high %v312_v57, %v316_v60  ;;  %v176_v7 = vld [vmem:[#allocation2 + $0xc8] sm:$0xff] }
 0x1d6   :  { %v9609_v41 = vpop.f32.mrf.mxu0  ;;  %v296_v27 = vld [vmem:[#allocation2 + $0x488] sm:$0xff] }
 0x1d7   :  { %9852 = vmatmul.mubr.bf16.vlgmr.msra.gmra.mxu0 %v18499_v10  ;;  %9893 = vmatmul.mubr.bf16.vlgmr.msra.gmra.mxu1 %v18501_v13  ;;  %v18506_v45 = vadd.f32 %v9648_v35, %v9608_v34  ;;  %v9610_v47 = vadd.f32 %v9609_v41, %v18491_v3  ;;  %v9652_v62 = vpop.f32.mrf.mxu1  ;;  %v16038_v3 = vcombine.low %v320_v30, %v324_v33  ;;  %v300_v29 = vld [vmem:[#allocation2 + $0x4a8] sm:$0xff] }
 0x1d8   :  { %9902 = vmatpush1.bf16.msra.mxu0 %v15926_v15  ;;  %9943 = vmatpush1.bf16.msra.mxu1 %v16054_v17  ;;  %v9611_v55 = vpop.f32.mrf.mxu0  ;;  %v16030_v15 = vcombine.low %v312_v57, %v316_v60  ;;  %v15895_v17 = vcombine.high %v176_v7, %v180_v8  ;;  %v15894_v30 = vcombine.low %v176_v7, %v180_v8  ;;  %v164_v41 = vld [vmem:[#allocation2 + $0x68] sm:$0xff] }
 0x1d9   :  { %9903 = vmatprep.subr.bf16.mxu0 %v15919_v22  ;;  %9944 = vmatprep.subr.bf16.mxu1 %v16047_v23  ;;  %v18511_v61 = vadd.f32 %v9650_v48, %v9610_v47  ;;  %v9653_v1 = vpop.f32.mrf.mxu1  ;;  %v16023_v22 = vcombine.high %v304_v32, %v308_v11  ;;  %v168_v23 = vld [vmem:[#allocation2 + $0x88] sm:$0xff]  ;;  %v16022_v33 = vcombine.low %v304_v32, %v308_v11 }
 0x1da   :  { %9933 = vmatprep.mubr.bf16.mxu0 %v18349_v58  ;;  %9974 = vmatprep.mubr.bf16.mxu1 %v18351_v59  ;;  %v9612_v19 = vpop.f32.mrf.mxu0  ;;  %v15887_v34 = vcombine.high %v168_v23, %v172_v24  ;;  %v16015_v35 = vcombine.high %v296_v27, %v300_v29  ;;  %v15886_v47 = vcombine.low %v168_v23, %v172_v24  ;;  %v152_v54 = vld [vmem:[#allocation2 + $0x8] sm:$0xff] }
 0x1db   :  { %v16014_v48 = vcombine.low %v296_v27, %v300_v29  ;;  %v156_v55 = vld [vmem:[#allocation2 + $0x28] sm:$0xff] }
 0x1dc   :  { %9904 = vmatpush1.bf16.msra.mxu0 %v15918_v36  ;;  %9945 = vmatpush1.bf16.msra.mxu1 %v16046_v42  ;;  %v160_v36 = vld [vmem:[#allocation2 + $0x48] sm:$0xff]  ;;  %v15871_v19 = vcombine.high %v152_v54, %v156_v55  ;;  %v15870_v8 = vcombine.low %v152_v54, %v156_v55 }
 0x1dd   :  { %9905 = vmatprep.subr.bf16.mxu0 %v15911_v43  ;;  %9946 = vmatprep.subr.bf16.mxu1 %v16039_v52  ;;  %v288_v42 = vld [vmem:[#allocation2 + $0x448] sm:$0xff]  ;;  %v15879_v52 = vcombine.high %v160_v36, %v164_v41  ;;  %v15878_v62 = vcombine.low %v160_v36, %v164_v41 }
 0x1de   :  { %v292_v43 = vld [vmem:[#allocation2 + $0x468] sm:$0xff] }
 0x1df   :  { %v16007_v53 = vcombine.high %v288_v42, %v292_v43  ;;  %v280_v57 = vld [vmem:[#allocation2 + $0x408] sm:$0xff] }
 0x1e0   :  { %9906 = vmatpush1.bf16.msra.mxu0 %v15910_v63  ;;  %9947 = vmatpush1.bf16.msra.mxu1 %v16038_v3  ;;  %v284_v60 = vld [vmem:[#allocation2 + $0x428] sm:$0xff]  ;;  %v16006_v63 = vcombine.low %v288_v42, %v292_v43 }
 0x1e1   :  { %9907 = vmatprep.subr.bf16.mxu0 %v15903_v0  ;;  %9948 = vmatprep.subr.bf16.mxu1 %v16031_v5  ;;  %v15999_v3 = vcombine.high %v280_v57, %v284_v60  ;;  %v272_v0 = vld [vmem:[#allocation2 + $0x3c8] sm:$0xff]  ;;  %v15998_v32 = vcombine.low %v280_v57, %v284_v60 }
 0x1e2   :  { %v276_v1 = vld [vmem:[#allocation2 + $0x3e8] sm:$0xff] }
 0x1e3   :  { %v400_v5 = vld [vmem:[#allocation2 + $0x7c8] sm:$0xff]  ;;  %v15991_v11 = vcombine.high %v272_v0, %v276_v1  ;;  %v15990_v24 = vcombine.low %v272_v0, %v276_v1 }
 0x1e4   :  { %9908 = vmatpush1.bf16.msra.mxu0 %v15902_v12  ;;  %9949 = vmatpush1.bf16.msra.mxu1 %v16030_v15  ;;  %v404_v7 = vld [vmem:[#allocation2 + $0x7e8] sm:$0xff] }
 0x1e5   :  { %9909 = vmatprep.subr.bf16.mxu0 %v15895_v17  ;;  %9950 = vmatprep.subr.bf16.mxu1 %v16023_v22  ;;  %v16119_v12 = vcombine.high %v400_v5, %v404_v7  ;;  %v264_v15 = vld [vmem:[#allocation2 + $0x388] sm:$0xff]  ;;  %v16118_v27 = vcombine.low %v400_v5, %v404_v7 }
 0x1e6   :  { %v268_v17 = vld [vmem:[#allocation2 + $0x3a8] sm:$0xff] }
 0x1e7   :  { %v392_v22 = vld [vmem:[#allocation2 + $0x788] sm:$0xff]  ;;  %v15983_v29 = vcombine.high %v264_v15, %v268_v17  ;;  %v15982_v41 = vcombine.low %v264_v15, %v268_v17 }
 0x1e8   :  { %9910 = vmatpush1.bf16.msra.mxu0 %v15894_v30  ;;  %9951 = vmatpush1.bf16.msra.mxu1 %v16022_v33  ;;  %v396_v23 = vld [vmem:[#allocation2 + $0x7a8] sm:$0xff] }
 0x1e9   :  { %9911 = vmatprep.subr.bf16.mxu0 %v15887_v34  ;;  %9952 = vmatprep.subr.bf16.mxu1 %v16015_v35  ;;  %v16111_v30 = vcombine.high %v392_v22, %v396_v23  ;;  %v256_v33 = vld [vmem:[#allocation2 + $0x348] sm:$0xff]  ;;  %v16110_v42 = vcombine.low %v392_v22, %v396_v23 }
 0x1ea   :  { %v260_v34 = vld [vmem:[#allocation2 + $0x368] sm:$0xff] }
 0x1eb   :  { %v384_v35 = vld [vmem:[#allocation2 + $0x748] sm:$0xff]  ;;  %v15975_v43 = vcombine.high %v256_v33, %v260_v34  ;;  %v15974_v55 = vcombine.low %v256_v33, %v260_v34 }
 0x1ec   :  { %9912 = vmatpush1.bf16.msra.mxu0 %v15886_v47  ;;  %9953 = vmatpush1.bf16.msra.mxu1 %v16014_v48  ;;  %v388_v36 = vld [vmem:[#allocation2 + $0x768] sm:$0xff] }
 0x1ed   :  { %9913 = vmatprep.subr.bf16.mxu0 %v15879_v52  ;;  %9954 = vmatprep.subr.bf16.mxu1 %v16007_v53  ;;  %v16103_v47 = vcombine.high %v384_v35, %v388_v36  ;;  %v248_v48 = vld [vmem:[#allocation2 + $0x308] sm:$0xff]  ;;  %v16102_v57 = vcombine.low %v384_v35, %v388_v36 }
 0x1ee   :  { %v252_v52 = vld [vmem:[#allocation2 + $0x328] sm:$0xff] }
 0x1ef   :  { %v376_v53 = vld [vmem:[#allocation2 + $0x708] sm:$0xff]  ;;  %v15967_v60 = vcombine.high %v248_v48, %v252_v52  ;;  %v15966_v1 = vcombine.low %v248_v48, %v252_v52 }
 0x1f0   :  { %9914 = vmatpush1.bf16.msra.mxu0 %v15878_v62  ;;  %9955 = vmatpush1.bf16.msra.mxu1 %v16006_v63  ;;  %v380_v54 = vld [vmem:[#allocation2 + $0x728] sm:$0xff] }
 0x1f1   :  { %9915 = vmatprep.subr.bf16.mxu0 %v15871_v19  ;;  %9956 = vmatprep.subr.bf16.mxu1 %v15999_v3  ;;  %v16095_v62 = vcombine.high %v376_v53, %v380_v54  ;;  %v240_v63 = vld [vmem:[#allocation2 + $0x2c8] sm:$0xff]  ;;  %v16094_v5 = vcombine.low %v376_v53, %v380_v54 }
 0x1f2   :  { %v244_v19 = vld [vmem:[#allocation2 + $0x2e8] sm:$0xff] }
 0x1f3   :  { %v368_v3 = vld [vmem:[#allocation2 + $0x6c8] sm:$0xff]  ;;  %v15959_v7 = vcombine.high %v240_v63, %v244_v19  ;;  %v15958_v17 = vcombine.low %v240_v63, %v244_v19 }
 0x1f4   :  { %9916 = vmatpush1.bf16.msra.mxu0 %v15870_v8  ;;  %9957 = vmatpush1.bf16.msra.mxu1 %v15998_v32  ;;  %v372_v0 = vld [vmem:[#allocation2 + $0x6e8] sm:$0xff] }
 0x1f5   :  { %9917 = vmatprep.subr.bf16.mxu0 %v15991_v11  ;;  %9958 = vmatprep.subr.bf16.mxu1 %v16119_v12  ;;  %v16087_v8 = vcombine.high %v368_v3, %v372_v0  ;;  %v232_v32 = vld [vmem:[#allocation2 + $0x288] sm:$0xff]  ;;  %v16086_v22 = vcombine.low %v368_v3, %v372_v0 }
 0x1f6   :  { %v236_v11 = vld [vmem:[#allocation2 + $0x2a8] sm:$0xff] }
 0x1f7   :  { %v360_v12 = vld [vmem:[#allocation2 + $0x688] sm:$0xff]  ;;  %v15951_v23 = vcombine.high %v232_v32, %v236_v11  ;;  %v15950_v34 = vcombine.low %v232_v32, %v236_v11 }
 0x1f8   :  { %9918 = vmatpush2.bf16.msra.mxu0 %v15990_v24  ;;  %9959 = vmatpush2.bf16.msra.mxu1 %v16118_v27  ;;  %v364_v15 = vld [vmem:[#allocation2 + $0x6a8] sm:$0xff] }
 0x1f9   :  { %9919 = vmatprep.subr.bf16.mxu0 %v15983_v29  ;;  %9960 = vmatprep.subr.bf16.mxu1 %v16111_v30  ;;  %v16079_v24 = vcombine.high %v360_v12, %v364_v15  ;;  %v224_v27 = vld [vmem:[#allocation2 + $0x248] sm:$0xff]  ;;  %v16078_v35 = vcombine.low %v360_v12, %v364_v15 }
 0x1fa   :  { %v228_v29 = vld [vmem:[#allocation2 + $0x268] sm:$0xff] }
 0x1fb   :  { %v352_v30 = vld [vmem:[#allocation2 + $0x648] sm:$0xff]  ;;  %v15943_v36 = vcombine.high %v224_v27, %v228_v29  ;;  %v15942_v52 = vcombine.low %v224_v27, %v228_v29 }
 0x1fc   :  { %9920 = vmatpush2.bf16.msra.mxu0 %v15982_v41  ;;  %9961 = vmatpush2.bf16.msra.mxu1 %v16110_v42  ;;  %v356_v33 = vld [vmem:[#allocation2 + $0x668] sm:$0xff] }
 0x1fd   :  { %9921 = vmatprep.subr.bf16.mxu0 %v15975_v43  ;;  %9962 = vmatprep.subr.bf16.mxu1 %v16103_v47  ;;  %v16071_v41 = vcombine.high %v352_v30, %v356_v33  ;;  %v216_v42 = vld [vmem:[#allocation2 + $0x208] sm:$0xff]  ;;  %v16070_v53 = vcombine.low %v352_v30, %v356_v33 }
 0x1fe   :  { %v220_v43 = vld [vmem:[#allocation2 + $0x228] sm:$0xff] }
 0x1ff   :  { %v344_v47 = vld [vmem:[#allocation2 + $0x608] sm:$0xff]  ;;  %v15935_v54 = vcombine.high %v216_v42, %v220_v43  ;;  %v15934_v19 = vcombine.low %v216_v42, %v220_v43 }
 0x200   :  { %9922 = vmatpush2.bf16.msra.mxu0 %v15974_v55  ;;  %9963 = vmatpush2.bf16.msra.mxu1 %v16102_v57  ;;  %v348_v48 = vld [vmem:[#allocation2 + $0x628] sm:$0xff] }
 0x201   :  { %9923 = vmatprep.subr.bf16.mxu0 %v15967_v60  ;;  %9964 = vmatprep.subr.bf16.mxu1 %v16095_v62  ;;  %v16063_v55 = vcombine.high %v344_v47, %v348_v48  ;;  %v464_v57 = vld [vmem:[#allocation2 + $0x9c8] sm:$0xff]  ;;  %v16062_v3 = vcombine.low %v344_v47, %v348_v48 }
 0x202   :  { %v468_v60 = vld [vmem:[#allocation2 + $0x9e8] sm:$0xff] }
 0x203   :  { %v592_v62 = vld [vmem:[#allocation2 + $0xdc8] sm:$0xff]  ;;  %v16183_v0 = vcombine.high %v464_v57, %v468_v60  ;;  %v16182_v11 = vcombine.low %v464_v57, %v468_v60 }
 0x204   :  { %9924 = vmatpush2.bf16.msra.mxu0 %v15966_v1  ;;  %9965 = vmatpush2.bf16.msra.mxu1 %v16094_v5  ;;  %v596_v63 = vld [vmem:[#allocation2 + $0xde8] sm:$0xff] }
 0x205   :  { %9925 = vmatprep.subr.bf16.mxu0 %v15959_v7  ;;  %9966 = vmatprep.subr.bf16.mxu1 %v16087_v8  ;;  %v16311_v1 = vcombine.high %v592_v62, %v596_v63  ;;  %v456_v5 = vld [vmem:[#allocation2 + $0x988] sm:$0xff]  ;;  %v16310_v12 = vcombine.low %v592_v62, %v596_v63 }
 0x206   :  { %v460_v7 = vld [vmem:[#allocation2 + $0x9a8] sm:$0xff] }
 0x207   :  { %v584_v8 = vld [vmem:[#allocation2 + $0xd88] sm:$0xff]  ;;  %v16175_v15 = vcombine.high %v456_v5, %v460_v7 }
 0x208   :  { %9926 = vmatpush2.bf16.msra.mxu0 %v15958_v17  ;;  %9967 = vmatpush2.bf16.msra.mxu1 %v16086_v22  ;;  %v588_v32 = vld [vmem:[#allocation2 + $0xda8] sm:$0xff] }
 0x209   :  { %9927 = vmatprep.subr.bf16.mxu0 %v15951_v23  ;;  %9968 = vmatprep.subr.bf16.mxu1 %v16079_v24  ;;  %v16303_v17 = vcombine.high %v584_v8, %v588_v32  ;;  %v448_v22 = vld [vmem:[#allocation2 + $0x948] sm:$0xff] }
 0x20a   :  { %v452_v23 = vld [vmem:[#allocation2 + $0x968] sm:$0xff] }
 0x20b   :  { %v576_v27 = vld [vmem:[#allocation2 + $0xd48] sm:$0xff]  ;;  %v16166_v62 = vcombine.low %v448_v22, %v452_v23 }
 0x20c   :  { %9928 = vmatpush2.bf16.msra.mxu0 %v15950_v34  ;;  %9969 = vmatpush2.bf16.msra.mxu1 %v16078_v35  ;;  %v580_v29 = vld [vmem:[#allocation2 + $0xd68] sm:$0xff]  ;;  %v16174_v34 = vcombine.low %v456_v5, %v460_v7 }
 0x20d   :  { %9929 = vmatprep.subr.bf16.mxu0 %v15943_v36  ;;  %9970 = vmatprep.subr.bf16.mxu1 %v16071_v41  ;;  %v16302_v36 = vcombine.low %v584_v8, %v588_v32  ;;  %v16167_v41 = vcombine.high %v448_v22, %v452_v23  ;;  %v16295_v48 = vcombine.high %v576_v27, %v580_v29  ;;  %v436_v5 = vld [vmem:[#allocation2 + $0x8e8] sm:$0xff] }
 0x20e   :  { %v560_v7 = vld [vmem:[#allocation2 + $0xcc8] sm:$0xff] }
 0x20f   :  { %v564_v8 = vld [vmem:[#allocation2 + $0xce8] sm:$0xff] }
 0x210   :  { %9930 = vmatpush2.bf16.msra.mxu0 %v15942_v52  ;;  %9971 = vmatpush2.bf16.msra.mxu1 %v16070_v53  ;;  %v440_v52 = vld [vmem:[#allocation2 + $0x908] sm:$0xff] }
 0x211   :  { %9931 = vmatprep.subr.bf16.mxu0 %v15935_v54  ;;  %9972 = vmatprep.subr.bf16.mxu1 %v16063_v55  ;;  %v444_v53 = vld [vmem:[#allocation2 + $0x928] sm:$0xff] }
 0x212   :  { %v568_v54 = vld [vmem:[#allocation2 + $0xd08] sm:$0xff]  ;;  %v16158_v32 = vcombine.low %v440_v52, %v444_v53 }
 0x213   :  { %v572_v55 = vld [vmem:[#allocation2 + $0xd28] sm:$0xff] }
 0x214   :  { %9932 = vmatpush2.bf16.msra.mxu0 %v15934_v19  ;;  %9973 = vmatpush2.bf16.msra.mxu1 %v16062_v3  ;;  %v9730_v33 = vpop.f32.mrf.mxu1  ;;  %v16159_v19 = vcombine.high %v440_v52, %v444_v53  ;;  %v428_v22 = vld [vmem:[#allocation2 + $0x8a8] sm:$0xff] }
 0x215   :  { %9983 = vmatprep.subr.bf16.mxu0 %v16183_v0  ;;  %10024 = vmatprep.subr.bf16.mxu1 %v16311_v1  ;;  %v9689_v24 = vpop.f32.mrf.mxu0  ;;  %v16287_v0 = vcombine.high %v568_v54, %v572_v55  ;;  %v432_v1 = vld [vmem:[#allocation2 + $0x8c8] sm:$0xff] }
 0x216   :  { %v9690_v30 = vadd.f32 %v9689_v24, %v18506_v45  ;;  %v9732_v47 = vpop.f32.mrf.mxu1  ;;  %v552_v23 = vld [vmem:[#allocation2 + $0xc88] sm:$0xff] }
 0x217   :  { %9934 = vmatmul.mubr.bf16.vlgmr.msra.gmra.mxu0 %v18361_v16  ;;  %9975 = vmatmul.mubr.bf16.vlgmr.msra.gmra.mxu1 %v18366_v20  ;;  %v9691_v35 = vpop.f32.mrf.mxu0  ;;  %v556_v24 = vld [vmem:[#allocation2 + $0xca8] sm:$0xff] }
 0x218   :  { %9984 = vmatpush1.bf16.msra.mxu0 %v16182_v11  ;;  %10025 = vmatpush1.bf16.msra.mxu1 %v16310_v12  ;;  %v18516_v42 = vadd.f32 %v9730_v33, %v9690_v30  ;;  %v9692_v43 = vadd.f32 %v9691_v35, %v18511_v61  ;;  %v9734_v60 = vpop.f32.mrf.mxu1  ;;  %v16294_v61 = vcombine.low %v576_v27, %v580_v29  ;;  %v420_v35 = vld [vmem:[#allocation2 + $0x868] sm:$0xff] }
 0x219   :  { %9985 = vmatprep.subr.bf16.mxu0 %v16175_v15  ;;  %10026 = vmatprep.subr.bf16.mxu1 %v16303_v17  ;;  %v9693_v45 = vpop.f32.mrf.mxu0  ;;  %v16286_v11 = vcombine.low %v568_v54, %v572_v55  ;;  %v16151_v12 = vcombine.high %v432_v1, %v436_v5  ;;  %v16279_v15 = vcombine.high %v560_v7, %v564_v8  ;;  %v424_v17 = vld [vmem:[#allocation2 + $0x888] sm:$0xff] }
 0x21a   :  { %10015 = vmatprep.mubr.bf16.mxu0 %v18371_v28  ;;  %10056 = vmatprep.mubr.bf16.mxu1 %v18374_v31  ;;  %v18521_v57 = vadd.f32 %v9732_v47, %v9692_v43  ;;  %v9735_v3 = vpop.f32.mrf.mxu1  ;;  %v16150_v27 = vcombine.low %v432_v1, %v436_v5  ;;  %v16278_v29 = vcombine.low %v560_v7, %v564_v8  ;;  %v408_v53 = vld [vmem:[#allocation2 + $0x808] sm:$0xff] }
 0x21b   :  { %v9694_v63 = vpop.f32.mrf.mxu0  ;;  %v16143_v30 = vcombine.high %v424_v17, %v428_v22  ;;  %v16271_v33 = vcombine.high %v552_v23, %v556_v24  ;;  %v16142_v43 = vcombine.low %v424_v17, %v428_v22  ;;  %v16270_v47 = vcombine.low %v552_v23, %v556_v24  ;;  %v412_v45 = vld [vmem:[#allocation2 + $0x828] sm:$0xff] }
 0x21c   :  { %9986 = vmatpush1.bf16.msra.mxu0 %v16174_v34  ;;  %10027 = vmatpush1.bf16.msra.mxu1 %v16302_v36  ;;  %v416_v34 = vld [vmem:[#allocation2 + $0x848] sm:$0xff]  ;;  %v16127_v63 = vcombine.high %v408_v53, %v412_v45  ;;  %v16126_v5 = vcombine.low %v408_v53, %v412_v45 }
 0x21d   :  { %9987 = vmatprep.subr.bf16.mxu0 %v16167_v41  ;;  %10028 = vmatprep.subr.bf16.mxu1 %v16295_v48  ;;  %v544_v36 = vld [vmem:[#allocation2 + $0xc48] sm:$0xff]  ;;  %v16135_v48 = vcombine.high %v416_v34, %v420_v35  ;;  %v16134_v60 = vcombine.low %v416_v34, %v420_v35 }
 0x21e   :  { %v548_v41 = vld [vmem:[#allocation2 + $0xc68] sm:$0xff] }
 0x21f   :  { %v16263_v52 = vcombine.high %v544_v36, %v548_v41  ;;  %v536_v54 = vld [vmem:[#allocation2 + $0xc08] sm:$0xff] }
 0x220   :  { %9988 = vmatpush1.bf16.msra.mxu0 %v16166_v62  ;;  %10029 = vmatpush1.bf16.msra.mxu1 %v16294_v61  ;;  %v540_v55 = vld [vmem:[#allocation2 + $0xc28] sm:$0xff]  ;;  %v16262_v62 = vcombine.low %v544_v36, %v548_v41 }
 0x221   :  { %9989 = vmatprep.subr.bf16.mxu0 %v16159_v19  ;;  %10030 = vmatprep.subr.bf16.mxu1 %v16287_v0  ;;  %v16255_v61 = vcombine.high %v536_v54, %v540_v55  ;;  %v528_v19 = vld [vmem:[#allocation2 + $0xbc8] sm:$0xff]  ;;  %v16254_v7 = vcombine.low %v536_v54, %v540_v55 }
 0x222   :  { %v532_v3 = vld [vmem:[#allocation2 + $0xbe8] sm:$0xff] }
 0x223   :  { %v656_v0 = vld [vmem:[#allocation2 + $0xfc8] sm:$0xff]  ;;  %v16247_v8 = vcombine.high %v528_v19, %v532_v3  ;;  %v16246_v22 = vcombine.low %v528_v19, %v532_v3 }
 0x224   :  { %9990 = vmatpush1.bf16.msra.mxu0 %v16158_v32  ;;  %10031 = vmatpush1.bf16.msra.mxu1 %v16286_v11  ;;  %v660_v1 = vld [vmem:[#allocation2 + $0xfe8] sm:$0xff] }
 0x225   :  { %9991 = vmatprep.subr.bf16.mxu0 %v16151_v12  ;;  %10032 = vmatprep.subr.bf16.mxu1 %v16279_v15  ;;  %v16375_v32 = vcombine.high %v656_v0, %v660_v1  ;;  %v520_v11 = vld [vmem:[#allocation2 + $0xb88] sm:$0xff]  ;;  %v16374_v23 = vcombine.low %v656_v0, %v660_v1 }
 0x226   :  { %v524_v12 = vld [vmem:[#allocation2 + $0xba8] sm:$0xff] }
 0x227   :  { %v648_v15 = vld [vmem:[#allocation2 + $0xf88] sm:$0xff]  ;;  %v16239_v24 = vcombine.high %v520_v11, %v524_v12  ;;  %v16238_v35 = vcombine.low %v520_v11, %v524_v12 }
 0x228   :  { %9992 = vmatpush1.bf16.msra.mxu0 %v16150_v27  ;;  %10033 = vmatpush1.bf16.msra.mxu1 %v16278_v29  ;;  %v652_v17 = vld [vmem:[#allocation2 + $0xfa8] sm:$0xff] }
 0x229   :  { %9993 = vmatprep.subr.bf16.mxu0 %v16143_v30  ;;  %10034 = vmatprep.subr.bf16.mxu1 %v16271_v33  ;;  %v16367_v27 = vcombine.high %v648_v15, %v652_v17  ;;  %v512_v29 = vld [vmem:[#allocation2 + $0xb48] sm:$0xff]  ;;  %v16366_v36 = vcombine.low %v648_v15, %v652_v17 }
 0x22a   :  { %v516_v30 = vld [vmem:[#allocation2 + $0xb68] sm:$0xff] }
 0x22b   :  { %v640_v33 = vld [vmem:[#allocation2 + $0xf48] sm:$0xff]  ;;  %v16231_v41 = vcombine.high %v512_v29, %v516_v30  ;;  %v16230_v45 = vcombine.low %v512_v29, %v516_v30 }
 0x22c   :  { %9994 = vmatpush1.bf16.msra.mxu0 %v16142_v43  ;;  %10035 = vmatpush1.bf16.msra.mxu1 %v16270_v47  ;;  %v644_v34 = vld [vmem:[#allocation2 + $0xf68] sm:$0xff] }
 0x22d   :  { %9995 = vmatprep.subr.bf16.mxu0 %v16135_v48  ;;  %10036 = vmatprep.subr.bf16.mxu1 %v16263_v52  ;;  %v16359_v43 = vcombine.high %v640_v33, %v644_v34  ;;  %v504_v47 = vld [vmem:[#allocation2 + $0xb08] sm:$0xff]  ;;  %v16358_v54 = vcombine.low %v640_v33, %v644_v34 }
 0x22e   :  { %v508_v48 = vld [vmem:[#allocation2 + $0xb28] sm:$0xff] }
 0x22f   :  { %v632_v52 = vld [vmem:[#allocation2 + $0xf08] sm:$0xff]  ;;  %v16223_v55 = vcombine.high %v504_v47, %v508_v48  ;;  %v16222_v3 = vcombine.low %v504_v47, %v508_v48 }
 0x230   :  { %9996 = vmatpush1.bf16.msra.mxu0 %v16134_v60  ;;  %10037 = vmatpush1.bf16.msra.mxu1 %v16262_v62  ;;  %v636_v53 = vld [vmem:[#allocation2 + $0xf28] sm:$0xff] }
 0x231   :  { %9997 = vmatprep.subr.bf16.mxu0 %v16127_v63  ;;  %10038 = vmatprep.subr.bf16.mxu1 %v16255_v61  ;;  %v16351_v60 = vcombine.high %v632_v52, %v636_v53  ;;  %v496_v62 = vld [vmem:[#allocation2 + $0xac8] sm:$0xff]  ;;  %v16350_v0 = vcombine.low %v632_v52, %v636_v53 }
 0x232   :  { %v500_v63 = vld [vmem:[#allocation2 + $0xae8] sm:$0xff] }
 0x233   :  { %v624_v61 = vld [vmem:[#allocation2 + $0xec8] sm:$0xff]  ;;  %v16215_v1 = vcombine.high %v496_v62, %v500_v63  ;;  %v16214_v12 = vcombine.low %v496_v62, %v500_v63 }
 0x234   :  { %9998 = vmatpush1.bf16.msra.mxu0 %v16126_v5  ;;  %10039 = vmatpush1.bf16.msra.mxu1 %v16254_v7  ;;  %v628_v19 = vld [vmem:[#allocation2 + $0xee8] sm:$0xff] }
 0x235   :  { %9999 = vmatprep.subr.bf16.mxu0 %v16247_v8  ;;  %10040 = vmatprep.subr.bf16.mxu1 %v16375_v32  ;;  %v16343_v5 = vcombine.high %v624_v61, %v628_v19  ;;  %v488_v7 = vld [vmem:[#allocation2 + $0xa88] sm:$0xff]  ;;  %v16342_v15 = vcombine.low %v624_v61, %v628_v19 }
 0x236   :  { %v492_v8 = vld [vmem:[#allocation2 + $0xaa8] sm:$0xff] }
 0x237   :  { %v616_v32 = vld [vmem:[#allocation2 + $0xe88] sm:$0xff]  ;;  %v16207_v17 = vcombine.high %v488_v7, %v492_v8  ;;  %v16206_v30 = vcombine.low %v488_v7, %v492_v8 }
 0x238   :  { %10000 = vmatpush2.bf16.msra.mxu0 %v16246_v22  ;;  %10041 = vmatpush2.bf16.msra.mxu1 %v16374_v23  ;;  %v620_v11 = vld [vmem:[#allocation2 + $0xea8] sm:$0xff] }
 0x239   :  { %10001 = vmatprep.subr.bf16.mxu0 %v16239_v24  ;;  %10042 = vmatprep.subr.bf16.mxu1 %v16367_v27  ;;  %v16335_v22 = vcombine.high %v616_v32, %v620_v11  ;;  %v480_v23 = vld [vmem:[#allocation2 + $0xa48] sm:$0xff]  ;;  %v16334_v33 = vcombine.low %v616_v32, %v620_v11 }
 0x23a   :  { %v484_v24 = vld [vmem:[#allocation2 + $0xa68] sm:$0xff] }
 0x23b   :  { %v608_v27 = vld [vmem:[#allocation2 + $0xe48] sm:$0xff]  ;;  %v16199_v34 = vcombine.high %v480_v23, %v484_v24  ;;  %v16198_v48 = vcombine.low %v480_v23, %v484_v24 }
 0x23c   :  { %10002 = vmatpush2.bf16.msra.mxu0 %v16238_v35  ;;  %10043 = vmatpush2.bf16.msra.mxu1 %v16366_v36  ;;  %v612_v29 = vld [vmem:[#allocation2 + $0xe68] sm:$0xff] }
 0x23d   :  { %10003 = vmatprep.subr.bf16.mxu0 %v16231_v41  ;;  %10044 = vmatprep.subr.bf16.mxu1 %v16359_v43  ;;  %v16327_v35 = vcombine.high %v608_v27, %v612_v29  ;;  %v472_v36 = vld [vmem:[#allocation2 + $0xa08] sm:$0xff]  ;;  %v16326_v52 = vcombine.low %v608_v27, %v612_v29 }
 0x23e   :  { %v476_v41 = vld [vmem:[#allocation2 + $0xa28] sm:$0xff] }
 0x23f   :  { %v600_v43 = vld [vmem:[#allocation2 + $0xe08] sm:$0xff]  ;;  %v16191_v53 = vcombine.high %v472_v36, %v476_v41  ;;  %v16190_v63 = vcombine.low %v472_v36, %v476_v41 }
 0x240   :  { %10004 = vmatpush2.bf16.msra.mxu0 %v16230_v45  ;;  %10045 = vmatpush2.bf16.msra.mxu1 %v16358_v54  ;;  %v604_v47 = vld [vmem:[#allocation2 + $0xe28] sm:$0xff] }
 0x241   :  { %10005 = vmatprep.subr.bf16.mxu0 %v16223_v55  ;;  %10046 = vmatprep.subr.bf16.mxu1 %v16351_v60  ;;  %v16319_v45 = vcombine.high %v600_v43, %v604_v47  ;;  %v720_v54 = vld [vmem:[#allocation2 + $0x11c8] sm:$0xff]  ;;  %v16318_v61 = vcombine.low %v600_v43, %v604_v47 }
 0x242   :  { %v724_v55 = vld [vmem:[#allocation2 + $0x11e8] sm:$0xff] }
 0x243   :  { %v848_v60 = vld [vmem:[#allocation2 + $0x15c8] sm:$0xff]  ;;  %v16439_v19 = vcombine.high %v720_v54, %v724_v55  ;;  %v16438_v8 = vcombine.low %v720_v54, %v724_v55 }
 0x244   :  { %10006 = vmatpush2.bf16.msra.mxu0 %v16222_v3  ;;  %10047 = vmatpush2.bf16.msra.mxu1 %v16350_v0  ;;  %v852_v62 = vld [vmem:[#allocation2 + $0x15e8] sm:$0xff] }
 0x245   :  { %10007 = vmatprep.subr.bf16.mxu0 %v16215_v1  ;;  %10048 = vmatprep.subr.bf16.mxu1 %v16343_v5  ;;  %v16567_v3 = vcombine.high %v848_v60, %v852_v62  ;;  %v712_v0 = vld [vmem:[#allocation2 + $0x1188] sm:$0xff]  ;;  %v16566_v32 = vcombine.low %v848_v60, %v852_v62 }
 0x246   :  { %v716_v1 = vld [vmem:[#allocation2 + $0x11a8] sm:$0xff] }
 0x247   :  { %v840_v5 = vld [vmem:[#allocation2 + $0x1588] sm:$0xff]  ;;  %v16431_v11 = vcombine.high %v712_v0, %v716_v1 }
 0x248   :  { %10008 = vmatpush2.bf16.msra.mxu0 %v16214_v12  ;;  %10049 = vmatpush2.bf16.msra.mxu1 %v16342_v15  ;;  %v844_v7 = vld [vmem:[#allocation2 + $0x15a8] sm:$0xff] }
 0x249   :  { %10009 = vmatprep.subr.bf16.mxu0 %v16207_v17  ;;  %10050 = vmatprep.subr.bf16.mxu1 %v16335_v22  ;;  %v16559_v12 = vcombine.high %v840_v5, %v844_v7  ;;  %v704_v15 = vld [vmem:[#allocation2 + $0x1148] sm:$0xff] }
 0x24a   :  { %v708_v17 = vld [vmem:[#allocation2 + $0x1168] sm:$0xff] }
 0x24b   :  { %v832_v23 = vld [vmem:[#allocation2 + $0x1548] sm:$0xff]  ;;  %v16422_v60 = vcombine.low %v704_v15, %v708_v17 }
 0x24c   :  { %10010 = vmatpush2.bf16.msra.mxu0 %v16206_v30  ;;  %10051 = vmatpush2.bf16.msra.mxu1 %v16334_v33  ;;  %v836_v24 = vld [vmem:[#allocation2 + $0x1568] sm:$0xff]  ;;  %v16430_v30 = vcombine.low %v712_v0, %v716_v1 }
 0x24d   :  { %10011 = vmatprep.subr.bf16.mxu0 %v16199_v34  ;;  %10052 = vmatprep.subr.bf16.mxu1 %v16327_v35  ;;  %v16558_v34 = vcombine.low %v840_v5, %v844_v7  ;;  %v16423_v35 = vcombine.high %v704_v15, %v708_v17  ;;  %v16551_v47 = vcombine.high %v832_v23, %v836_v24  ;;  %v692_v0 = vld [vmem:[#allocation2 + $0x10e8] sm:$0xff] }
 0x24e   :  { %v816_v1 = vld [vmem:[#allocation2 + $0x14c8] sm:$0xff] }
 0x24f   :  { %v820_v5 = vld [vmem:[#allocation2 + $0x14e8] sm:$0xff] }
 0x250   :  { %10012 = vmatpush2.bf16.msra.mxu0 %v16198_v48  ;;  %10053 = vmatpush2.bf16.msra.mxu1 %v16326_v52  ;;  %v696_v48 = vld [vmem:[#allocation2 + $0x1108] sm:$0xff] }
 0x251   :  { %10013 = vmatprep.subr.bf16.mxu0 %v16191_v53  ;;  %10054 = vmatprep.subr.bf16.mxu1 %v16319_v45  ;;  %v700_v52 = vld [vmem:[#allocation2 + $0x1128] sm:$0xff] }
 0x252   :  { %v824_v53 = vld [vmem:[#allocation2 + $0x1508] sm:$0xff]  ;;  %v16414_v7 = vcombine.low %v696_v48, %v700_v52 }
 0x253   :  { %v828_v45 = vld [vmem:[#allocation2 + $0x1528] sm:$0xff] }
 0x254   :  { %10014 = vmatpush2.bf16.msra.mxu0 %v16190_v63  ;;  %10055 = vmatpush2.bf16.msra.mxu1 %v16318_v61  ;;  %v16415_v63 = vcombine.high %v696_v48, %v700_v52  ;;  %v684_v15 = vld [vmem:[#allocation2 + $0x10a8] sm:$0xff] }
 0x255   :  { %10065 = vmatprep.subr.bf16.mxu0 %v16439_v19  ;;  %10106 = vmatprep.subr.bf16.mxu1 %v16567_v3  ;;  %v16543_v19 = vcombine.high %v824_v53, %v828_v45  ;;  %v688_v3 = vld [vmem:[#allocation2 + $0x10c8] sm:$0xff] }
 0x256   :  { %v9812_v29 = vpop.f32.mrf.mxu1  ;;  %v808_v17 = vld [vmem:[#allocation2 + $0x1488] sm:$0xff] }
 0x257   :  { %v9771_v22 = vpop.f32.mrf.mxu0  ;;  %10016 = vmatmul.mubr.bf16.vlgmr.msra.gmra.mxu0 %v18388_v39  ;;  %10057 = vmatmul.mubr.bf16.vlgmr.msra.gmra.mxu1 %v18390_v40  ;;  %v664_v52 = vld [vmem:[#allocation2 + $0x1008] sm:$0xff] }
 0x258   :  { %v9772_v27 = vadd.f32 %v9771_v22, %v18516_v42  ;;  %10066 = vmatpush1.bf16.msra.mxu0 %v16438_v8  ;;  %10107 = vmatpush1.bf16.msra.mxu1 %v16566_v32  ;;  %v9814_v43 = vpop.f32.mrf.mxu1  ;;  %v16542_v8 = vcombine.low %v824_v53, %v828_v45  ;;  %v16407_v32 = vcombine.high %v688_v3, %v692_v0  ;;  %v812_v22 = vld [vmem:[#allocation2 + $0x14a8] sm:$0xff] }
 0x259   :  { %v9773_v33 = vpop.f32.mrf.mxu0  ;;  %10067 = vmatprep.subr.bf16.mxu0 %v16431_v11  ;;  %10108 = vmatprep.subr.bf16.mxu1 %v16559_v12  ;;  %v16535_v11 = vcombine.high %v816_v1, %v820_v5  ;;  %v680_v12 = vld [vmem:[#allocation2 + $0x1088] sm:$0xff] }
 0x25a   :  { %v18526_v36 = vadd.f32 %v9812_v29, %v9772_v27  ;;  %v9774_v41 = vadd.f32 %v9773_v33, %v18521_v57  ;;  %10097 = vmatprep.mubr.bf16.mxu0 %v18395_v49  ;;  %10138 = vmatprep.mubr.bf16.mxu1 %v18398_v51  ;;  %v9816_v55 = vpop.f32.mrf.mxu1  ;;  %v16550_v57 = vcombine.low %v832_v23, %v836_v24  ;;  %v676_v33 = vld [vmem:[#allocation2 + $0x1068] sm:$0xff] }
 0x25b   :  { %v9775_v42 = vpop.f32.mrf.mxu0  ;;  %v16406_v23 = vcombine.low %v688_v3, %v692_v0  ;;  %v16534_v24 = vcombine.low %v816_v1, %v820_v5  ;;  %v16399_v27 = vcombine.high %v680_v12, %v684_v15  ;;  %v16527_v29 = vcombine.high %v808_v17, %v812_v22  ;;  %v792_v53 = vld [vmem:[#allocation2 + $0x1408] sm:$0xff] }
 0x25c   :  { %v18531_v54 = vadd.f32 %v9814_v43, %v9774_v41  ;;  %10068 = vmatpush1.bf16.msra.mxu0 %v16430_v30  ;;  %10109 = vmatpush1.bf16.msra.mxu1 %v16558_v34  ;;  %v9817_v61 = vpop.f32.mrf.mxu1  ;;  %v672_v30 = vld [vmem:[#allocation2 + $0x1048] sm:$0xff]  ;;  %v16398_v41 = vcombine.low %v680_v12, %v684_v15  ;;  %v16526_v43 = vcombine.low %v808_v17, %v812_v22 }
 0x25d   :  { %v9776_v62 = vpop.f32.mrf.mxu0  ;;  %10069 = vmatprep.subr.bf16.mxu0 %v16423_v35  ;;  %10110 = vmatprep.subr.bf16.mxu1 %v16551_v47  ;;  %v800_v34 = vld [vmem:[#allocation2 + $0x1448] sm:$0xff]  ;;  %v16391_v47 = vcombine.high %v672_v30, %v676_v33  ;;  %v16390_v55 = vcombine.low %v672_v30, %v676_v33 }
 0x25e   :  { %v804_v35 = vld [vmem:[#allocation2 + $0x1468] sm:$0xff] }
 0x25f   :  { %v16519_v48 = vcombine.high %v800_v34, %v804_v35  ;;  %v668_v42 = vld [vmem:[#allocation2 + $0x1028] sm:$0xff] }
 0x260   :  { %10070 = vmatpush1.bf16.msra.mxu0 %v16422_v60  ;;  %10111 = vmatpush1.bf16.msra.mxu1 %v16550_v57  ;;  %v796_v45 = vld [vmem:[#allocation2 + $0x1428] sm:$0xff]  ;;  %v16518_v60 = vcombine.low %v800_v34, %v804_v35  ;;  %v16383_v62 = vcombine.high %v664_v52, %v668_v42  ;;  %v16382_v0 = vcombine.low %v664_v52, %v668_v42 }
 0x261   :  { %10071 = vmatprep.subr.bf16.mxu0 %v16415_v63  ;;  %10112 = vmatprep.subr.bf16.mxu1 %v16543_v19  ;;  %v16511_v57 = vcombine.high %v792_v53, %v796_v45  ;;  %v784_v63 = vld [vmem:[#allocation2 + $0x13c8] sm:$0xff]  ;;  %v16510_v1 = vcombine.low %v792_v53, %v796_v45 }
 0x262   :  { %v788_v61 = vld [vmem:[#allocation2 + $0x13e8] sm:$0xff] }
 0x263   :  { %v912_v19 = vld [vmem:[#allocation2 + $0x17c8] sm:$0xff]  ;;  %v16503_v5 = vcombine.high %v784_v63, %v788_v61  ;;  %v16502_v15 = vcombine.low %v784_v63, %v788_v61 }
 0x264   :  { %10072 = vmatpush1.bf16.msra.mxu0 %v16414_v7  ;;  %10113 = vmatpush1.bf16.msra.mxu1 %v16542_v8  ;;  %v916_v3 = vld [vmem:[#allocation2 + $0x17e8] sm:$0xff] }
 0x265   :  { %10073 = vmatprep.subr.bf16.mxu0 %v16407_v32  ;;  %10114 = vmatprep.subr.bf16.mxu1 %v16535_v11  ;;  %v16631_v7 = vcombine.high %v912_v19, %v916_v3  ;;  %v776_v8 = vld [vmem:[#allocation2 + $0x1388] sm:$0xff]  ;;  %v16630_v17 = vcombine.low %v912_v19, %v916_v3 }
 0x266   :  { %v780_v32 = vld [vmem:[#allocation2 + $0x13a8] sm:$0xff] }
 0x267   :  { %v904_v11 = vld [vmem:[#allocation2 + $0x1788] sm:$0xff]  ;;  %v16495_v22 = vcombine.high %v776_v8, %v780_v32  ;;  %v16494_v33 = vcombine.low %v776_v8, %v780_v32 }
 0x268   :  { %10074 = vmatpush1.bf16.msra.mxu0 %v16406_v23  ;;  %10115 = vmatpush1.bf16.msra.mxu1 %v16534_v24  ;;  %v908_v12 = vld [vmem:[#allocation2 + $0x17a8] sm:$0xff] }
 0x269   :  { %10075 = vmatprep.subr.bf16.mxu0 %v16399_v27  ;;  %10116 = vmatprep.subr.bf16.mxu1 %v16527_v29  ;;  %v16623_v23 = vcombine.high %v904_v11, %v908_v12  ;;  %v768_v24 = vld [vmem:[#allocation2 + $0x1348] sm:$0xff]  ;;  %v16622_v34 = vcombine.low %v904_v11, %v908_v12 }
 0x26a   :  { %v772_v27 = vld [vmem:[#allocation2 + $0x1368] sm:$0xff] }
 0x26b   :  { %v896_v29 = vld [vmem:[#allocation2 + $0x1748] sm:$0xff]  ;;  %v16487_v35 = vcombine.high %v768_v24, %v772_v27  ;;  %v16486_v42 = vcombine.low %v768_v24, %v772_v27 }
 0x26c   :  { %10076 = vmatpush1.bf16.msra.mxu0 %v16398_v41  ;;  %10117 = vmatpush1.bf16.msra.mxu1 %v16526_v43  ;;  %v900_v30 = vld [vmem:[#allocation2 + $0x1768] sm:$0xff] }
 0x26d   :  { %10077 = vmatprep.subr.bf16.mxu0 %v16391_v47  ;;  %10118 = vmatprep.subr.bf16.mxu1 %v16519_v48  ;;  %v16615_v41 = vcombine.high %v896_v29, %v900_v30  ;;  %v760_v43 = vld [vmem:[#allocation2 + $0x1308] sm:$0xff]  ;;  %v16614_v53 = vcombine.low %v896_v29, %v900_v30 }
 0x26e   :  { %v764_v47 = vld [vmem:[#allocation2 + $0x1328] sm:$0xff] }
 0x26f   :  { %v888_v48 = vld [vmem:[#allocation2 + $0x1708] sm:$0xff]  ;;  %v16479_v45 = vcombine.high %v760_v43, %v764_v47  ;;  %v16478_v61 = vcombine.low %v760_v43, %v764_v47 }
 0x270   :  { %10078 = vmatpush1.bf16.msra.mxu0 %v16390_v55  ;;  %10119 = vmatpush1.bf16.msra.mxu1 %v16518_v60  ;;  %v892_v52 = vld [vmem:[#allocation2 + $0x1728] sm:$0xff] }
 0x271   :  { %10079 = vmatprep.subr.bf16.mxu0 %v16383_v62  ;;  %10120 = vmatprep.subr.bf16.mxu1 %v16511_v57  ;;  %v16607_v55 = vcombine.high %v888_v48, %v892_v52  ;;  %v752_v60 = vld [vmem:[#allocation2 + $0x12c8] sm:$0xff]  ;;  %v16606_v19 = vcombine.low %v888_v48, %v892_v52 }
 0x272   :  { %v756_v62 = vld [vmem:[#allocation2 + $0x12e8] sm:$0xff] }
 0x273   :  { %v880_v57 = vld [vmem:[#allocation2 + $0x16c8] sm:$0xff]  ;;  %v16471_v3 = vcombine.high %v752_v60, %v756_v62  ;;  %v16470_v32 = vcombine.low %v752_v60, %v756_v62 }
 0x274   :  { %10080 = vmatpush1.bf16.msra.mxu0 %v16382_v0  ;;  %10121 = vmatpush1.bf16.msra.mxu1 %v16510_v1  ;;  %v884_v63 = vld [vmem:[#allocation2 + $0x16e8] sm:$0xff] }
 0x275   :  { %10081 = vmatprep.subr.bf16.mxu0 %v16503_v5  ;;  %10122 = vmatprep.subr.bf16.mxu1 %v16631_v7  ;;  %v16599_v0 = vcombine.high %v880_v57, %v884_v63  ;;  %v744_v1 = vld [vmem:[#allocation2 + $0x1288] sm:$0xff]  ;;  %v16598_v11 = vcombine.low %v880_v57, %v884_v63 }
 0x276   :  { %v748_v5 = vld [vmem:[#allocation2 + $0x12a8] sm:$0xff] }
 0x277   :  { %v872_v7 = vld [vmem:[#allocation2 + $0x1688] sm:$0xff]  ;;  %v16463_v12 = vcombine.high %v744_v1, %v748_v5  ;;  %v16462_v27 = vcombine.low %v744_v1, %v748_v5 }
 0x278   :  { %10082 = vmatpush2.bf16.msra.mxu0 %v16502_v15  ;;  %10123 = vmatpush2.bf16.msra.mxu1 %v16630_v17  ;;  %v876_v8 = vld [vmem:[#allocation2 + $0x16a8] sm:$0xff] }
 0x279   :  { %10083 = vmatprep.subr.bf16.mxu0 %v16495_v22  ;;  %10124 = vmatprep.subr.bf16.mxu1 %v16623_v23  ;;  %v16591_v15 = vcombine.high %v872_v7, %v876_v8  ;;  %v736_v17 = vld [vmem:[#allocation2 + $0x1248] sm:$0xff]  ;;  %v16590_v29 = vcombine.low %v872_v7, %v876_v8 }
 0x27a   :  { %v740_v22 = vld [vmem:[#allocation2 + $0x1268] sm:$0xff] }
 0x27b   :  { %v864_v23 = vld [vmem:[#allocation2 + $0x1648] sm:$0xff]  ;;  %v16455_v30 = vcombine.high %v736_v17, %v740_v22  ;;  %v16454_v47 = vcombine.low %v736_v17, %v740_v22 }
 0x27c   :  { %10084 = vmatpush2.bf16.msra.mxu0 %v16494_v33  ;;  %10125 = vmatpush2.bf16.msra.mxu1 %v16622_v34  ;;  %v868_v24 = vld [vmem:[#allocation2 + $0x1668] sm:$0xff] }
 0x27d   :  { %10085 = vmatprep.subr.bf16.mxu0 %v16487_v35  ;;  %10126 = vmatprep.subr.bf16.mxu1 %v16615_v41  ;;  %v16583_v33 = vcombine.high %v864_v23, %v868_v24  ;;  %v728_v34 = vld [vmem:[#allocation2 + $0x1208] sm:$0xff]  ;;  %v16582_v48 = vcombine.low %v864_v23, %v868_v24 }
 0x27e   :  { %v732_v35 = vld [vmem:[#allocation2 + $0x1228] sm:$0xff] }
 0x27f   :  { %v856_v41 = vld [vmem:[#allocation2 + $0x1608] sm:$0xff]  ;;  %v16447_v52 = vcombine.high %v728_v34, %v732_v35  ;;  %v16446_v62 = vcombine.low %v728_v34, %v732_v35 }
 0x280   :  { %10086 = vmatpush2.bf16.msra.mxu0 %v16486_v42  ;;  %10127 = vmatpush2.bf16.msra.mxu1 %v16614_v53  ;;  %v860_v43 = vld [vmem:[#allocation2 + $0x1628] sm:$0xff] }
 0x281   :  { %10087 = vmatprep.subr.bf16.mxu0 %v16479_v45  ;;  %10128 = vmatprep.subr.bf16.mxu1 %v16607_v55  ;;  %v16575_v42 = vcombine.high %v856_v41, %v860_v43  ;;  %v976_v53 = vld [vmem:[#allocation2 + $0x19c8] sm:$0xff]  ;;  %v16574_v57 = vcombine.low %v856_v41, %v860_v43 }
 0x282   :  { %v980_v45 = vld [vmem:[#allocation2 + $0x19e8] sm:$0xff] }
 0x283   :  { %v1104_v55 = vld [vmem:[#allocation2 + $0x1dc8] sm:$0xff]  ;;  %v16695_v63 = vcombine.high %v976_v53, %v980_v45  ;;  %v16694_v5 = vcombine.low %v976_v53, %v980_v45 }
 0x284   :  { %10088 = vmatpush2.bf16.msra.mxu0 %v16478_v61  ;;  %10129 = vmatpush2.bf16.msra.mxu1 %v16606_v19  ;;  %v1108_v60 = vld [vmem:[#allocation2 + $0x1de8] sm:$0xff] }
 0x285   :  { %10089 = vmatprep.subr.bf16.mxu0 %v16471_v3  ;;  %10130 = vmatprep.subr.bf16.mxu1 %v16599_v0  ;;  %v16823_v61 = vcombine.high %v1104_v55, %v1108_v60  ;;  %v968_v19 = vld [vmem:[#allocation2 + $0x1988] sm:$0xff]  ;;  %v16822_v7 = vcombine.low %v1104_v55, %v1108_v60 }
 0x286   :  { %v972_v3 = vld [vmem:[#allocation2 + $0x19a8] sm:$0xff] }
 0x287   :  { %v1096_v0 = vld [vmem:[#allocation2 + $0x1d88] sm:$0xff]  ;;  %v16687_v8 = vcombine.high %v968_v19, %v972_v3 }
 0x288   :  { %10090 = vmatpush2.bf16.msra.mxu0 %v16470_v32  ;;  %10131 = vmatpush2.bf16.msra.mxu1 %v16598_v11  ;;  %v1100_v1 = vld [vmem:[#allocation2 + $0x1da8] sm:$0xff] }
 0x289   :  { %10091 = vmatprep.subr.bf16.mxu0 %v16463_v12  ;;  %10132 = vmatprep.subr.bf16.mxu1 %v16591_v15  ;;  %v16815_v32 = vcombine.high %v1096_v0, %v1100_v1  ;;  %v960_v11 = vld [vmem:[#allocation2 + $0x1948] sm:$0xff] }
 0x28a   :  { %v964_v12 = vld [vmem:[#allocation2 + $0x1968] sm:$0xff] }
 0x28b   :  { %v1088_v17 = vld [vmem:[#allocation2 + $0x1d48] sm:$0xff]  ;;  %v16678_v55 = vcombine.low %v960_v11, %v964_v12 }
 0x28c   :  { %10092 = vmatpush2.bf16.msra.mxu0 %v16462_v27  ;;  %10133 = vmatpush2.bf16.msra.mxu1 %v16590_v29  ;;  %v1092_v22 = vld [vmem:[#allocation2 + $0x1d68] sm:$0xff]  ;;  %v16686_v27 = vcombine.low %v968_v19, %v972_v3 }
 0x28d   :  { %10093 = vmatprep.subr.bf16.mxu0 %v16455_v30  ;;  %10134 = vmatprep.subr.bf16.mxu1 %v16583_v33  ;;  %v16814_v30 = vcombine.low %v1096_v0, %v1100_v1  ;;  %v16679_v33 = vcombine.high %v960_v11, %v964_v12  ;;  %v16807_v43 = vcombine.high %v1088_v17, %v1092_v22  ;;  %v948_v19 = vld [vmem:[#allocation2 + $0x18e8] sm:$0xff] }
 0x28e   :  { %v1072_v3 = vld [vmem:[#allocation2 + $0x1cc8] sm:$0xff] }
 0x28f   :  { %v1076_v0 = vld [vmem:[#allocation2 + $0x1ce8] sm:$0xff] }
 0x290   :  { %10094 = vmatpush2.bf16.msra.mxu0 %v16454_v47  ;;  %10135 = vmatpush2.bf16.msra.mxu1 %v16582_v48  ;;  %v952_v47 = vld [vmem:[#allocation2 + $0x1908] sm:$0xff] }
 0x291   :  { %10095 = vmatprep.subr.bf16.mxu0 %v16447_v52  ;;  %10136 = vmatprep.subr.bf16.mxu1 %v16575_v42  ;;  %v956_v48 = vld [vmem:[#allocation2 + $0x1928] sm:$0xff] }
 0x292   :  { %v1080_v52 = vld [vmem:[#allocation2 + $0x1d08] sm:$0xff]  ;;  %v16670_v1 = vcombine.low %v952_v47, %v956_v48 }
 0x293   :  { %v1084_v42 = vld [vmem:[#allocation2 + $0x1d28] sm:$0xff] }
 0x294   :  { %10096 = vmatpush2.bf16.msra.mxu0 %v16446_v62  ;;  %10137 = vmatpush2.bf16.msra.mxu1 %v16574_v57  ;;  %v16671_v62 = vcombine.high %v952_v47, %v956_v48  ;;  %v940_v11 = vld [vmem:[#allocation2 + $0x18a8] sm:$0xff] }
 0x295   :  { %10147 = vmatprep.subr.bf16.mxu0 %v16695_v63  ;;  %10188 = vmatprep.subr.bf16.mxu1 %v16823_v61  ;;  %v16799_v63 = vcombine.high %v1080_v52, %v1084_v42  ;;  %v944_v61 = vld [vmem:[#allocation2 + $0x18c8] sm:$0xff] }
 0x296   :  { %v1064_v12 = vld [vmem:[#allocation2 + $0x1c88] sm:$0xff] }
 0x297   :  { %v9853_v15 = vpop.f32.mrf.mxu0  ;;  %10098 = vmatmul.mubr.bf16.vlgmr.msra.gmra.mxu0 %v18409_v2  ;;  %v9894_v24 = vpop.f32.mrf.mxu1  ;;  %10139 = vmatmul.mubr.bf16.vlgmr.msra.gmra.mxu1 %v18414_v6  ;;  %v920_v48 = vld [vmem:[#allocation2 + $0x1808] sm:$0xff] }
 0x298   :  { %v9854_v23 = vadd.f32 %v9853_v15, %v18526_v36  ;;  %10148 = vmatpush1.bf16.msra.mxu0 %v16694_v5  ;;  %10189 = vmatpush1.bf16.msra.mxu1 %v16822_v7  ;;  %v16798_v5 = vcombine.low %v1080_v52, %v1084_v42  ;;  %v16663_v7 = vcombine.high %v944_v61, %v948_v19  ;;  %v1068_v15 = vld [vmem:[#allocation2 + $0x1ca8] sm:$0xff] }
 0x299   :  { %v9855_v29 = vpop.f32.mrf.mxu0  ;;  %10149 = vmatprep.subr.bf16.mxu0 %v16687_v8  ;;  %v9896_v41 = vpop.f32.mrf.mxu1  ;;  %10190 = vmatprep.subr.bf16.mxu1 %v16815_v32  ;;  %v16791_v8 = vcombine.high %v1072_v3, %v1076_v0  ;;  %v936_v32 = vld [vmem:[#allocation2 + $0x1888] sm:$0xff] }
 0x29a   :  { %v18536_v34 = vadd.f32 %v9894_v24, %v9854_v23  ;;  %v9856_v35 = vadd.f32 %v9855_v29, %v18531_v54  ;;  %10179 = vmatprep.mubr.bf16.mxu0 %v18419_v14  ;;  %10220 = vmatprep.mubr.bf16.mxu1 %v18422_v18  ;;  %v16806_v54 = vcombine.low %v1088_v17, %v1092_v22  ;;  %v932_v29 = vld [vmem:[#allocation2 + $0x1868] sm:$0xff] }
 0x29b   :  { %v9857_v36 = vpop.f32.mrf.mxu0  ;;  %v9898_v45 = vpop.f32.mrf.mxu1  ;;  %v16662_v17 = vcombine.low %v944_v61, %v948_v19  ;;  %v16790_v22 = vcombine.low %v1072_v3, %v1076_v0  ;;  %v16655_v23 = vcombine.high %v936_v32, %v940_v11  ;;  %v16783_v24 = vcombine.high %v1064_v12, %v1068_v15  ;;  %v1048_v52 = vld [vmem:[#allocation2 + $0x1c08] sm:$0xff] }
 0x29c   :  { %v18541_v53 = vadd.f32 %v9896_v41, %v9856_v35  ;;  %10150 = vmatpush1.bf16.msra.mxu0 %v16686_v27  ;;  %10191 = vmatpush1.bf16.msra.mxu1 %v16814_v30  ;;  %v928_v27 = vld [vmem:[#allocation2 + $0x1848] sm:$0xff]  ;;  %v16654_v35 = vcombine.low %v936_v32, %v940_v11  ;;  %v16782_v41 = vcombine.low %v1064_v12, %v1068_v15 }
 0x29d   :  { %v9858_v60 = vpop.f32.mrf.mxu0  ;;  %10151 = vmatprep.subr.bf16.mxu0 %v16679_v33  ;;  %v9899_v57 = vpop.f32.mrf.mxu1  ;;  %10192 = vmatprep.subr.bf16.mxu1 %v16807_v43  ;;  %v1056_v30 = vld [vmem:[#allocation2 + $0x1c48] sm:$0xff]  ;;  %v16647_v43 = vcombine.high %v928_v27, %v932_v29  ;;  %v16646_v45 = vcombine.low %v928_v27, %v932_v29 }
 0x29e   :  { %v1060_v33 = vld [vmem:[#allocation2 + $0x1c68] sm:$0xff] }
 0x29f   :  { %v16775_v47 = vcombine.high %v1056_v30, %v1060_v33  ;;  %v924_v36 = vld [vmem:[#allocation2 + $0x1828] sm:$0xff] }
 0x2a0   :  { %10152 = vmatpush1.bf16.msra.mxu0 %v16678_v55  ;;  %10193 = vmatpush1.bf16.msra.mxu1 %v16806_v54  ;;  %v1052_v42 = vld [vmem:[#allocation2 + $0x1c28] sm:$0xff]  ;;  %v16774_v55 = vcombine.low %v1056_v30, %v1060_v33  ;;  %v16639_v60 = vcombine.high %v920_v48, %v924_v36  ;;  %v16638_v19 = vcombine.low %v920_v48, %v924_v36 }
 0x2a1   :  { %10153 = vmatprep.subr.bf16.mxu0 %v16671_v62  ;;  %10194 = vmatprep.subr.bf16.mxu1 %v16799_v63  ;;  %v16767_v54 = vcombine.high %v1048_v52, %v1052_v42  ;;  %v1040_v62 = vld [vmem:[#allocation2 + $0x1bc8] sm:$0xff]  ;;  %v16766_v3 = vcombine.low %v1048_v52, %v1052_v42 }
 0x2a2   :  { %v1044_v57 = vld [vmem:[#allocation2 + $0x1be8] sm:$0xff] }
 0x2a3   :  { %v1168_v63 = vld [vmem:[#allocation2 + $0x1fc8] sm:$0xff]  ;;  %v16759_v0 = vcombine.high %v1040_v62, %v1044_v57  ;;  %v16758_v11 = vcombine.low %v1040_v62, %v1044_v57 }
 0x2a4   :  { %10154 = vmatpush1.bf16.msra.mxu0 %v16670_v1  ;;  %10195 = vmatpush1.bf16.msra.mxu1 %v16798_v5  ;;  %v1172_v61 = vld [vmem:[#allocation2 + $0x1fe8] sm:$0xff] }
 0x2a5   :  { %10155 = vmatprep.subr.bf16.mxu0 %v16663_v7  ;;  %10196 = vmatprep.subr.bf16.mxu1 %v16791_v8  ;;  %v16887_v1 = vcombine.high %v1168_v63, %v1172_v61  ;;  %v1032_v5 = vld [vmem:[#allocation2 + $0x1b88] sm:$0xff]  ;;  %v16886_v12 = vcombine.low %v1168_v63, %v1172_v61 }
 0x2a6   :  { %v1036_v7 = vld [vmem:[#allocation2 + $0x1ba8] sm:$0xff] }
 0x2a7   :  { %v1160_v8 = vld [vmem:[#allocation2 + $0x1f88] sm:$0xff]  ;;  %v16751_v15 = vcombine.high %v1032_v5, %v1036_v7  ;;  %v16750_v29 = vcombine.low %v1032_v5, %v1036_v7 }
 0x2a8   :  { %10156 = vmatpush1.bf16.msra.mxu0 %v16662_v17  ;;  %10197 = vmatpush1.bf16.msra.mxu1 %v16790_v22  ;;  %v1164_v32 = vld [vmem:[#allocation2 + $0x1fa8] sm:$0xff] }
 0x2a9   :  { %10157 = vmatprep.subr.bf16.mxu0 %v16655_v23  ;;  %10198 = vmatprep.subr.bf16.mxu1 %v16783_v24  ;;  %v16879_v17 = vcombine.high %v1160_v8, %v1164_v32  ;;  %v1024_v22 = vld [vmem:[#allocation2 + $0x1b48] sm:$0xff]  ;;  %v16878_v30 = vcombine.low %v1160_v8, %v1164_v32 }
 0x2aa   :  { %v1028_v23 = vld [vmem:[#allocation2 + $0x1b68] sm:$0xff] }
 0x2ab   :  { %v1152_v24 = vld [vmem:[#allocation2 + $0x1f48] sm:$0xff]  ;;  %v16743_v33 = vcombine.high %v1024_v22, %v1028_v23  ;;  %v16742_v36 = vcombine.low %v1024_v22, %v1028_v23 }
 0x2ac   :  { %10158 = vmatpush1.bf16.msra.mxu0 %v16654_v35  ;;  %10199 = vmatpush1.bf16.msra.mxu1 %v16782_v41  ;;  %v1156_v27 = vld [vmem:[#allocation2 + $0x1f68] sm:$0xff] }
 0x2ad   :  { %10159 = vmatprep.subr.bf16.mxu0 %v16647_v43  ;;  %10200 = vmatprep.subr.bf16.mxu1 %v16775_v47  ;;  %v16871_v35 = vcombine.high %v1152_v24, %v1156_v27  ;;  %v1016_v41 = vld [vmem:[#allocation2 + $0x1b08] sm:$0xff]  ;;  %v16870_v52 = vcombine.low %v1152_v24, %v1156_v27 }
 0x2ae   :  { %v1020_v43 = vld [vmem:[#allocation2 + $0x1b28] sm:$0xff] }
 0x2af   :  { %v1144_v47 = vld [vmem:[#allocation2 + $0x1f08] sm:$0xff]  ;;  %v16735_v42 = vcombine.high %v1016_v41, %v1020_v43  ;;  %v16734_v57 = vcombine.low %v1016_v41, %v1020_v43 }
 0x2b0   :  { %10160 = vmatpush1.bf16.msra.mxu0 %v16646_v45  ;;  %10201 = vmatpush1.bf16.msra.mxu1 %v16774_v55  ;;  %v1148_v48 = vld [vmem:[#allocation2 + $0x1f28] sm:$0xff] }
 0x2b1   :  { %10161 = vmatprep.subr.bf16.mxu0 %v16639_v60  ;;  %10202 = vmatprep.subr.bf16.mxu1 %v16767_v54  ;;  %v16863_v45 = vcombine.high %v1144_v47, %v1148_v48  ;;  %v1008_v55 = vld [vmem:[#allocation2 + $0x1ac8] sm:$0xff]  ;;  %v16862_v63 = vcombine.low %v1144_v47, %v1148_v48 }
 0x2b2   :  { %v1012_v60 = vld [vmem:[#allocation2 + $0x1ae8] sm:$0xff] }
 0x2b3   :  { %v1136_v54 = vld [vmem:[#allocation2 + $0x1ec8] sm:$0xff]  ;;  %v16727_v61 = vcombine.high %v1008_v55, %v1012_v60  ;;  %v16726_v7 = vcombine.low %v1008_v55, %v1012_v60 }
 0x2b4   :  { %10162 = vmatpush1.bf16.msra.mxu0 %v16638_v19  ;;  %10203 = vmatpush1.bf16.msra.mxu1 %v16766_v3  ;;  %v1140_v62 = vld [vmem:[#allocation2 + $0x1ee8] sm:$0xff] }
 0x2b5   :  { %10163 = vmatprep.subr.bf16.mxu0 %v16759_v0  ;;  %10204 = vmatprep.subr.bf16.mxu1 %v16887_v1  ;;  %v16855_v19 = vcombine.high %v1136_v54, %v1140_v62  ;;  %v1000_v3 = vld [vmem:[#allocation2 + $0x1a88] sm:$0xff]  ;;  %v16854_v8 = vcombine.low %v1136_v54, %v1140_v62  ;;  %v1699_v54 = vsub.s32 2, %v18427_v26 }
 0x2b6   :  { %v1004_v0 = vld [vmem:[#allocation2 + $0x1aa8] sm:$0xff] }
 0x2b7   :  { %v1128_v1 = vld [vmem:[#allocation2 + $0x1e88] sm:$0xff]  ;;  %v16719_v32 = vcombine.high %v1000_v3, %v1004_v0  ;;  %v16718_v23 = vcombine.low %v1000_v3, %v1004_v0 }
 0x2b8   :  { %10164 = vmatpush2.bf16.msra.mxu0 %v16758_v11  ;;  %10205 = vmatpush2.bf16.msra.mxu1 %v16886_v12  ;;  %v1132_v5 = vld [vmem:[#allocation2 + $0x1ea8] sm:$0xff] }
 0x2b9   :  { %10165 = vmatprep.subr.bf16.mxu0 %v16751_v15  ;;  %10206 = vmatprep.subr.bf16.mxu1 %v16879_v17  ;;  %v16847_v11 = vcombine.high %v1128_v1, %v1132_v5  ;;  %v992_v12 = vld [vmem:[#allocation2 + $0x1a48] sm:$0xff]  ;;  %v16846_v24 = vcombine.low %v1128_v1, %v1132_v5  ;;  %v18143_v5 = vld [vmem:[#allocation4] sm:$0xff] }
 0x2ba   :  { %v996_v15 = vld [vmem:[#allocation2 + $0x1a68] sm:$0xff] }
 0x2bb   :  { %v1120_v17 = vld [vmem:[#allocation2 + $0x1e48] sm:$0xff]  ;;  %v16711_v27 = vcombine.high %v992_v12, %v996_v15  ;;  %v16710_v43 = vcombine.low %v992_v12, %v996_v15 }
 0x2bc   :  { %10166 = vmatpush2.bf16.msra.mxu0 %v16750_v29  ;;  %10207 = vmatpush2.bf16.msra.mxu1 %v16878_v30  ;;  %v1124_v22 = vld [vmem:[#allocation2 + $0x1e68] sm:$0xff] }
 0x2bd   :  { %10167 = vmatprep.subr.bf16.mxu0 %v16743_v33  ;;  %10208 = vmatprep.subr.bf16.mxu1 %v16871_v35  ;;  %v16839_v29 = vcombine.high %v1120_v17, %v1124_v22  ;;  %v984_v30 = vld [vmem:[#allocation2 + $0x1a08] sm:$0xff]  ;;  %v16838_v47 = vcombine.low %v1120_v17, %v1124_v22 }
 0x2be   :  { %v988_v33 = vld [vmem:[#allocation2 + $0x1a28] sm:$0xff] }
 0x2bf   :  { %v1112_v35 = vld [vmem:[#allocation2 + $0x1e08] sm:$0xff]  ;;  %v16703_v48 = vcombine.high %v984_v30, %v988_v33  ;;  %v16702_v60 = vcombine.low %v984_v30, %v988_v33 }
 0x2c0   :  { %10168 = vmatpush2.bf16.msra.mxu0 %v16742_v36  ;;  %10209 = vmatpush2.bf16.msra.mxu1 %v16870_v52  ;;  %v1116_v41 = vld [vmem:[#allocation2 + $0x1e28] sm:$0xff] }
 0x2c1   :  { %10169 = vmatprep.subr.bf16.mxu0 %v16735_v42  ;;  %10210 = vmatprep.subr.bf16.mxu1 %v16863_v45  ;;  %v16831_v36 = vcombine.high %v1112_v35, %v1116_v41  ;;  %v1232_v52 = vld [vmem:[#allocation2 + $0x21c8] sm:$0xff]  ;;  %v16830_v62 = vcombine.low %v1112_v35, %v1116_v41 }
 0x2c2   :  { %v1236_v42 = vld [vmem:[#allocation2 + $0x21e8] sm:$0xff] }
 0x2c3   :  { %v1360_v45 = vld [vmem:[#allocation2 + $0x25c8] sm:$0xff] }
 0x2c4   :  { %10170 = vmatpush2.bf16.msra.mxu0 %v16734_v57  ;;  %10211 = vmatpush2.bf16.msra.mxu1 %v16862_v63  ;;  %v1364_v55 = vld [vmem:[#allocation2 + $0x25e8] sm:$0xff]  ;;  %v16951_v57 = vcombine.high %v1232_v52, %v1236_v42 }
 0x2c5   :  { %10171 = vmatprep.subr.bf16.mxu0 %v16727_v61  ;;  %10212 = vmatprep.subr.bf16.mxu1 %v16855_v19  ;;  %v17079_v63 = vcombine.high %v1360_v45, %v1364_v55  ;;  %v1703_v61 = vsub.s32 3, %v18427_v26  ;;  %v1224_v19 = vld [vmem:[#allocation2 + $0x2188] sm:$0xff] }
 0x2c6   :  { %v1228_v3 = vld [vmem:[#allocation2 + $0x21a8] sm:$0xff] }
 0x2c7   :  { %v1352_v0 = vld [vmem:[#allocation2 + $0x2588] sm:$0xff]  ;;  %v1704_v12 = vrot.slane %v18143_v5, %v1703_v61  ;;  %v16942_v33 = vcombine.low %v1224_v19, %v1228_v3 }
 0x2c8   :  { %10172 = vmatpush2.bf16.msra.mxu0 %v16726_v7  ;;  %10213 = vmatpush2.bf16.msra.mxu1 %v16854_v8  ;;  %v1356_v1 = vld [vmem:[#allocation2 + $0x25a8] sm:$0xff]  ;;  %v1700_v7 = vrot.slane %v18143_v5, %v1699_v54  ;;  %v16950_v8 = vcombine.low %v1232_v52, %v1236_v42 }
 0x2c9   :  { %10173 = vmatprep.subr.bf16.mxu0 %v16719_v32  ;;  %10214 = vmatprep.subr.bf16.mxu1 %v16847_v11  ;;  %v17078_v32 = vcombine.low %v1360_v45, %v1364_v55  ;;  %v16943_v11 = vcombine.high %v1224_v19, %v1228_v3  ;;  %v17071_v15 = vcombine.high %v1352_v0, %v1356_v1  ;;  %v1216_v17 = vld [vmem:[#allocation2 + $0x2148] sm:$0xff] }
 0x2ca   :  { %v1220_v22 = vld [vmem:[#allocation2 + $0x2168] sm:$0xff]  ;;  %v17070_v41 = vcombine.low %v1352_v0, %v1356_v1 }
 0x2cb   :  { %v1208_v42 = vld [vmem:[#allocation2 + $0x2108] sm:$0xff]  ;;  %v16934_v19 = vcombine.low %v1216_v17, %v1220_v22 }
 0x2cc   :  { %10174 = vmatpush2.bf16.msra.mxu0 %v16718_v23  ;;  %10215 = vmatpush2.bf16.msra.mxu1 %v16846_v24  ;;  %v1344_v24 = vld [vmem:[#allocation2 + $0x2548] sm:$0xff] }
 0x2cd   :  { %10175 = vmatprep.subr.bf16.mxu0 %v16711_v27  ;;  %10216 = vmatprep.subr.bf16.mxu1 %v16839_v29  ;;  %v1348_v27 = vld [vmem:[#allocation2 + $0x2568] sm:$0xff] }
 0x2ce   :  { %v17063_v52 = vcombine.high %v1344_v24, %v1348_v27  ;;  %v1212_v45 = vld [vmem:[#allocation2 + $0x2128] sm:$0xff]  ;;  %v17062_v0 = vcombine.low %v1344_v24, %v1348_v27 }
 0x2cf   :  { %v16927_v1 = vcombine.high %v1208_v42, %v1212_v45  ;;  %v1324_v24 = vld [vmem:[#allocation2 + $0x24a8] sm:$0xff] }
 0x2d0   :  { %10176 = vmatpush2.bf16.msra.mxu0 %v16710_v43  ;;  %10217 = vmatpush2.bf16.msra.mxu1 %v16838_v47  ;;  %v16935_v43 = vcombine.high %v1216_v17, %v1220_v22  ;;  %v1192_v22 = vld [vmem:[#allocation2 + $0x2088] sm:$0xff] }
 0x2d1   :  { %10177 = vmatprep.subr.bf16.mxu0 %v16703_v48  ;;  %10218 = vmatprep.subr.bf16.mxu1 %v16831_v36 }
 0x2d4   :  { %10178 = vmatpush2.bf16.msra.mxu0 %v16702_v60  ;;  %10219 = vmatpush2.bf16.msra.mxu1 %v16830_v62  ;;  %v1336_v60 = vld [vmem:[#allocation2 + $0x2508] sm:$0xff] }
 0x2d5   :  { %10229 = vmatprep.subr.bf16.mxu0 %v16951_v57  ;;  %10270 = vmatprep.subr.bf16.mxu1 %v17079_v63  ;;  %v1340_v62 = vld [vmem:[#allocation2 + $0x2528] sm:$0xff] }
 0x2d7   :  { %v9935_v23 = vpop.f32.mrf.mxu0  ;;  %10180 = vmatmul.mubr.bf16.vlgmr.msra.gmra.mxu0 %v18437_v50  ;;  %v9976_v30 = vpop.f32.mrf.mxu1  ;;  %10221 = vmatmul.mubr.bf16.vlgmr.msra.gmra.mxu1 %v18444_v56 }
 0x2d8   :  { %v9936_v29 = vadd.f32 %v9935_v23, %v1700_v7  ;;  %10230 = vmatpush1.bf16.msra.mxu0 %v16950_v8  ;;  %10271 = vmatpush1.bf16.msra.mxu1 %v17078_v32  ;;  %v17055_v7 = vcombine.high %v1336_v60, %v1340_v62  ;;  %v1200_v8 = vld [vmem:[#allocation2 + $0x20c8] sm:$0xff]  ;;  %v17054_v23 = vcombine.low %v1336_v60, %v1340_v62 }
 0x2d9   :  { %v9937_v35 = vpop.f32.mrf.mxu0  ;;  %10231 = vmatprep.subr.bf16.mxu0 %v16943_v11  ;;  %v9978_v36 = vpop.f32.mrf.mxu1  ;;  %10272 = vmatprep.subr.bf16.mxu1 %v17071_v15  ;;  %v1204_v32 = vld [vmem:[#allocation2 + $0x20e8] sm:$0xff]  ;;  %v16926_v15 = vcombine.low %v1208_v42, %v1212_v45 }
 0x2da   :  { %v18551_v47 = vadd.f32 %v9976_v30, %v9936_v29  ;;  %v9938_v48 = vadd.f32 %v9937_v35, %v1704_v12  ;;  %10261 = vmatprep.mubr.bf16.mxu0 %v18451_v4  ;;  %10302 = vmatprep.mubr.bf16.mxu1 %v18454_v9  ;;  %v1328_v11 = vld [vmem:[#allocation2 + $0x24c8] sm:$0xff]  ;;  %v16919_v29 = vcombine.high %v1200_v8, %v1204_v32 }
 0x2db   :  { %v9939_v55 = vpop.f32.mrf.mxu0  ;;  %v9980_v63 = vpop.f32.mrf.mxu1  ;;  %v1332_v12 = vld [vmem:[#allocation2 + $0x24e8] sm:$0xff]  ;;  %v16918_v27 = vcombine.low %v1200_v8, %v1204_v32 }
 0x2dc   :  { %v18555_v57 = vadd.f32 %v9978_v36, %v9938_v48  ;;  %10232 = vmatpush1.bf16.msra.mxu0 %v16942_v33  ;;  %10273 = vmatpush1.bf16.msra.mxu1 %v17070_v41  ;;  %v17047_v17 = vcombine.high %v1328_v11, %v1332_v12  ;;  %v1196_v30 = vld [vmem:[#allocation2 + $0x20a8] sm:$0xff]  ;;  %v17046_v35 = vcombine.low %v1328_v11, %v1332_v12 }
 0x2dd   :  { %v9940_v3 = vpop.f32.mrf.mxu0  ;;  %10233 = vmatprep.subr.bf16.mxu0 %v16935_v43  ;;  %v9981_v5 = vpop.f32.mrf.mxu1  ;;  %10274 = vmatprep.subr.bf16.mxu1 %v17063_v52  ;;  %v1320_v33 = vld [vmem:[#allocation2 + $0x2488] sm:$0xff]  ;;  %v16911_v41 = vcombine.high %v1192_v22, %v1196_v30  ;;  %v16910_v45 = vcombine.low %v1192_v22, %v1196_v30 }
 0x2de   :  { %v17039_v43 = vcombine.high %v1320_v33, %v1324_v24  ;;  %v1184_v48 = vld [vmem:[#allocation2 + $0x2048] sm:$0xff]  ;;  %v17038_v55 = vcombine.low %v1320_v33, %v1324_v24 }
 0x2df   :  { %v1188_v36 = vld [vmem:[#allocation2 + $0x2068] sm:$0xff] }
 0x2e0   :  { %10234 = vmatpush1.bf16.msra.mxu0 %v16934_v19  ;;  %10275 = vmatpush1.bf16.msra.mxu1 %v17062_v0  ;;  %v1312_v52 = vld [vmem:[#allocation2 + $0x2448] sm:$0xff]  ;;  %v16903_v60 = vcombine.high %v1184_v48, %v1188_v36 }
 0x2e1   :  { %10235 = vmatprep.subr.bf16.mxu0 %v16927_v1  ;;  %10276 = vmatprep.subr.bf16.mxu1 %v17055_v7  ;;  %v1316_v42 = vld [vmem:[#allocation2 + $0x2468] sm:$0xff]  ;;  %v16902_v1 = vcombine.low %v1184_v48, %v1188_v36 }
 0x2e2   :  { %v17031_v62 = vcombine.high %v1312_v52, %v1316_v42  ;;  %v1176_v63 = vld [vmem:[#allocation2 + $0x2008] sm:$0xff]  ;;  %v17030_v5 = vcombine.low %v1312_v52, %v1316_v42 }
 0x2e3   :  { %v1180_v19 = vld [vmem:[#allocation2 + $0x2028] sm:$0xff] }
 0x2e4   :  { %10236 = vmatpush1.bf16.msra.mxu0 %v16926_v15  ;;  %10277 = vmatpush1.bf16.msra.mxu1 %v17054_v23  ;;  %v1304_v3 = vld [vmem:[#allocation2 + $0x2408] sm:$0xff]  ;;  %v16895_v7 = vcombine.high %v1176_v63, %v1180_v19  ;;  %v16894_v23 = vcombine.low %v1176_v63, %v1180_v19 }
 0x2e5   :  { %10237 = vmatprep.subr.bf16.mxu0 %v16919_v29  ;;  %10278 = vmatprep.subr.bf16.mxu1 %v17047_v17  ;;  %v1308_v0 = vld [vmem:[#allocation2 + $0x2428] sm:$0xff] }
 0x2e6   :  { %v17023_v8 = vcombine.high %v1304_v3, %v1308_v0  ;;  %v1296_v32 = vld [vmem:[#allocation2 + $0x23c8] sm:$0xff]  ;;  %v17022_v29 = vcombine.low %v1304_v3, %v1308_v0 }
 0x2e7   :  { %v1300_v11 = vld [vmem:[#allocation2 + $0x23e8] sm:$0xff] }
 0x2e8   :  { %10238 = vmatpush1.bf16.msra.mxu0 %v16918_v27  ;;  %10279 = vmatpush1.bf16.msra.mxu1 %v17046_v35  ;;  %v1424_v12 = vld [vmem:[#allocation2 + $0x27c8] sm:$0xff]  ;;  %v17015_v17 = vcombine.high %v1296_v32, %v1300_v11  ;;  %v17014_v35 = vcombine.low %v1296_v32, %v1300_v11 }
 0x2e9   :  { %10239 = vmatprep.subr.bf16.mxu0 %v16911_v41  ;;  %10280 = vmatprep.subr.bf16.mxu1 %v17039_v43  ;;  %v1428_v15 = vld [vmem:[#allocation2 + $0x27e8] sm:$0xff] }
 0x2ea   :  { %v17143_v22 = vcombine.high %v1424_v12, %v1428_v15  ;;  %v1288_v30 = vld [vmem:[#allocation2 + $0x2388] sm:$0xff]  ;;  %v17142_v41 = vcombine.low %v1424_v12, %v1428_v15 }
 0x2eb   :  { %v1292_v33 = vld [vmem:[#allocation2 + $0x23a8] sm:$0xff] }
 0x2ec   :  { %10240 = vmatpush1.bf16.msra.mxu0 %v16910_v45  ;;  %10281 = vmatpush1.bf16.msra.mxu1 %v17038_v55  ;;  %v1416_v24 = vld [vmem:[#allocation2 + $0x2788] sm:$0xff]  ;;  %v17007_v43 = vcombine.high %v1288_v30, %v1292_v33  ;;  %v17006_v55 = vcombine.low %v1288_v30, %v1292_v33 }
 0x2ed   :  { %10241 = vmatprep.subr.bf16.mxu0 %v16903_v60  ;;  %10282 = vmatprep.subr.bf16.mxu1 %v17031_v62  ;;  %v1420_v27 = vld [vmem:[#allocation2 + $0x27a8] sm:$0xff] }
 0x2ee   :  { %v17135_v48 = vcombine.high %v1416_v24, %v1420_v27  ;;  %v1280_v36 = vld [vmem:[#allocation2 + $0x2348] sm:$0xff]  ;;  %v17134_v60 = vcombine.low %v1416_v24, %v1420_v27 }
 0x2ef   :  { %v1284_v52 = vld [vmem:[#allocation2 + $0x2368] sm:$0xff] }
 0x2f0   :  { %10242 = vmatpush1.bf16.msra.mxu0 %v16902_v1  ;;  %10283 = vmatpush1.bf16.msra.mxu1 %v17030_v5  ;;  %v1408_v42 = vld [vmem:[#allocation2 + $0x2748] sm:$0xff]  ;;  %v16999_v62 = vcombine.high %v1280_v36, %v1284_v52  ;;  %v16998_v5 = vcombine.low %v1280_v36, %v1284_v52 }
 0x2f1   :  { %10243 = vmatprep.subr.bf16.mxu0 %v16895_v7  ;;  %10284 = vmatprep.subr.bf16.mxu1 %v17023_v8  ;;  %v1412_v45 = vld [vmem:[#allocation2 + $0x2768] sm:$0xff] }
 0x2f2   :  { %v17127_v63 = vcombine.high %v1408_v42, %v1412_v45  ;;  %v1272_v19 = vld [vmem:[#allocation2 + $0x2308] sm:$0xff]  ;;  %v17126_v7 = vcombine.low %v1408_v42, %v1412_v45 }
 0x2f3   :  { %v1276_v3 = vld [vmem:[#allocation2 + $0x2328] sm:$0xff] }
 0x2f4   :  { %10244 = vmatpush1.bf16.msra.mxu0 %v16894_v23  ;;  %10285 = vmatpush1.bf16.msra.mxu1 %v17022_v29  ;;  %v1400_v0 = vld [vmem:[#allocation2 + $0x2708] sm:$0xff]  ;;  %v16991_v8 = vcombine.high %v1272_v19, %v1276_v3  ;;  %v16990_v29 = vcombine.low %v1272_v19, %v1276_v3 }
 0x2f5   :  { %10245 = vmatprep.subr.bf16.mxu0 %v17015_v17  ;;  %10286 = vmatprep.subr.bf16.mxu1 %v17143_v22  ;;  %v1404_v1 = vld [vmem:[#allocation2 + $0x2728] sm:$0xff] }
 0x2f6   :  { %v17119_v32 = vcombine.high %v1400_v0, %v1404_v1  ;;  %v1264_v11 = vld [vmem:[#allocation2 + $0x22c8] sm:$0xff]  ;;  %v17118_v17 = vcombine.low %v1400_v0, %v1404_v1 }
 0x2f7   :  { %v1268_v12 = vld [vmem:[#allocation2 + $0x22e8] sm:$0xff] }
 0x2f8   :  { %10246 = vmatpush2.bf16.msra.mxu0 %v17014_v35  ;;  %10287 = vmatpush2.bf16.msra.mxu1 %v17142_v41  ;;  %v1392_v15 = vld [vmem:[#allocation2 + $0x26c8] sm:$0xff]  ;;  %v16983_v22 = vcombine.high %v1264_v11, %v1268_v12  ;;  %v16982_v41 = vcombine.low %v1264_v11, %v1268_v12 }
 0x2f9   :  { %10247 = vmatprep.subr.bf16.mxu0 %v17007_v43  ;;  %10288 = vmatprep.subr.bf16.mxu1 %v17135_v48  ;;  %v1396_v23 = vld [vmem:[#allocation2 + $0x26e8] sm:$0xff] }
 0x2fa   :  { %v17111_v30 = vcombine.high %v1392_v15, %v1396_v23  ;;  %v1256_v33 = vld [vmem:[#allocation2 + $0x2288] sm:$0xff]  ;;  %v17110_v43 = vcombine.low %v1392_v15, %v1396_v23 }
 0x2fb   :  { %v1260_v24 = vld [vmem:[#allocation2 + $0x22a8] sm:$0xff] }
 0x2fc   :  { %10248 = vmatpush2.bf16.msra.mxu0 %v17006_v55  ;;  %10289 = vmatpush2.bf16.msra.mxu1 %v17134_v60  ;;  %v1384_v27 = vld [vmem:[#allocation2 + $0x2688] sm:$0xff]  ;;  %v16975_v48 = vcombine.high %v1256_v33, %v1260_v24  ;;  %v16974_v60 = vcombine.low %v1256_v33, %v1260_v24 }
 0x2fd   :  { %10249 = vmatprep.subr.bf16.mxu0 %v16999_v62  ;;  %10290 = vmatprep.subr.bf16.mxu1 %v17127_v63  ;;  %v1388_v35 = vld [vmem:[#allocation2 + $0x26a8] sm:$0xff] }
 0x2fe   :  { %v17103_v36 = vcombine.high %v1384_v27, %v1388_v35  ;;  %v1248_v52 = vld [vmem:[#allocation2 + $0x2248] sm:$0xff]  ;;  %v17102_v62 = vcombine.low %v1384_v27, %v1388_v35 }
 0x2ff   :  { %v1252_v42 = vld [vmem:[#allocation2 + $0x2268] sm:$0xff] }
 0x300   :  { %10250 = vmatpush2.bf16.msra.mxu0 %v16998_v5  ;;  %10291 = vmatpush2.bf16.msra.mxu1 %v17126_v7  ;;  %v1376_v45 = vld [vmem:[#allocation2 + $0x2648] sm:$0xff]  ;;  %v16967_v63 = vcombine.high %v1248_v52, %v1252_v42  ;;  %v16966_v7 = vcombine.low %v1248_v52, %v1252_v42 }
 0x301   :  { %10251 = vmatprep.subr.bf16.mxu0 %v16991_v8  ;;  %10292 = vmatprep.subr.bf16.mxu1 %v17119_v32  ;;  %v1380_v55 = vld [vmem:[#allocation2 + $0x2668] sm:$0xff] }
 0x302   :  { %v17095_v19 = vcombine.high %v1376_v45, %v1380_v55  ;;  %v1240_v3 = vld [vmem:[#allocation2 + $0x2208] sm:$0xff]  ;;  %v17094_v8 = vcombine.low %v1376_v45, %v1380_v55 }
 0x303   :  { %v1244_v0 = vld [vmem:[#allocation2 + $0x2228] sm:$0xff] }
 0x304   :  { %10252 = vmatpush2.bf16.msra.mxu0 %v16990_v29  ;;  %10293 = vmatpush2.bf16.msra.mxu1 %v17118_v17  ;;  %v1368_v1 = vld [vmem:[#allocation2 + $0x2608] sm:$0xff]  ;;  %v16959_v32 = vcombine.high %v1240_v3, %v1244_v0  ;;  %v16958_v17 = vcombine.low %v1240_v3, %v1244_v0 }
 0x305   :  { %10253 = vmatprep.subr.bf16.mxu0 %v16983_v22  ;;  %10294 = vmatprep.subr.bf16.mxu1 %v17111_v30  ;;  %v1372_v5 = vld [vmem:[#allocation2 + $0x2628] sm:$0xff] }
 0x306   :  { %v17087_v11 = vcombine.high %v1368_v1, %v1372_v5  ;;  %v1488_v12 = vld [vmem:[#allocation2 + $0x29c8] sm:$0xff]  ;;  %v17086_v22 = vcombine.low %v1368_v1, %v1372_v5 }
 0x307   :  { %v1492_v15 = vld [vmem:[#allocation2 + $0x29e8] sm:$0xff] }
 0x308   :  { %10254 = vmatpush2.bf16.msra.mxu0 %v16982_v41  ;;  %10295 = vmatpush2.bf16.msra.mxu1 %v17110_v43  ;;  %v1616_v23 = vld [vmem:[#allocation2 + $0x2dc8] sm:$0xff]  ;;  %v17207_v30 = vcombine.high %v1488_v12, %v1492_v15  ;;  %v17206_v43 = vcombine.low %v1488_v12, %v1492_v15 }
 0x309   :  { %10255 = vmatprep.subr.bf16.mxu0 %v16975_v48  ;;  %10296 = vmatprep.subr.bf16.mxu1 %v17103_v36  ;;  %v1620_v29 = vld [vmem:[#allocation2 + $0x2de8] sm:$0xff] }
 0x30a   :  { %v17335_v33 = vcombine.high %v1616_v23, %v1620_v29  ;;  %v1480_v24 = vld [vmem:[#allocation2 + $0x2988] sm:$0xff]  ;;  %v17334_v48 = vcombine.low %v1616_v23, %v1620_v29 }
 0x30b   :  { %v1484_v27 = vld [vmem:[#allocation2 + $0x29a8] sm:$0xff] }
 0x30c   :  { %10256 = vmatpush2.bf16.msra.mxu0 %v16974_v60  ;;  %10297 = vmatpush2.bf16.msra.mxu1 %v17102_v62  ;;  %v1608_v35 = vld [vmem:[#allocation2 + $0x2d88] sm:$0xff]  ;;  %v17199_v36 = vcombine.high %v1480_v24, %v1484_v27  ;;  %v17198_v3 = vcombine.low %v1480_v24, %v1484_v27 }
 0x30d   :  { %10257 = vmatprep.subr.bf16.mxu0 %v16967_v63  ;;  %10298 = vmatprep.subr.bf16.mxu1 %v17095_v19  ;;  %v1612_v41 = vld [vmem:[#allocation2 + $0x2da8] sm:$0xff] }
 0x30e   :  { %v17327_v52 = vcombine.high %v1608_v35, %v1612_v41  ;;  %v1472_v42 = vld [vmem:[#allocation2 + $0x2948] sm:$0xff]  ;;  %v17326_v1 = vcombine.low %v1608_v35, %v1612_v41 }
 0x30f   :  { %v1476_v45 = vld [vmem:[#allocation2 + $0x2968] sm:$0xff] }
 0x310   :  { %10258 = vmatpush2.bf16.msra.mxu0 %v16966_v7  ;;  %10299 = vmatpush2.bf16.msra.mxu1 %v17094_v8  ;;  %v1600_v60 = vld [vmem:[#allocation2 + $0x2d48] sm:$0xff]  ;;  %v17191_v5 = vcombine.high %v1472_v42, %v1476_v45 }
 0x311   :  { %10259 = vmatprep.subr.bf16.mxu0 %v16959_v32  ;;  %10300 = vmatprep.subr.bf16.mxu1 %v17087_v11  ;;  %v1604_v62 = vld [vmem:[#allocation2 + $0x2d68] sm:$0xff] }
 0x312   :  { %v17319_v11 = vcombine.high %v1600_v60, %v1604_v62  ;;  %v1464_v12 = vld [vmem:[#allocation2 + $0x2908] sm:$0xff] }
 0x313   :  { %v1468_v15 = vld [vmem:[#allocation2 + $0x2928] sm:$0xff] }
 0x314   :  { %10260 = vmatpush2.bf16.msra.mxu0 %v16958_v17  ;;  %10301 = vmatpush2.bf16.msra.mxu1 %v17086_v22  ;;  %v1592_v23 = vld [vmem:[#allocation2 + $0x2d08] sm:$0xff]  ;;  %v17183_v24 = vcombine.high %v1464_v12, %v1468_v15 }
 0x315   :  { %10311 = vmatprep.subr.bf16.mxu0 %v17207_v30  ;;  %10352 = vmatprep.subr.bf16.mxu1 %v17335_v33  ;;  %v1596_v29 = vld [vmem:[#allocation2 + $0x2d28] sm:$0xff]  ;;  %v17190_v30 = vcombine.low %v1472_v42, %v1476_v45 }
 0x316   :  { %v17311_v35 = vcombine.high %v1592_v23, %v1596_v29  ;;  %v1456_v41 = vld [vmem:[#allocation2 + $0x28c8] sm:$0xff] }
 0x317   :  { %v10017_v55 = vpop.f32.mrf.mxu0  ;;  %10262 = vmatmul.mubr.bf16.vlgmr.msra.gmra.mxu0 %v18469_v21  ;;  %v10058_v19 = vpop.f32.mrf.mxu1  ;;  %10303 = vmatmul.mubr.bf16.vlgmr.msra.gmra.mxu1 %v18474_v25  ;;  %v1448_v45 = vld [vmem:[#allocation2 + $0x2888] sm:$0xff] }
 0x318   :  { %v10018_v63 = vadd.f32 %v10017_v55, %v18551_v47  ;;  %10312 = vmatpush1.bf16.msra.mxu0 %v17206_v43  ;;  %10353 = vmatpush1.bf16.msra.mxu1 %v17334_v48  ;;  %v1460_v43 = vld [vmem:[#allocation2 + $0x28e8] sm:$0xff]  ;;  %v17310_v55 = vcombine.low %v1592_v23, %v1596_v29 }
 0x319   :  { %v10019_v0 = vpop.f32.mrf.mxu0  ;;  %10313 = vmatprep.subr.bf16.mxu0 %v17199_v36  ;;  %v10060_v32 = vpop.f32.mrf.mxu1  ;;  %10354 = vmatprep.subr.bf16.mxu1 %v17327_v52  ;;  %v1584_v48 = vld [vmem:[#allocation2 + $0x2cc8] sm:$0xff]  ;;  %v17182_v52 = vcombine.low %v1464_v12, %v1468_v15 }
 0x31a   :  { %v18560_v7 = vadd.f32 %v10058_v19, %v10018_v63  ;;  %v10020_v8 = vadd.f32 %v10019_v0, %v18555_v57  ;;  %10343 = vmatprep.mubr.bf16.mxu0 %v18479_v38  ;;  %10384 = vmatprep.mubr.bf16.mxu1 %v18482_v44  ;;  %v17318_v57 = vcombine.low %v1600_v60, %v1604_v62  ;;  %v1588_v36 = vld [vmem:[#allocation2 + $0x2ce8] sm:$0xff] }
 0x31b   :  { %v10021_v47 = vpop.f32.mrf.mxu0  ;;  %v10062_v22 = vpop.f32.mrf.mxu1  ;;  %v17175_v63 = vcombine.high %v1456_v41, %v1460_v43  ;;  %v17303_v42 = vcombine.high %v1584_v48, %v1588_v36  ;;  %v1452_v19 = vld [vmem:[#allocation2 + $0x28a8] sm:$0xff]  ;;  %v17174_v62 = vcombine.low %v1456_v41, %v1460_v43  ;;  %v17302_v0 = vcombine.low %v1584_v48, %v1588_v36 }
 0x31c   :  { %v18565_v17 = vadd.f32 %v10060_v32, %v10020_v8  ;;  %10314 = vmatpush1.bf16.msra.mxu0 %v17198_v3  ;;  %10355 = vmatpush1.bf16.msra.mxu1 %v17326_v1  ;;  %v1576_v3 = vld [vmem:[#allocation2 + $0x2c88] sm:$0xff]  ;;  %v17167_v1 = vcombine.high %v1448_v45, %v1452_v19  ;;  %v17166_v15 = vcombine.low %v1448_v45, %v1452_v19 }
 0x31d   :  { %v10022_v33 = vpop.f32.mrf.mxu0  ;;  %10315 = vmatprep.subr.bf16.mxu0 %v17191_v5  ;;  %v10063_v27 = vpop.f32.mrf.mxu1  ;;  %10356 = vmatprep.subr.bf16.mxu1 %v17319_v11  ;;  %v1580_v60 = vld [vmem:[#allocation2 + $0x2ca8] sm:$0xff] }
 0x31e   :  { %v17295_v5 = vcombine.high %v1576_v3, %v1580_v60  ;;  %v1440_v8 = vld [vmem:[#allocation2 + $0x2848] sm:$0xff]  ;;  %v17294_v47 = vcombine.low %v1576_v3, %v1580_v60 }
 0x31f   :  { %v1444_v32 = vld [vmem:[#allocation2 + $0x2868] sm:$0xff] }
 0x320   :  { %10316 = vmatpush1.bf16.msra.mxu0 %v17190_v30  ;;  %10357 = vmatpush1.bf16.msra.mxu1 %v17318_v57  ;;  %v1568_v11 = vld [vmem:[#allocation2 + $0x2c48] sm:$0xff]  ;;  %v17159_v23 = vcombine.high %v1440_v8, %v1444_v32 }
 0x321   :  { %10317 = vmatprep.subr.bf16.mxu0 %v17183_v24  ;;  %10358 = vmatprep.subr.bf16.mxu1 %v17311_v35  ;;  %v1572_v12 = vld [vmem:[#allocation2 + $0x2c68] sm:$0xff]  ;;  %v17158_v24 = vcombine.low %v1440_v8, %v1444_v32 }
 0x322   :  { %v17287_v29 = vcombine.high %v1568_v11, %v1572_v12  ;;  %v1432_v22 = vld [vmem:[#allocation2 + $0x2808] sm:$0xff]  ;;  %v17286_v27 = vcombine.low %v1568_v11, %v1572_v12 }
 0x323   :  { %v1436_v30 = vld [vmem:[#allocation2 + $0x2828] sm:$0xff] }
 0x324   :  { %10318 = vmatpush1.bf16.msra.mxu0 %v17182_v52  ;;  %10359 = vmatpush1.bf16.msra.mxu1 %v17310_v55  ;;  %v1560_v33 = vld [vmem:[#allocation2 + $0x2c08] sm:$0xff]  ;;  %v17151_v35 = vcombine.high %v1432_v22, %v1436_v30  ;;  %v17150_v55 = vcombine.low %v1432_v22, %v1436_v30 }
 0x325   :  { %10319 = vmatprep.subr.bf16.mxu0 %v17175_v63  ;;  %10360 = vmatprep.subr.bf16.mxu1 %v17303_v42  ;;  %v1564_v57 = vld [vmem:[#allocation2 + $0x2c28] sm:$0xff] }
 0x326   :  { %v17279_v41 = vcombine.high %v1560_v33, %v1564_v57  ;;  %v1552_v43 = vld [vmem:[#allocation2 + $0x2bc8] sm:$0xff]  ;;  %v17278_v63 = vcombine.low %v1560_v33, %v1564_v57 }
 0x327   :  { %v1556_v48 = vld [vmem:[#allocation2 + $0x2be8] sm:$0xff] }
 0x328   :  { %10320 = vmatpush1.bf16.msra.mxu0 %v17174_v62  ;;  %10361 = vmatpush1.bf16.msra.mxu1 %v17302_v0  ;;  %v1680_v36 = vld [vmem:[#allocation2 + $0x2fc8] sm:$0xff]  ;;  %v17271_v42 = vcombine.high %v1552_v43, %v1556_v48  ;;  %v17270_v0 = vcombine.low %v1552_v43, %v1556_v48 }
 0x329   :  { %10321 = vmatprep.subr.bf16.mxu0 %v17167_v1  ;;  %10362 = vmatprep.subr.bf16.mxu1 %v17295_v5  ;;  %v1684_v52 = vld [vmem:[#allocation2 + $0x2fe8] sm:$0xff] }
 0x32a   :  { %v17399_v45 = vcombine.high %v1680_v36, %v1684_v52  ;;  %v1544_v19 = vld [vmem:[#allocation2 + $0x2b88] sm:$0xff]  ;;  %v17398_v1 = vcombine.low %v1680_v36, %v1684_v52 }
 0x32b   :  { %v1548_v3 = vld [vmem:[#allocation2 + $0x2ba8] sm:$0xff] }
 0x32c   :  { %10322 = vmatpush1.bf16.msra.mxu0 %v17166_v15  ;;  %10363 = vmatpush1.bf16.msra.mxu1 %v17294_v47  ;;  %v1672_v60 = vld [vmem:[#allocation2 + $0x2f88] sm:$0xff]  ;;  %v17263_v5 = vcombine.high %v1544_v19, %v1548_v3  ;;  %v17262_v47 = vcombine.low %v1544_v19, %v1548_v3 }
 0x32d   :  { %10323 = vmatprep.subr.bf16.mxu0 %v17159_v23  ;;  %10364 = vmatprep.subr.bf16.mxu1 %v17287_v29  ;;  %v1676_v62 = vld [vmem:[#allocation2 + $0x2fa8] sm:$0xff] }
 0x32e   :  { %v17391_v8 = vcombine.high %v1672_v60, %v1676_v62  ;;  %v1536_v32 = vld [vmem:[#allocation2 + $0x2b48] sm:$0xff]  ;;  %v17390_v23 = vcombine.low %v1672_v60, %v1676_v62 }
 0x32f   :  { %v1540_v11 = vld [vmem:[#allocation2 + $0x2b68] sm:$0xff] }
 0x330   :  { %10324 = vmatpush1.bf16.msra.mxu0 %v17158_v24  ;;  %10365 = vmatpush1.bf16.msra.mxu1 %v17286_v27  ;;  %v1664_v12 = vld [vmem:[#allocation2 + $0x2f48] sm:$0xff]  ;;  %v17255_v29 = vcombine.high %v1536_v32, %v1540_v11  ;;  %v17254_v27 = vcombine.low %v1536_v32, %v1540_v11 }
 0x331   :  { %10325 = vmatprep.subr.bf16.mxu0 %v17151_v35  ;;  %10366 = vmatprep.subr.bf16.mxu1 %v17279_v41  ;;  %v1668_v15 = vld [vmem:[#allocation2 + $0x2f68] sm:$0xff] }
 0x332   :  { %v17383_v22 = vcombine.high %v1664_v12, %v1668_v15  ;;  %v1528_v30 = vld [vmem:[#allocation2 + $0x2b08] sm:$0xff]  ;;  %v17382_v35 = vcombine.low %v1664_v12, %v1668_v15 }
 0x333   :  { %v1532_v33 = vld [vmem:[#allocation2 + $0x2b28] sm:$0xff] }
 0x334   :  { %10326 = vmatpush1.bf16.msra.mxu0 %v17150_v55  ;;  %10367 = vmatpush1.bf16.msra.mxu1 %v17278_v63  ;;  %v1656_v57 = vld [vmem:[#allocation2 + $0x2f08] sm:$0xff]  ;;  %v17247_v41 = vcombine.high %v1528_v30, %v1532_v33  ;;  %v17246_v63 = vcombine.low %v1528_v30, %v1532_v33 }
 0x335   :  { %10327 = vmatprep.subr.bf16.mxu0 %v17271_v42  ;;  %10368 = vmatprep.subr.bf16.mxu1 %v17399_v45  ;;  %v1660_v24 = vld [vmem:[#allocation2 + $0x2f28] sm:$0xff] }
 0x336   :  { %v17375_v43 = vcombine.high %v1656_v57, %v1660_v24  ;;  %v1520_v48 = vld [vmem:[#allocation2 + $0x2ac8] sm:$0xff]  ;;  %v17374_v42 = vcombine.low %v1656_v57, %v1660_v24 }
 0x337   :  { %v1524_v36 = vld [vmem:[#allocation2 + $0x2ae8] sm:$0xff] }
 0x338   :  { %10328 = vmatpush2.bf16.msra.mxu0 %v17270_v0  ;;  %10369 = vmatpush2.bf16.msra.mxu1 %v17398_v1  ;;  %v1648_v52 = vld [vmem:[#allocation2 + $0x2ec8] sm:$0xff]  ;;  %v17239_v45 = vcombine.high %v1520_v48, %v1524_v36  ;;  %v17238_v1 = vcombine.low %v1520_v48, %v1524_v36  ;;  %v209_v36 = vld [vmem:[#allocation2 + $0x1d0] sm:$0xff] }
 0x339   :  { %10329 = vmatprep.subr.bf16.mxu0 %v17263_v5  ;;  %10370 = vmatprep.subr.bf16.mxu1 %v17391_v8  ;;  %v1652_v55 = vld [vmem:[#allocation2 + $0x2ee8] sm:$0xff] }
 0x33a   :  { %v17367_v19 = vcombine.high %v1648_v52, %v1652_v55  ;;  %v1512_v3 = vld [vmem:[#allocation2 + $0x2a88] sm:$0xff]  ;;  %v17366_v5 = vcombine.low %v1648_v52, %v1652_v55  ;;  %v213_v52 = vld [vmem:[#allocation2 + $0x1f0] sm:$0xff] }
 0x33b   :  { %v1516_v60 = vld [vmem:[#allocation2 + $0x2aa8] sm:$0xff]  ;;  %v337_v55 = vld [vmem:[#allocation2 + $0x5d0] sm:$0xff] }
 0x33c   :  { %10330 = vmatpush2.bf16.msra.mxu0 %v17262_v47  ;;  %10371 = vmatpush2.bf16.msra.mxu1 %v17390_v23  ;;  %v1640_v62 = vld [vmem:[#allocation2 + $0x2e88] sm:$0xff]  ;;  %v17231_v8 = vcombine.high %v1512_v3, %v1516_v60  ;;  %v17230_v23 = vcombine.low %v1512_v3, %v1516_v60  ;;  %v201_v60 = vld [vmem:[#allocation2 + $0x190] sm:$0xff] }
 0x33d   :  { %10331 = vmatprep.subr.bf16.mxu0 %v17255_v29  ;;  %10372 = vmatprep.subr.bf16.mxu1 %v17383_v22  ;;  %v1644_v0 = vld [vmem:[#allocation2 + $0x2ea8] sm:$0xff] }
 0x33e   :  { %v17359_v32 = vcombine.high %v1640_v62, %v1644_v0  ;;  %v1504_v11 = vld [vmem:[#allocation2 + $0x2a48] sm:$0xff]  ;;  %v17358_v29 = vcombine.low %v1640_v62, %v1644_v0  ;;  %v205_v62 = vld [vmem:[#allocation2 + $0x1b0] sm:$0xff] }
 0x33f   :  { %v1508_v12 = vld [vmem:[#allocation2 + $0x2a68] sm:$0xff]  ;;  %v329_v0 = vld [vmem:[#allocation2 + $0x590] sm:$0xff] }
 0x340   :  { %10332 = vmatpush2.bf16.msra.mxu0 %v17254_v27  ;;  %10373 = vmatpush2.bf16.msra.mxu1 %v17382_v35  ;;  %v1632_v15 = vld [vmem:[#allocation2 + $0x2e48] sm:$0xff]  ;;  %v17223_v22 = vcombine.high %v1504_v11, %v1508_v12  ;;  %v17222_v35 = vcombine.low %v1504_v11, %v1508_v12  ;;  %v193_v12 = vld [vmem:[#allocation2 + $0x150] sm:$0xff] }
 0x341   :  { %10333 = vmatprep.subr.bf16.mxu0 %v17247_v41  ;;  %10374 = vmatprep.subr.bf16.mxu1 %v17375_v43  ;;  %v1636_v47 = vld [vmem:[#allocation2 + $0x2e68] sm:$0xff] }
 0x342   :  { %v17351_v30 = vcombine.high %v1632_v15, %v1636_v47  ;;  %v1496_v33 = vld [vmem:[#allocation2 + $0x2a08] sm:$0xff]  ;;  %v17350_v41 = vcombine.low %v1632_v15, %v1636_v47  ;;  %v197_v15 = vld [vmem:[#allocation2 + $0x170] sm:$0xff] }
 0x343   :  { %v1500_v57 = vld [vmem:[#allocation2 + $0x2a28] sm:$0xff] }
 0x344   :  { %10334 = vmatpush2.bf16.msra.mxu0 %v17246_v63  ;;  %10375 = vmatpush2.bf16.msra.mxu1 %v17374_v42  ;;  %v1624_v24 = vld [vmem:[#allocation2 + $0x2e08] sm:$0xff]  ;;  %v17215_v43 = vcombine.high %v1496_v33, %v1500_v57  ;;  %v341_v63 = vld [vmem:[#allocation2 + $0x5f0] sm:$0xff]  ;;  %v17214_v42 = vcombine.low %v1496_v33, %v1500_v57  ;;  %v15920_v33 = vcombine.low %v201_v60, %v205_v62 }
 0x345   :  { %10335 = vmatprep.subr.bf16.mxu0 %v17239_v45  ;;  %10376 = vmatprep.subr.bf16.mxu1 %v17367_v19  ;;  %v1628_v27 = vld [vmem:[#allocation2 + $0x2e28] sm:$0xff]  ;;  %v15929_v19 = vcombine.high %v209_v36, %v213_v52  ;;  %v16057_v3 = vcombine.high %v337_v55, %v341_v63 }
 0x346   :  { %v17343_v48 = vcombine.high %v1624_v24, %v1628_v27  ;;  %v17342_v45 = vcombine.low %v1624_v24, %v1628_v27  ;;  %v15913_v27 = vcombine.high %v193_v12, %v197_v15 }
 0x348   :  { %10336 = vmatpush2.bf16.msra.mxu0 %v17238_v1  ;;  %10377 = vmatpush2.bf16.msra.mxu1 %v17366_v5  ;;  %v333_v1 = vld [vmem:[#allocation2 + $0x5b0] sm:$0xff]  ;;  %v15928_v5 = vcombine.low %v209_v36, %v213_v52 }
 0x349   :  { %10337 = vmatprep.subr.bf16.mxu0 %v17231_v8  ;;  %10378 = vmatprep.subr.bf16.mxu1 %v17359_v32  ;;  %v16056_v8 = vcombine.low %v337_v55, %v341_v63  ;;  %v15921_v32 = vcombine.high %v201_v60, %v205_v62  ;;  %v16049_v11 = vcombine.high %v329_v0, %v333_v1  ;;  %v185_v36 = vld [vmem:[#allocation2 + $0x110] sm:$0xff] }
 0x34a   :  { %v16048_v24 = vcombine.low %v329_v0, %v333_v1  ;;  %v189_v52 = vld [vmem:[#allocation2 + $0x130] sm:$0xff] }
 0x34b   :  { %v313_v55 = vld [vmem:[#allocation2 + $0x510] sm:$0xff]  ;;  %v15905_v60 = vcombine.high %v185_v36, %v189_v52 }
 0x34c   :  { %10338 = vmatpush2.bf16.msra.mxu0 %v17230_v23  ;;  %10379 = vmatpush2.bf16.msra.mxu1 %v17358_v29  ;;  %v321_v23 = vld [vmem:[#allocation2 + $0x550] sm:$0xff] }
 0x34d   :  { %10339 = vmatprep.subr.bf16.mxu0 %v17223_v22  ;;  %10380 = vmatprep.subr.bf16.mxu1 %v17351_v30  ;;  %v325_v29 = vld [vmem:[#allocation2 + $0x570] sm:$0xff] }
 0x34e   :  { %v317_v63 = vld [vmem:[#allocation2 + $0x530] sm:$0xff] }
 0x34f   :  { %v16033_v0 = vcombine.high %v313_v55, %v317_v63  ;;  %v177_v1 = vld [vmem:[#allocation2 + $0xd0] sm:$0xff] }
 0x350   :  { %10340 = vmatpush2.bf16.msra.mxu0 %v17222_v35  ;;  %10381 = vmatpush2.bf16.msra.mxu1 %v17350_v41 }
 0x351   :  { %10341 = vmatprep.subr.bf16.mxu0 %v17215_v43  ;;  %10382 = vmatprep.subr.bf16.mxu1 %v17343_v48  ;;  %v16041_v48 = vcombine.high %v321_v23, %v325_v29 }
 0x354   :  { %10342 = vmatpush2.bf16.msra.mxu0 %v17214_v42  ;;  %10383 = vmatpush2.bf16.msra.mxu1 %v17342_v45 }
 0x355   :  { %10393 = vmatprep.subr.bf16.mxu0 %v15929_v19  ;;  %10434 = vmatprep.subr.bf16.mxu1 %v16057_v3  ;;  %v15912_v19 = vcombine.low %v193_v12, %v197_v15  ;;  %v169_v15 = vld [vmem:[#allocation2 + $0x90] sm:$0xff] }
 0x357   :  { %v10099_v47 = vpop.f32.mrf.mxu0  ;;  %10344 = vmatmul.mubr.bf16.vlgmr.msra.gmra.mxu0 %v18499_v10  ;;  %v10140_v30 = vpop.f32.mrf.mxu1  ;;  %10385 = vmatmul.mubr.bf16.vlgmr.msra.gmra.mxu1 %v18501_v13 }
 0x358   :  { %v10100_v22 = vadd.f32 %v10099_v47, %v18560_v7  ;;  %10394 = vmatpush1.bf16.msra.mxu0 %v15928_v5  ;;  %10435 = vmatpush1.bf16.msra.mxu1 %v16056_v8  ;;  %v181_v5 = vld [vmem:[#allocation2 + $0xf0] sm:$0xff]  ;;  %v16032_v47 = vcombine.low %v313_v55, %v317_v63 }
 0x359   :  { %v10101_v57 = vpop.f32.mrf.mxu0  ;;  %10395 = vmatprep.subr.bf16.mxu0 %v15921_v32  ;;  %v10142_v43 = vpop.f32.mrf.mxu1  ;;  %10436 = vmatprep.subr.bf16.mxu1 %v16049_v11  ;;  %v305_v8 = vld [vmem:[#allocation2 + $0x4d0] sm:$0xff]  ;;  %v15904_v11 = vcombine.low %v185_v36, %v189_v52 }
 0x35a   :  { %v18570_v35 = vadd.f32 %v10140_v30, %v10100_v22  ;;  %v10102_v41 = vadd.f32 %v10101_v57, %v18565_v17  ;;  %10425 = vmatprep.mubr.bf16.mxu0 %v18349_v58  ;;  %10466 = vmatprep.mubr.bf16.mxu1 %v18351_v59  ;;  %v16040_v17 = vcombine.low %v321_v23, %v325_v29  ;;  %v309_v32 = vld [vmem:[#allocation2 + $0x4f0] sm:$0xff] }
 0x35b   :  { %v10103_v7 = vpop.f32.mrf.mxu0  ;;  %v10144_v45 = vpop.f32.mrf.mxu1  ;;  %v15897_v22 = vcombine.high %v177_v1, %v181_v5  ;;  %v16025_v12 = vcombine.high %v305_v8, %v309_v32  ;;  %v173_v30 = vld [vmem:[#allocation2 + $0xb0] sm:$0xff]  ;;  %v15896_v29 = vcombine.low %v177_v1, %v181_v5  ;;  %v16024_v57 = vcombine.low %v305_v8, %v309_v32 }
 0x35c   :  { %v18575_v42 = vadd.f32 %v10142_v43, %v10102_v41  ;;  %10396 = vmatpush1.bf16.msra.mxu0 %v15920_v33  ;;  %10437 = vmatpush1.bf16.msra.mxu1 %v16048_v24  ;;  %v297_v33 = vld [vmem:[#allocation2 + $0x490] sm:$0xff]  ;;  %v15889_v24 = vcombine.high %v169_v15, %v173_v30  ;;  %v15888_v52 = vcombine.low %v169_v15, %v173_v30 }
 0x35d   :  { %v10104_v3 = vpop.f32.mrf.mxu0  ;;  %10397 = vmatprep.subr.bf16.mxu0 %v15913_v27  ;;  %v10145_v62 = vpop.f32.mrf.mxu1  ;;  %10438 = vmatprep.subr.bf16.mxu1 %v16041_v48  ;;  %v301_v23 = vld [vmem:[#allocation2 + $0x4b0] sm:$0xff] }
 0x35e   :  { %v16017_v27 = vcombine.high %v297_v33, %v301_v23  ;;  %v161_v41 = vld [vmem:[#allocation2 + $0x50] sm:$0xff]  ;;  %v16016_v7 = vcombine.low %v297_v33, %v301_v23 }
 0x35f   :  { %v165_v43 = vld [vmem:[#allocation2 + $0x70] sm:$0xff] }
 0x360   :  { %10398 = vmatpush1.bf16.msra.mxu0 %v15912_v19  ;;  %10439 = vmatpush1.bf16.msra.mxu1 %v16040_v17  ;;  %v289_v48 = vld [vmem:[#allocation2 + $0x450] sm:$0xff]  ;;  %v15881_v55 = vcombine.high %v161_v41, %v165_v43 }
 0x361   :  { %10399 = vmatprep.subr.bf16.mxu0 %v15905_v60  ;;  %10440 = vmatprep.subr.bf16.mxu1 %v16033_v0  ;;  %v293_v36 = vld [vmem:[#allocation2 + $0x470] sm:$0xff]  ;;  %v15880_v60 = vcombine.low %v161_v41, %v165_v43 }
 0x362   :  { %v16009_v63 = vcombine.high %v289_v48, %v293_v36  ;;  %v153_v45 = vld [vmem:[#allocation2 + $0x10] sm:$0xff]  ;;  %v16008_v62 = vcombine.low %v289_v48, %v293_v36 }
 0x363   :  { %v157_v19 = vld [vmem:[#allocation2 + $0x30] sm:$0xff] }
 0x364   :  { %10400 = vmatpush1.bf16.msra.mxu0 %v15904_v11  ;;  %10441 = vmatpush1.bf16.msra.mxu1 %v16032_v47  ;;  %v281_v3 = vld [vmem:[#allocation2 + $0x410] sm:$0xff]  ;;  %v15873_v0 = vcombine.high %v153_v45, %v157_v19  ;;  %v15872_v47 = vcombine.low %v153_v45, %v157_v19 }
 0x365   :  { %10401 = vmatprep.subr.bf16.mxu0 %v15897_v22  ;;  %10442 = vmatprep.subr.bf16.mxu1 %v16025_v12  ;;  %v285_v17 = vld [vmem:[#allocation2 + $0x430] sm:$0xff] }
 0x366   :  { %v16001_v1 = vcombine.high %v281_v3, %v285_v17  ;;  %v273_v5 = vld [vmem:[#allocation2 + $0x3d0] sm:$0xff]  ;;  %v16000_v22 = vcombine.low %v281_v3, %v285_v17 }
 0x367   :  { %v277_v8 = vld [vmem:[#allocation2 + $0x3f0] sm:$0xff] }
 0x368   :  { %10402 = vmatpush1.bf16.msra.mxu0 %v15896_v29  ;;  %10443 = vmatpush1.bf16.msra.mxu1 %v16024_v57  ;;  %v401_v32 = vld [vmem:[#allocation2 + $0x7d0] sm:$0xff]  ;;  %v15993_v12 = vcombine.high %v273_v5, %v277_v8  ;;  %v15992_v57 = vcombine.low %v273_v5, %v277_v8 }
 0x369   :  { %10403 = vmatprep.subr.bf16.mxu0 %v15889_v24  ;;  %10444 = vmatprep.subr.bf16.mxu1 %v16017_v27  ;;  %v405_v11 = vld [vmem:[#allocation2 + $0x7f0] sm:$0xff] }
 0x36a   :  { %v16121_v15 = vcombine.high %v401_v32, %v405_v11  ;;  %v265_v30 = vld [vmem:[#allocation2 + $0x390] sm:$0xff]  ;;  %v16120_v24 = vcombine.low %v401_v32, %v405_v11 }
 0x36b   :  { %v269_v33 = vld [vmem:[#allocation2 + $0x3b0] sm:$0xff] }
 0x36c   :  { %10404 = vmatpush1.bf16.msra.mxu0 %v15888_v52  ;;  %10445 = vmatpush1.bf16.msra.mxu1 %v16016_v7  ;;  %v393_v23 = vld [vmem:[#allocation2 + $0x790] sm:$0xff]  ;;  %v15985_v27 = vcombine.high %v265_v30, %v269_v33  ;;  %v15984_v7 = vcombine.low %v265_v30, %v269_v33 }
 0x36d   :  { %10405 = vmatprep.subr.bf16.mxu0 %v15881_v55  ;;  %10446 = vmatprep.subr.bf16.mxu1 %v16009_v63  ;;  %v397_v29 = vld [vmem:[#allocation2 + $0x7b0] sm:$0xff] }
 0x36e   :  { %v16113_v41 = vcombine.high %v393_v23, %v397_v29  ;;  %v257_v43 = vld [vmem:[#allocation2 + $0x350] sm:$0xff]  ;;  %v16112_v55 = vcombine.low %v393_v23, %v397_v29 }
 0x36f   :  { %v261_v48 = vld [vmem:[#allocation2 + $0x370] sm:$0xff] }
 0x370   :  { %10406 = vmatpush1.bf16.msra.mxu0 %v15880_v60  ;;  %10447 = vmatpush1.bf16.msra.mxu1 %v16008_v62  ;;  %v385_v36 = vld [vmem:[#allocation2 + $0x750] sm:$0xff]  ;;  %v15977_v63 = vcombine.high %v257_v43, %v261_v48  ;;  %v15976_v62 = vcombine.low %v257_v43, %v261_v48 }
 0x371   :  { %10407 = vmatprep.subr.bf16.mxu0 %v15873_v0  ;;  %10448 = vmatprep.subr.bf16.mxu1 %v16001_v1  ;;  %v389_v52 = vld [vmem:[#allocation2 + $0x770] sm:$0xff] }
 0x372   :  { %v16105_v45 = vcombine.high %v385_v36, %v389_v52  ;;  %v249_v19 = vld [vmem:[#allocation2 + $0x310] sm:$0xff]  ;;  %v16104_v0 = vcombine.low %v385_v36, %v389_v52 }
 0x373   :  { %v253_v3 = vld [vmem:[#allocation2 + $0x330] sm:$0xff] }
 0x374   :  { %10408 = vmatpush1.bf16.msra.mxu0 %v15872_v47  ;;  %10449 = vmatpush1.bf16.msra.mxu1 %v16000_v22  ;;  %v377_v17 = vld [vmem:[#allocation2 + $0x710] sm:$0xff]  ;;  %v15969_v1 = vcombine.high %v249_v19, %v253_v3  ;;  %v15968_v22 = vcombine.low %v249_v19, %v253_v3 }
 0x375   :  { %10409 = vmatprep.subr.bf16.mxu0 %v15993_v12  ;;  %10450 = vmatprep.subr.bf16.mxu1 %v16121_v15  ;;  %v381_v60 = vld [vmem:[#allocation2 + $0x730] sm:$0xff] }
 0x376   :  { %v16097_v5 = vcombine.high %v377_v17, %v381_v60  ;;  %v241_v8 = vld [vmem:[#allocation2 + $0x2d0] sm:$0xff]  ;;  %v16096_v12 = vcombine.low %v377_v17, %v381_v60 }
 0x377   :  { %v245_v32 = vld [vmem:[#allocation2 + $0x2f0] sm:$0xff] }
 0x378   :  { %10410 = vmatpush2.bf16.msra.mxu0 %v15992_v57  ;;  %10451 = vmatpush2.bf16.msra.mxu1 %v16120_v24  ;;  %v369_v11 = vld [vmem:[#allocation2 + $0x6d0] sm:$0xff]  ;;  %v15961_v15 = vcombine.high %v241_v8, %v245_v32  ;;  %v15960_v24 = vcombine.low %v241_v8, %v245_v32 }
 0x379   :  { %10411 = vmatprep.subr.bf16.mxu0 %v15985_v27  ;;  %10452 = vmatprep.subr.bf16.mxu1 %v16113_v41  ;;  %v373_v47 = vld [vmem:[#allocation2 + $0x6f0] sm:$0xff] }
 0x37a   :  { %v16089_v30 = vcombine.high %v369_v11, %v373_v47  ;;  %v233_v33 = vld [vmem:[#allocation2 + $0x290] sm:$0xff]  ;;  %v16088_v27 = vcombine.low %v369_v11, %v373_v47 }
 0x37b   :  { %v237_v23 = vld [vmem:[#allocation2 + $0x2b0] sm:$0xff] }
 0x37c   :  { %10412 = vmatpush2.bf16.msra.mxu0 %v15984_v7  ;;  %10453 = vmatpush2.bf16.msra.mxu1 %v16112_v55  ;;  %v361_v29 = vld [vmem:[#allocation2 + $0x690] sm:$0xff]  ;;  %v15953_v41 = vcombine.high %v233_v33, %v237_v23  ;;  %v15952_v55 = vcombine.low %v233_v33, %v237_v23 }
 0x37d   :  { %10413 = vmatprep.subr.bf16.mxu0 %v15977_v63  ;;  %10454 = vmatprep.subr.bf16.mxu1 %v16105_v45  ;;  %v365_v57 = vld [vmem:[#allocation2 + $0x6b0] sm:$0xff] }
 0x37e   :  { %v16081_v43 = vcombine.high %v361_v29, %v365_v57  ;;  %v225_v48 = vld [vmem:[#allocation2 + $0x250] sm:$0xff]  ;;  %v16080_v63 = vcombine.low %v361_v29, %v365_v57 }
 0x37f   :  { %v229_v36 = vld [vmem:[#allocation2 + $0x270] sm:$0xff] }
 0x380   :  { %10414 = vmatpush2.bf16.msra.mxu0 %v15976_v62  ;;  %10455 = vmatpush2.bf16.msra.mxu1 %v16104_v0  ;;  %v353_v52 = vld [vmem:[#allocation2 + $0x650] sm:$0xff]  ;;  %v15945_v45 = vcombine.high %v225_v48, %v229_v36  ;;  %v15944_v0 = vcombine.low %v225_v48, %v229_v36 }
 0x381   :  { %10415 = vmatprep.subr.bf16.mxu0 %v15969_v1  ;;  %10456 = vmatprep.subr.bf16.mxu1 %v16097_v5  ;;  %v357_v7 = vld [vmem:[#allocation2 + $0x670] sm:$0xff] }
 0x382   :  { %v16073_v19 = vcombine.high %v353_v52, %v357_v7  ;;  %v217_v3 = vld [vmem:[#allocation2 + $0x210] sm:$0xff]  ;;  %v16072_v1 = vcombine.low %v353_v52, %v357_v7 }
 0x383   :  { %v221_v17 = vld [vmem:[#allocation2 + $0x230] sm:$0xff] }
 0x384   :  { %10416 = vmatpush2.bf16.msra.mxu0 %v15968_v22  ;;  %10457 = vmatpush2.bf16.msra.mxu1 %v16096_v12  ;;  %v345_v60 = vld [vmem:[#allocation2 + $0x610] sm:$0xff]  ;;  %v15937_v5 = vcombine.high %v217_v3, %v221_v17  ;;  %v15936_v12 = vcombine.low %v217_v3, %v221_v17 }
 0x385   :  { %10417 = vmatprep.subr.bf16.mxu0 %v15961_v15  ;;  %10458 = vmatprep.subr.bf16.mxu1 %v16089_v30  ;;  %v349_v62 = vld [vmem:[#allocation2 + $0x630] sm:$0xff] }
 0x386   :  { %v16065_v8 = vcombine.high %v345_v60, %v349_v62  ;;  %v465_v32 = vld [vmem:[#allocation2 + $0x9d0] sm:$0xff]  ;;  %v16064_v15 = vcombine.low %v345_v60, %v349_v62 }
 0x387   :  { %v469_v11 = vld [vmem:[#allocation2 + $0x9f0] sm:$0xff] }
 0x388   :  { %10418 = vmatpush2.bf16.msra.mxu0 %v15960_v24  ;;  %10459 = vmatpush2.bf16.msra.mxu1 %v16088_v27  ;;  %v593_v47 = vld [vmem:[#allocation2 + $0xdd0] sm:$0xff]  ;;  %v16185_v30 = vcombine.high %v465_v32, %v469_v11  ;;  %v16184_v27 = vcombine.low %v465_v32, %v469_v11 }
 0x389   :  { %10419 = vmatprep.subr.bf16.mxu0 %v15953_v41  ;;  %10460 = vmatprep.subr.bf16.mxu1 %v16081_v43  ;;  %v597_v22 = vld [vmem:[#allocation2 + $0xdf0] sm:$0xff] }
 0x38a   :  { %v16313_v33 = vcombine.high %v593_v47, %v597_v22  ;;  %v457_v23 = vld [vmem:[#allocation2 + $0x990] sm:$0xff]  ;;  %v16312_v41 = vcombine.low %v593_v47, %v597_v22 }
 0x38b   :  { %v461_v29 = vld [vmem:[#allocation2 + $0x9b0] sm:$0xff] }
 0x38c   :  { %10420 = vmatpush2.bf16.msra.mxu0 %v15952_v55  ;;  %10461 = vmatpush2.bf16.msra.mxu1 %v16080_v63  ;;  %v585_v57 = vld [vmem:[#allocation2 + $0xd90] sm:$0xff]  ;;  %v16177_v43 = vcombine.high %v457_v23, %v461_v29  ;;  %v16176_v3 = vcombine.low %v457_v23, %v461_v29 }
 0x38d   :  { %10421 = vmatprep.subr.bf16.mxu0 %v15945_v45  ;;  %10462 = vmatprep.subr.bf16.mxu1 %v16073_v19  ;;  %v589_v24 = vld [vmem:[#allocation2 + $0xdb0] sm:$0xff] }
 0x38e   :  { %v16305_v48 = vcombine.high %v585_v57, %v589_v24  ;;  %v449_v36 = vld [vmem:[#allocation2 + $0x950] sm:$0xff]  ;;  %v16304_v60 = vcombine.low %v585_v57, %v589_v24 }
 0x38f   :  { %v453_v52 = vld [vmem:[#allocation2 + $0x970] sm:$0xff] }
 0x390   :  { %10422 = vmatpush2.bf16.msra.mxu0 %v15944_v0  ;;  %10463 = vmatpush2.bf16.msra.mxu1 %v16072_v1  ;;  %v577_v55 = vld [vmem:[#allocation2 + $0xd50] sm:$0xff]  ;;  %v16169_v62 = vcombine.high %v449_v36, %v453_v52 }
 0x391   :  { %10423 = vmatprep.subr.bf16.mxu0 %v15937_v5  ;;  %10464 = vmatprep.subr.bf16.mxu1 %v16065_v8  ;;  %v581_v63 = vld [vmem:[#allocation2 + $0xd70] sm:$0xff] }
 0x392   :  { %v16297_v8 = vcombine.high %v577_v55, %v581_v63  ;;  %v441_v32 = vld [vmem:[#allocation2 + $0x910] sm:$0xff] }
 0x393   :  { %v445_v11 = vld [vmem:[#allocation2 + $0x930] sm:$0xff] }
 0x394   :  { %10424 = vmatpush2.bf16.msra.mxu0 %v15936_v12  ;;  %10465 = vmatpush2.bf16.msra.mxu1 %v16064_v15  ;;  %v569_v47 = vld [vmem:[#allocation2 + $0xd10] sm:$0xff]  ;;  %v16161_v23 = vcombine.high %v441_v32, %v445_v11 }
 0x395   :  { %10475 = vmatprep.subr.bf16.mxu0 %v16185_v30  ;;  %10516 = vmatprep.subr.bf16.mxu1 %v16313_v33  ;;  %v573_v22 = vld [vmem:[#allocation2 + $0xd30] sm:$0xff]  ;;  %v16168_v30 = vcombine.low %v449_v36, %v453_v52 }
 0x396   :  { %v16289_v57 = vcombine.high %v569_v47, %v573_v22  ;;  %v433_v24 = vld [vmem:[#allocation2 + $0x8d0] sm:$0xff] }
 0x397   :  { %v10181_v7 = vpop.f32.mrf.mxu0  ;;  %10426 = vmatmul.mubr.bf16.vlgmr.msra.gmra.mxu0 %v18361_v16  ;;  %v10222_v19 = vpop.f32.mrf.mxu1  ;;  %10467 = vmatmul.mubr.bf16.vlgmr.msra.gmra.mxu1 %v18366_v20  ;;  %v425_v52 = vld [vmem:[#allocation2 + $0x890] sm:$0xff] }
 0x398   :  { %v10182_v45 = vadd.f32 %v10181_v7, %v18570_v35  ;;  %10476 = vmatpush1.bf16.msra.mxu0 %v16184_v27  ;;  %10517 = vmatpush1.bf16.msra.mxu1 %v16312_v41  ;;  %v437_v27 = vld [vmem:[#allocation2 + $0x8f0] sm:$0xff]  ;;  %v16288_v7 = vcombine.low %v569_v47, %v573_v22 }
 0x399   :  { %v10183_v17 = vpop.f32.mrf.mxu0  ;;  %10477 = vmatprep.subr.bf16.mxu0 %v16177_v43  ;;  %v10224_v5 = vpop.f32.mrf.mxu1  ;;  %10518 = vmatprep.subr.bf16.mxu1 %v16305_v48  ;;  %v561_v41 = vld [vmem:[#allocation2 + $0xcd0] sm:$0xff]  ;;  %v16160_v48 = vcombine.low %v441_v32, %v445_v11 }
 0x39a   :  { %v18580_v0 = vadd.f32 %v10222_v19, %v10182_v45  ;;  %v10184_v1 = vadd.f32 %v10183_v17, %v18575_v42  ;;  %10507 = vmatprep.mubr.bf16.mxu0 %v18371_v28  ;;  %10548 = vmatprep.mubr.bf16.mxu1 %v18374_v31  ;;  %v16296_v42 = vcombine.low %v577_v55, %v581_v63  ;;  %v565_v43 = vld [vmem:[#allocation2 + $0xcf0] sm:$0xff] }
 0x39b   :  { %v10185_v35 = vpop.f32.mrf.mxu0  ;;  %v10226_v15 = vpop.f32.mrf.mxu1  ;;  %v16153_v45 = vcombine.high %v433_v24, %v437_v27  ;;  %v16281_v36 = vcombine.high %v561_v41, %v565_v43  ;;  %v429_v19 = vld [vmem:[#allocation2 + $0x8b0] sm:$0xff]  ;;  %v16152_v63 = vcombine.low %v433_v24, %v437_v27  ;;  %v16280_v17 = vcombine.low %v561_v41, %v565_v43 }
 0x39c   :  { %v18585_v12 = vadd.f32 %v10224_v5, %v10184_v1  ;;  %10478 = vmatpush1.bf16.msra.mxu0 %v16176_v3  ;;  %10519 = vmatpush1.bf16.msra.mxu1 %v16304_v60  ;;  %v553_v3 = vld [vmem:[#allocation2 + $0xc90] sm:$0xff]  ;;  %v16145_v60 = vcombine.high %v425_v52, %v429_v19  ;;  %v16144_v11 = vcombine.low %v425_v52, %v429_v19 }
 0x39d   :  { %v10186_v33 = vpop.f32.mrf.mxu0  ;;  %10479 = vmatprep.subr.bf16.mxu0 %v16169_v62  ;;  %v10227_v29 = vpop.f32.mrf.mxu1  ;;  %10520 = vmatprep.subr.bf16.mxu1 %v16297_v8  ;;  %v557_v55 = vld [vmem:[#allocation2 + $0xcb0] sm:$0xff] }
 0x39e   :  { %v16273_v62 = vcombine.high %v553_v3, %v557_v55  ;;  %v417_v1 = vld [vmem:[#allocation2 + $0x850] sm:$0xff]  ;;  %v16272_v35 = vcombine.low %v553_v3, %v557_v55 }
 0x39f   :  { %v421_v5 = vld [vmem:[#allocation2 + $0x870] sm:$0xff] }
 0x3a0   :  { %10480 = vmatpush1.bf16.msra.mxu0 %v16168_v30  ;;  %10521 = vmatpush1.bf16.msra.mxu1 %v16296_v42  ;;  %v545_v8 = vld [vmem:[#allocation2 + $0xc50] sm:$0xff]  ;;  %v16137_v47 = vcombine.high %v417_v1, %v421_v5 }
 0x3a1   :  { %10481 = vmatprep.subr.bf16.mxu0 %v16161_v23  ;;  %10522 = vmatprep.subr.bf16.mxu1 %v16289_v57  ;;  %v549_v32 = vld [vmem:[#allocation2 + $0xc70] sm:$0xff]  ;;  %v16136_v23 = vcombine.low %v417_v1, %v421_v5 }
 0x3a2   :  { %v16265_v22 = vcombine.high %v545_v8, %v549_v32  ;;  %v409_v15 = vld [vmem:[#allocation2 + $0x810] sm:$0xff]  ;;  %v16264_v29 = vcombine.low %v545_v8, %v549_v32 }
 0x3a3   :  { %v413_v30 = vld [vmem:[#allocation2 + $0x830] sm:$0xff] }
 0x3a4   :  { %10482 = vmatpush1.bf16.msra.mxu0 %v16160_v48  ;;  %10523 = vmatpush1.bf16.msra.mxu1 %v16288_v7  ;;  %v537_v33 = vld [vmem:[#allocation2 + $0xc10] sm:$0xff]  ;;  %v16129_v57 = vcombine.high %v409_v15, %v413_v30  ;;  %v16128_v7 = vcombine.low %v409_v15, %v413_v30 }
 0x3a5   :  { %10483 = vmatprep.subr.bf16.mxu0 %v16153_v45  ;;  %10524 = vmatprep.subr.bf16.mxu1 %v16281_v36  ;;  %v541_v42 = vld [vmem:[#allocation2 + $0xc30] sm:$0xff] }
 0x3a6   :  { %v16257_v24 = vcombine.high %v537_v33, %v541_v42  ;;  %v529_v27 = vld [vmem:[#allocation2 + $0xbd0] sm:$0xff]  ;;  %v16256_v45 = vcombine.low %v537_v33, %v541_v42 }
 0x3a7   :  { %v533_v41 = vld [vmem:[#allocation2 + $0xbf0] sm:$0xff] }
 0x3a8   :  { %10484 = vmatpush1.bf16.msra.mxu0 %v16152_v63  ;;  %10525 = vmatpush1.bf16.msra.mxu1 %v16280_v17  ;;  %v657_v43 = vld [vmem:[#allocation2 + $0xfd0] sm:$0xff]  ;;  %v16249_v36 = vcombine.high %v529_v27, %v533_v41  ;;  %v16248_v17 = vcombine.low %v529_v27, %v533_v41 }
 0x3a9   :  { %10485 = vmatprep.subr.bf16.mxu0 %v16145_v60  ;;  %10526 = vmatprep.subr.bf16.mxu1 %v16273_v62  ;;  %v661_v48 = vld [vmem:[#allocation2 + $0xff0] sm:$0xff] }
 0x3aa   :  { %v16377_v52 = vcombine.high %v657_v43, %v661_v48  ;;  %v521_v19 = vld [vmem:[#allocation2 + $0xb90] sm:$0xff]  ;;  %v16376_v60 = vcombine.low %v657_v43, %v661_v48 }
 0x3ab   :  { %v525_v3 = vld [vmem:[#allocation2 + $0xbb0] sm:$0xff] }
 0x3ac   :  { %10486 = vmatpush1.bf16.msra.mxu0 %v16144_v11  ;;  %10527 = vmatpush1.bf16.msra.mxu1 %v16272_v35  ;;  %v649_v55 = vld [vmem:[#allocation2 + $0xf90] sm:$0xff]  ;;  %v16241_v62 = vcombine.high %v521_v19, %v525_v3  ;;  %v16240_v35 = vcombine.low %v521_v19, %v525_v3 }
 0x3ad   :  { %10487 = vmatprep.subr.bf16.mxu0 %v16137_v47  ;;  %10528 = vmatprep.subr.bf16.mxu1 %v16265_v22  ;;  %v653_v63 = vld [vmem:[#allocation2 + $0xfb0] sm:$0xff] }
 0x3ae   :  { %v16369_v1 = vcombine.high %v649_v55, %v653_v63  ;;  %v513_v5 = vld [vmem:[#allocation2 + $0xb50] sm:$0xff]  ;;  %v16368_v47 = vcombine.low %v649_v55, %v653_v63 }
 0x3af   :  { %v517_v8 = vld [vmem:[#allocation2 + $0xb70] sm:$0xff] }
 0x3b0   :  { %10488 = vmatpush1.bf16.msra.mxu0 %v16136_v23  ;;  %10529 = vmatpush1.bf16.msra.mxu1 %v16264_v29  ;;  %v641_v32 = vld [vmem:[#allocation2 + $0xf50] sm:$0xff]  ;;  %v16233_v22 = vcombine.high %v513_v5, %v517_v8  ;;  %v16232_v29 = vcombine.low %v513_v5, %v517_v8 }
 0x3b1   :  { %10489 = vmatprep.subr.bf16.mxu0 %v16129_v57  ;;  %10530 = vmatprep.subr.bf16.mxu1 %v16257_v24  ;;  %v645_v11 = vld [vmem:[#allocation2 + $0xf70] sm:$0xff] }
 0x3b2   :  { %v16361_v15 = vcombine.high %v641_v32, %v645_v11  ;;  %v505_v30 = vld [vmem:[#allocation2 + $0xb10] sm:$0xff]  ;;  %v16360_v57 = vcombine.low %v641_v32, %v645_v11 }
 0x3b3   :  { %v509_v33 = vld [vmem:[#allocation2 + $0xb30] sm:$0xff] }
 0x3b4   :  { %10490 = vmatpush1.bf16.msra.mxu0 %v16128_v7  ;;  %10531 = vmatpush1.bf16.msra.mxu1 %v16256_v45  ;;  %v633_v42 = vld [vmem:[#allocation2 + $0xf10] sm:$0xff]  ;;  %v16225_v24 = vcombine.high %v505_v30, %v509_v33  ;;  %v16224_v45 = vcombine.low %v505_v30, %v509_v33 }
 0x3b5   :  { %10491 = vmatprep.subr.bf16.mxu0 %v16249_v36  ;;  %10532 = vmatprep.subr.bf16.mxu1 %v16377_v52  ;;  %v637_v23 = vld [vmem:[#allocation2 + $0xf30] sm:$0xff] }
 0x3b6   :  { %v16353_v27 = vcombine.high %v633_v42, %v637_v23  ;;  %v497_v41 = vld [vmem:[#allocation2 + $0xad0] sm:$0xff]  ;;  %v16352_v36 = vcombine.low %v633_v42, %v637_v23 }
 0x3b7   :  { %v501_v43 = vld [vmem:[#allocation2 + $0xaf0] sm:$0xff] }
 0x3b8   :  { %10492 = vmatpush2.bf16.msra.mxu0 %v16248_v17  ;;  %10533 = vmatpush2.bf16.msra.mxu1 %v16376_v60  ;;  %v625_v48 = vld [vmem:[#allocation2 + $0xed0] sm:$0xff]  ;;  %v16217_v52 = vcombine.high %v497_v41, %v501_v43  ;;  %v16216_v60 = vcombine.low %v497_v41, %v501_v43 }
 0x3b9   :  { %10493 = vmatprep.subr.bf16.mxu0 %v16241_v62  ;;  %10534 = vmatprep.subr.bf16.mxu1 %v16369_v1  ;;  %v629_v7 = vld [vmem:[#allocation2 + $0xef0] sm:$0xff] }
 0x3ba   :  { %v16345_v19 = vcombine.high %v625_v48, %v629_v7  ;;  %v489_v3 = vld [vmem:[#allocation2 + $0xa90] sm:$0xff]  ;;  %v16344_v62 = vcombine.low %v625_v48, %v629_v7 }
 0x3bb   :  { %v493_v55 = vld [vmem:[#allocation2 + $0xab0] sm:$0xff] }
 0x3bc   :  { %10494 = vmatpush2.bf16.msra.mxu0 %v16240_v35  ;;  %10535 = vmatpush2.bf16.msra.mxu1 %v16368_v47  ;;  %v617_v63 = vld [vmem:[#allocation2 + $0xe90] sm:$0xff]  ;;  %v16209_v1 = vcombine.high %v489_v3, %v493_v55  ;;  %v16208_v47 = vcombine.low %v489_v3, %v493_v55 }
 0x3bd   :  { %10495 = vmatprep.subr.bf16.mxu0 %v16233_v22  ;;  %10536 = vmatprep.subr.bf16.mxu1 %v16361_v15  ;;  %v621_v17 = vld [vmem:[#allocation2 + $0xeb0] sm:$0xff] }
 0x3be   :  { %v16337_v5 = vcombine.high %v617_v63, %v621_v17  ;;  %v481_v8 = vld [vmem:[#allocation2 + $0xa50] sm:$0xff]  ;;  %v16336_v22 = vcombine.low %v617_v63, %v621_v17 }
 0x3bf   :  { %v485_v32 = vld [vmem:[#allocation2 + $0xa70] sm:$0xff] }
 0x3c0   :  { %10496 = vmatpush2.bf16.msra.mxu0 %v16232_v29  ;;  %10537 = vmatpush2.bf16.msra.mxu1 %v16360_v57  ;;  %v609_v11 = vld [vmem:[#allocation2 + $0xe50] sm:$0xff]  ;;  %v16201_v15 = vcombine.high %v481_v8, %v485_v32  ;;  %v16200_v57 = vcombine.low %v481_v8, %v485_v32 }
 0x3c1   :  { %10497 = vmatprep.subr.bf16.mxu0 %v16225_v24  ;;  %10538 = vmatprep.subr.bf16.mxu1 %v16353_v27  ;;  %v613_v35 = vld [vmem:[#allocation2 + $0xe70] sm:$0xff] }
 0x3c2   :  { %v16329_v30 = vcombine.high %v609_v11, %v613_v35  ;;  %v473_v33 = vld [vmem:[#allocation2 + $0xa10] sm:$0xff]  ;;  %v16328_v24 = vcombine.low %v609_v11, %v613_v35 }
 0x3c3   :  { %v477_v42 = vld [vmem:[#allocation2 + $0xa30] sm:$0xff] }
 0x3c4   :  { %10498 = vmatpush2.bf16.msra.mxu0 %v16224_v45  ;;  %10539 = vmatpush2.bf16.msra.mxu1 %v16352_v36  ;;  %v601_v23 = vld [vmem:[#allocation2 + $0xe10] sm:$0xff]  ;;  %v16193_v27 = vcombine.high %v473_v33, %v477_v42  ;;  %v16192_v36 = vcombine.low %v473_v33, %v477_v42 }
 0x3c5   :  { %10499 = vmatprep.subr.bf16.mxu0 %v16217_v52  ;;  %10540 = vmatprep.subr.bf16.mxu1 %v16345_v19  ;;  %v605_v29 = vld [vmem:[#allocation2 + $0xe30] sm:$0xff] }
 0x3c6   :  { %v16321_v41 = vcombine.high %v601_v23, %v605_v29  ;;  %v721_v43 = vld [vmem:[#allocation2 + $0x11d0] sm:$0xff]  ;;  %v16320_v52 = vcombine.low %v601_v23, %v605_v29 }
 0x3c7   :  { %v725_v48 = vld [vmem:[#allocation2 + $0x11f0] sm:$0xff] }
 0x3c8   :  { %10500 = vmatpush2.bf16.msra.mxu0 %v16216_v60  ;;  %10541 = vmatpush2.bf16.msra.mxu1 %v16344_v62  ;;  %v849_v7 = vld [vmem:[#allocation2 + $0x15d0] sm:$0xff]  ;;  %v16441_v19 = vcombine.high %v721_v43, %v725_v48  ;;  %v16440_v62 = vcombine.low %v721_v43, %v725_v48 }
 0x3c9   :  { %10501 = vmatprep.subr.bf16.mxu0 %v16209_v1  ;;  %10542 = vmatprep.subr.bf16.mxu1 %v16337_v5  ;;  %v853_v45 = vld [vmem:[#allocation2 + $0x15f0] sm:$0xff] }
 0x3ca   :  { %v16569_v3 = vcombine.high %v849_v7, %v853_v45  ;;  %v713_v55 = vld [vmem:[#allocation2 + $0x1190] sm:$0xff]  ;;  %v16568_v1 = vcombine.low %v849_v7, %v853_v45 }
 0x3cb   :  { %v717_v63 = vld [vmem:[#allocation2 + $0x11b0] sm:$0xff] }
 0x3cc   :  { %10502 = vmatpush2.bf16.msra.mxu0 %v16208_v47  ;;  %10543 = vmatpush2.bf16.msra.mxu1 %v16336_v22  ;;  %v841_v17 = vld [vmem:[#allocation2 + $0x1590] sm:$0xff]  ;;  %v16433_v5 = vcombine.high %v713_v55, %v717_v63  ;;  %v16432_v33 = vcombine.low %v713_v55, %v717_v63 }
 0x3cd   :  { %10503 = vmatprep.subr.bf16.mxu0 %v16201_v15  ;;  %10544 = vmatprep.subr.bf16.mxu1 %v16329_v30  ;;  %v845_v60 = vld [vmem:[#allocation2 + $0x15b0] sm:$0xff] }
 0x3ce   :  { %v16561_v8 = vcombine.high %v841_v17, %v845_v60  ;;  %v705_v32 = vld [vmem:[#allocation2 + $0x1150] sm:$0xff]  ;;  %v16560_v23 = vcombine.low %v841_v17, %v845_v60 }
 0x3cf   :  { %v709_v11 = vld [vmem:[#allocation2 + $0x1170] sm:$0xff] }
 0x3d0   :  { %10504 = vmatpush2.bf16.msra.mxu0 %v16200_v57  ;;  %10545 = vmatpush2.bf16.msra.mxu1 %v16328_v24  ;;  %v833_v47 = vld [vmem:[#allocation2 + $0x1550] sm:$0xff]  ;;  %v16425_v29 = vcombine.high %v705_v32, %v709_v11 }
 0x3d1   :  { %10505 = vmatprep.subr.bf16.mxu0 %v16193_v27  ;;  %10546 = vmatprep.subr.bf16.mxu1 %v16321_v41  ;;  %v837_v22 = vld [vmem:[#allocation2 + $0x1570] sm:$0xff] }
 0x3d2   :  { %v16553_v41 = vcombine.high %v833_v47, %v837_v22  ;;  %v697_v43 = vld [vmem:[#allocation2 + $0x1110] sm:$0xff] }
 0x3d3   :  { %v701_v48 = vld [vmem:[#allocation2 + $0x1130] sm:$0xff] }
 0x3d4   :  { %10506 = vmatpush2.bf16.msra.mxu0 %v16192_v36  ;;  %10547 = vmatpush2.bf16.msra.mxu1 %v16320_v52  ;;  %v825_v7 = vld [vmem:[#allocation2 + $0x1510] sm:$0xff]  ;;  %v16417_v55 = vcombine.high %v697_v43, %v701_v48 }
 0x3d5   :  { %10557 = vmatprep.subr.bf16.mxu0 %v16441_v19  ;;  %10598 = vmatprep.subr.bf16.mxu1 %v16569_v3  ;;  %v829_v45 = vld [vmem:[#allocation2 + $0x1530] sm:$0xff]  ;;  %v16424_v19 = vcombine.low %v705_v32, %v709_v11 }
 0x3d6   :  { %v16545_v17 = vcombine.high %v825_v7, %v829_v45  ;;  %v689_v60 = vld [vmem:[#allocation2 + $0x10d0] sm:$0xff] }
 0x3d7   :  { %v10263_v35 = vpop.f32.mrf.mxu0  ;;  %10508 = vmatmul.mubr.bf16.vlgmr.msra.gmra.mxu0 %v18388_v39  ;;  %v10304_v30 = vpop.f32.mrf.mxu1  ;;  %10549 = vmatmul.mubr.bf16.vlgmr.msra.gmra.mxu1 %v18390_v40  ;;  %v681_v11 = vld [vmem:[#allocation2 + $0x1090] sm:$0xff] }
 0x3d8   :  { %v10264_v15 = vadd.f32 %v10263_v35, %v18580_v0  ;;  %10558 = vmatpush1.bf16.msra.mxu0 %v16440_v62  ;;  %10599 = vmatpush1.bf16.msra.mxu1 %v16568_v1  ;;  %v693_v62 = vld [vmem:[#allocation2 + $0x10f0] sm:$0xff]  ;;  %v16544_v35 = vcombine.low %v825_v7, %v829_v45 }
 0x3d9   :  { %v10265_v42 = vpop.f32.mrf.mxu0  ;;  %10559 = vmatprep.subr.bf16.mxu0 %v16433_v5  ;;  %v10306_v27 = vpop.f32.mrf.mxu1  ;;  %10600 = vmatprep.subr.bf16.mxu1 %v16561_v8  ;;  %v817_v1 = vld [vmem:[#allocation2 + $0x14d0] sm:$0xff]  ;;  %v16416_v8 = vcombine.low %v697_v43, %v701_v48 }
 0x3da   :  { %v18590_v57 = vadd.f32 %v10304_v30, %v10264_v15  ;;  %v10266_v24 = vadd.f32 %v10265_v42, %v18585_v12  ;;  %10589 = vmatprep.mubr.bf16.mxu0 %v18395_v49  ;;  %10630 = vmatprep.mubr.bf16.mxu1 %v18398_v51  ;;  %v16552_v12 = vcombine.low %v833_v47, %v837_v22  ;;  %v821_v5 = vld [vmem:[#allocation2 + $0x14f0] sm:$0xff] }
 0x3db   :  { %v10267_v0 = vpop.f32.mrf.mxu0  ;;  %v10308_v52 = vpop.f32.mrf.mxu1  ;;  %v16409_v15 = vcombine.high %v689_v60, %v693_v62  ;;  %v16537_v32 = vcombine.high %v817_v1, %v821_v5  ;;  %v685_v30 = vld [vmem:[#allocation2 + $0x10b0] sm:$0xff]  ;;  %v16408_v22 = vcombine.low %v689_v60, %v693_v62  ;;  %v16536_v42 = vcombine.low %v817_v1, %v821_v5 }
 0x3dc   :  { %v18595_v36 = vadd.f32 %v10306_v27, %v10266_v24  ;;  %10560 = vmatpush1.bf16.msra.mxu0 %v16432_v33  ;;  %10601 = vmatpush1.bf16.msra.mxu1 %v16560_v23  ;;  %v809_v33 = vld [vmem:[#allocation2 + $0x1490] sm:$0xff]  ;;  %v16401_v23 = vcombine.high %v681_v11, %v685_v30  ;;  %v16400_v48 = vcombine.low %v681_v11, %v685_v30 }
 0x3dd   :  { %v10268_v3 = vpop.f32.mrf.mxu0  ;;  %10561 = vmatprep.subr.bf16.mxu0 %v16425_v29  ;;  %v10309_v63 = vpop.f32.mrf.mxu1  ;;  %10602 = vmatprep.subr.bf16.mxu1 %v16553_v41  ;;  %v813_v47 = vld [vmem:[#allocation2 + $0x14b0] sm:$0xff] }
 0x3de   :  { %v16529_v29 = vcombine.high %v809_v33, %v813_v47  ;;  %v673_v24 = vld [vmem:[#allocation2 + $0x1050] sm:$0xff]  ;;  %v16528_v0 = vcombine.low %v809_v33, %v813_v47 }
 0x3df   :  { %v677_v27 = vld [vmem:[#allocation2 + $0x1070] sm:$0xff] }
 0x3e0   :  { %10562 = vmatpush1.bf16.msra.mxu0 %v16424_v19  ;;  %10603 = vmatpush1.bf16.msra.mxu1 %v16552_v12  ;;  %v801_v41 = vld [vmem:[#allocation2 + $0x1450] sm:$0xff]  ;;  %v16393_v7 = vcombine.high %v673_v24, %v677_v27 }
 0x3e1   :  { %10563 = vmatprep.subr.bf16.mxu0 %v16417_v55  ;;  %10604 = vmatprep.subr.bf16.mxu1 %v16545_v17  ;;  %v805_v43 = vld [vmem:[#allocation2 + $0x1470] sm:$0xff]  ;;  %v16392_v55 = vcombine.low %v673_v24, %v677_v27 }
 0x3e2   :  { %v16521_v45 = vcombine.high %v801_v41, %v805_v43  ;;  %v665_v52 = vld [vmem:[#allocation2 + $0x1010] sm:$0xff]  ;;  %v16520_v63 = vcombine.low %v801_v41, %v805_v43 }
 0x3e3   :  { %v669_v19 = vld [vmem:[#allocation2 + $0x1030] sm:$0xff] }
 0x3e4   :  { %10564 = vmatpush1.bf16.msra.mxu0 %v16416_v8  ;;  %10605 = vmatpush1.bf16.msra.mxu1 %v16544_v35  ;;  %v793_v3 = vld [vmem:[#allocation2 + $0x1410] sm:$0xff]  ;;  %v16385_v17 = vcombine.high %v665_v52, %v669_v19  ;;  %v16384_v35 = vcombine.low %v665_v52, %v669_v19 }
 0x3e5   :  { %10565 = vmatprep.subr.bf16.mxu0 %v16409_v15  ;;  %10606 = vmatprep.subr.bf16.mxu1 %v16537_v32  ;;  %v797_v12 = vld [vmem:[#allocation2 + $0x1430] sm:$0xff] }
 0x3e6   :  { %v16513_v60 = vcombine.high %v793_v3, %v797_v12  ;;  %v785_v62 = vld [vmem:[#allocation2 + $0x13d0] sm:$0xff]  ;;  %v16512_v15 = vcombine.low %v793_v3, %v797_v12 }
 0x3e7   :  { %v789_v1 = vld [vmem:[#allocation2 + $0x13f0] sm:$0xff] }
 0x3e8   :  { %10566 = vmatpush1.bf16.msra.mxu0 %v16408_v22  ;;  %10607 = vmatpush1.bf16.msra.mxu1 %v16536_v42  ;;  %v913_v5 = vld [vmem:[#allocation2 + $0x17d0] sm:$0xff]  ;;  %v16505_v32 = vcombine.high %v785_v62, %v789_v1  ;;  %v16504_v42 = vcombine.low %v785_v62, %v789_v1 }
 0x3e9   :  { %10567 = vmatprep.subr.bf16.mxu0 %v16401_v23  ;;  %10608 = vmatprep.subr.bf16.mxu1 %v16529_v29  ;;  %v917_v8 = vld [vmem:[#allocation2 + $0x17f0] sm:$0xff] }
 0x3ea   :  { %v16633_v11 = vcombine.high %v913_v5, %v917_v8  ;;  %v777_v30 = vld [vmem:[#allocation2 + $0x1390] sm:$0xff]  ;;  %v16632_v23 = vcombine.low %v913_v5, %v917_v8 }
 0x3eb   :  { %v781_v33 = vld [vmem:[#allocation2 + $0x13b0] sm:$0xff] }
 0x3ec   :  { %10568 = vmatpush1.bf16.msra.mxu0 %v16400_v48  ;;  %10609 = vmatpush1.bf16.msra.mxu1 %v16528_v0  ;;  %v905_v47 = vld [vmem:[#allocation2 + $0x1790] sm:$0xff]  ;;  %v16497_v29 = vcombine.high %v777_v30, %v781_v33  ;;  %v16496_v0 = vcombine.low %v777_v30, %v781_v33 }
 0x3ed   :  { %10569 = vmatprep.subr.bf16.mxu0 %v16393_v7  ;;  %10610 = vmatprep.subr.bf16.mxu1 %v16521_v45  ;;  %v909_v22 = vld [vmem:[#allocation2 + $0x17b0] sm:$0xff] }
 0x3ee   :  { %v16625_v24 = vcombine.high %v905_v47, %v909_v22  ;;  %v769_v27 = vld [vmem:[#allocation2 + $0x1350] sm:$0xff]  ;;  %v16624_v7 = vcombine.low %v905_v47, %v909_v22 }
 0x3ef   :  { %v773_v41 = vld [vmem:[#allocation2 + $0x1370] sm:$0xff] }
 0x3f0   :  { %10570 = vmatpush1.bf16.msra.mxu0 %v16392_v55  ;;  %10611 = vmatpush1.bf16.msra.mxu1 %v16520_v63  ;;  %v897_v43 = vld [vmem:[#allocation2 + $0x1750] sm:$0xff]  ;;  %v16489_v45 = vcombine.high %v769_v27, %v773_v41  ;;  %v16488_v63 = vcombine.low %v769_v27, %v773_v41 }
 0x3f1   :  { %10571 = vmatprep.subr.bf16.mxu0 %v16385_v17  ;;  %10612 = vmatprep.subr.bf16.mxu1 %v16513_v60  ;;  %v901_v48 = vld [vmem:[#allocation2 + $0x1770] sm:$0xff] }
 0x3f2   :  { %v16617_v52 = vcombine.high %v897_v43, %v901_v48  ;;  %v761_v19 = vld [vmem:[#allocation2 + $0x1310] sm:$0xff]  ;;  %v16616_v17 = vcombine.low %v897_v43, %v901_v48 }
 0x3f3   :  { %v765_v3 = vld [vmem:[#allocation2 + $0x1330] sm:$0xff] }
 0x3f4   :  { %10572 = vmatpush1.bf16.msra.mxu0 %v16384_v35  ;;  %10613 = vmatpush1.bf16.msra.mxu1 %v16512_v15  ;;  %v889_v12 = vld [vmem:[#allocation2 + $0x1710] sm:$0xff]  ;;  %v16481_v60 = vcombine.high %v761_v19, %v765_v3  ;;  %v16480_v15 = vcombine.low %v761_v19, %v765_v3 }
 0x3f5   :  { %10573 = vmatprep.subr.bf16.mxu0 %v16505_v32  ;;  %10614 = vmatprep.subr.bf16.mxu1 %v16633_v11  ;;  %v893_v55 = vld [vmem:[#allocation2 + $0x1730] sm:$0xff] }
 0x3f6   :  { %v16609_v62 = vcombine.high %v889_v12, %v893_v55  ;;  %v753_v1 = vld [vmem:[#allocation2 + $0x12d0] sm:$0xff]  ;;  %v16608_v32 = vcombine.low %v889_v12, %v893_v55 }
 0x3f7   :  { %v757_v5 = vld [vmem:[#allocation2 + $0x12f0] sm:$0xff] }
 0x3f8   :  { %10574 = vmatpush2.bf16.msra.mxu0 %v16504_v42  ;;  %10615 = vmatpush2.bf16.msra.mxu1 %v16632_v23  ;;  %v881_v8 = vld [vmem:[#allocation2 + $0x16d0] sm:$0xff]  ;;  %v16473_v11 = vcombine.high %v753_v1, %v757_v5  ;;  %v16472_v23 = vcombine.low %v753_v1, %v757_v5 }
 0x3f9   :  { %10575 = vmatprep.subr.bf16.mxu0 %v16497_v29  ;;  %10616 = vmatprep.subr.bf16.mxu1 %v16625_v24  ;;  %v885_v35 = vld [vmem:[#allocation2 + $0x16f0] sm:$0xff] }
 0x3fa   :  { %v16601_v30 = vcombine.high %v881_v8, %v885_v35  ;;  %v745_v33 = vld [vmem:[#allocation2 + $0x1290] sm:$0xff]  ;;  %v16600_v29 = vcombine.low %v881_v8, %v885_v35 }
 0x3fb   :  { %v749_v47 = vld [vmem:[#allocation2 + $0x12b0] sm:$0xff] }
 0x3fc   :  { %10576 = vmatpush2.bf16.msra.mxu0 %v16496_v0  ;;  %10617 = vmatpush2.bf16.msra.mxu1 %v16624_v7  ;;  %v873_v22 = vld [vmem:[#allocation2 + $0x1690] sm:$0xff]  ;;  %v16465_v24 = vcombine.high %v745_v33, %v749_v47  ;;  %v16464_v7 = vcombine.low %v745_v33, %v749_v47 }
 0x3fd   :  { %10577 = vmatprep.subr.bf16.mxu0 %v16489_v45  ;;  %10618 = vmatprep.subr.bf16.mxu1 %v16617_v52  ;;  %v877_v42 = vld [vmem:[#allocation2 + $0x16b0] sm:$0xff] }
 0x3fe   :  { %v16593_v27 = vcombine.high %v873_v22, %v877_v42  ;;  %v737_v41 = vld [vmem:[#allocation2 + $0x1250] sm:$0xff]  ;;  %v16592_v45 = vcombine.low %v873_v22, %v877_v42 }
 0x3ff   :  { %v741_v43 = vld [vmem:[#allocation2 + $0x1270] sm:$0xff] }
 0x400   :  { %10578 = vmatpush2.bf16.msra.mxu0 %v16488_v63  ;;  %10619 = vmatpush2.bf16.msra.mxu1 %v16616_v17  ;;  %v865_v48 = vld [vmem:[#allocation2 + $0x1650] sm:$0xff]  ;;  %v16457_v52 = vcombine.high %v737_v41, %v741_v43  ;;  %v16456_v17 = vcombine.low %v737_v41, %v741_v43 }
 0x401   :  { %10579 = vmatprep.subr.bf16.mxu0 %v16481_v60  ;;  %10620 = vmatprep.subr.bf16.mxu1 %v16609_v62  ;;  %v869_v0 = vld [vmem:[#allocation2 + $0x1670] sm:$0xff] }
 0x402   :  { %v16585_v19 = vcombine.high %v865_v48, %v869_v0  ;;  %v729_v3 = vld [vmem:[#allocation2 + $0x1210] sm:$0xff]  ;;  %v16584_v60 = vcombine.low %v865_v48, %v869_v0 }
 0x403   :  { %v733_v12 = vld [vmem:[#allocation2 + $0x1230] sm:$0xff] }
 0x404   :  { %10580 = vmatpush2.bf16.msra.mxu0 %v16480_v15  ;;  %10621 = vmatpush2.bf16.msra.mxu1 %v16608_v32  ;;  %v857_v55 = vld [vmem:[#allocation2 + $0x1610] sm:$0xff]  ;;  %v16449_v62 = vcombine.high %v729_v3, %v733_v12  ;;  %v16448_v32 = vcombine.low %v729_v3, %v733_v12 }
 0x405   :  { %10581 = vmatprep.subr.bf16.mxu0 %v16473_v11  ;;  %10622 = vmatprep.subr.bf16.mxu1 %v16601_v30  ;;  %v861_v63 = vld [vmem:[#allocation2 + $0x1630] sm:$0xff] }
 0x406   :  { %v16577_v1 = vcombine.high %v857_v55, %v861_v63  ;;  %v977_v5 = vld [vmem:[#allocation2 + $0x19d0] sm:$0xff]  ;;  %v16576_v11 = vcombine.low %v857_v55, %v861_v63 }
 0x407   :  { %v981_v8 = vld [vmem:[#allocation2 + $0x19f0] sm:$0xff] }
 0x408   :  { %10582 = vmatpush2.bf16.msra.mxu0 %v16472_v23  ;;  %10623 = vmatpush2.bf16.msra.mxu1 %v16600_v29  ;;  %v1105_v35 = vld [vmem:[#allocation2 + $0x1dd0] sm:$0xff]  ;;  %v16697_v30 = vcombine.high %v977_v5, %v981_v8  ;;  %v16696_v29 = vcombine.low %v977_v5, %v981_v8 }
 0x409   :  { %10583 = vmatprep.subr.bf16.mxu0 %v16465_v24  ;;  %10624 = vmatprep.subr.bf16.mxu1 %v16593_v27  ;;  %v1109_v15 = vld [vmem:[#allocation2 + $0x1df0] sm:$0xff] }
 0x40a   :  { %v16825_v33 = vcombine.high %v1105_v35, %v1109_v15  ;;  %v969_v47 = vld [vmem:[#allocation2 + $0x1990] sm:$0xff]  ;;  %v16824_v24 = vcombine.low %v1105_v35, %v1109_v15 }
 0x40b   :  { %v973_v22 = vld [vmem:[#allocation2 + $0x19b0] sm:$0xff] }
 0x40c   :  { %10584 = vmatpush2.bf16.msra.mxu0 %v16464_v7  ;;  %10625 = vmatpush2.bf16.msra.mxu1 %v16592_v45  ;;  %v1097_v42 = vld [vmem:[#allocation2 + $0x1d90] sm:$0xff]  ;;  %v16689_v27 = vcombine.high %v969_v47, %v973_v22  ;;  %v16688_v3 = vcombine.low %v969_v47, %v973_v22 }
 0x40d   :  { %10585 = vmatprep.subr.bf16.mxu0 %v16457_v52  ;;  %10626 = vmatprep.subr.bf16.mxu1 %v16585_v19  ;;  %v1101_v23 = vld [vmem:[#allocation2 + $0x1db0] sm:$0xff] }
 0x40e   :  { %v16817_v41 = vcombine.high %v1097_v42, %v1101_v23  ;;  %v961_v43 = vld [vmem:[#allocation2 + $0x1950] sm:$0xff]  ;;  %v16816_v55 = vcombine.low %v1097_v42, %v1101_v23 }
 0x40f   :  { %v965_v48 = vld [vmem:[#allocation2 + $0x1970] sm:$0xff] }
 0x410   :  { %10586 = vmatpush2.bf16.msra.mxu0 %v16456_v17  ;;  %10627 = vmatpush2.bf16.msra.mxu1 %v16584_v60  ;;  %v1089_v7 = vld [vmem:[#allocation2 + $0x1d50] sm:$0xff]  ;;  %v16681_v63 = vcombine.high %v961_v43, %v965_v48 }
 0x411   :  { %10587 = vmatprep.subr.bf16.mxu0 %v16449_v62  ;;  %10628 = vmatprep.subr.bf16.mxu1 %v16577_v1  ;;  %v1093_v45 = vld [vmem:[#allocation2 + $0x1d70] sm:$0xff] }
 0x412   :  { %v16809_v1 = vcombine.high %v1089_v7, %v1093_v45  ;;  %v953_v5 = vld [vmem:[#allocation2 + $0x1910] sm:$0xff] }
 0x413   :  { %v957_v8 = vld [vmem:[#allocation2 + $0x1930] sm:$0xff] }
 0x414   :  { %10588 = vmatpush2.bf16.msra.mxu0 %v16448_v32  ;;  %10629 = vmatpush2.bf16.msra.mxu1 %v16576_v11  ;;  %v1081_v35 = vld [vmem:[#allocation2 + $0x1d10] sm:$0xff]  ;;  %v16673_v47 = vcombine.high %v953_v5, %v957_v8 }
 0x415   :  { %10639 = vmatprep.subr.bf16.mxu0 %v16697_v30  ;;  %10680 = vmatprep.subr.bf16.mxu1 %v16825_v33  ;;  %v1085_v15 = vld [vmem:[#allocation2 + $0x1d30] sm:$0xff]  ;;  %v16680_v30 = vcombine.low %v961_v43, %v965_v48 }
 0x416   :  { %v16801_v42 = vcombine.high %v1081_v35, %v1085_v15  ;;  %v945_v23 = vld [vmem:[#allocation2 + $0x18d0] sm:$0xff] }
 0x417   :  { %v10345_v0 = vpop.f32.mrf.mxu0  ;;  %10590 = vmatmul.mubr.bf16.vlgmr.msra.gmra.mxu0 %v18409_v2  ;;  %v10386_v19 = vpop.f32.mrf.mxu1  ;;  %10631 = vmatmul.mubr.bf16.vlgmr.msra.gmra.mxu1 %v18414_v6  ;;  %v937_v48 = vld [vmem:[#allocation2 + $0x1890] sm:$0xff] }
 0x418   :  { %v10346_v52 = vadd.f32 %v10345_v0, %v18590_v57  ;;  %10640 = vmatpush1.bf16.msra.mxu0 %v16696_v29  ;;  %10681 = vmatpush1.bf16.msra.mxu1 %v16824_v24  ;;  %v949_v29 = vld [vmem:[#allocation2 + $0x18f0] sm:$0xff]  ;;  %v16800_v0 = vcombine.low %v1081_v35, %v1085_v15 }
 0x419   :  { %v10347_v12 = vpop.f32.mrf.mxu0  ;;  %10641 = vmatprep.subr.bf16.mxu0 %v16689_v27  ;;  %v10388_v62 = vpop.f32.mrf.mxu1  ;;  %10682 = vmatprep.subr.bf16.mxu1 %v16817_v41  ;;  %v1073_v24 = vld [vmem:[#allocation2 + $0x1cd0] sm:$0xff]  ;;  %v16672_v41 = vcombine.low %v953_v5, %v957_v8 }
 0x41a   :  { %v18600_v17 = vadd.f32 %v10386_v19, %v10346_v52  ;;  %v10348_v60 = vadd.f32 %v10347_v12, %v18595_v36  ;;  %10671 = vmatprep.mubr.bf16.mxu0 %v18419_v14  ;;  %10712 = vmatprep.mubr.bf16.mxu1 %v18422_v18  ;;  %v16808_v36 = vcombine.low %v1089_v7, %v1093_v45  ;;  %v1077_v27 = vld [vmem:[#allocation2 + $0x1cf0] sm:$0xff] }
 0x41b   :  { %v10349_v57 = vpop.f32.mrf.mxu0  ;;  %v10390_v11 = vpop.f32.mrf.mxu1  ;;  %v16665_v52 = vcombine.high %v945_v23, %v949_v29  ;;  %v16793_v43 = vcombine.high %v1073_v24, %v1077_v27  ;;  %v941_v19 = vld [vmem:[#allocation2 + $0x18b0] sm:$0xff]  ;;  %v16664_v45 = vcombine.low %v945_v23, %v949_v29  ;;  %v16792_v12 = vcombine.low %v1073_v24, %v1077_v27 }
 0x41c   :  { %v18605_v32 = vadd.f32 %v10388_v62, %v10348_v60  ;;  %10642 = vmatpush1.bf16.msra.mxu0 %v16688_v3  ;;  %10683 = vmatpush1.bf16.msra.mxu1 %v16816_v55  ;;  %v1065_v3 = vld [vmem:[#allocation2 + $0x1c90] sm:$0xff]  ;;  %v16657_v55 = vcombine.high %v937_v48, %v941_v19  ;;  %v16656_v8 = vcombine.low %v937_v48, %v941_v19 }
 0x41d   :  { %v10350_v33 = vpop.f32.mrf.mxu0  ;;  %10643 = vmatprep.subr.bf16.mxu0 %v16681_v63  ;;  %v10391_v22 = vpop.f32.mrf.mxu1  ;;  %10684 = vmatprep.subr.bf16.mxu1 %v16809_v1  ;;  %v1069_v7 = vld [vmem:[#allocation2 + $0x1cb0] sm:$0xff] }
 0x41e   :  { %v16785_v63 = vcombine.high %v1065_v3, %v1069_v7  ;;  %v929_v60 = vld [vmem:[#allocation2 + $0x1850] sm:$0xff]  ;;  %v16784_v57 = vcombine.low %v1065_v3, %v1069_v7 }
 0x41f   :  { %v933_v62 = vld [vmem:[#allocation2 + $0x1870] sm:$0xff] }
 0x420   :  { %10644 = vmatpush1.bf16.msra.mxu0 %v16680_v30  ;;  %10685 = vmatpush1.bf16.msra.mxu1 %v16808_v36  ;;  %v1057_v1 = vld [vmem:[#allocation2 + $0x1c50] sm:$0xff]  ;;  %v16649_v35 = vcombine.high %v929_v60, %v933_v62 }
 0x421   :  { %10645 = vmatprep.subr.bf16.mxu0 %v16673_v47  ;;  %10686 = vmatprep.subr.bf16.mxu1 %v16801_v42  ;;  %v1061_v5 = vld [vmem:[#allocation2 + $0x1c70] sm:$0xff]  ;;  %v16648_v47 = vcombine.low %v929_v60, %v933_v62 }
 0x422   :  { %v16777_v15 = vcombine.high %v1057_v1, %v1061_v5  ;;  %v921_v11 = vld [vmem:[#allocation2 + $0x1810] sm:$0xff]  ;;  %v16776_v22 = vcombine.low %v1057_v1, %v1061_v5 }
 0x423   :  { %v925_v30 = vld [vmem:[#allocation2 + $0x1830] sm:$0xff] }
 0x424   :  { %10646 = vmatpush1.bf16.msra.mxu0 %v16672_v41  ;;  %10687 = vmatpush1.bf16.msra.mxu1 %v16800_v0  ;;  %v1049_v33 = vld [vmem:[#allocation2 + $0x1c10] sm:$0xff]  ;;  %v16641_v42 = vcombine.high %v921_v11, %v925_v30  ;;  %v16640_v0 = vcombine.low %v921_v11, %v925_v30 }
 0x425   :  { %10647 = vmatprep.subr.bf16.mxu0 %v16665_v52  ;;  %10688 = vmatprep.subr.bf16.mxu1 %v16793_v43  ;;  %v1053_v36 = vld [vmem:[#allocation2 + $0x1c30] sm:$0xff] }
 0x426   :  { %v16769_v23 = vcombine.high %v1049_v33, %v1053_v36  ;;  %v1041_v29 = vld [vmem:[#allocation2 + $0x1bd0] sm:$0xff]  ;;  %v16768_v52 = vcombine.low %v1049_v33, %v1053_v36 }
 0x427   :  { %v1045_v24 = vld [vmem:[#allocation2 + $0x1bf0] sm:$0xff] }
 0x428   :  { %10648 = vmatpush1.bf16.msra.mxu0 %v16664_v45  ;;  %10689 = vmatpush1.bf16.msra.mxu1 %v16792_v12  ;;  %v1169_v27 = vld [vmem:[#allocation2 + $0x1fd0] sm:$0xff]  ;;  %v16761_v43 = vcombine.high %v1041_v29, %v1045_v24  ;;  %v16760_v12 = vcombine.low %v1041_v29, %v1045_v24 }
 0x429   :  { %10649 = vmatprep.subr.bf16.mxu0 %v16657_v55  ;;  %10690 = vmatprep.subr.bf16.mxu1 %v16785_v63  ;;  %v1173_v41 = vld [vmem:[#allocation2 + $0x1ff0] sm:$0xff] }
 0x42a   :  { %v16889_v48 = vcombine.high %v1169_v27, %v1173_v41  ;;  %v1033_v19 = vld [vmem:[#allocation2 + $0x1b90] sm:$0xff]  ;;  %v16888_v55 = vcombine.low %v1169_v27, %v1173_v41 }
 0x42b   :  { %v1037_v3 = vld [vmem:[#allocation2 + $0x1bb0] sm:$0xff] }
 0x42c   :  { %10650 = vmatpush1.bf16.msra.mxu0 %v16656_v8  ;;  %10691 = vmatpush1.bf16.msra.mxu1 %v16784_v57  ;;  %v1161_v7 = vld [vmem:[#allocation2 + $0x1f90] sm:$0xff]  ;;  %v16753_v63 = vcombine.high %v1033_v19, %v1037_v3  ;;  %v16752_v57 = vcombine.low %v1033_v19, %v1037_v3 }
 0x42d   :  { %10651 = vmatprep.subr.bf16.mxu0 %v16649_v35  ;;  %10692 = vmatprep.subr.bf16.mxu1 %v16777_v15  ;;  %v1165_v45 = vld [vmem:[#allocation2 + $0x1fb0] sm:$0xff] }
 0x42e   :  { %v16881_v60 = vcombine.high %v1161_v7, %v1165_v45  ;;  %v1025_v62 = vld [vmem:[#allocation2 + $0x1b50] sm:$0xff]  ;;  %v16880_v35 = vcombine.low %v1161_v7, %v1165_v45 }
 0x42f   :  { %v1029_v1 = vld [vmem:[#allocation2 + $0x1b70] sm:$0xff] }
 0x430   :  { %10652 = vmatpush1.bf16.msra.mxu0 %v16648_v47  ;;  %10693 = vmatpush1.bf16.msra.mxu1 %v16776_v22  ;;  %v1153_v5 = vld [vmem:[#allocation2 + $0x1f50] sm:$0xff]  ;;  %v16745_v15 = vcombine.high %v1025_v62, %v1029_v1  ;;  %v16744_v22 = vcombine.low %v1025_v62, %v1029_v1 }
 0x431   :  { %10653 = vmatprep.subr.bf16.mxu0 %v16641_v42  ;;  %10694 = vmatprep.subr.bf16.mxu1 %v16769_v23  ;;  %v1157_v8 = vld [vmem:[#allocation2 + $0x1f70] sm:$0xff] }
 0x432   :  { %v16873_v11 = vcombine.high %v1153_v5, %v1157_v8  ;;  %v1017_v30 = vld [vmem:[#allocation2 + $0x1b10] sm:$0xff]  ;;  %v16872_v42 = vcombine.low %v1153_v5, %v1157_v8 }
 0x433   :  { %v1021_v33 = vld [vmem:[#allocation2 + $0x1b30] sm:$0xff] }
 0x434   :  { %10654 = vmatpush1.bf16.msra.mxu0 %v16640_v0  ;;  %10695 = vmatpush1.bf16.msra.mxu1 %v16768_v52  ;;  %v1145_v36 = vld [vmem:[#allocation2 + $0x1f10] sm:$0xff]  ;;  %v16737_v23 = vcombine.high %v1017_v30, %v1021_v33  ;;  %v16736_v52 = vcombine.low %v1017_v30, %v1021_v33 }
 0x435   :  { %10655 = vmatprep.subr.bf16.mxu0 %v16761_v43  ;;  %10696 = vmatprep.subr.bf16.mxu1 %v16889_v48  ;;  %v1149_v47 = vld [vmem:[#allocation2 + $0x1f30] sm:$0xff] }
 0x436   :  { %v16865_v29 = vcombine.high %v1145_v36, %v1149_v47  ;;  %v1009_v24 = vld [vmem:[#allocation2 + $0x1ad0] sm:$0xff]  ;;  %v16864_v43 = vcombine.low %v1145_v36, %v1149_v47 }
 0x437   :  { %v1013_v27 = vld [vmem:[#allocation2 + $0x1af0] sm:$0xff] }
 0x438   :  { %10656 = vmatpush2.bf16.msra.mxu0 %v16760_v12  ;;  %10697 = vmatpush2.bf16.msra.mxu1 %v16888_v55  ;;  %v1137_v41 = vld [vmem:[#allocation2 + $0x1ed0] sm:$0xff]  ;;  %v16729_v48 = vcombine.high %v1009_v24, %v1013_v27  ;;  %v16728_v55 = vcombine.low %v1009_v24, %v1013_v27 }
 0x439   :  { %10657 = vmatprep.subr.bf16.mxu0 %v16753_v63  ;;  %10698 = vmatprep.subr.bf16.mxu1 %v16881_v60  ;;  %v1141_v0 = vld [vmem:[#allocation2 + $0x1ef0] sm:$0xff] }
 0x43a   :  { %v16857_v19 = vcombine.high %v1137_v41, %v1141_v0  ;;  %v1001_v3 = vld [vmem:[#allocation2 + $0x1a90] sm:$0xff]  ;;  %v16856_v63 = vcombine.low %v1137_v41, %v1141_v0 }
 0x43b   :  { %v1005_v7 = vld [vmem:[#allocation2 + $0x1ab0] sm:$0xff] }
 0x43c   :  { %10658 = vmatpush2.bf16.msra.mxu0 %v16752_v57  ;;  %10699 = vmatpush2.bf16.msra.mxu1 %v16880_v35  ;;  %v1129_v45 = vld [vmem:[#allocation2 + $0x1e90] sm:$0xff]  ;;  %v16721_v60 = vcombine.high %v1001_v3, %v1005_v7  ;;  %v16720_v35 = vcombine.low %v1001_v3, %v1005_v7 }
 0x43d   :  { %10659 = vmatprep.subr.bf16.mxu0 %v16745_v15  ;;  %10700 = vmatprep.subr.bf16.mxu1 %v16873_v11  ;;  %v1133_v12 = vld [vmem:[#allocation2 + $0x1eb0] sm:$0xff] }
 0x43e   :  { %v16849_v62 = vcombine.high %v1129_v45, %v1133_v12  ;;  %v993_v1 = vld [vmem:[#allocation2 + $0x1a50] sm:$0xff]  ;;  %v16848_v15 = vcombine.low %v1129_v45, %v1133_v12  ;;  %v1711_v45 = vsub.s32 5, %v18427_v26 }
 0x43f   :  { %v997_v5 = vld [vmem:[#allocation2 + $0x1a70] sm:$0xff] }
 0x440   :  { %10660 = vmatpush2.bf16.msra.mxu0 %v16744_v22  ;;  %10701 = vmatpush2.bf16.msra.mxu1 %v16872_v42  ;;  %v1121_v8 = vld [vmem:[#allocation2 + $0x1e50] sm:$0xff]  ;;  %v16713_v11 = vcombine.high %v993_v1, %v997_v5  ;;  %v16712_v42 = vcombine.low %v993_v1, %v997_v5 }
 0x441   :  { %10661 = vmatprep.subr.bf16.mxu0 %v16737_v23  ;;  %10702 = vmatprep.subr.bf16.mxu1 %v16865_v29  ;;  %v1125_v57 = vld [vmem:[#allocation2 + $0x1e70] sm:$0xff] }
 0x442   :  { %v16841_v30 = vcombine.high %v1121_v8, %v1125_v57  ;;  %v985_v33 = vld [vmem:[#allocation2 + $0x1a10] sm:$0xff]  ;;  %v16840_v23 = vcombine.low %v1121_v8, %v1125_v57 }
 0x443   :  { %v989_v36 = vld [vmem:[#allocation2 + $0x1a30] sm:$0xff] }
 0x444   :  { %10662 = vmatpush2.bf16.msra.mxu0 %v16736_v52  ;;  %10703 = vmatpush2.bf16.msra.mxu1 %v16864_v43  ;;  %v1113_v47 = vld [vmem:[#allocation2 + $0x1e10] sm:$0xff]  ;;  %v16705_v29 = vcombine.high %v985_v33, %v989_v36  ;;  %v16704_v43 = vcombine.low %v985_v33, %v989_v36 }
 0x445   :  { %10663 = vmatprep.subr.bf16.mxu0 %v16729_v48  ;;  %10704 = vmatprep.subr.bf16.mxu1 %v16857_v19  ;;  %v1117_v22 = vld [vmem:[#allocation2 + $0x1e30] sm:$0xff]  ;;  %v1707_v48 = vsub.s32 4, %v18427_v26 }
 0x446   :  { %v16833_v24 = vcombine.high %v1113_v47, %v1117_v22  ;;  %v1233_v27 = vld [vmem:[#allocation2 + $0x21d0] sm:$0xff]  ;;  %v16832_v19 = vcombine.low %v1113_v47, %v1117_v22 }
 0x447   :  { %v1237_v41 = vld [vmem:[#allocation2 + $0x21f0] sm:$0xff] }
 0x448   :  { %10664 = vmatpush2.bf16.msra.mxu0 %v16728_v55  ;;  %10705 = vmatpush2.bf16.msra.mxu1 %v16856_v63  ;;  %v1361_v0 = vld [vmem:[#allocation2 + $0x25d0] sm:$0xff]  ;;  %v16953_v3 = vcombine.high %v1233_v27, %v1237_v41  ;;  %v16952_v5 = vcombine.low %v1233_v27, %v1237_v41 }
 0x449   :  { %10665 = vmatprep.subr.bf16.mxu0 %v16721_v60  ;;  %10706 = vmatprep.subr.bf16.mxu1 %v16849_v62  ;;  %v1365_v52 = vld [vmem:[#allocation2 + $0x25f0] sm:$0xff]  ;;  %v18144_v62 = vld [vmem:[#allocation4] sm:$0xff] }
 0x44a   :  { %v17081_v7 = vcombine.high %v1361_v0, %v1365_v52  ;;  %v1225_v12 = vld [vmem:[#allocation2 + $0x2190] sm:$0xff]  ;;  %v1708_v1 = vrot.slane %v18144_v62, %v1707_v48  ;;  %v17080_v8 = vcombine.low %v1361_v0, %v1365_v52 }
 0x44b   :  { %v1229_v55 = vld [vmem:[#allocation2 + $0x21b0] sm:$0xff] }
 0x44c   :  { %10666 = vmatpush2.bf16.msra.mxu0 %v16720_v35  ;;  %10707 = vmatpush2.bf16.msra.mxu1 %v16848_v15  ;;  %v1353_v63 = vld [vmem:[#allocation2 + $0x2590] sm:$0xff]  ;;  %v16945_v57 = vcombine.high %v1225_v12, %v1229_v55  ;;  %v1712_v35 = vrot.slane %v18144_v62, %v1711_v45 }
 0x44d   :  { %10667 = vmatprep.subr.bf16.mxu0 %v16713_v11  ;;  %10708 = vmatprep.subr.bf16.mxu1 %v16841_v30  ;;  %v1357_v60 = vld [vmem:[#allocation2 + $0x25b0] sm:$0xff] }
 0x44e   :  { %v17073_v15 = vcombine.high %v1353_v63, %v1357_v60  ;;  %v1217_v11 = vld [vmem:[#allocation2 + $0x2150] sm:$0xff] }
 0x44f   :  { %v1221_v30 = vld [vmem:[#allocation2 + $0x2170] sm:$0xff] }
 0x450   :  { %10668 = vmatpush2.bf16.msra.mxu0 %v16712_v42  ;;  %10709 = vmatpush2.bf16.msra.mxu1 %v16840_v23  ;;  %v1345_v36 = vld [vmem:[#allocation2 + $0x2550] sm:$0xff]  ;;  %v16944_v23 = vcombine.low %v1225_v12, %v1229_v55  ;;  %v16937_v27 = vcombine.high %v1217_v11, %v1221_v30 }
 0x451   :  { %10669 = vmatprep.subr.bf16.mxu0 %v16705_v29  ;;  %10710 = vmatprep.subr.bf16.mxu1 %v16833_v24  ;;  %v1349_v47 = vld [vmem:[#allocation2 + $0x2570] sm:$0xff]  ;;  %v17072_v24 = vcombine.low %v1353_v63, %v1357_v60  ;;  %v16936_v63 = vcombine.low %v1217_v11, %v1221_v30 }
 0x452   :  { %v1337_v62 = vld [vmem:[#allocation2 + $0x2510] sm:$0xff] }
 0x453   :  { %v1193_v30 = vld [vmem:[#allocation2 + $0x2090] sm:$0xff] }
 0x454   :  { %10670 = vmatpush2.bf16.msra.mxu0 %v16704_v43  ;;  %10711 = vmatpush2.bf16.msra.mxu1 %v16832_v19  ;;  %v17065_v43 = vcombine.high %v1345_v36, %v1349_v47  ;;  %v1209_v19 = vld [vmem:[#allocation2 + $0x2110] sm:$0xff] }
 0x455   :  { %10721 = vmatprep.subr.bf16.mxu0 %v16953_v3  ;;  %10762 = vmatprep.subr.bf16.mxu1 %v17081_v7  ;;  %v1213_v3 = vld [vmem:[#allocation2 + $0x2130] sm:$0xff] }
 0x457   :  { %v10427_v33 = vpop.f32.mrf.mxu0  ;;  %10672 = vmatmul.mubr.bf16.vlgmr.msra.gmra.mxu0 %v18437_v50  ;;  %v10468_v42 = vpop.f32.mrf.mxu1  ;;  %10713 = vmatmul.mubr.bf16.vlgmr.msra.gmra.mxu1 %v18444_v56 }
 0x458   :  { %v10428_v22 = vadd.f32 %v10427_v33, %v1708_v1  ;;  %10722 = vmatpush1.bf16.msra.mxu0 %v16952_v5  ;;  %10763 = vmatpush1.bf16.msra.mxu1 %v17080_v8  ;;  %v1341_v1 = vld [vmem:[#allocation2 + $0x2530] sm:$0xff]  ;;  %v17064_v5 = vcombine.low %v1345_v36, %v1349_v47  ;;  %v16929_v8 = vcombine.high %v1209_v19, %v1213_v3 }
 0x459   :  { %v10429_v29 = vpop.f32.mrf.mxu0  ;;  %10723 = vmatprep.subr.bf16.mxu0 %v16945_v57  ;;  %v10470_v52 = vpop.f32.mrf.mxu1  ;;  %10764 = vmatprep.subr.bf16.mxu1 %v17073_v15  ;;  %v1201_v15 = vld [vmem:[#allocation2 + $0x20d0] sm:$0xff] }
 0x45a   :  { %v18615_v41 = vadd.f32 %v10468_v42, %v10428_v22  ;;  %v10430_v0 = vadd.f32 %v10429_v29, %v1712_v35  ;;  %10753 = vmatprep.mubr.bf16.mxu0 %v18451_v4  ;;  %10794 = vmatprep.mubr.bf16.mxu1 %v18454_v9  ;;  %v17057_v35 = vcombine.high %v1337_v62, %v1341_v1  ;;  %v1205_v33 = vld [vmem:[#allocation2 + $0x20f0] sm:$0xff] }
 0x45b   :  { %v10431_v7 = vpop.f32.mrf.mxu0  ;;  %v10472_v55 = vpop.f32.mrf.mxu1  ;;  %v1329_v22 = vld [vmem:[#allocation2 + $0x24d0] sm:$0xff]  ;;  %v16928_v29 = vcombine.low %v1209_v19, %v1213_v3  ;;  %v16920_v47 = vcombine.low %v1201_v15, %v1205_v33 }
 0x45c   :  { %v18619_v12 = vadd.f32 %v10470_v52, %v10430_v0  ;;  %10724 = vmatpush1.bf16.msra.mxu0 %v16944_v23  ;;  %10765 = vmatpush1.bf16.msra.mxu1 %v17072_v24  ;;  %v1333_v42 = vld [vmem:[#allocation2 + $0x24f0] sm:$0xff]  ;;  %v17056_v0 = vcombine.low %v1337_v62, %v1341_v1  ;;  %v16921_v52 = vcombine.high %v1201_v15, %v1205_v33 }
 0x45d   :  { %v10432_v60 = vpop.f32.mrf.mxu0  ;;  %10725 = vmatprep.subr.bf16.mxu0 %v16937_v27  ;;  %v10473_v57 = vpop.f32.mrf.mxu1  ;;  %10766 = vmatprep.subr.bf16.mxu1 %v17065_v43  ;;  %v17049_v11 = vcombine.high %v1329_v22, %v1333_v42  ;;  %v1197_v23 = vld [vmem:[#allocation2 + $0x20b0] sm:$0xff]  ;;  %v17048_v27 = vcombine.low %v1329_v22, %v1333_v42 }
 0x45e   :  { %v1321_v24 = vld [vmem:[#allocation2 + $0x2490] sm:$0xff]  ;;  %v16913_v43 = vcombine.high %v1193_v30, %v1197_v23  ;;  %v16912_v62 = vcombine.low %v1193_v30, %v1197_v23 }
 0x45f   :  { %v1325_v36 = vld [vmem:[#allocation2 + $0x24b0] sm:$0xff] }
 0x460   :  { %10726 = vmatpush1.bf16.msra.mxu0 %v16936_v63  ;;  %10767 = vmatpush1.bf16.msra.mxu1 %v17064_v5  ;;  %v17041_v7 = vcombine.high %v1321_v24, %v1325_v36  ;;  %v1185_v55 = vld [vmem:[#allocation2 + $0x2050] sm:$0xff]  ;;  %v17040_v1 = vcombine.low %v1321_v24, %v1325_v36 }
 0x461   :  { %10727 = vmatprep.subr.bf16.mxu0 %v16929_v8  ;;  %10768 = vmatprep.subr.bf16.mxu1 %v17057_v35  ;;  %v1189_v19 = vld [vmem:[#allocation2 + $0x2070] sm:$0xff] }
 0x462   :  { %v1313_v3 = vld [vmem:[#allocation2 + $0x2450] sm:$0xff]  ;;  %v16905_v60 = vcombine.high %v1185_v55, %v1189_v19  ;;  %v16904_v33 = vcombine.low %v1185_v55, %v1189_v19 }
 0x463   :  { %v1317_v63 = vld [vmem:[#allocation2 + $0x2470] sm:$0xff] }
 0x464   :  { %10728 = vmatpush1.bf16.msra.mxu0 %v16928_v29  ;;  %10769 = vmatpush1.bf16.msra.mxu1 %v17056_v0  ;;  %v17033_v5 = vcombine.high %v1313_v3, %v1317_v63  ;;  %v1177_v8 = vld [vmem:[#allocation2 + $0x2010] sm:$0xff]  ;;  %v17032_v22 = vcombine.low %v1313_v3, %v1317_v63 }
 0x465   :  { %10729 = vmatprep.subr.bf16.mxu0 %v16921_v52  ;;  %10770 = vmatprep.subr.bf16.mxu1 %v17049_v11  ;;  %v1181_v57 = vld [vmem:[#allocation2 + $0x2030] sm:$0xff] }
 0x466   :  { %v1305_v35 = vld [vmem:[#allocation2 + $0x2410] sm:$0xff]  ;;  %v16897_v42 = vcombine.high %v1177_v8, %v1181_v57  ;;  %v16896_v23 = vcombine.low %v1177_v8, %v1181_v57 }
 0x467   :  { %v1309_v15 = vld [vmem:[#allocation2 + $0x2430] sm:$0xff] }
 0x468   :  { %10730 = vmatpush1.bf16.msra.mxu0 %v16920_v47  ;;  %10771 = vmatpush1.bf16.msra.mxu1 %v17048_v27  ;;  %v17025_v29 = vcombine.high %v1305_v35, %v1309_v15  ;;  %v1297_v0 = vld [vmem:[#allocation2 + $0x23d0] sm:$0xff]  ;;  %v17024_v24 = vcombine.low %v1305_v35, %v1309_v15 }
 0x469   :  { %10731 = vmatprep.subr.bf16.mxu0 %v16913_v43  ;;  %10772 = vmatprep.subr.bf16.mxu1 %v17041_v7  ;;  %v1301_v52 = vld [vmem:[#allocation2 + $0x23f0] sm:$0xff] }
 0x46a   :  { %v1425_v11 = vld [vmem:[#allocation2 + $0x27d0] sm:$0xff]  ;;  %v17017_v36 = vcombine.high %v1297_v0, %v1301_v52  ;;  %v17016_v19 = vcombine.low %v1297_v0, %v1301_v52 }
 0x46b   :  { %v1429_v30 = vld [vmem:[#allocation2 + $0x27f0] sm:$0xff] }
 0x46c   :  { %10732 = vmatpush1.bf16.msra.mxu0 %v16912_v62  ;;  %10773 = vmatpush1.bf16.msra.mxu1 %v17040_v1  ;;  %v17145_v47 = vcombine.high %v1425_v11, %v1429_v30  ;;  %v1289_v27 = vld [vmem:[#allocation2 + $0x2390] sm:$0xff]  ;;  %v17144_v3 = vcombine.low %v1425_v11, %v1429_v30 }
 0x46d   :  { %10733 = vmatprep.subr.bf16.mxu0 %v16905_v60  ;;  %10774 = vmatprep.subr.bf16.mxu1 %v17033_v5  ;;  %v1293_v43 = vld [vmem:[#allocation2 + $0x23b0] sm:$0xff] }
 0x46e   :  { %v1417_v7 = vld [vmem:[#allocation2 + $0x2790] sm:$0xff]  ;;  %v17009_v63 = vcombine.high %v1289_v27, %v1293_v43  ;;  %v17008_v57 = vcombine.low %v1289_v27, %v1293_v43 }
 0x46f   :  { %v1421_v55 = vld [vmem:[#allocation2 + $0x27b0] sm:$0xff] }
 0x470   :  { %10734 = vmatpush1.bf16.msra.mxu0 %v16904_v33  ;;  %10775 = vmatpush1.bf16.msra.mxu1 %v17032_v22  ;;  %v17137_v62 = vcombine.high %v1417_v7, %v1421_v55  ;;  %v1281_v1 = vld [vmem:[#allocation2 + $0x2350] sm:$0xff]  ;;  %v17136_v35 = vcombine.low %v1417_v7, %v1421_v55 }
 0x471   :  { %10735 = vmatprep.subr.bf16.mxu0 %v16897_v42  ;;  %10776 = vmatprep.subr.bf16.mxu1 %v17025_v29  ;;  %v1285_v60 = vld [vmem:[#allocation2 + $0x2370] sm:$0xff] }
 0x472   :  { %v1409_v5 = vld [vmem:[#allocation2 + $0x2750] sm:$0xff]  ;;  %v17001_v15 = vcombine.high %v1281_v1, %v1285_v60  ;;  %v17000_v52 = vcombine.low %v1281_v1, %v1285_v60 }
 0x473   :  { %v1413_v8 = vld [vmem:[#allocation2 + $0x2770] sm:$0xff] }
 0x474   :  { %10736 = vmatpush1.bf16.msra.mxu0 %v16896_v23  ;;  %10777 = vmatpush1.bf16.msra.mxu1 %v17024_v24  ;;  %v17129_v33 = vcombine.high %v1409_v5, %v1413_v8  ;;  %v1273_v22 = vld [vmem:[#allocation2 + $0x2310] sm:$0xff]  ;;  %v17128_v11 = vcombine.low %v1409_v5, %v1413_v8 }
 0x475   :  { %10737 = vmatprep.subr.bf16.mxu0 %v17017_v36  ;;  %10778 = vmatprep.subr.bf16.mxu1 %v17145_v47  ;;  %v1277_v42 = vld [vmem:[#allocation2 + $0x2330] sm:$0xff] }
 0x476   :  { %v1401_v29 = vld [vmem:[#allocation2 + $0x2710] sm:$0xff]  ;;  %v16993_v30 = vcombine.high %v1273_v22, %v1277_v42  ;;  %v16992_v43 = vcombine.low %v1273_v22, %v1277_v42 }
 0x477   :  { %v1405_v0 = vld [vmem:[#allocation2 + $0x2730] sm:$0xff] }
 0x478   :  { %10738 = vmatpush2.bf16.msra.mxu0 %v17016_v19  ;;  %10779 = vmatpush2.bf16.msra.mxu1 %v17144_v3  ;;  %v17121_v23 = vcombine.high %v1401_v29, %v1405_v0  ;;  %v1265_v24 = vld [vmem:[#allocation2 + $0x22d0] sm:$0xff]  ;;  %v17120_v7 = vcombine.low %v1401_v29, %v1405_v0 }
 0x479   :  { %10739 = vmatprep.subr.bf16.mxu0 %v17009_v63  ;;  %10780 = vmatprep.subr.bf16.mxu1 %v17137_v62  ;;  %v1269_v36 = vld [vmem:[#allocation2 + $0x22f0] sm:$0xff] }
 0x47a   :  { %v1393_v47 = vld [vmem:[#allocation2 + $0x26d0] sm:$0xff]  ;;  %v16985_v55 = vcombine.high %v1265_v24, %v1269_v36  ;;  %v16984_v60 = vcombine.low %v1265_v24, %v1269_v36 }
 0x47b   :  { %v1397_v27 = vld [vmem:[#allocation2 + $0x26f0] sm:$0xff] }
 0x47c   :  { %10740 = vmatpush2.bf16.msra.mxu0 %v17008_v57  ;;  %10781 = vmatpush2.bf16.msra.mxu1 %v17136_v35  ;;  %v17113_v19 = vcombine.high %v1393_v47, %v1397_v27  ;;  %v1257_v3 = vld [vmem:[#allocation2 + $0x2290] sm:$0xff]  ;;  %v17112_v5 = vcombine.low %v1393_v47, %v1397_v27 }
 0x47d   :  { %10741 = vmatprep.subr.bf16.mxu0 %v17001_v15  ;;  %10782 = vmatprep.subr.bf16.mxu1 %v17129_v33  ;;  %v1261_v63 = vld [vmem:[#allocation2 + $0x22b0] sm:$0xff] }
 0x47e   :  { %v1385_v62 = vld [vmem:[#allocation2 + $0x2690] sm:$0xff]  ;;  %v16977_v8 = vcombine.high %v1257_v3, %v1261_v63  ;;  %v16976_v42 = vcombine.low %v1257_v3, %v1261_v63 }
 0x47f   :  { %v1389_v1 = vld [vmem:[#allocation2 + $0x26b0] sm:$0xff] }
 0x480   :  { %10742 = vmatpush2.bf16.msra.mxu0 %v17000_v52  ;;  %10783 = vmatpush2.bf16.msra.mxu1 %v17128_v11  ;;  %v17105_v57 = vcombine.high %v1385_v62, %v1389_v1  ;;  %v1249_v35 = vld [vmem:[#allocation2 + $0x2250] sm:$0xff]  ;;  %v17104_v29 = vcombine.low %v1385_v62, %v1389_v1 }
 0x481   :  { %10743 = vmatprep.subr.bf16.mxu0 %v16993_v30  ;;  %10784 = vmatprep.subr.bf16.mxu1 %v17121_v23  ;;  %v1253_v15 = vld [vmem:[#allocation2 + $0x2270] sm:$0xff] }
 0x482   :  { %v1377_v33 = vld [vmem:[#allocation2 + $0x2650] sm:$0xff]  ;;  %v16969_v0 = vcombine.high %v1249_v35, %v1253_v15  ;;  %v16968_v36 = vcombine.low %v1249_v35, %v1253_v15 }
 0x483   :  { %v1381_v22 = vld [vmem:[#allocation2 + $0x2670] sm:$0xff] }
 0x484   :  { %10744 = vmatpush2.bf16.msra.mxu0 %v16992_v43  ;;  %10785 = vmatpush2.bf16.msra.mxu1 %v17120_v7  ;;  %v17097_v52 = vcombine.high %v1377_v33, %v1381_v22  ;;  %v1241_v11 = vld [vmem:[#allocation2 + $0x2210] sm:$0xff]  ;;  %v17096_v47 = vcombine.low %v1377_v33, %v1381_v22 }
 0x485   :  { %10745 = vmatprep.subr.bf16.mxu0 %v16985_v55  ;;  %10786 = vmatprep.subr.bf16.mxu1 %v17113_v19  ;;  %v1245_v30 = vld [vmem:[#allocation2 + $0x2230] sm:$0xff] }
 0x486   :  { %v1369_v23 = vld [vmem:[#allocation2 + $0x2610] sm:$0xff]  ;;  %v16961_v27 = vcombine.high %v1241_v11, %v1245_v30  ;;  %v16960_v63 = vcombine.low %v1241_v11, %v1245_v30 }
 0x487   :  { %v1373_v24 = vld [vmem:[#allocation2 + $0x2630] sm:$0xff] }
 0x488   :  { %10746 = vmatpush2.bf16.msra.mxu0 %v16984_v60  ;;  %10787 = vmatpush2.bf16.msra.mxu1 %v17112_v5  ;;  %v17089_v43 = vcombine.high %v1369_v23, %v1373_v24  ;;  %v1489_v7 = vld [vmem:[#allocation2 + $0x29d0] sm:$0xff]  ;;  %v17088_v62 = vcombine.low %v1369_v23, %v1373_v24 }
 0x489   :  { %10747 = vmatprep.subr.bf16.mxu0 %v16977_v8  ;;  %10788 = vmatprep.subr.bf16.mxu1 %v17105_v57  ;;  %v1493_v55 = vld [vmem:[#allocation2 + $0x29f0] sm:$0xff] }
 0x48a   :  { %v1617_v19 = vld [vmem:[#allocation2 + $0x2dd0] sm:$0xff]  ;;  %v17209_v1 = vcombine.high %v1489_v7, %v1493_v55  ;;  %v17208_v15 = vcombine.low %v1489_v7, %v1493_v55 }
 0x48b   :  { %v1621_v3 = vld [vmem:[#allocation2 + $0x2df0] sm:$0xff] }
 0x48c   :  { %10748 = vmatpush2.bf16.msra.mxu0 %v16976_v42  ;;  %10789 = vmatpush2.bf16.msra.mxu1 %v17104_v29  ;;  %v17337_v60 = vcombine.high %v1617_v19, %v1621_v3  ;;  %v1481_v5 = vld [vmem:[#allocation2 + $0x2990] sm:$0xff]  ;;  %v17336_v33 = vcombine.low %v1617_v19, %v1621_v3 }
 0x48d   :  { %10749 = vmatprep.subr.bf16.mxu0 %v16969_v0  ;;  %10790 = vmatprep.subr.bf16.mxu1 %v17097_v52  ;;  %v1485_v8 = vld [vmem:[#allocation2 + $0x29b0] sm:$0xff] }
 0x48e   :  { %v1609_v57 = vld [vmem:[#allocation2 + $0x2d90] sm:$0xff]  ;;  %v17201_v22 = vcombine.high %v1481_v5, %v1485_v8 }
 0x48f   :  { %v1613_v35 = vld [vmem:[#allocation2 + $0x2db0] sm:$0xff] }
 0x490   :  { %10750 = vmatpush2.bf16.msra.mxu0 %v16968_v36  ;;  %10791 = vmatpush2.bf16.msra.mxu1 %v17096_v47  ;;  %v17329_v42 = vcombine.high %v1609_v57, %v1613_v35  ;;  %v1473_v29 = vld [vmem:[#allocation2 + $0x2950] sm:$0xff]  ;;  %v17200_v36 = vcombine.low %v1481_v5, %v1485_v8 }
 0x491   :  { %10751 = vmatprep.subr.bf16.mxu0 %v16961_v27  ;;  %10792 = vmatprep.subr.bf16.mxu1 %v17089_v43  ;;  %v1477_v0 = vld [vmem:[#allocation2 + $0x2970] sm:$0xff]  ;;  %v17328_v27 = vcombine.low %v1609_v57, %v1613_v35 }
 0x492   :  { %v1601_v11 = vld [vmem:[#allocation2 + $0x2d50] sm:$0xff]  ;;  %v17193_v43 = vcombine.high %v1473_v29, %v1477_v0  ;;  %v17192_v57 = vcombine.low %v1473_v29, %v1477_v0 }
 0x493   :  { %v1605_v30 = vld [vmem:[#allocation2 + $0x2d70] sm:$0xff] }
 0x494   :  { %10752 = vmatpush2.bf16.msra.mxu0 %v16960_v63  ;;  %10793 = vmatpush2.bf16.msra.mxu1 %v17088_v62  ;;  %v17321_v3 = vcombine.high %v1601_v11, %v1605_v30  ;;  %v1465_v63 = vld [vmem:[#allocation2 + $0x2910] sm:$0xff] }
 0x495   :  { %10803 = vmatprep.subr.bf16.mxu0 %v17209_v1  ;;  %10844 = vmatprep.subr.bf16.mxu1 %v17337_v60  ;;  %v1469_v62 = vld [vmem:[#allocation2 + $0x2930] sm:$0xff] }
 0x496   :  { %v1593_v1 = vld [vmem:[#allocation2 + $0x2d10] sm:$0xff] }
 0x497   :  { %v10509_v52 = vpop.f32.mrf.mxu0  ;;  %10754 = vmatmul.mubr.bf16.vlgmr.msra.gmra.mxu0 %v18469_v21  ;;  %v10550_v24 = vpop.f32.mrf.mxu1  ;;  %10795 = vmatmul.mubr.bf16.vlgmr.msra.gmra.mxu1 %v18474_v25  ;;  %v1597_v60 = vld [vmem:[#allocation2 + $0x2d30] sm:$0xff] }
 0x498   :  { %v10510_v23 = vadd.f32 %v10509_v52, %v18615_v41  ;;  %10804 = vmatpush1.bf16.msra.mxu0 %v17208_v15  ;;  %10845 = vmatpush1.bf16.msra.mxu1 %v17336_v33  ;;  %v17185_v15 = vcombine.high %v1465_v63, %v1469_v62  ;;  %v1461_v52 = vld [vmem:[#allocation2 + $0x28f0] sm:$0xff] }
 0x499   :  { %v10511_v47 = vpop.f32.mrf.mxu0  ;;  %10805 = vmatprep.subr.bf16.mxu0 %v17201_v22  ;;  %v10552_v19 = vpop.f32.mrf.mxu1  ;;  %10846 = vmatprep.subr.bf16.mxu1 %v17329_v42  ;;  %v17313_v22 = vcombine.high %v1593_v1, %v1597_v60  ;;  %v1457_v42 = vld [vmem:[#allocation2 + $0x28d0] sm:$0xff] }
 0x49a   :  { %v18624_v7 = vadd.f32 %v10550_v24, %v10510_v23  ;;  %v10512_v55 = vadd.f32 %v10511_v47, %v18619_v12  ;;  %10835 = vmatprep.mubr.bf16.mxu0 %v18479_v38  ;;  %10876 = vmatprep.mubr.bf16.mxu1 %v18482_v44  ;;  %v17320_v12 = vcombine.low %v1601_v11, %v1605_v30  ;;  %v1585_v23 = vld [vmem:[#allocation2 + $0x2cd0] sm:$0xff] }
 0x49b   :  { %v10513_v41 = vpop.f32.mrf.mxu0  ;;  %v10554_v8 = vpop.f32.mrf.mxu1  ;;  %v1589_v24 = vld [vmem:[#allocation2 + $0x2cf0] sm:$0xff]  ;;  %v17184_v47 = vcombine.low %v1465_v63, %v1469_v62  ;;  %v17176_v30 = vcombine.low %v1457_v42, %v1461_v52 }
 0x49c   :  { %v18629_v5 = vadd.f32 %v10552_v19, %v10512_v55  ;;  %10806 = vmatpush1.bf16.msra.mxu0 %v17200_v36  ;;  %10847 = vmatpush1.bf16.msra.mxu1 %v17328_v27  ;;  %v17312_v55 = vcombine.low %v1593_v1, %v1597_v60  ;;  %v17177_v19 = vcombine.high %v1457_v42, %v1461_v52  ;;  %v1449_v0 = vld [vmem:[#allocation2 + $0x2890] sm:$0xff] }
 0x49d   :  { %v10514_v35 = vpop.f32.mrf.mxu0  ;;  %10807 = vmatprep.subr.bf16.mxu0 %v17193_v43  ;;  %v10555_v33 = vpop.f32.mrf.mxu1  ;;  %10848 = vmatprep.subr.bf16.mxu1 %v17321_v3  ;;  %v17305_v29 = vcombine.high %v1585_v23, %v1589_v24  ;;  %v1453_v36 = vld [vmem:[#allocation2 + $0x28b0] sm:$0xff]  ;;  %v17304_v43 = vcombine.low %v1585_v23, %v1589_v24 }
 0x49e   :  { %v1577_v27 = vld [vmem:[#allocation2 + $0x2c90] sm:$0xff]  ;;  %v17169_v3 = vcombine.high %v1449_v0, %v1453_v36  ;;  %v17168_v1 = vcombine.low %v1449_v0, %v1453_v36 }
 0x49f   :  { %v1581_v11 = vld [vmem:[#allocation2 + $0x2cb0] sm:$0xff] }
 0x4a0   :  { %10808 = vmatpush1.bf16.msra.mxu0 %v17192_v57  ;;  %10849 = vmatpush1.bf16.msra.mxu1 %v17320_v12  ;;  %v17297_v41 = vcombine.high %v1577_v27, %v1581_v11  ;;  %v1441_v8 = vld [vmem:[#allocation2 + $0x2850] sm:$0xff]  ;;  %v17296_v60 = vcombine.low %v1577_v27, %v1581_v11 }
 0x4a1   :  { %10809 = vmatprep.subr.bf16.mxu0 %v17185_v15  ;;  %10850 = vmatprep.subr.bf16.mxu1 %v17313_v22  ;;  %v1445_v63 = vld [vmem:[#allocation2 + $0x2870] sm:$0xff] }
 0x4a2   :  { %v1569_v62 = vld [vmem:[#allocation2 + $0x2c50] sm:$0xff]  ;;  %v17161_v35 = vcombine.high %v1441_v8, %v1445_v63  ;;  %v17160_v52 = vcombine.low %v1441_v8, %v1445_v63 }
 0x4a3   :  { %v1573_v57 = vld [vmem:[#allocation2 + $0x2c70] sm:$0xff] }
 0x4a4   :  { %10810 = vmatpush1.bf16.msra.mxu0 %v17184_v47  ;;  %10851 = vmatpush1.bf16.msra.mxu1 %v17312_v55  ;;  %v17289_v12 = vcombine.high %v1569_v62, %v1573_v57  ;;  %v1433_v15 = vld [vmem:[#allocation2 + $0x2810] sm:$0xff]  ;;  %v17288_v23 = vcombine.low %v1569_v62, %v1573_v57 }
 0x4a5   :  { %10811 = vmatprep.subr.bf16.mxu0 %v17177_v19  ;;  %10852 = vmatprep.subr.bf16.mxu1 %v17305_v29  ;;  %v1437_v33 = vld [vmem:[#allocation2 + $0x2830] sm:$0xff] }
 0x4a6   :  { %v1561_v22 = vld [vmem:[#allocation2 + $0x2c10] sm:$0xff]  ;;  %v17153_v24 = vcombine.high %v1433_v15, %v1437_v33  ;;  %v17152_v36 = vcombine.low %v1433_v15, %v1437_v33 }
 0x4a7   :  { %v1565_v42 = vld [vmem:[#allocation2 + $0x2c30] sm:$0xff] }
 0x4a8   :  { %10812 = vmatpush1.bf16.msra.mxu0 %v17176_v30  ;;  %10853 = vmatpush1.bf16.msra.mxu1 %v17304_v43  ;;  %v17281_v47 = vcombine.high %v1561_v22, %v1565_v42  ;;  %v1553_v55 = vld [vmem:[#allocation2 + $0x2bd0] sm:$0xff]  ;;  %v17280_v27 = vcombine.low %v1561_v22, %v1565_v42 }
 0x4a9   :  { %10813 = vmatprep.subr.bf16.mxu0 %v17169_v3  ;;  %10854 = vmatprep.subr.bf16.mxu1 %v17297_v41  ;;  %v1557_v19 = vld [vmem:[#allocation2 + $0x2bf0] sm:$0xff] }
 0x4aa   :  { %v1681_v29 = vld [vmem:[#allocation2 + $0x2fd0] sm:$0xff]  ;;  %v17273_v11 = vcombine.high %v1553_v55, %v1557_v19  ;;  %v17272_v63 = vcombine.low %v1553_v55, %v1557_v19 }
 0x4ab   :  { %v1685_v0 = vld [vmem:[#allocation2 + $0x2ff0] sm:$0xff] }
 0x4ac   :  { %10814 = vmatpush1.bf16.msra.mxu0 %v17168_v1  ;;  %10855 = vmatpush1.bf16.msra.mxu1 %v17296_v60  ;;  %v17401_v30 = vcombine.high %v1681_v29, %v1685_v0  ;;  %v1545_v43 = vld [vmem:[#allocation2 + $0x2b90] sm:$0xff]  ;;  %v17400_v62 = vcombine.low %v1681_v29, %v1685_v0 }
 0x4ad   :  { %10815 = vmatprep.subr.bf16.mxu0 %v17161_v35  ;;  %10856 = vmatprep.subr.bf16.mxu1 %v17289_v12  ;;  %v1549_v3 = vld [vmem:[#allocation2 + $0x2bb0] sm:$0xff] }
 0x4ae   :  { %v1673_v41 = vld [vmem:[#allocation2 + $0x2f90] sm:$0xff]  ;;  %v17265_v57 = vcombine.high %v1545_v43, %v1549_v3  ;;  %v17264_v33 = vcombine.low %v1545_v43, %v1549_v3 }
 0x4af   :  { %v1677_v8 = vld [vmem:[#allocation2 + $0x2fb0] sm:$0xff] }
 0x4b0   :  { %10816 = vmatpush1.bf16.msra.mxu0 %v17160_v52  ;;  %10857 = vmatpush1.bf16.msra.mxu1 %v17288_v23  ;;  %v17393_v1 = vcombine.high %v1673_v41, %v1677_v8  ;;  %v1537_v60 = vld [vmem:[#allocation2 + $0x2b50] sm:$0xff]  ;;  %v17392_v22 = vcombine.low %v1673_v41, %v1677_v8 }
 0x4b1   :  { %10817 = vmatprep.subr.bf16.mxu0 %v17153_v24  ;;  %10858 = vmatprep.subr.bf16.mxu1 %v17281_v47  ;;  %v1541_v35 = vld [vmem:[#allocation2 + $0x2b70] sm:$0xff] }
 0x4b2   :  { %v1665_v12 = vld [vmem:[#allocation2 + $0x2f50] sm:$0xff]  ;;  %v17257_v42 = vcombine.high %v1537_v60, %v1541_v35  ;;  %v17256_v19 = vcombine.low %v1537_v60, %v1541_v35 }
 0x4b3   :  { %v1669_v15 = vld [vmem:[#allocation2 + $0x2f70] sm:$0xff] }
 0x4b4   :  { %10818 = vmatpush1.bf16.msra.mxu0 %v17152_v36  ;;  %10859 = vmatpush1.bf16.msra.mxu1 %v17280_v27  ;;  %v17385_v52 = vcombine.high %v1665_v12, %v1669_v15  ;;  %v1529_v23 = vld [vmem:[#allocation2 + $0x2b10] sm:$0xff]  ;;  %v17384_v29 = vcombine.low %v1665_v12, %v1669_v15 }
 0x4b5   :  { %10819 = vmatprep.subr.bf16.mxu0 %v17273_v11  ;;  %10860 = vmatprep.subr.bf16.mxu1 %v17401_v30  ;;  %v1533_v24 = vld [vmem:[#allocation2 + $0x2b30] sm:$0xff] }
 0x4b6   :  { %v1657_v47 = vld [vmem:[#allocation2 + $0x2f10] sm:$0xff]  ;;  %v17249_v0 = vcombine.high %v1529_v23, %v1533_v24  ;;  %v17248_v3 = vcombine.low %v1529_v23, %v1533_v24 }
 0x4b7   :  { %v1661_v55 = vld [vmem:[#allocation2 + $0x2f30] sm:$0xff] }
 0x4b8   :  { %10820 = vmatpush2.bf16.msra.mxu0 %v17272_v63  ;;  %10861 = vmatpush2.bf16.msra.mxu1 %v17400_v62  ;;  %v17377_v36 = vcombine.high %v1657_v47, %v1661_v55  ;;  %v1521_v27 = vld [vmem:[#allocation2 + $0x2ad0] sm:$0xff]  ;;  %v17376_v41 = vcombine.low %v1657_v47, %v1661_v55 }
 0x4b9   :  { %10821 = vmatprep.subr.bf16.mxu0 %v17265_v57  ;;  %10862 = vmatprep.subr.bf16.mxu1 %v17393_v1  ;;  %v1525_v11 = vld [vmem:[#allocation2 + $0x2af0] sm:$0xff] }
 0x4ba   :  { %v1649_v30 = vld [vmem:[#allocation2 + $0x2ed0] sm:$0xff]  ;;  %v17241_v8 = vcombine.high %v1521_v27, %v1525_v11  ;;  %v17240_v35 = vcombine.low %v1521_v27, %v1525_v11 }
 0x4bb   :  { %v1653_v43 = vld [vmem:[#allocation2 + $0x2ef0] sm:$0xff] }
 0x4bc   :  { %10822 = vmatpush2.bf16.msra.mxu0 %v17264_v33  ;;  %10863 = vmatpush2.bf16.msra.mxu1 %v17392_v22  ;;  %v17369_v63 = vcombine.high %v1649_v30, %v1653_v43  ;;  %v1513_v62 = vld [vmem:[#allocation2 + $0x2a90] sm:$0xff]  ;;  %v17368_v12 = vcombine.low %v1649_v30, %v1653_v43 }
 0x4bd   :  { %10823 = vmatprep.subr.bf16.mxu0 %v17257_v42  ;;  %10864 = vmatprep.subr.bf16.mxu1 %v17385_v52  ;;  %v1517_v57 = vld [vmem:[#allocation2 + $0x2ab0] sm:$0xff] }
 0x4be   :  { %v1641_v1 = vld [vmem:[#allocation2 + $0x2e90] sm:$0xff]  ;;  %v17233_v15 = vcombine.high %v1513_v62, %v1517_v57  ;;  %v17232_v24 = vcombine.low %v1513_v62, %v1517_v57  ;;  %v342_v62 = vld [vmem:[#allocation2 + $0x5f8] sm:$0xff] }
 0x4bf   :  { %v1645_v60 = vld [vmem:[#allocation2 + $0x2eb0] sm:$0xff] }
 0x4c0   :  { %10824 = vmatpush2.bf16.msra.mxu0 %v17256_v19  ;;  %10865 = vmatpush2.bf16.msra.mxu1 %v17384_v29  ;;  %v17361_v33 = vcombine.high %v1641_v1, %v1645_v60  ;;  %v1505_v22 = vld [vmem:[#allocation2 + $0x2a50] sm:$0xff]  ;;  %v17360_v47 = vcombine.low %v1641_v1, %v1645_v60 }
 0x4c1   :  { %10825 = vmatprep.subr.bf16.mxu0 %v17249_v0  ;;  %10866 = vmatprep.subr.bf16.mxu1 %v17377_v36  ;;  %v1509_v42 = vld [vmem:[#allocation2 + $0x2a70] sm:$0xff] }
 0x4c2   :  { %v1633_v52 = vld [vmem:[#allocation2 + $0x2e50] sm:$0xff]  ;;  %v17225_v55 = vcombine.high %v1505_v22, %v1509_v42  ;;  %v17224_v11 = vcombine.low %v1505_v22, %v1509_v42  ;;  %v334_v22 = vld [vmem:[#allocation2 + $0x5b8] sm:$0xff] }
 0x4c3   :  { %v1637_v23 = vld [vmem:[#allocation2 + $0x2e70] sm:$0xff] }
 0x4c4   :  { %10826 = vmatpush2.bf16.msra.mxu0 %v17248_v3  ;;  %10867 = vmatpush2.bf16.msra.mxu1 %v17376_v41  ;;  %v17353_v19 = vcombine.high %v1633_v52, %v1637_v23  ;;  %v1497_v29 = vld [vmem:[#allocation2 + $0x2a10] sm:$0xff]  ;;  %v17352_v30 = vcombine.low %v1633_v52, %v1637_v23  ;;  %v210_v41 = vld [vmem:[#allocation2 + $0x1d8] sm:$0xff] }
 0x4c5   :  { %10827 = vmatprep.subr.bf16.mxu0 %v17241_v8  ;;  %10868 = vmatprep.subr.bf16.mxu1 %v17369_v63  ;;  %v1501_v0 = vld [vmem:[#allocation2 + $0x2a30] sm:$0xff]  ;;  %v214_v8 = vld [vmem:[#allocation2 + $0x1f8] sm:$0xff] }
 0x4c6   :  { %v1625_v36 = vld [vmem:[#allocation2 + $0x2e10] sm:$0xff]  ;;  %v17217_v43 = vcombine.high %v1497_v29, %v1501_v0  ;;  %v338_v63 = vld [vmem:[#allocation2 + $0x5d8] sm:$0xff]  ;;  %v17216_v57 = vcombine.low %v1497_v29, %v1501_v0  ;;  %v15931_v60 = vcombine.high %v210_v41, %v214_v8  ;;  %v15930_v42 = vcombine.low %v210_v41, %v214_v8 }
 0x4c7   :  { %v1629_v27 = vld [vmem:[#allocation2 + $0x2e30] sm:$0xff]  ;;  %v16058_v52 = vcombine.low %v338_v63, %v342_v62  ;;  %v322_v29 = vld [vmem:[#allocation2 + $0x558] sm:$0xff] }
 0x4c8   :  { %10828 = vmatpush2.bf16.msra.mxu0 %v17240_v35  ;;  %10869 = vmatpush2.bf16.msra.mxu1 %v17368_v12  ;;  %v17345_v3 = vcombine.high %v1625_v36, %v1629_v27  ;;  %v17344_v1 = vcombine.low %v1625_v36, %v1629_v27  ;;  %v16059_v35 = vcombine.high %v338_v63, %v342_v62  ;;  %v202_v12 = vld [vmem:[#allocation2 + $0x198] sm:$0xff] }
 0x4c9   :  { %10829 = vmatprep.subr.bf16.mxu0 %v17233_v15  ;;  %10870 = vmatprep.subr.bf16.mxu1 %v17361_v33  ;;  %v206_v15 = vld [vmem:[#allocation2 + $0x1b8] sm:$0xff] }
 0x4ca   :  { %v330_v33 = vld [vmem:[#allocation2 + $0x598] sm:$0xff]  ;;  %v15923_v23 = vcombine.high %v202_v12, %v206_v15 }
 0x4cb   :  { %v326_v0 = vld [vmem:[#allocation2 + $0x578] sm:$0xff] }
 0x4cc   :  { %10830 = vmatpush2.bf16.msra.mxu0 %v17232_v24  ;;  %10871 = vmatpush2.bf16.msra.mxu1 %v17360_v47  ;;  %v16051_v24 = vcombine.high %v330_v33, %v334_v22  ;;  %v194_v47 = vld [vmem:[#allocation2 + $0x158] sm:$0xff]  ;;  %v16043_v62 = vcombine.high %v322_v29, %v326_v0 }
 0x4cd   :  { %10831 = vmatprep.subr.bf16.mxu0 %v17225_v55  ;;  %10872 = vmatprep.subr.bf16.mxu1 %v17353_v19  ;;  %v198_v55 = vld [vmem:[#allocation2 + $0x178] sm:$0xff] }
 0x4d0   :  { %10832 = vmatpush2.bf16.msra.mxu0 %v17224_v11  ;;  %10873 = vmatpush2.bf16.msra.mxu1 %v17352_v30  ;;  %v15922_v11 = vcombine.low %v202_v12, %v206_v15 }
 0x4d1   :  { %10833 = vmatprep.subr.bf16.mxu0 %v17217_v43  ;;  %10874 = vmatprep.subr.bf16.mxu1 %v17345_v3  ;;  %v16050_v43 = vcombine.low %v330_v33, %v334_v22  ;;  %v15915_v3 = vcombine.high %v194_v47, %v198_v55  ;;  %v15914_v33 = vcombine.low %v194_v47, %v198_v55  ;;  %v170_v55 = vld [vmem:[#allocation2 + $0x98] sm:$0xff] }
 0x4d4   :  { %10834 = vmatpush2.bf16.msra.mxu0 %v17216_v57  ;;  %10875 = vmatpush2.bf16.msra.mxu1 %v17344_v1  ;;  %v186_v57 = vld [vmem:[#allocation2 + $0x118] sm:$0xff] }
 0x4d5   :  { %10885 = vmatprep.subr.bf16.mxu0 %v15931_v60  ;;  %10926 = vmatprep.subr.bf16.mxu1 %v16059_v35  ;;  %v190_v1 = vld [vmem:[#allocation2 + $0x138] sm:$0xff] }
 0x4d6   :  { %v314_v60 = vld [vmem:[#allocation2 + $0x518] sm:$0xff] }
 0x4d7   :  { %v10591_v19 = vpop.f32.mrf.mxu0  ;;  %10836 = vmatmul.mubr.bf16.vlgmr.msra.gmra.mxu0 %v18499_v10  ;;  %v10632_v27 = vpop.f32.mrf.mxu1  ;;  %10877 = vmatmul.mubr.bf16.vlgmr.msra.gmra.mxu1 %v18501_v13  ;;  %v318_v35 = vld [vmem:[#allocation2 + $0x538] sm:$0xff] }
 0x4d8   :  { %v10592_v36 = vadd.f32 %v10591_v19, %v18624_v7  ;;  %10886 = vmatpush1.bf16.msra.mxu0 %v15930_v42  ;;  %10927 = vmatpush1.bf16.msra.mxu1 %v16058_v52  ;;  %v15907_v42 = vcombine.high %v186_v57, %v190_v1  ;;  %v306_v19 = vld [vmem:[#allocation2 + $0x4d8] sm:$0xff] }
 0x4d9   :  { %v10593_v30 = vpop.f32.mrf.mxu0  ;;  %10887 = vmatprep.subr.bf16.mxu0 %v15923_v23  ;;  %v10634_v63 = vpop.f32.mrf.mxu1  ;;  %10928 = vmatprep.subr.bf16.mxu1 %v16051_v24  ;;  %v16035_v23 = vcombine.high %v314_v60, %v318_v35  ;;  %v178_v24 = vld [vmem:[#allocation2 + $0xd8] sm:$0xff] }
 0x4da   :  { %v18634_v41 = vadd.f32 %v10632_v27, %v10592_v36  ;;  %v10594_v8 = vadd.f32 %v10593_v30, %v18629_v5  ;;  %10917 = vmatprep.mubr.bf16.mxu0 %v18349_v58  ;;  %10958 = vmatprep.mubr.bf16.mxu1 %v18351_v59  ;;  %v16042_v5 = vcombine.low %v322_v29, %v326_v0  ;;  %v182_v58 = vld [vmem:[#allocation2 + $0xf8] sm:$0xff] }
 0x4db   :  { %v10595_v7 = vpop.f32.mrf.mxu0  ;;  %v10636_v15 = vpop.f32.mrf.mxu1  ;;  %v310_v36 = vld [vmem:[#allocation2 + $0x4f8] sm:$0xff]  ;;  %v15906_v27 = vcombine.low %v186_v57, %v190_v1  ;;  %v16034_v59 = vcombine.low %v314_v60, %v318_v35  ;;  %v15899_v30 = vcombine.high %v178_v24, %v182_v58  ;;  %v15898_v0 = vcombine.low %v178_v24, %v182_v58 }
 0x4dc   :  { %v18639_v12 = vadd.f32 %v10634_v63, %v10594_v8  ;;  %10888 = vmatpush1.bf16.msra.mxu0 %v15922_v11  ;;  %10929 = vmatpush1.bf16.msra.mxu1 %v16050_v43  ;;  %v16027_v47 = vcombine.high %v306_v19, %v310_v36  ;;  %v174_v11 = vld [vmem:[#allocation2 + $0xb8] sm:$0xff] }
 0x4dd   :  { %v10596_v22 = vpop.f32.mrf.mxu0  ;;  %10889 = vmatprep.subr.bf16.mxu0 %v15915_v3  ;;  %v10637_v52 = vpop.f32.mrf.mxu1  ;;  %10930 = vmatprep.subr.bf16.mxu1 %v16043_v62  ;;  %v298_v43 = vld [vmem:[#allocation2 + $0x498] sm:$0xff]  ;;  %v16026_v3 = vcombine.low %v306_v19, %v310_v36  ;;  %v15891_v8 = vcombine.high %v170_v55, %v174_v11  ;;  %v15890_v60 = vcombine.low %v170_v55, %v174_v11 }
 0x4de   :  { %v302_v29 = vld [vmem:[#allocation2 + $0x4b8] sm:$0xff] }
 0x4df   :  { %v16019_v63 = vcombine.high %v298_v43, %v302_v29  ;;  %v162_v62 = vld [vmem:[#allocation2 + $0x58] sm:$0xff]  ;;  %v16018_v35 = vcombine.low %v298_v43, %v302_v29 }
 0x4e0   :  { %10890 = vmatpush1.bf16.msra.mxu0 %v15914_v33  ;;  %10931 = vmatpush1.bf16.msra.mxu1 %v16042_v5  ;;  %v166_v57 = vld [vmem:[#allocation2 + $0x78] sm:$0xff] }
 0x4e1   :  { %10891 = vmatprep.subr.bf16.mxu0 %v15907_v42  ;;  %10932 = vmatprep.subr.bf16.mxu1 %v16035_v23  ;;  %v290_v1 = vld [vmem:[#allocation2 + $0x458] sm:$0xff]  ;;  %v15883_v15 = vcombine.high %v162_v62, %v166_v57  ;;  %v15882_v23 = vcombine.low %v162_v62, %v166_v57 }
 0x4e2   :  { %v294_v7 = vld [vmem:[#allocation2 + $0x478] sm:$0xff] }
 0x4e3   :  { %v16011_v33 = vcombine.high %v290_v1, %v294_v7  ;;  %v154_v22 = vld [vmem:[#allocation2 + $0x18] sm:$0xff]  ;;  %v16010_v24 = vcombine.low %v290_v1, %v294_v7 }
 0x4e4   :  { %10892 = vmatpush1.bf16.msra.mxu0 %v15906_v27  ;;  %10933 = vmatpush1.bf16.msra.mxu1 %v16034_v59  ;;  %v158_v5 = vld [vmem:[#allocation2 + $0x38] sm:$0xff] }
 0x4e5   :  { %10893 = vmatprep.subr.bf16.mxu0 %v15899_v30  ;;  %10934 = vmatprep.subr.bf16.mxu1 %v16027_v47  ;;  %v282_v42 = vld [vmem:[#allocation2 + $0x418] sm:$0xff]  ;;  %v15875_v58 = vcombine.high %v154_v22, %v158_v5  ;;  %v15874_v47 = vcombine.low %v154_v22, %v158_v5 }
 0x4e6   :  { %v286_v52 = vld [vmem:[#allocation2 + $0x438] sm:$0xff] }
 0x4e7   :  { %v16003_v19 = vcombine.high %v282_v42, %v286_v52  ;;  %v274_v36 = vld [vmem:[#allocation2 + $0x3d8] sm:$0xff]  ;;  %v16002_v55 = vcombine.low %v282_v42, %v286_v52 }
 0x4e8   :  { %10894 = vmatpush1.bf16.msra.mxu0 %v15898_v0  ;;  %10935 = vmatpush1.bf16.msra.mxu1 %v16026_v3  ;;  %v278_v27 = vld [vmem:[#allocation2 + $0x3f8] sm:$0xff] }
 0x4e9   :  { %10895 = vmatprep.subr.bf16.mxu0 %v15891_v8  ;;  %10936 = vmatprep.subr.bf16.mxu1 %v16019_v63  ;;  %v402_v59 = vld [vmem:[#allocation2 + $0x7d8] sm:$0xff]  ;;  %v15995_v11 = vcombine.high %v274_v36, %v278_v27  ;;  %v15994_v63 = vcombine.low %v274_v36, %v278_v27 }
 0x4ea   :  { %v406_v30 = vld [vmem:[#allocation2 + $0x7f8] sm:$0xff] }
 0x4eb   :  { %v16123_v43 = vcombine.high %v402_v59, %v406_v30  ;;  %v266_v29 = vld [vmem:[#allocation2 + $0x398] sm:$0xff]  ;;  %v16122_v62 = vcombine.low %v402_v59, %v406_v30 }
 0x4ec   :  { %10896 = vmatpush1.bf16.msra.mxu0 %v15890_v60  ;;  %10937 = vmatpush1.bf16.msra.mxu1 %v16018_v35  ;;  %v270_v0 = vld [vmem:[#allocation2 + $0x3b8] sm:$0xff] }
 0x4ed   :  { %10897 = vmatprep.subr.bf16.mxu0 %v15883_v15  ;;  %10938 = vmatprep.subr.bf16.mxu1 %v16011_v33  ;;  %v394_v3 = vld [vmem:[#allocation2 + $0x798] sm:$0xff]  ;;  %v15987_v57 = vcombine.high %v266_v29, %v270_v0  ;;  %v15986_v33 = vcombine.low %v266_v29, %v270_v0 }
 0x4ee   :  { %v398_v8 = vld [vmem:[#allocation2 + $0x7b8] sm:$0xff] }
 0x4ef   :  { %v16115_v1 = vcombine.high %v394_v3, %v398_v8  ;;  %v258_v7 = vld [vmem:[#allocation2 + $0x358] sm:$0xff]  ;;  %v16114_v22 = vcombine.low %v394_v3, %v398_v8 }
 0x4f0   :  { %10898 = vmatpush1.bf16.msra.mxu0 %v15882_v23  ;;  %10939 = vmatpush1.bf16.msra.mxu1 %v16010_v24  ;;  %v262_v60 = vld [vmem:[#allocation2 + $0x378] sm:$0xff] }
 0x4f1   :  { %10899 = vmatprep.subr.bf16.mxu0 %v15875_v58  ;;  %10940 = vmatprep.subr.bf16.mxu1 %v16003_v19  ;;  %v386_v35 = vld [vmem:[#allocation2 + $0x758] sm:$0xff]  ;;  %v15979_v5 = vcombine.high %v258_v7, %v262_v60  ;;  %v15978_v19 = vcombine.low %v258_v7, %v262_v60 }
 0x4f2   :  { %v390_v15 = vld [vmem:[#allocation2 + $0x778] sm:$0xff] }
 0x4f3   :  { %v16107_v42 = vcombine.high %v386_v35, %v390_v15  ;;  %v250_v52 = vld [vmem:[#allocation2 + $0x318] sm:$0xff]  ;;  %v16106_v36 = vcombine.low %v386_v35, %v390_v15 }
 0x4f4   :  { %10900 = vmatpush1.bf16.msra.mxu0 %v15874_v47  ;;  %10941 = vmatpush1.bf16.msra.mxu1 %v16002_v55  ;;  %v254_v23 = vld [vmem:[#allocation2 + $0x338] sm:$0xff] }
 0x4f5   :  { %10901 = vmatprep.subr.bf16.mxu0 %v15995_v11  ;;  %10942 = vmatprep.subr.bf16.mxu1 %v16123_v43  ;;  %v378_v24 = vld [vmem:[#allocation2 + $0x718] sm:$0xff]  ;;  %v15971_v27 = vcombine.high %v250_v52, %v254_v23  ;;  %v15970_v43 = vcombine.low %v250_v52, %v254_v23 }
 0x4f6   :  { %v382_v58 = vld [vmem:[#allocation2 + $0x738] sm:$0xff] }
 0x4f7   :  { %v16099_v59 = vcombine.high %v378_v24, %v382_v58  ;;  %v242_v30 = vld [vmem:[#allocation2 + $0x2d8] sm:$0xff]  ;;  %v16098_v29 = vcombine.low %v378_v24, %v382_v58 }
 0x4f8   :  { %10902 = vmatpush2.bf16.msra.mxu0 %v15994_v63  ;;  %10943 = vmatpush2.bf16.msra.mxu1 %v16122_v62  ;;  %v246_v47 = vld [vmem:[#allocation2 + $0x2f8] sm:$0xff] }
 0x4f9   :  { %10903 = vmatprep.subr.bf16.mxu0 %v15987_v57  ;;  %10944 = vmatprep.subr.bf16.mxu1 %v16115_v1  ;;  %v370_v55 = vld [vmem:[#allocation2 + $0x6d8] sm:$0xff]  ;;  %v15963_v0 = vcombine.high %v242_v30, %v246_v47  ;;  %v15962_v1 = vcombine.low %v242_v30, %v246_v47 }
 0x4fa   :  { %v374_v11 = vld [vmem:[#allocation2 + $0x6f8] sm:$0xff] }
 0x4fb   :  { %v16091_v3 = vcombine.high %v370_v55, %v374_v11  ;;  %v234_v8 = vld [vmem:[#allocation2 + $0x298] sm:$0xff]  ;;  %v16090_v7 = vcombine.low %v370_v55, %v374_v11 }
 0x4fc   :  { %10904 = vmatpush2.bf16.msra.mxu0 %v15986_v33  ;;  %10945 = vmatpush2.bf16.msra.mxu1 %v16114_v22  ;;  %v238_v63 = vld [vmem:[#allocation2 + $0x2b8] sm:$0xff] }
 0x4fd   :  { %10905 = vmatprep.subr.bf16.mxu0 %v15979_v5  ;;  %10946 = vmatprep.subr.bf16.mxu1 %v16107_v42  ;;  %v362_v62 = vld [vmem:[#allocation2 + $0x698] sm:$0xff]  ;;  %v15955_v60 = vcombine.high %v234_v8, %v238_v63  ;;  %v15954_v42 = vcombine.low %v234_v8, %v238_v63 }
 0x4fe   :  { %v366_v57 = vld [vmem:[#allocation2 + $0x6b8] sm:$0xff] }
 0x4ff   :  { %v16083_v35 = vcombine.high %v362_v62, %v366_v57  ;;  %v226_v15 = vld [vmem:[#allocation2 + $0x258] sm:$0xff]  ;;  %v16082_v52 = vcombine.low %v362_v62, %v366_v57 }
 0x500   :  { %10906 = vmatpush2.bf16.msra.mxu0 %v15978_v19  ;;  %10947 = vmatpush2.bf16.msra.mxu1 %v16106_v36  ;;  %v230_v33 = vld [vmem:[#allocation2 + $0x278] sm:$0xff] }
 0x501   :  { %10907 = vmatprep.subr.bf16.mxu0 %v15971_v27  ;;  %10948 = vmatprep.subr.bf16.mxu1 %v16099_v59  ;;  %v354_v22 = vld [vmem:[#allocation2 + $0x658] sm:$0xff]  ;;  %v15947_v23 = vcombine.high %v226_v15, %v230_v33  ;;  %v15946_v59 = vcombine.low %v226_v15, %v230_v33 }
 0x502   :  { %v358_v5 = vld [vmem:[#allocation2 + $0x678] sm:$0xff] }
 0x503   :  { %v16075_v24 = vcombine.high %v354_v22, %v358_v5  ;;  %v218_v58 = vld [vmem:[#allocation2 + $0x218] sm:$0xff]  ;;  %v16074_v30 = vcombine.low %v354_v22, %v358_v5 }
 0x504   :  { %10908 = vmatpush2.bf16.msra.mxu0 %v15970_v43  ;;  %10949 = vmatpush2.bf16.msra.mxu1 %v16098_v29  ;;  %v222_v19 = vld [vmem:[#allocation2 + $0x238] sm:$0xff] }
 0x505   :  { %10909 = vmatprep.subr.bf16.mxu0 %v15963_v0  ;;  %10950 = vmatprep.subr.bf16.mxu1 %v16091_v3  ;;  %v346_v36 = vld [vmem:[#allocation2 + $0x618] sm:$0xff]  ;;  %v15939_v47 = vcombine.high %v218_v58, %v222_v19  ;;  %v15938_v3 = vcombine.low %v218_v58, %v222_v19 }
 0x506   :  { %v350_v27 = vld [vmem:[#allocation2 + $0x638] sm:$0xff] }
 0x507   :  { %v16067_v55 = vcombine.high %v346_v36, %v350_v27  ;;  %v466_v11 = vld [vmem:[#allocation2 + $0x9d8] sm:$0xff]  ;;  %v16066_v8 = vcombine.low %v346_v36, %v350_v27 }
 0x508   :  { %10910 = vmatpush2.bf16.msra.mxu0 %v15962_v1  ;;  %10951 = vmatpush2.bf16.msra.mxu1 %v16090_v7  ;;  %v470_v43 = vld [vmem:[#allocation2 + $0x9f8] sm:$0xff] }
 0x509   :  { %10911 = vmatprep.subr.bf16.mxu0 %v15955_v60  ;;  %10952 = vmatprep.subr.bf16.mxu1 %v16083_v35  ;;  %v594_v29 = vld [vmem:[#allocation2 + $0xdd8] sm:$0xff]  ;;  %v16187_v63 = vcombine.high %v466_v11, %v470_v43  ;;  %v16186_v35 = vcombine.low %v466_v11, %v470_v43 }
 0x50a   :  { %v598_v0 = vld [vmem:[#allocation2 + $0xdf8] sm:$0xff] }
 0x50b   :  { %v16315_v62 = vcombine.high %v594_v29, %v598_v0  ;;  %v458_v57 = vld [vmem:[#allocation2 + $0x998] sm:$0xff]  ;;  %v16314_v15 = vcombine.low %v594_v29, %v598_v0 }
 0x50c   :  { %10912 = vmatpush2.bf16.msra.mxu0 %v15954_v42  ;;  %10953 = vmatpush2.bf16.msra.mxu1 %v16082_v52  ;;  %v462_v1 = vld [vmem:[#allocation2 + $0x9b8] sm:$0xff] }
 0x50d   :  { %10913 = vmatprep.subr.bf16.mxu0 %v15947_v23  ;;  %10954 = vmatprep.subr.bf16.mxu1 %v16075_v24  ;;  %v586_v7 = vld [vmem:[#allocation2 + $0xd98] sm:$0xff]  ;;  %v16179_v33 = vcombine.high %v458_v57, %v462_v1  ;;  %v16178_v36 = vcombine.low %v458_v57, %v462_v1 }
 0x50e   :  { %v590_v60 = vld [vmem:[#allocation2 + $0xdb8] sm:$0xff] }
 0x50f   :  { %v16307_v22 = vcombine.high %v586_v7, %v590_v60  ;;  %v450_v5 = vld [vmem:[#allocation2 + $0x958] sm:$0xff] }
 0x510   :  { %10914 = vmatpush2.bf16.msra.mxu0 %v15946_v59  ;;  %10955 = vmatpush2.bf16.msra.mxu1 %v16074_v30  ;;  %v454_v42 = vld [vmem:[#allocation2 + $0x978] sm:$0xff]  ;;  %v16306_v59 = vcombine.low %v586_v7, %v590_v60 }
 0x511   :  { %10915 = vmatprep.subr.bf16.mxu0 %v15939_v47  ;;  %10956 = vmatprep.subr.bf16.mxu1 %v16067_v55  ;;  %v578_v23 = vld [vmem:[#allocation2 + $0xd58] sm:$0xff]  ;;  %v16171_v30 = vcombine.high %v450_v5, %v454_v42 }
 0x512   :  { %v582_v24 = vld [vmem:[#allocation2 + $0xd78] sm:$0xff] }
 0x513   :  { %v442_v43 = vld [vmem:[#allocation2 + $0x918] sm:$0xff] }
 0x514   :  { %10916 = vmatpush2.bf16.msra.mxu0 %v15938_v3  ;;  %10957 = vmatpush2.bf16.msra.mxu1 %v16066_v8  ;;  %v446_v29 = vld [vmem:[#allocation2 + $0x938] sm:$0xff] }
 0x515   :  { %10967 = vmatprep.subr.bf16.mxu0 %v16187_v63  ;;  %11008 = vmatprep.subr.bf16.mxu1 %v16315_v62  ;;  %v574_v0 = vld [vmem:[#allocation2 + $0xd38] sm:$0xff]  ;;  %v16170_v63 = vcombine.low %v450_v5, %v454_v42  ;;  %v16163_v57 = vcombine.high %v442_v43, %v446_v29 }
 0x516   :  { %v434_v60 = vld [vmem:[#allocation2 + $0x8d8] sm:$0xff] }
 0x517   :  { %v10673_v52 = vpop.f32.mrf.mxu0  ;;  %10918 = vmatmul.mubr.bf16.vlgmr.msra.gmra.mxu0 %v18361_v16  ;;  %v10714_v19 = vpop.f32.mrf.mxu1  ;;  %10959 = vmatmul.mubr.bf16.vlgmr.msra.gmra.mxu1 %v18366_v20  ;;  %v16299_v16 = vcombine.high %v578_v23, %v582_v24  ;;  %v570_v20 = vld [vmem:[#allocation2 + $0xd18] sm:$0xff] }
 0x518   :  { %v10674_v58 = vadd.f32 %v10673_v52, %v18634_v41  ;;  %10968 = vmatpush1.bf16.msra.mxu0 %v16186_v35  ;;  %11009 = vmatpush1.bf16.msra.mxu1 %v16314_v15  ;;  %v16291_v7 = vcombine.high %v570_v20, %v574_v0  ;;  %v562_v35 = vld [vmem:[#allocation2 + $0xcd8] sm:$0xff] }
 0x519   :  { %v10675_v27 = vpop.f32.mrf.mxu0  ;;  %10969 = vmatprep.subr.bf16.mxu0 %v16179_v33  ;;  %v10716_v11 = vpop.f32.mrf.mxu1  ;;  %11010 = vmatprep.subr.bf16.mxu1 %v16307_v22  ;;  %v566_v15 = vld [vmem:[#allocation2 + $0xcf8] sm:$0xff]  ;;  %v16162_v33 = vcombine.low %v442_v43, %v446_v29 }
 0x51a   :  { %v18644_v47 = vadd.f32 %v10714_v19, %v10674_v58  ;;  %v10676_v55 = vadd.f32 %v10675_v27, %v18639_v12  ;;  %10999 = vmatprep.mubr.bf16.mxu0 %v18371_v28  ;;  %11040 = vmatprep.mubr.bf16.mxu1 %v18374_v31  ;;  %v16298_v12 = vcombine.low %v578_v23, %v582_v24  ;;  %v438_v28 = vld [vmem:[#allocation2 + $0x8f8] sm:$0xff] }
 0x51b   :  { %v10677_v41 = vpop.f32.mrf.mxu0  ;;  %v10718_v8 = vpop.f32.mrf.mxu1  ;;  %v16290_v31 = vcombine.low %v570_v20, %v574_v0  ;;  %v16155_v22 = vcombine.high %v434_v60, %v438_v28  ;;  %v16283_v5 = vcombine.high %v562_v35, %v566_v15  ;;  %v426_v42 = vld [vmem:[#allocation2 + $0x898] sm:$0xff]  ;;  %v16154_v24 = vcombine.low %v434_v60, %v438_v28 }
 0x51c   :  { %v18649_v3 = vadd.f32 %v10716_v11, %v10676_v55  ;;  %10970 = vmatpush1.bf16.msra.mxu0 %v16178_v36  ;;  %11011 = vmatpush1.bf16.msra.mxu1 %v16306_v59  ;;  %v430_v52 = vld [vmem:[#allocation2 + $0x8b8] sm:$0xff]  ;;  %v16282_v19 = vcombine.low %v562_v35, %v566_v15 }
 0x51d   :  { %v10678_v62 = vpop.f32.mrf.mxu0  ;;  %10971 = vmatprep.subr.bf16.mxu0 %v16171_v30  ;;  %v10719_v1 = vpop.f32.mrf.mxu1  ;;  %11012 = vmatprep.subr.bf16.mxu1 %v16299_v16  ;;  %v554_v58 = vld [vmem:[#allocation2 + $0xc98] sm:$0xff]  ;;  %v16147_v36 = vcombine.high %v426_v42, %v430_v52  ;;  %v16146_v16 = vcombine.low %v426_v42, %v430_v52 }
 0x51e   :  { %v558_v23 = vld [vmem:[#allocation2 + $0xcb8] sm:$0xff] }
 0x51f   :  { %v16275_v27 = vcombine.high %v554_v58, %v558_v23  ;;  %v418_v59 = vld [vmem:[#allocation2 + $0x858] sm:$0xff]  ;;  %v16274_v43 = vcombine.low %v554_v58, %v558_v23 }
 0x520   :  { %10972 = vmatpush1.bf16.msra.mxu0 %v16170_v63  ;;  %11013 = vmatpush1.bf16.msra.mxu1 %v16298_v12  ;;  %v422_v30 = vld [vmem:[#allocation2 + $0x878] sm:$0xff] }
 0x521   :  { %10973 = vmatprep.subr.bf16.mxu0 %v16163_v57  ;;  %11014 = vmatprep.subr.bf16.mxu1 %v16291_v7  ;;  %v546_v55 = vld [vmem:[#allocation2 + $0xc58] sm:$0xff]  ;;  %v16139_v29 = vcombine.high %v418_v59, %v422_v30  ;;  %v16138_v62 = vcombine.low %v418_v59, %v422_v30 }
 0x522   :  { %v550_v11 = vld [vmem:[#allocation2 + $0xc78] sm:$0xff] }
 0x523   :  { %v16267_v41 = vcombine.high %v546_v55, %v550_v11  ;;  %v410_v20 = vld [vmem:[#allocation2 + $0x818] sm:$0xff]  ;;  %v16266_v12 = vcombine.low %v546_v55, %v550_v11 }
 0x524   :  { %10974 = vmatpush1.bf16.msra.mxu0 %v16162_v33  ;;  %11015 = vmatpush1.bf16.msra.mxu1 %v16290_v31  ;;  %v414_v0 = vld [vmem:[#allocation2 + $0x838] sm:$0xff] }
 0x525   :  { %10975 = vmatprep.subr.bf16.mxu0 %v16155_v22  ;;  %11016 = vmatprep.subr.bf16.mxu1 %v16283_v5  ;;  %v538_v8 = vld [vmem:[#allocation2 + $0xc18] sm:$0xff]  ;;  %v16131_v57 = vcombine.high %v410_v20, %v414_v0  ;;  %v16130_v15 = vcombine.low %v410_v20, %v414_v0 }
 0x526   :  { %v542_v63 = vld [vmem:[#allocation2 + $0xc38] sm:$0xff] }
 0x527   :  { %v16259_v1 = vcombine.high %v538_v8, %v542_v63  ;;  %v530_v7 = vld [vmem:[#allocation2 + $0xbd8] sm:$0xff]  ;;  %v16258_v33 = vcombine.low %v538_v8, %v542_v63 }
 0x528   :  { %10976 = vmatpush1.bf16.msra.mxu0 %v16154_v24  ;;  %11017 = vmatpush1.bf16.msra.mxu1 %v16282_v19  ;;  %v534_v60 = vld [vmem:[#allocation2 + $0xbf8] sm:$0xff] }
 0x529   :  { %10977 = vmatprep.subr.bf16.mxu0 %v16147_v36  ;;  %11018 = vmatprep.subr.bf16.mxu1 %v16275_v27  ;;  %v658_v28 = vld [vmem:[#allocation2 + $0xfd8] sm:$0xff]  ;;  %v16251_v31 = vcombine.high %v530_v7, %v534_v60  ;;  %v16250_v23 = vcombine.low %v530_v7, %v534_v60 }
 0x52a   :  { %v662_v35 = vld [vmem:[#allocation2 + $0xff8] sm:$0xff] }
 0x52b   :  { %v16379_v22 = vcombine.high %v658_v28, %v662_v35  ;;  %v522_v5 = vld [vmem:[#allocation2 + $0xb98] sm:$0xff]  ;;  %v16378_v24 = vcombine.low %v658_v28, %v662_v35 }
 0x52c   :  { %10978 = vmatpush1.bf16.msra.mxu0 %v16146_v16  ;;  %11019 = vmatpush1.bf16.msra.mxu1 %v16274_v43  ;;  %v526_v42 = vld [vmem:[#allocation2 + $0xbb8] sm:$0xff] }
 0x52d   :  { %10979 = vmatprep.subr.bf16.mxu0 %v16139_v29  ;;  %11020 = vmatprep.subr.bf16.mxu1 %v16267_v41  ;;  %v650_v52 = vld [vmem:[#allocation2 + $0xf98] sm:$0xff]  ;;  %v16243_v19 = vcombine.high %v522_v5, %v526_v42  ;;  %v16242_v11 = vcombine.low %v522_v5, %v526_v42 }
 0x52e   :  { %v654_v58 = vld [vmem:[#allocation2 + $0xfb8] sm:$0xff] }
 0x52f   :  { %v16371_v36 = vcombine.high %v650_v52, %v654_v58  ;;  %v514_v27 = vld [vmem:[#allocation2 + $0xb58] sm:$0xff]  ;;  %v16370_v16 = vcombine.low %v650_v52, %v654_v58 }
 0x530   :  { %10980 = vmatpush1.bf16.msra.mxu0 %v16138_v62  ;;  %11021 = vmatpush1.bf16.msra.mxu1 %v16266_v12  ;;  %v518_v59 = vld [vmem:[#allocation2 + $0xb78] sm:$0xff] }
 0x531   :  { %10981 = vmatprep.subr.bf16.mxu0 %v16131_v57  ;;  %11022 = vmatprep.subr.bf16.mxu1 %v16259_v1  ;;  %v642_v30 = vld [vmem:[#allocation2 + $0xf58] sm:$0xff]  ;;  %v16235_v43 = vcombine.high %v514_v27, %v518_v59  ;;  %v16234_v63 = vcombine.low %v514_v27, %v518_v59 }
 0x532   :  { %v646_v55 = vld [vmem:[#allocation2 + $0xf78] sm:$0xff] }
 0x533   :  { %v16363_v29 = vcombine.high %v642_v30, %v646_v55  ;;  %v506_v41 = vld [vmem:[#allocation2 + $0xb18] sm:$0xff]  ;;  %v16362_v62 = vcombine.low %v642_v30, %v646_v55 }
 0x534   :  { %10982 = vmatpush1.bf16.msra.mxu0 %v16130_v15  ;;  %11023 = vmatpush1.bf16.msra.mxu1 %v16258_v33  ;;  %v510_v20 = vld [vmem:[#allocation2 + $0xb38] sm:$0xff] }
 0x535   :  { %10983 = vmatprep.subr.bf16.mxu0 %v16251_v31  ;;  %11024 = vmatprep.subr.bf16.mxu1 %v16379_v22  ;;  %v634_v0 = vld [vmem:[#allocation2 + $0xf18] sm:$0xff]  ;;  %v16227_v12 = vcombine.high %v506_v41, %v510_v20  ;;  %v16226_v35 = vcombine.low %v506_v41, %v510_v20 }
 0x536   :  { %v638_v8 = vld [vmem:[#allocation2 + $0xf38] sm:$0xff] }
 0x537   :  { %v16355_v57 = vcombine.high %v634_v0, %v638_v8  ;;  %v498_v1 = vld [vmem:[#allocation2 + $0xad8] sm:$0xff]  ;;  %v16354_v15 = vcombine.low %v634_v0, %v638_v8 }
 0x538   :  { %10984 = vmatpush2.bf16.msra.mxu0 %v16250_v23  ;;  %11025 = vmatpush2.bf16.msra.mxu1 %v16378_v24  ;;  %v502_v7 = vld [vmem:[#allocation2 + $0xaf8] sm:$0xff] }
 0x539   :  { %10985 = vmatprep.subr.bf16.mxu0 %v16243_v19  ;;  %11026 = vmatprep.subr.bf16.mxu1 %v16371_v36  ;;  %v626_v60 = vld [vmem:[#allocation2 + $0xed8] sm:$0xff]  ;;  %v16219_v33 = vcombine.high %v498_v1, %v502_v7  ;;  %v16218_v58 = vcombine.low %v498_v1, %v502_v7 }
 0x53a   :  { %v630_v28 = vld [vmem:[#allocation2 + $0xef8] sm:$0xff] }
 0x53b   :  { %v16347_v31 = vcombine.high %v626_v60, %v630_v28  ;;  %v490_v22 = vld [vmem:[#allocation2 + $0xa98] sm:$0xff]  ;;  %v16346_v23 = vcombine.low %v626_v60, %v630_v28 }
 0x53c   :  { %10986 = vmatpush2.bf16.msra.mxu0 %v16242_v11  ;;  %11027 = vmatpush2.bf16.msra.mxu1 %v16370_v16  ;;  %v494_v5 = vld [vmem:[#allocation2 + $0xab8] sm:$0xff] }
 0x53d   :  { %10987 = vmatprep.subr.bf16.mxu0 %v16235_v43  ;;  %11028 = vmatprep.subr.bf16.mxu1 %v16363_v29  ;;  %v618_v42 = vld [vmem:[#allocation2 + $0xe98] sm:$0xff]  ;;  %v16211_v24 = vcombine.high %v490_v22, %v494_v5  ;;  %v16210_v55 = vcombine.low %v490_v22, %v494_v5 }
 0x53e   :  { %v622_v52 = vld [vmem:[#allocation2 + $0xeb8] sm:$0xff] }
 0x53f   :  { %v16339_v19 = vcombine.high %v618_v42, %v622_v52  ;;  %v482_v36 = vld [vmem:[#allocation2 + $0xa58] sm:$0xff]  ;;  %v16338_v11 = vcombine.low %v618_v42, %v622_v52 }
 0x540   :  { %10988 = vmatpush2.bf16.msra.mxu0 %v16234_v63  ;;  %11029 = vmatpush2.bf16.msra.mxu1 %v16362_v62  ;;  %v486_v27 = vld [vmem:[#allocation2 + $0xa78] sm:$0xff] }
 0x541   :  { %10989 = vmatprep.subr.bf16.mxu0 %v16227_v12  ;;  %11030 = vmatprep.subr.bf16.mxu1 %v16355_v57  ;;  %v610_v59 = vld [vmem:[#allocation2 + $0xe58] sm:$0xff]  ;;  %v16203_v16 = vcombine.high %v482_v36, %v486_v27  ;;  %v16202_v8 = vcombine.low %v482_v36, %v486_v27 }
 0x542   :  { %v614_v30 = vld [vmem:[#allocation2 + $0xe78] sm:$0xff] }
 0x543   :  { %v16331_v43 = vcombine.high %v610_v59, %v614_v30  ;;  %v474_v29 = vld [vmem:[#allocation2 + $0xa18] sm:$0xff]  ;;  %v16330_v63 = vcombine.low %v610_v59, %v614_v30 }
 0x544   :  { %10990 = vmatpush2.bf16.msra.mxu0 %v16226_v35  ;;  %11031 = vmatpush2.bf16.msra.mxu1 %v16354_v15  ;;  %v478_v41 = vld [vmem:[#allocation2 + $0xa38] sm:$0xff] }
 0x545   :  { %10991 = vmatprep.subr.bf16.mxu0 %v16219_v33  ;;  %11032 = vmatprep.subr.bf16.mxu1 %v16347_v31  ;;  %v602_v20 = vld [vmem:[#allocation2 + $0xe18] sm:$0xff]  ;;  %v16195_v62 = vcombine.high %v474_v29, %v478_v41  ;;  %v16194_v28 = vcombine.low %v474_v29, %v478_v41 }
 0x546   :  { %v606_v0 = vld [vmem:[#allocation2 + $0xe38] sm:$0xff] }
 0x547   :  { %v16323_v12 = vcombine.high %v602_v20, %v606_v0  ;;  %v722_v57 = vld [vmem:[#allocation2 + $0x11d8] sm:$0xff]  ;;  %v16322_v35 = vcombine.low %v602_v20, %v606_v0 }
 0x548   :  { %10992 = vmatpush2.bf16.msra.mxu0 %v16218_v58  ;;  %11033 = vmatpush2.bf16.msra.mxu1 %v16346_v23  ;;  %v726_v1 = vld [vmem:[#allocation2 + $0x11f8] sm:$0xff] }
 0x549   :  { %10993 = vmatprep.subr.bf16.mxu0 %v16211_v24  ;;  %11034 = vmatprep.subr.bf16.mxu1 %v16339_v19  ;;  %v850_v7 = vld [vmem:[#allocation2 + $0x15d8] sm:$0xff]  ;;  %v16443_v15 = vcombine.high %v722_v57, %v726_v1  ;;  %v16442_v52 = vcombine.low %v722_v57, %v726_v1 }
 0x54a   :  { %v854_v60 = vld [vmem:[#allocation2 + $0x15f8] sm:$0xff] }
 0x54b   :  { %v16571_v33 = vcombine.high %v850_v7, %v854_v60  ;;  %v714_v31 = vld [vmem:[#allocation2 + $0x1198] sm:$0xff]  ;;  %v16570_v58 = vcombine.low %v850_v7, %v854_v60 }
 0x54c   :  { %10994 = vmatpush2.bf16.msra.mxu0 %v16210_v55  ;;  %11035 = vmatpush2.bf16.msra.mxu1 %v16338_v11  ;;  %v718_v22 = vld [vmem:[#allocation2 + $0x11b8] sm:$0xff] }
 0x54d   :  { %10995 = vmatprep.subr.bf16.mxu0 %v16203_v16  ;;  %11036 = vmatprep.subr.bf16.mxu1 %v16331_v43  ;;  %v842_v5 = vld [vmem:[#allocation2 + $0x1598] sm:$0xff]  ;;  %v16435_v23 = vcombine.high %v714_v31, %v718_v22  ;;  %v16434_v16 = vcombine.low %v714_v31, %v718_v22 }
 0x54e   :  { %v846_v42 = vld [vmem:[#allocation2 + $0x15b8] sm:$0xff] }
 0x54f   :  { %v16563_v24 = vcombine.high %v842_v5, %v846_v42  ;;  %v706_v19 = vld [vmem:[#allocation2 + $0x1158] sm:$0xff]  ;;  %v16562_v29 = vcombine.low %v842_v5, %v846_v42 }
 0x550   :  { %10996 = vmatpush2.bf16.msra.mxu0 %v16202_v8  ;;  %11037 = vmatpush2.bf16.msra.mxu1 %v16330_v63  ;;  %v710_v36 = vld [vmem:[#allocation2 + $0x1178] sm:$0xff] }
 0x551   :  { %10997 = vmatprep.subr.bf16.mxu0 %v16195_v62  ;;  %11038 = vmatprep.subr.bf16.mxu1 %v16323_v12  ;;  %v834_v59 = vld [vmem:[#allocation2 + $0x1558] sm:$0xff]  ;;  %v16427_v41 = vcombine.high %v706_v19, %v710_v36  ;;  %v16426_v7 = vcombine.low %v706_v19, %v710_v36 }
 0x552   :  { %v838_v30 = vld [vmem:[#allocation2 + $0x1578] sm:$0xff] }
 0x553   :  { %v698_v63 = vld [vmem:[#allocation2 + $0x1118] sm:$0xff] }
 0x554   :  { %10998 = vmatpush2.bf16.msra.mxu0 %v16194_v28  ;;  %11039 = vmatpush2.bf16.msra.mxu1 %v16322_v35  ;;  %v702_v62 = vld [vmem:[#allocation2 + $0x1138] sm:$0xff] }
 0x555   :  { %11049 = vmatprep.subr.bf16.mxu0 %v16443_v15  ;;  %11090 = vmatprep.subr.bf16.mxu1 %v16571_v33  ;;  %v830_v12 = vld [vmem:[#allocation2 + $0x1538] sm:$0xff]  ;;  %v16419_v28 = vcombine.high %v698_v63, %v702_v62  ;;  %v16418_v5 = vcombine.low %v698_v63, %v702_v62 }
 0x556   :  { %v690_v33 = vld [vmem:[#allocation2 + $0x10d8] sm:$0xff] }
 0x557   :  { %v10755_v27 = vpop.f32.mrf.mxu0  ;;  %11000 = vmatmul.mubr.bf16.vlgmr.msra.gmra.mxu0 %v18388_v39  ;;  %v10796_v11 = vpop.f32.mrf.mxu1  ;;  %11041 = vmatmul.mubr.bf16.vlgmr.msra.gmra.mxu1 %v18390_v40  ;;  %v16555_v39 = vcombine.high %v834_v59, %v838_v30  ;;  %v826_v40 = vld [vmem:[#allocation2 + $0x1518] sm:$0xff] }
 0x558   :  { %v10756_v55 = vadd.f32 %v10755_v27, %v18644_v47  ;;  %11050 = vmatpush1.bf16.msra.mxu0 %v16442_v52  ;;  %11091 = vmatpush1.bf16.msra.mxu1 %v16570_v58  ;;  %v16547_v15 = vcombine.high %v826_v40, %v830_v12  ;;  %v818_v31 = vld [vmem:[#allocation2 + $0x14d8] sm:$0xff] }
 0x559   :  { %v10757_v43 = vpop.f32.mrf.mxu0  ;;  %11051 = vmatprep.subr.bf16.mxu0 %v16435_v23  ;;  %v10798_v8 = vpop.f32.mrf.mxu1  ;;  %11092 = vmatprep.subr.bf16.mxu1 %v16563_v24  ;;  %v822_v22 = vld [vmem:[#allocation2 + $0x14f8] sm:$0xff] }
 0x55a   :  { %v18654_v20 = vadd.f32 %v10796_v11, %v10756_v55  ;;  %v10758_v0 = vadd.f32 %v10757_v43, %v18649_v3  ;;  %11081 = vmatprep.mubr.bf16.mxu0 %v18395_v49  ;;  %11122 = vmatprep.mubr.bf16.mxu1 %v18398_v51  ;;  %v16554_v3 = vcombine.low %v834_v59, %v838_v30  ;;  %v694_v49 = vld [vmem:[#allocation2 + $0x10f8] sm:$0xff] }
 0x55b   :  { %v10759_v47 = vpop.f32.mrf.mxu0  ;;  %v10800_v1 = vpop.f32.mrf.mxu1  ;;  %v16546_v51 = vcombine.low %v826_v40, %v830_v12  ;;  %v16411_v42 = vcombine.high %v690_v33, %v694_v49  ;;  %v16539_v52 = vcombine.high %v818_v31, %v822_v22  ;;  %v682_v58 = vld [vmem:[#allocation2 + $0x1098] sm:$0xff]  ;;  %v16410_v36 = vcombine.low %v690_v33, %v694_v49 }
 0x55c   :  { %v18659_v57 = vadd.f32 %v10798_v8, %v10758_v0  ;;  %11052 = vmatpush1.bf16.msra.mxu0 %v16434_v16  ;;  %11093 = vmatpush1.bf16.msra.mxu1 %v16562_v29  ;;  %v686_v23 = vld [vmem:[#allocation2 + $0x10b8] sm:$0xff]  ;;  %v16538_v27 = vcombine.low %v818_v31, %v822_v22 }
 0x55d   :  { %v10760_v60 = vpop.f32.mrf.mxu0  ;;  %11053 = vmatprep.subr.bf16.mxu0 %v16427_v41  ;;  %v10801_v35 = vpop.f32.mrf.mxu1  ;;  %11094 = vmatprep.subr.bf16.mxu1 %v16555_v39  ;;  %v810_v24 = vld [vmem:[#allocation2 + $0x1498] sm:$0xff]  ;;  %v16403_v59 = vcombine.high %v682_v58, %v686_v23  ;;  %v16402_v29 = vcombine.low %v682_v58, %v686_v23 }
 0x55e   :  { %v814_v19 = vld [vmem:[#allocation2 + $0x14b8] sm:$0xff] }
 0x55f   :  { %v16531_v30 = vcombine.high %v810_v24, %v814_v19  ;;  %v674_v55 = vld [vmem:[#allocation2 + $0x1058] sm:$0xff]  ;;  %v16530_v41 = vcombine.low %v810_v24, %v814_v19 }
 0x560   :  { %11054 = vmatpush1.bf16.msra.mxu0 %v16426_v7  ;;  %11095 = vmatpush1.bf16.msra.mxu1 %v16554_v3  ;;  %v678_v11 = vld [vmem:[#allocation2 + $0x1078] sm:$0xff] }
 0x561   :  { %11055 = vmatprep.subr.bf16.mxu0 %v16419_v28  ;;  %11096 = vmatprep.subr.bf16.mxu1 %v16547_v15  ;;  %v802_v16 = vld [vmem:[#allocation2 + $0x1458] sm:$0xff]  ;;  %v16395_v0 = vcombine.high %v674_v55, %v678_v11  ;;  %v16394_v40 = vcombine.low %v674_v55, %v678_v11 }
 0x562   :  { %v806_v43 = vld [vmem:[#allocation2 + $0x1478] sm:$0xff] }
 0x563   :  { %v16523_v8 = vcombine.high %v802_v16, %v806_v43  ;;  %v666_v39 = vld [vmem:[#allocation2 + $0x1018] sm:$0xff]  ;;  %v16522_v12 = vcombine.low %v802_v16, %v806_v43 }
 0x564   :  { %11056 = vmatpush1.bf16.msra.mxu0 %v16418_v5  ;;  %11097 = vmatpush1.bf16.msra.mxu1 %v16546_v51  ;;  %v670_v63 = vld [vmem:[#allocation2 + $0x1038] sm:$0xff] }
 0x565   :  { %11057 = vmatprep.subr.bf16.mxu0 %v16411_v42  ;;  %11098 = vmatprep.subr.bf16.mxu1 %v16539_v52  ;;  %v794_v62 = vld [vmem:[#allocation2 + $0x1418] sm:$0xff]  ;;  %v16387_v1 = vcombine.high %v666_v39, %v670_v63  ;;  %v16386_v15 = vcombine.low %v666_v39, %v670_v63 }
 0x566   :  { %v798_v47 = vld [vmem:[#allocation2 + $0x1438] sm:$0xff] }
 0x567   :  { %v16515_v7 = vcombine.high %v794_v62, %v798_v47  ;;  %v786_v60 = vld [vmem:[#allocation2 + $0x13d8] sm:$0xff]  ;;  %v16514_v33 = vcombine.low %v794_v62, %v798_v47 }
 0x568   :  { %11058 = vmatpush1.bf16.msra.mxu0 %v16410_v36  ;;  %11099 = vmatpush1.bf16.msra.mxu1 %v16538_v27  ;;  %v790_v3 = vld [vmem:[#allocation2 + $0x13f8] sm:$0xff] }
 0x569   :  { %11059 = vmatprep.subr.bf16.mxu0 %v16403_v59  ;;  %11100 = vmatprep.subr.bf16.mxu1 %v16531_v30  ;;  %v914_v28 = vld [vmem:[#allocation2 + $0x17d8] sm:$0xff]  ;;  %v16507_v49 = vcombine.high %v786_v60, %v790_v3  ;;  %v16506_v52 = vcombine.low %v786_v60, %v790_v3 }
 0x56a   :  { %v918_v35 = vld [vmem:[#allocation2 + $0x17f8] sm:$0xff] }
 0x56b   :  { %v16635_v31 = vcombine.high %v914_v28, %v918_v35  ;;  %v778_v22 = vld [vmem:[#allocation2 + $0x1398] sm:$0xff]  ;;  %v16634_v58 = vcombine.low %v914_v28, %v918_v35 }
 0x56c   :  { %11060 = vmatpush1.bf16.msra.mxu0 %v16402_v29  ;;  %11101 = vmatpush1.bf16.msra.mxu1 %v16530_v41  ;;  %v782_v5 = vld [vmem:[#allocation2 + $0x13b8] sm:$0xff] }
 0x56d   :  { %11061 = vmatprep.subr.bf16.mxu0 %v16395_v0  ;;  %11102 = vmatprep.subr.bf16.mxu1 %v16523_v8  ;;  %v906_v51 = vld [vmem:[#allocation2 + $0x1798] sm:$0xff]  ;;  %v16499_v23 = vcombine.high %v778_v22, %v782_v5  ;;  %v16498_v30 = vcombine.low %v778_v22, %v782_v5 }
 0x56e   :  { %v910_v42 = vld [vmem:[#allocation2 + $0x17b8] sm:$0xff] }
 0x56f   :  { %v16627_v24 = vcombine.high %v906_v51, %v910_v42  ;;  %v770_v19 = vld [vmem:[#allocation2 + $0x1358] sm:$0xff]  ;;  %v16626_v55 = vcombine.low %v906_v51, %v910_v42 }
 0x570   :  { %11062 = vmatpush1.bf16.msra.mxu0 %v16394_v40  ;;  %11103 = vmatpush1.bf16.msra.mxu1 %v16522_v12  ;;  %v774_v36 = vld [vmem:[#allocation2 + $0x1378] sm:$0xff] }
 0x571   :  { %11063 = vmatprep.subr.bf16.mxu0 %v16387_v1  ;;  %11104 = vmatprep.subr.bf16.mxu1 %v16515_v7  ;;  %v898_v27 = vld [vmem:[#allocation2 + $0x1758] sm:$0xff]  ;;  %v16491_v11 = vcombine.high %v770_v19, %v774_v36  ;;  %v16490_v8 = vcombine.low %v770_v19, %v774_v36 }
 0x572   :  { %v902_v59 = vld [vmem:[#allocation2 + $0x1778] sm:$0xff] }
 0x573   :  { %v16619_v16 = vcombine.high %v898_v27, %v902_v59  ;;  %v762_v43 = vld [vmem:[#allocation2 + $0x1318] sm:$0xff]  ;;  %v16618_v39 = vcombine.low %v898_v27, %v902_v59 }
 0x574   :  { %11064 = vmatpush1.bf16.msra.mxu0 %v16386_v15  ;;  %11105 = vmatpush1.bf16.msra.mxu1 %v16514_v33  ;;  %v766_v29 = vld [vmem:[#allocation2 + $0x1338] sm:$0xff] }
 0x575   :  { %11065 = vmatprep.subr.bf16.mxu0 %v16507_v49  ;;  %11106 = vmatprep.subr.bf16.mxu1 %v16635_v31  ;;  %v890_v41 = vld [vmem:[#allocation2 + $0x1718] sm:$0xff]  ;;  %v16483_v63 = vcombine.high %v762_v43, %v766_v29  ;;  %v16482_v7 = vcombine.low %v762_v43, %v766_v29 }
 0x576   :  { %v894_v0 = vld [vmem:[#allocation2 + $0x1738] sm:$0xff] }
 0x577   :  { %v16611_v62 = vcombine.high %v890_v41, %v894_v0  ;;  %v754_v47 = vld [vmem:[#allocation2 + $0x12d8] sm:$0xff]  ;;  %v16610_v60 = vcombine.low %v890_v41, %v894_v0 }
 0x578   :  { %11066 = vmatpush2.bf16.msra.mxu0 %v16506_v52  ;;  %11107 = vmatpush2.bf16.msra.mxu1 %v16634_v58  ;;  %v758_v40 = vld [vmem:[#allocation2 + $0x12f8] sm:$0xff] }
 0x579   :  { %11067 = vmatprep.subr.bf16.mxu0 %v16499_v23  ;;  %11108 = vmatprep.subr.bf16.mxu1 %v16627_v24  ;;  %v882_v12 = vld [vmem:[#allocation2 + $0x16d8] sm:$0xff]  ;;  %v16475_v3 = vcombine.high %v754_v47, %v758_v40  ;;  %v16474_v31 = vcombine.low %v754_v47, %v758_v40 }
 0x57a   :  { %v886_v1 = vld [vmem:[#allocation2 + $0x16f8] sm:$0xff] }
 0x57b   :  { %v16603_v28 = vcombine.high %v882_v12, %v886_v1  ;;  %v746_v35 = vld [vmem:[#allocation2 + $0x1298] sm:$0xff]  ;;  %v16602_v22 = vcombine.low %v882_v12, %v886_v1 }
 0x57c   :  { %11068 = vmatpush2.bf16.msra.mxu0 %v16498_v30  ;;  %11109 = vmatpush2.bf16.msra.mxu1 %v16626_v55  ;;  %v750_v15 = vld [vmem:[#allocation2 + $0x12b8] sm:$0xff] }
 0x57d   :  { %11069 = vmatprep.subr.bf16.mxu0 %v16491_v11  ;;  %11110 = vmatprep.subr.bf16.mxu1 %v16619_v16  ;;  %v874_v33 = vld [vmem:[#allocation2 + $0x1698] sm:$0xff]  ;;  %v16467_v5 = vcombine.high %v746_v35, %v750_v15  ;;  %v16466_v24 = vcombine.low %v746_v35, %v750_v15 }
 0x57e   :  { %v878_v49 = vld [vmem:[#allocation2 + $0x16b8] sm:$0xff] }
 0x57f   :  { %v16595_v51 = vcombine.high %v874_v33, %v878_v49  ;;  %v738_v42 = vld [vmem:[#allocation2 + $0x1258] sm:$0xff]  ;;  %v16594_v19 = vcombine.low %v874_v33, %v878_v49 }
 0x580   :  { %11070 = vmatpush2.bf16.msra.mxu0 %v16490_v8  ;;  %11111 = vmatpush2.bf16.msra.mxu1 %v16618_v39  ;;  %v742_v52 = vld [vmem:[#allocation2 + $0x1278] sm:$0xff] }
 0x581   :  { %11071 = vmatprep.subr.bf16.mxu0 %v16483_v63  ;;  %11112 = vmatprep.subr.bf16.mxu1 %v16611_v62  ;;  %v866_v58 = vld [vmem:[#allocation2 + $0x1658] sm:$0xff]  ;;  %v16459_v36 = vcombine.high %v738_v42, %v742_v52  ;;  %v16458_v16 = vcombine.low %v738_v42, %v742_v52 }
 0x582   :  { %v870_v23 = vld [vmem:[#allocation2 + $0x1678] sm:$0xff] }
 0x583   :  { %v16587_v27 = vcombine.high %v866_v58, %v870_v23  ;;  %v730_v59 = vld [vmem:[#allocation2 + $0x1218] sm:$0xff]  ;;  %v16586_v43 = vcombine.low %v866_v58, %v870_v23 }
 0x584   :  { %11072 = vmatpush2.bf16.msra.mxu0 %v16482_v7  ;;  %11113 = vmatpush2.bf16.msra.mxu1 %v16610_v60  ;;  %v734_v30 = vld [vmem:[#allocation2 + $0x1238] sm:$0xff] }
 0x585   :  { %11073 = vmatprep.subr.bf16.mxu0 %v16475_v3  ;;  %11114 = vmatprep.subr.bf16.mxu1 %v16603_v28  ;;  %v858_v55 = vld [vmem:[#allocation2 + $0x1618] sm:$0xff]  ;;  %v16451_v29 = vcombine.high %v730_v59, %v734_v30  ;;  %v16450_v62 = vcombine.low %v730_v59, %v734_v30 }
 0x586   :  { %v862_v11 = vld [vmem:[#allocation2 + $0x1638] sm:$0xff] }
 0x587   :  { %v16579_v41 = vcombine.high %v858_v55, %v862_v11  ;;  %v978_v0 = vld [vmem:[#allocation2 + $0x19d8] sm:$0xff]  ;;  %v16578_v47 = vcombine.low %v858_v55, %v862_v11 }
 0x588   :  { %11074 = vmatpush2.bf16.msra.mxu0 %v16474_v31  ;;  %11115 = vmatpush2.bf16.msra.mxu1 %v16602_v22  ;;  %v982_v8 = vld [vmem:[#allocation2 + $0x19f8] sm:$0xff] }
 0x589   :  { %11075 = vmatprep.subr.bf16.mxu0 %v16467_v5  ;;  %11116 = vmatprep.subr.bf16.mxu1 %v16595_v51  ;;  %v1106_v39 = vld [vmem:[#allocation2 + $0x1dd8] sm:$0xff]  ;;  %v16699_v40 = vcombine.high %v978_v0, %v982_v8  ;;  %v16698_v28 = vcombine.low %v978_v0, %v982_v8 }
 0x58a   :  { %v1110_v63 = vld [vmem:[#allocation2 + $0x1df8] sm:$0xff] }
 0x58b   :  { %v16827_v12 = vcombine.high %v1106_v39, %v1110_v63  ;;  %v970_v1 = vld [vmem:[#allocation2 + $0x1998] sm:$0xff]  ;;  %v16826_v35 = vcombine.low %v1106_v39, %v1110_v63 }
 0x58c   :  { %11076 = vmatpush2.bf16.msra.mxu0 %v16466_v24  ;;  %11117 = vmatpush2.bf16.msra.mxu1 %v16594_v19  ;;  %v974_v7 = vld [vmem:[#allocation2 + $0x19b8] sm:$0xff] }
 0x58d   :  { %11077 = vmatprep.subr.bf16.mxu0 %v16459_v36  ;;  %11118 = vmatprep.subr.bf16.mxu1 %v16587_v27  ;;  %v1098_v60 = vld [vmem:[#allocation2 + $0x1d98] sm:$0xff]  ;;  %v16691_v15 = vcombine.high %v970_v1, %v974_v7  ;;  %v16690_v58 = vcombine.low %v970_v1, %v974_v7 }
 0x58e   :  { %v1102_v3 = vld [vmem:[#allocation2 + $0x1db8] sm:$0xff] }
 0x58f   :  { %v16819_v33 = vcombine.high %v1098_v60, %v1102_v3  ;;  %v962_v49 = vld [vmem:[#allocation2 + $0x1958] sm:$0xff]  ;;  %v16818_v24 = vcombine.low %v1098_v60, %v1102_v3 }
 0x590   :  { %11078 = vmatpush2.bf16.msra.mxu0 %v16458_v16  ;;  %11119 = vmatpush2.bf16.msra.mxu1 %v16586_v43  ;;  %v966_v31 = vld [vmem:[#allocation2 + $0x1978] sm:$0xff] }
 0x591   :  { %11079 = vmatprep.subr.bf16.mxu0 %v16451_v29  ;;  %11120 = vmatprep.subr.bf16.mxu1 %v16579_v41  ;;  %v1090_v5 = vld [vmem:[#allocation2 + $0x1d58] sm:$0xff]  ;;  %v16683_v19 = vcombine.high %v962_v49, %v966_v31  ;;  %v16682_v29 = vcombine.low %v962_v49, %v966_v31 }
 0x592   :  { %v1094_v51 = vld [vmem:[#allocation2 + $0x1d78] sm:$0xff] }
 0x593   :  { %v954_v30 = vld [vmem:[#allocation2 + $0x1918] sm:$0xff] }
 0x594   :  { %11080 = vmatpush2.bf16.msra.mxu0 %v16450_v62  ;;  %11121 = vmatpush2.bf16.msra.mxu1 %v16578_v47  ;;  %v958_v55 = vld [vmem:[#allocation2 + $0x1938] sm:$0xff] }
 0x595   :  { %11131 = vmatprep.subr.bf16.mxu0 %v16699_v40  ;;  %11172 = vmatprep.subr.bf16.mxu1 %v16827_v12  ;;  %v1086_v11 = vld [vmem:[#allocation2 + $0x1d38] sm:$0xff]  ;;  %v16675_v0 = vcombine.high %v954_v30, %v958_v55  ;;  %v16674_v40 = vcombine.low %v954_v30, %v958_v55 }
 0x596   :  { %v946_v63 = vld [vmem:[#allocation2 + $0x18d8] sm:$0xff] }
 0x597   :  { %v10837_v22 = vpop.f32.mrf.mxu0  ;;  %11082 = vmatmul.mubr.bf16.vlgmr.msra.gmra.mxu0 %v18409_v2  ;;  %v10878_v52 = vpop.f32.mrf.mxu1  ;;  %11123 = vmatmul.mubr.bf16.vlgmr.msra.gmra.mxu1 %v18414_v6  ;;  %v16811_v2 = vcombine.high %v1090_v5, %v1094_v51  ;;  %v1082_v6 = vld [vmem:[#allocation2 + $0x1d18] sm:$0xff] }
 0x598   :  { %v10838_v42 = vadd.f32 %v10837_v22, %v18654_v20  ;;  %11132 = vmatpush1.bf16.msra.mxu0 %v16698_v28  ;;  %11173 = vmatpush1.bf16.msra.mxu1 %v16826_v35  ;;  %v16803_v39 = vcombine.high %v1082_v6, %v1086_v11  ;;  %v1074_v62 = vld [vmem:[#allocation2 + $0x1cd8] sm:$0xff] }
 0x599   :  { %v10839_v23 = vpop.f32.mrf.mxu0  ;;  %11133 = vmatprep.subr.bf16.mxu0 %v16691_v15  ;;  %v10880_v59 = vpop.f32.mrf.mxu1  ;;  %11174 = vmatprep.subr.bf16.mxu1 %v16819_v33  ;;  %v1078_v47 = vld [vmem:[#allocation2 + $0x1cf8] sm:$0xff] }
 0x59a   :  { %v18664_v36 = vadd.f32 %v10878_v52, %v10838_v42  ;;  %v10840_v27 = vadd.f32 %v10839_v23, %v18659_v57  ;;  %11163 = vmatprep.mubr.bf16.mxu0 %v18419_v14  ;;  %11204 = vmatprep.mubr.bf16.mxu1 %v18422_v18  ;;  %v16810_v57 = vcombine.low %v1090_v5, %v1094_v51  ;;  %v950_v14 = vld [vmem:[#allocation2 + $0x18f8] sm:$0xff] }
 0x59b   :  { %v10841_v20 = vpop.f32.mrf.mxu0  ;;  %v10882_v43 = vpop.f32.mrf.mxu1  ;;  %v16802_v18 = vcombine.low %v1082_v6, %v1086_v11  ;;  %v16667_v12 = vcombine.high %v946_v63, %v950_v14  ;;  %v16795_v1 = vcombine.high %v1074_v62, %v1078_v47  ;;  %v938_v7 = vld [vmem:[#allocation2 + $0x1898] sm:$0xff]  ;;  %v16666_v35 = vcombine.low %v946_v63, %v950_v14 }
 0x59c   :  { %v18669_v16 = vadd.f32 %v10880_v59, %v10840_v27  ;;  %11134 = vmatpush1.bf16.msra.mxu0 %v16690_v58  ;;  %11175 = vmatpush1.bf16.msra.mxu1 %v16818_v24  ;;  %v942_v60 = vld [vmem:[#allocation2 + $0x18b8] sm:$0xff]  ;;  %v16794_v15 = vcombine.low %v1074_v62, %v1078_v47 }
 0x59d   :  { %v10842_v41 = vpop.f32.mrf.mxu0  ;;  %11135 = vmatprep.subr.bf16.mxu0 %v16683_v19  ;;  %v10883_v8 = vpop.f32.mrf.mxu1  ;;  %11176 = vmatprep.subr.bf16.mxu1 %v16811_v2  ;;  %v1066_v3 = vld [vmem:[#allocation2 + $0x1c98] sm:$0xff]  ;;  %v16659_v33 = vcombine.high %v938_v7, %v942_v60  ;;  %v16658_v42 = vcombine.low %v938_v7, %v942_v60 }
 0x59e   :  { %v1070_v28 = vld [vmem:[#allocation2 + $0x1cb8] sm:$0xff] }
 0x59f   :  { %v16787_v49 = vcombine.high %v1066_v3, %v1070_v28  ;;  %v930_v31 = vld [vmem:[#allocation2 + $0x1858] sm:$0xff]  ;;  %v16786_v52 = vcombine.low %v1066_v3, %v1070_v28 }
 0x5a0   :  { %11136 = vmatpush1.bf16.msra.mxu0 %v16682_v29  ;;  %11177 = vmatpush1.bf16.msra.mxu1 %v16810_v57  ;;  %v934_v22 = vld [vmem:[#allocation2 + $0x1878] sm:$0xff] }
 0x5a1   :  { %11137 = vmatprep.subr.bf16.mxu0 %v16675_v0  ;;  %11178 = vmatprep.subr.bf16.mxu1 %v16803_v39  ;;  %v1058_v5 = vld [vmem:[#allocation2 + $0x1c58] sm:$0xff]  ;;  %v16651_v58 = vcombine.high %v930_v31, %v934_v22  ;;  %v16650_v2 = vcombine.low %v930_v31, %v934_v22 }
 0x5a2   :  { %v1062_v51 = vld [vmem:[#allocation2 + $0x1c78] sm:$0xff] }
 0x5a3   :  { %v16779_v23 = vcombine.high %v1058_v5, %v1062_v51  ;;  %v922_v24 = vld [vmem:[#allocation2 + $0x1818] sm:$0xff]  ;;  %v16778_v30 = vcombine.low %v1058_v5, %v1062_v51 }
 0x5a4   :  { %11138 = vmatpush1.bf16.msra.mxu0 %v16674_v40  ;;  %11179 = vmatpush1.bf16.msra.mxu1 %v16802_v18  ;;  %v926_v19 = vld [vmem:[#allocation2 + $0x1838] sm:$0xff] }
 0x5a5   :  { %11139 = vmatprep.subr.bf16.mxu0 %v16667_v12  ;;  %11180 = vmatprep.subr.bf16.mxu1 %v16795_v1  ;;  %v1050_v27 = vld [vmem:[#allocation2 + $0x1c18] sm:$0xff]  ;;  %v16643_v55 = vcombine.high %v922_v24, %v926_v19  ;;  %v16642_v41 = vcombine.low %v922_v24, %v926_v19 }
 0x5a6   :  { %v1054_v59 = vld [vmem:[#allocation2 + $0x1c38] sm:$0xff] }
 0x5a7   :  { %v16771_v20 = vcombine.high %v1050_v27, %v1054_v59  ;;  %v1042_v6 = vld [vmem:[#allocation2 + $0x1bd8] sm:$0xff]  ;;  %v16770_v57 = vcombine.low %v1050_v27, %v1054_v59 }
 0x5a8   :  { %11140 = vmatpush1.bf16.msra.mxu0 %v16666_v35  ;;  %11181 = vmatpush1.bf16.msra.mxu1 %v16794_v15  ;;  %v1046_v11 = vld [vmem:[#allocation2 + $0x1bf8] sm:$0xff] }
 0x5a9   :  { %11141 = vmatprep.subr.bf16.mxu0 %v16659_v33  ;;  %11182 = vmatprep.subr.bf16.mxu1 %v16787_v49  ;;  %v1170_v43 = vld [vmem:[#allocation2 + $0x1fd8] sm:$0xff]  ;;  %v16763_v0 = vcombine.high %v1042_v6, %v1046_v11  ;;  %v16762_v47 = vcombine.low %v1042_v6, %v1046_v11 }
 0x5aa   :  { %v1174_v29 = vld [vmem:[#allocation2 + $0x1ff8] sm:$0xff] }
 0x5ab   :  { %v16891_v8 = vcombine.high %v1170_v43, %v1174_v29  ;;  %v1034_v39 = vld [vmem:[#allocation2 + $0x1b98] sm:$0xff]  ;;  %v16890_v40 = vcombine.low %v1170_v43, %v1174_v29 }
 0x5ac   :  { %11142 = vmatpush1.bf16.msra.mxu0 %v16658_v42  ;;  %11183 = vmatpush1.bf16.msra.mxu1 %v16786_v52  ;;  %v1038_v63 = vld [vmem:[#allocation2 + $0x1bb8] sm:$0xff] }
 0x5ad   :  { %11143 = vmatprep.subr.bf16.mxu0 %v16651_v58  ;;  %11184 = vmatprep.subr.bf16.mxu1 %v16779_v23  ;;  %v1162_v14 = vld [vmem:[#allocation2 + $0x1f98] sm:$0xff]  ;;  %v16755_v18 = vcombine.high %v1034_v39, %v1038_v63  ;;  %v16754_v28 = vcombine.low %v1034_v39, %v1038_v63 }
 0x5ae   :  { %v1166_v62 = vld [vmem:[#allocation2 + $0x1fb8] sm:$0xff] }
 0x5af   :  { %v16883_v12 = vcombine.high %v1162_v14, %v1166_v62  ;;  %v1026_v1 = vld [vmem:[#allocation2 + $0x1b58] sm:$0xff]  ;;  %v16882_v35 = vcombine.low %v1162_v14, %v1166_v62 }
 0x5b0   :  { %11144 = vmatpush1.bf16.msra.mxu0 %v16650_v2  ;;  %11185 = vmatpush1.bf16.msra.mxu1 %v16778_v30  ;;  %v1030_v7 = vld [vmem:[#allocation2 + $0x1b78] sm:$0xff] }
 0x5b1   :  { %11145 = vmatprep.subr.bf16.mxu0 %v16643_v55  ;;  %11186 = vmatprep.subr.bf16.mxu1 %v16771_v20  ;;  %v1154_v60 = vld [vmem:[#allocation2 + $0x1f58] sm:$0xff]  ;;  %v16747_v15 = vcombine.high %v1026_v1, %v1030_v7  ;;  %v16746_v51 = vcombine.low %v1026_v1, %v1030_v7 }
 0x5b2   :  { %v1158_v3 = vld [vmem:[#allocation2 + $0x1f78] sm:$0xff] }
 0x5b3   :  { %v16875_v33 = vcombine.high %v1154_v60, %v1158_v3  ;;  %v1018_v49 = vld [vmem:[#allocation2 + $0x1b18] sm:$0xff]  ;;  %v16874_v42 = vcombine.low %v1154_v60, %v1158_v3 }
 0x5b4   :  { %11146 = vmatpush1.bf16.msra.mxu0 %v16642_v41  ;;  %11187 = vmatpush1.bf16.msra.mxu1 %v16770_v57  ;;  %v1022_v31 = vld [vmem:[#allocation2 + $0x1b38] sm:$0xff] }
 0x5b5   :  { %11147 = vmatprep.subr.bf16.mxu0 %v16763_v0  ;;  %11188 = vmatprep.subr.bf16.mxu1 %v16891_v8  ;;  %v1146_v22 = vld [vmem:[#allocation2 + $0x1f18] sm:$0xff]  ;;  %v16739_v52 = vcombine.high %v1018_v49, %v1022_v31  ;;  %v16738_v59 = vcombine.low %v1018_v49, %v1022_v31 }
 0x5b6   :  { %v1150_v5 = vld [vmem:[#allocation2 + $0x1f38] sm:$0xff] }
 0x5b7   :  { %v16867_v58 = vcombine.high %v1146_v22, %v1150_v5  ;;  %v1010_v23 = vld [vmem:[#allocation2 + $0x1ad8] sm:$0xff]  ;;  %v16866_v2 = vcombine.low %v1146_v22, %v1150_v5 }
 0x5b8   :  { %11148 = vmatpush2.bf16.msra.mxu0 %v16762_v47  ;;  %11189 = vmatpush2.bf16.msra.mxu1 %v16890_v40  ;;  %v1014_v24 = vld [vmem:[#allocation2 + $0x1af8] sm:$0xff] }
 0x5b9   :  { %11149 = vmatprep.subr.bf16.mxu0 %v16755_v18  ;;  %11190 = vmatprep.subr.bf16.mxu1 %v16883_v12  ;;  %v1138_v19 = vld [vmem:[#allocation2 + $0x1ed8] sm:$0xff]  ;;  %v16731_v30 = vcombine.high %v1010_v23, %v1014_v24  ;;  %v16730_v29 = vcombine.low %v1010_v23, %v1014_v24  ;;  %v1719_v23 = vsub.s32 7, %v18427_v26 }
 0x5ba   :  { %v1142_v27 = vld [vmem:[#allocation2 + $0x1ef8] sm:$0xff] }
 0x5bb   :  { %v16859_v55 = vcombine.high %v1138_v19, %v1142_v27  ;;  %v1002_v20 = vld [vmem:[#allocation2 + $0x1a98] sm:$0xff]  ;;  %v16858_v41 = vcombine.low %v1138_v19, %v1142_v27 }
 0x5bc   :  { %11150 = vmatpush2.bf16.msra.mxu0 %v16754_v28  ;;  %11191 = vmatpush2.bf16.msra.mxu1 %v16882_v35  ;;  %v1006_v6 = vld [vmem:[#allocation2 + $0x1ab8] sm:$0xff] }
 0x5bd   :  { %11151 = vmatprep.subr.bf16.mxu0 %v16747_v15  ;;  %11192 = vmatprep.subr.bf16.mxu1 %v16875_v33  ;;  %v1130_v11 = vld [vmem:[#allocation2 + $0x1e98] sm:$0xff]  ;;  %v16723_v57 = vcombine.high %v1002_v20, %v1006_v6  ;;  %v16722_v62 = vcombine.low %v1002_v20, %v1006_v6 }
 0x5be   :  { %v1134_v43 = vld [vmem:[#allocation2 + $0x1eb8] sm:$0xff] }
 0x5bf   :  { %v16851_v0 = vcombine.high %v1130_v11, %v1134_v43  ;;  %v994_v8 = vld [vmem:[#allocation2 + $0x1a58] sm:$0xff]  ;;  %v16850_v47 = vcombine.low %v1130_v11, %v1134_v43 }
 0x5c0   :  { %11152 = vmatpush2.bf16.msra.mxu0 %v16746_v51  ;;  %11193 = vmatpush2.bf16.msra.mxu1 %v16874_v42  ;;  %v998_v39 = vld [vmem:[#allocation2 + $0x1a78] sm:$0xff]  ;;  %v1715_v51 = vsub.s32 6, %v18427_v26 }
 0x5c1   :  { %11153 = vmatprep.subr.bf16.mxu0 %v16739_v52  ;;  %11194 = vmatprep.subr.bf16.mxu1 %v16867_v58  ;;  %v1122_v63 = vld [vmem:[#allocation2 + $0x1e58] sm:$0xff]  ;;  %v16715_v40 = vcombine.high %v994_v8, %v998_v39  ;;  %v16714_v3 = vcombine.low %v994_v8, %v998_v39 }
 0x5c2   :  { %v1126_v14 = vld [vmem:[#allocation2 + $0x1e78] sm:$0xff] }
 0x5c3   :  { %v16843_v18 = vcombine.high %v1122_v63, %v1126_v14  ;;  %v986_v12 = vld [vmem:[#allocation2 + $0x1a18] sm:$0xff]  ;;  %v16842_v28 = vcombine.low %v1122_v63, %v1126_v14 }
 0x5c4   :  { %11154 = vmatpush2.bf16.msra.mxu0 %v16738_v59  ;;  %11195 = vmatpush2.bf16.msra.mxu1 %v16866_v2  ;;  %v990_v1 = vld [vmem:[#allocation2 + $0x1a38] sm:$0xff]  ;;  %v18145_v2 = vld [vmem:[#allocation4] sm:$0xff] }
 0x5c5   :  { %11155 = vmatprep.subr.bf16.mxu0 %v16731_v30  ;;  %11196 = vmatprep.subr.bf16.mxu1 %v16859_v55  ;;  %v1114_v7 = vld [vmem:[#allocation2 + $0x1e18] sm:$0xff]  ;;  %v16707_v35 = vcombine.high %v986_v12, %v990_v1  ;;  %v16706_v5 = vcombine.low %v986_v12, %v990_v1  ;;  %v1716_v30 = vrot.slane %v18145_v2, %v1715_v51 }
 0x5c6   :  { %v1118_v60 = vld [vmem:[#allocation2 + $0x1e38] sm:$0xff]  ;;  %v1720_v11 = vrot.slane %v18145_v2, %v1719_v23 }
 0x5c7   :  { %v16835_v15 = vcombine.high %v1114_v7, %v1118_v60  ;;  %v1234_v33 = vld [vmem:[#allocation2 + $0x21d8] sm:$0xff]  ;;  %v16834_v42 = vcombine.low %v1114_v7, %v1118_v60 }
 0x5c8   :  { %11156 = vmatpush2.bf16.msra.mxu0 %v16730_v29  ;;  %11197 = vmatpush2.bf16.msra.mxu1 %v16858_v41  ;;  %v1238_v49 = vld [vmem:[#allocation2 + $0x21f8] sm:$0xff] }
 0x5c9   :  { %11157 = vmatprep.subr.bf16.mxu0 %v16723_v57  ;;  %11198 = vmatprep.subr.bf16.mxu1 %v16851_v0  ;;  %v1362_v31 = vld [vmem:[#allocation2 + $0x25d8] sm:$0xff]  ;;  %v16955_v52 = vcombine.high %v1234_v33, %v1238_v49  ;;  %v16954_v55 = vcombine.low %v1234_v33, %v1238_v49 }
 0x5ca   :  { %v1366_v22 = vld [vmem:[#allocation2 + $0x25f8] sm:$0xff] }
 0x5cb   :  { %v17083_v58 = vcombine.high %v1362_v31, %v1366_v22  ;;  %v1226_v24 = vld [vmem:[#allocation2 + $0x2198] sm:$0xff]  ;;  %v17082_v20 = vcombine.low %v1362_v31, %v1366_v22 }
 0x5cc   :  { %11158 = vmatpush2.bf16.msra.mxu0 %v16722_v62  ;;  %11199 = vmatpush2.bf16.msra.mxu1 %v16850_v47  ;;  %v1230_v19 = vld [vmem:[#allocation2 + $0x21b8] sm:$0xff] }
 0x5cd   :  { %11159 = vmatprep.subr.bf16.mxu0 %v16715_v40  ;;  %11200 = vmatprep.subr.bf16.mxu1 %v16843_v18  ;;  %v1354_v27 = vld [vmem:[#allocation2 + $0x2598] sm:$0xff]  ;;  %v16947_v6 = vcombine.high %v1226_v24, %v1230_v19  ;;  %v16946_v14 = vcombine.low %v1226_v24, %v1230_v19 }
 0x5ce   :  { %v1358_v59 = vld [vmem:[#allocation2 + $0x25b8] sm:$0xff] }
 0x5cf   :  { %v17075_v43 = vcombine.high %v1354_v27, %v1358_v59  ;;  %v1218_v29 = vld [vmem:[#allocation2 + $0x2158] sm:$0xff]  ;;  %v17074_v47 = vcombine.low %v1354_v27, %v1358_v59 }
 0x5d0   :  { %11160 = vmatpush2.bf16.msra.mxu0 %v16714_v3  ;;  %11201 = vmatpush2.bf16.msra.mxu1 %v16842_v28  ;;  %v1222_v41 = vld [vmem:[#allocation2 + $0x2178] sm:$0xff] }
 0x5d1   :  { %11161 = vmatprep.subr.bf16.mxu0 %v16707_v35  ;;  %11202 = vmatprep.subr.bf16.mxu1 %v16835_v15  ;;  %v1346_v0 = vld [vmem:[#allocation2 + $0x2558] sm:$0xff]  ;;  %v16939_v40 = vcombine.high %v1218_v29, %v1222_v41  ;;  %v16938_v33 = vcombine.low %v1218_v29, %v1222_v41 }
 0x5d2   :  { %v1350_v8 = vld [vmem:[#allocation2 + $0x2578] sm:$0xff] }
 0x5d3   :  { %v17067_v7 = vcombine.high %v1346_v0, %v1350_v8  ;;  %v1214_v60 = vld [vmem:[#allocation2 + $0x2138] sm:$0xff]  ;;  %v17066_v31 = vcombine.low %v1346_v0, %v1350_v8 }
 0x5d4   :  { %11162 = vmatpush2.bf16.msra.mxu0 %v16706_v5  ;;  %11203 = vmatpush2.bf16.msra.mxu1 %v16834_v42  ;;  %v1338_v28 = vld [vmem:[#allocation2 + $0x2518] sm:$0xff] }
 0x5d5   :  { %11213 = vmatprep.subr.bf16.mxu0 %v16955_v52  ;;  %11254 = vmatprep.subr.bf16.mxu1 %v17083_v58  ;;  %v1202_v52 = vld [vmem:[#allocation2 + $0x20d8] sm:$0xff] }
 0x5d6   :  { %v1330_v58 = vld [vmem:[#allocation2 + $0x24d8] sm:$0xff] }
 0x5d7   :  { %v10919_v57 = vpop.f32.mrf.mxu0  ;;  %11164 = vmatmul.mubr.bf16.vlgmr.msra.gmra.mxu0 %v18437_v50  ;;  %v10960_v63 = vpop.f32.mrf.mxu1  ;;  %11205 = vmatmul.mubr.bf16.vlgmr.msra.gmra.mxu1 %v18444_v56  ;;  %v1210_v50 = vld [vmem:[#allocation2 + $0x2118] sm:$0xff] }
 0x5d8   :  { %v10920_v39 = vadd.f32 %v10919_v57, %v1716_v30  ;;  %11214 = vmatpush1.bf16.msra.mxu0 %v16954_v55  ;;  %11255 = vmatpush1.bf16.msra.mxu1 %v17082_v20  ;;  %v1342_v56 = vld [vmem:[#allocation2 + $0x2538] sm:$0xff]  ;;  %v16931_v22 = vcombine.high %v1210_v50, %v1214_v60  ;;  %v16930_v19 = vcombine.low %v1210_v50, %v1214_v60 }
 0x5d9   :  { %v10921_v62 = vpop.f32.mrf.mxu0  ;;  %11215 = vmatprep.subr.bf16.mxu0 %v16947_v6  ;;  %v10962_v1 = vpop.f32.mrf.mxu1  ;;  %11256 = vmatprep.subr.bf16.mxu1 %v17075_v43  ;;  %v17059_v42 = vcombine.high %v1338_v28, %v1342_v56  ;;  %v1334_v24 = vld [vmem:[#allocation2 + $0x24f8] sm:$0xff] }
 0x5da   :  { %v18679_v18 = vadd.f32 %v10960_v63, %v10920_v39  ;;  %v10922_v12 = vadd.f32 %v10921_v62, %v1720_v11  ;;  %11245 = vmatprep.mubr.bf16.mxu0 %v18451_v4  ;;  %11286 = vmatprep.mubr.bf16.mxu1 %v18454_v9  ;;  %v1206_v4 = vld [vmem:[#allocation2 + $0x20f8] sm:$0xff]  ;;  %v17058_v9 = vcombine.low %v1338_v28, %v1342_v56 }
 0x5db   :  { %v10923_v3 = vpop.f32.mrf.mxu0  ;;  %v10964_v15 = vpop.f32.mrf.mxu1  ;;  %v16923_v27 = vcombine.high %v1202_v52, %v1206_v4  ;;  %v17051_v59 = vcombine.high %v1330_v58, %v1334_v24  ;;  %v1194_v2 = vld [vmem:[#allocation2 + $0x2098] sm:$0xff]  ;;  %v16922_v6 = vcombine.low %v1202_v52, %v1206_v4  ;;  %v17050_v11 = vcombine.low %v1330_v58, %v1334_v24 }
 0x5dc   :  { %v18683_v35 = vadd.f32 %v10962_v1, %v10922_v12  ;;  %11216 = vmatpush1.bf16.msra.mxu0 %v16946_v14  ;;  %11257 = vmatpush1.bf16.msra.mxu1 %v17074_v47  ;;  %v1198_v30 = vld [vmem:[#allocation2 + $0x20b8] sm:$0xff] }
 0x5dd   :  { %v10924_v49 = vpop.f32.mrf.mxu0  ;;  %11217 = vmatprep.subr.bf16.mxu0 %v16939_v40  ;;  %v10965_v5 = vpop.f32.mrf.mxu1  ;;  %11258 = vmatprep.subr.bf16.mxu1 %v17067_v7  ;;  %v1322_v55 = vld [vmem:[#allocation2 + $0x2498] sm:$0xff]  ;;  %v16915_v43 = vcombine.high %v1194_v2, %v1198_v30  ;;  %v16914_v39 = vcombine.low %v1194_v2, %v1198_v30 }
 0x5de   :  { %v1326_v20 = vld [vmem:[#allocation2 + $0x24b8] sm:$0xff] }
 0x5df   :  { %v17043_v29 = vcombine.high %v1322_v55, %v1326_v20  ;;  %v1186_v41 = vld [vmem:[#allocation2 + $0x2058] sm:$0xff]  ;;  %v17042_v63 = vcombine.low %v1322_v55, %v1326_v20 }
 0x5e0   :  { %11218 = vmatpush1.bf16.msra.mxu0 %v16938_v33  ;;  %11259 = vmatpush1.bf16.msra.mxu1 %v17066_v31  ;;  %v1190_v57 = vld [vmem:[#allocation2 + $0x2078] sm:$0xff] }
 0x5e1   :  { %11219 = vmatprep.subr.bf16.mxu0 %v16931_v22  ;;  %11260 = vmatprep.subr.bf16.mxu1 %v17059_v42  ;;  %v1314_v0 = vld [vmem:[#allocation2 + $0x2458] sm:$0xff]  ;;  %v16907_v14 = vcombine.high %v1186_v41, %v1190_v57  ;;  %v16906_v7 = vcombine.low %v1186_v41, %v1190_v57 }
 0x5e2   :  { %v1318_v8 = vld [vmem:[#allocation2 + $0x2478] sm:$0xff] }
 0x5e3   :  { %v17035_v62 = vcombine.high %v1314_v0, %v1318_v8  ;;  %v1178_v47 = vld [vmem:[#allocation2 + $0x2018] sm:$0xff]  ;;  %v17034_v50 = vcombine.low %v1314_v0, %v1318_v8 }
 0x5e4   :  { %11220 = vmatpush1.bf16.msra.mxu0 %v16930_v19  ;;  %11261 = vmatpush1.bf16.msra.mxu1 %v17058_v9  ;;  %v1182_v40 = vld [vmem:[#allocation2 + $0x2038] sm:$0xff] }
 0x5e5   :  { %11221 = vmatprep.subr.bf16.mxu0 %v16923_v27  ;;  %11262 = vmatprep.subr.bf16.mxu1 %v17051_v59  ;;  %v1306_v12 = vld [vmem:[#allocation2 + $0x2418] sm:$0xff]  ;;  %v16899_v60 = vcombine.high %v1178_v47, %v1182_v40  ;;  %v16898_v49 = vcombine.low %v1178_v47, %v1182_v40 }
 0x5e6   :  { %v1310_v1 = vld [vmem:[#allocation2 + $0x2438] sm:$0xff] }
 0x5e7   :  { %v17027_v3 = vcombine.high %v1306_v12, %v1310_v1  ;;  %v1298_v28 = vld [vmem:[#allocation2 + $0x23d8] sm:$0xff]  ;;  %v17026_v31 = vcombine.low %v1306_v12, %v1310_v1 }
 0x5e8   :  { %11222 = vmatpush1.bf16.msra.mxu0 %v16922_v6  ;;  %11263 = vmatpush1.bf16.msra.mxu1 %v17050_v11  ;;  %v1302_v56 = vld [vmem:[#allocation2 + $0x23f8] sm:$0xff] }
 0x5e9   :  { %11223 = vmatprep.subr.bf16.mxu0 %v16915_v43  ;;  %11264 = vmatprep.subr.bf16.mxu1 %v17043_v29  ;;  %v1426_v15 = vld [vmem:[#allocation2 + $0x27d8] sm:$0xff]  ;;  %v17019_v22 = vcombine.high %v1298_v28, %v1302_v56  ;;  %v17018_v24 = vcombine.low %v1298_v28, %v1302_v56 }
 0x5ea   :  { %v1430_v33 = vld [vmem:[#allocation2 + $0x27f8] sm:$0xff] }
 0x5eb   :  { %v17147_v5 = vcombine.high %v1426_v15, %v1430_v33  ;;  %v1290_v42 = vld [vmem:[#allocation2 + $0x2398] sm:$0xff]  ;;  %v17146_v19 = vcombine.low %v1426_v15, %v1430_v33 }
 0x5ec   :  { %11224 = vmatpush1.bf16.msra.mxu0 %v16914_v39  ;;  %11265 = vmatpush1.bf16.msra.mxu1 %v17042_v63  ;;  %v1294_v52 = vld [vmem:[#allocation2 + $0x23b8] sm:$0xff] }
 0x5ed   :  { %11225 = vmatprep.subr.bf16.mxu0 %v16907_v14  ;;  %11266 = vmatprep.subr.bf16.mxu1 %v17035_v62  ;;  %v1418_v4 = vld [vmem:[#allocation2 + $0x2798] sm:$0xff]  ;;  %v17011_v9 = vcombine.high %v1290_v42, %v1294_v52  ;;  %v17010_v20 = vcombine.low %v1290_v42, %v1294_v52 }
 0x5ee   :  { %v1422_v58 = vld [vmem:[#allocation2 + $0x27b8] sm:$0xff] }
 0x5ef   :  { %v17139_v27 = vcombine.high %v1418_v4, %v1422_v58  ;;  %v1282_v59 = vld [vmem:[#allocation2 + $0x2358] sm:$0xff]  ;;  %v17138_v6 = vcombine.low %v1418_v4, %v1422_v58 }
 0x5f0   :  { %11226 = vmatpush1.bf16.msra.mxu0 %v16906_v7  ;;  %11267 = vmatpush1.bf16.msra.mxu1 %v17034_v50  ;;  %v1286_v2 = vld [vmem:[#allocation2 + $0x2378] sm:$0xff] }
 0x5f1   :  { %11227 = vmatprep.subr.bf16.mxu0 %v16899_v60  ;;  %11268 = vmatprep.subr.bf16.mxu1 %v17027_v3  ;;  %v1410_v30 = vld [vmem:[#allocation2 + $0x2758] sm:$0xff]  ;;  %v17003_v11 = vcombine.high %v1282_v59, %v1286_v2  ;;  %v17002_v8 = vcombine.low %v1282_v59, %v1286_v2 }
 0x5f2   :  { %v1414_v55 = vld [vmem:[#allocation2 + $0x2778] sm:$0xff] }
 0x5f3   :  { %v17131_v43 = vcombine.high %v1410_v30, %v1414_v55  ;;  %v1274_v29 = vld [vmem:[#allocation2 + $0x2318] sm:$0xff]  ;;  %v17130_v39 = vcombine.low %v1410_v30, %v1414_v55 }
 0x5f4   :  { %11228 = vmatpush1.bf16.msra.mxu0 %v16898_v49  ;;  %11269 = vmatpush1.bf16.msra.mxu1 %v17026_v31  ;;  %v1278_v41 = vld [vmem:[#allocation2 + $0x2338] sm:$0xff] }
 0x5f5   :  { %11229 = vmatprep.subr.bf16.mxu0 %v17019_v22  ;;  %11270 = vmatprep.subr.bf16.mxu1 %v17147_v5  ;;  %v1402_v57 = vld [vmem:[#allocation2 + $0x2718] sm:$0xff]  ;;  %v16995_v63 = vcombine.high %v1274_v29, %v1278_v41  ;;  %v16994_v1 = vcombine.low %v1274_v29, %v1278_v41 }
 0x5f6   :  { %v1406_v0 = vld [vmem:[#allocation2 + $0x2738] sm:$0xff] }
 0x5f7   :  { %v17123_v14 = vcombine.high %v1402_v57, %v1406_v0  ;;  %v1266_v62 = vld [vmem:[#allocation2 + $0x22d8] sm:$0xff]  ;;  %v17122_v7 = vcombine.low %v1402_v57, %v1406_v0 }
 0x5f8   :  { %11230 = vmatpush2.bf16.msra.mxu0 %v17018_v24  ;;  %11271 = vmatpush2.bf16.msra.mxu1 %v17146_v19  ;;  %v1270_v47 = vld [vmem:[#allocation2 + $0x22f8] sm:$0xff] }
 0x5f9   :  { %11231 = vmatprep.subr.bf16.mxu0 %v17011_v9  ;;  %11272 = vmatprep.subr.bf16.mxu1 %v17139_v27  ;;  %v1394_v40 = vld [vmem:[#allocation2 + $0x26d8] sm:$0xff]  ;;  %v16987_v50 = vcombine.high %v1266_v62, %v1270_v47  ;;  %v16986_v33 = vcombine.low %v1266_v62, %v1270_v47 }
 0x5fa   :  { %v1398_v12 = vld [vmem:[#allocation2 + $0x26f8] sm:$0xff] }
 0x5fb   :  { %v17115_v60 = vcombine.high %v1394_v40, %v1398_v12  ;;  %v1258_v3 = vld [vmem:[#allocation2 + $0x2298] sm:$0xff]  ;;  %v17114_v49 = vcombine.low %v1394_v40, %v1398_v12 }
 0x5fc   :  { %11232 = vmatpush2.bf16.msra.mxu0 %v17010_v20  ;;  %11273 = vmatpush2.bf16.msra.mxu1 %v17138_v6  ;;  %v1262_v28 = vld [vmem:[#allocation2 + $0x22b8] sm:$0xff] }
 0x5fd   :  { %11233 = vmatprep.subr.bf16.mxu0 %v17003_v11  ;;  %11274 = vmatprep.subr.bf16.mxu1 %v17131_v43  ;;  %v1386_v56 = vld [vmem:[#allocation2 + $0x2698] sm:$0xff]  ;;  %v16979_v31 = vcombine.high %v1258_v3, %v1262_v28  ;;  %v16978_v58 = vcombine.low %v1258_v3, %v1262_v28 }
 0x5fe   :  { %v1390_v15 = vld [vmem:[#allocation2 + $0x26b8] sm:$0xff] }
 0x5ff   :  { %v17107_v22 = vcombine.high %v1386_v56, %v1390_v15  ;;  %v1250_v5 = vld [vmem:[#allocation2 + $0x2258] sm:$0xff]  ;;  %v17106_v24 = vcombine.low %v1386_v56, %v1390_v15 }
 0x600   :  { %11234 = vmatpush2.bf16.msra.mxu0 %v17002_v8  ;;  %11275 = vmatpush2.bf16.msra.mxu1 %v17130_v39  ;;  %v1254_v42 = vld [vmem:[#allocation2 + $0x2278] sm:$0xff] }
 0x601   :  { %11235 = vmatprep.subr.bf16.mxu0 %v16995_v63  ;;  %11276 = vmatprep.subr.bf16.mxu1 %v17123_v14  ;;  %v1378_v52 = vld [vmem:[#allocation2 + $0x2658] sm:$0xff]  ;;  %v16971_v19 = vcombine.high %v1250_v5, %v1254_v42  ;;  %v16970_v55 = vcombine.low %v1250_v5, %v1254_v42 }
 0x602   :  { %v1382_v4 = vld [vmem:[#allocation2 + $0x2678] sm:$0xff] }
 0x603   :  { %v17099_v9 = vcombine.high %v1378_v52, %v1382_v4  ;;  %v1242_v27 = vld [vmem:[#allocation2 + $0x2218] sm:$0xff]  ;;  %v17098_v20 = vcombine.low %v1378_v52, %v1382_v4 }
 0x604   :  { %11236 = vmatpush2.bf16.msra.mxu0 %v16994_v1  ;;  %11277 = vmatpush2.bf16.msra.mxu1 %v17122_v7  ;;  %v1246_v59 = vld [vmem:[#allocation2 + $0x2238] sm:$0xff] }
 0x605   :  { %11237 = vmatprep.subr.bf16.mxu0 %v16987_v50  ;;  %11278 = vmatprep.subr.bf16.mxu1 %v17115_v60  ;;  %v1370_v2 = vld [vmem:[#allocation2 + $0x2618] sm:$0xff]  ;;  %v16963_v6 = vcombine.high %v1242_v27, %v1246_v59  ;;  %v16962_v0 = vcombine.low %v1242_v27, %v1246_v59 }
 0x606   :  { %v1374_v30 = vld [vmem:[#allocation2 + $0x2638] sm:$0xff] }
 0x607   :  { %v17091_v11 = vcombine.high %v1370_v2, %v1374_v30  ;;  %v1490_v43 = vld [vmem:[#allocation2 + $0x29d8] sm:$0xff]  ;;  %v17090_v8 = vcombine.low %v1370_v2, %v1374_v30 }
 0x608   :  { %11238 = vmatpush2.bf16.msra.mxu0 %v16986_v33  ;;  %11279 = vmatpush2.bf16.msra.mxu1 %v17114_v49  ;;  %v1494_v29 = vld [vmem:[#allocation2 + $0x29f8] sm:$0xff] }
 0x609   :  { %11239 = vmatprep.subr.bf16.mxu0 %v16979_v31  ;;  %11280 = vmatprep.subr.bf16.mxu1 %v17107_v22  ;;  %v1618_v41 = vld [vmem:[#allocation2 + $0x2dd8] sm:$0xff]  ;;  %v17211_v39 = vcombine.high %v1490_v43, %v1494_v29  ;;  %v17210_v12 = vcombine.low %v1490_v43, %v1494_v29 }
 0x60a   :  { %v1622_v57 = vld [vmem:[#allocation2 + $0x2df8] sm:$0xff] }
 0x60b   :  { %v17339_v63 = vcombine.high %v1618_v41, %v1622_v57  ;;  %v1482_v14 = vld [vmem:[#allocation2 + $0x2998] sm:$0xff]  ;;  %v17338_v1 = vcombine.low %v1618_v41, %v1622_v57 }
 0x60c   :  { %11240 = vmatpush2.bf16.msra.mxu0 %v16978_v58  ;;  %11281 = vmatpush2.bf16.msra.mxu1 %v17106_v24  ;;  %v1486_v62 = vld [vmem:[#allocation2 + $0x29b8] sm:$0xff] }
 0x60d   :  { %11241 = vmatprep.subr.bf16.mxu0 %v16971_v19  ;;  %11282 = vmatprep.subr.bf16.mxu1 %v17099_v9  ;;  %v1610_v47 = vld [vmem:[#allocation2 + $0x2d98] sm:$0xff]  ;;  %v17203_v7 = vcombine.high %v1482_v14, %v1486_v62  ;;  %v17202_v31 = vcombine.low %v1482_v14, %v1486_v62 }
 0x60e   :  { %v1614_v40 = vld [vmem:[#allocation2 + $0x2db8] sm:$0xff] }
 0x60f   :  { %v17331_v50 = vcombine.high %v1610_v47, %v1614_v40  ;;  %v1474_v60 = vld [vmem:[#allocation2 + $0x2958] sm:$0xff]  ;;  %v17330_v5 = vcombine.low %v1610_v47, %v1614_v40 }
 0x610   :  { %11242 = vmatpush2.bf16.msra.mxu0 %v16970_v55  ;;  %11283 = vmatpush2.bf16.msra.mxu1 %v17098_v20  ;;  %v1478_v3 = vld [vmem:[#allocation2 + $0x2978] sm:$0xff] }
 0x611   :  { %11243 = vmatprep.subr.bf16.mxu0 %v16963_v6  ;;  %11284 = vmatprep.subr.bf16.mxu1 %v17091_v11  ;;  %v1602_v56 = vld [vmem:[#allocation2 + $0x2d58] sm:$0xff]  ;;  %v17195_v42 = vcombine.high %v1474_v60, %v1478_v3  ;;  %v17194_v2 = vcombine.low %v1474_v60, %v1478_v3 }
 0x612   :  { %v1606_v15 = vld [vmem:[#allocation2 + $0x2d78] sm:$0xff] }
 0x613   :  { %v1466_v24 = vld [vmem:[#allocation2 + $0x2918] sm:$0xff] }
 0x614   :  { %11244 = vmatpush2.bf16.msra.mxu0 %v16962_v0  ;;  %11285 = vmatpush2.bf16.msra.mxu1 %v17090_v8  ;;  %v1470_v19 = vld [vmem:[#allocation2 + $0x2938] sm:$0xff] }
 0x615   :  { %11295 = vmatprep.subr.bf16.mxu0 %v17211_v39  ;;  %11336 = vmatprep.subr.bf16.mxu1 %v17339_v63  ;;  %v1598_v9 = vld [vmem:[#allocation2 + $0x2d38] sm:$0xff]  ;;  %v17187_v55 = vcombine.high %v1466_v24, %v1470_v19  ;;  %v17186_v41 = vcombine.low %v1466_v24, %v1470_v19 }
 0x616   :  { %v1458_v11 = vld [vmem:[#allocation2 + $0x28d8] sm:$0xff] }
 0x617   :  { %v11001_v28 = vpop.f32.mrf.mxu0  ;;  %11246 = vmatmul.mubr.bf16.vlgmr.msra.gmra.mxu0 %v18469_v21  ;;  %v11042_v49 = vpop.f32.mrf.mxu1  ;;  %11287 = vmatmul.mubr.bf16.vlgmr.msra.gmra.mxu1 %v18474_v25  ;;  %v17323_v21 = vcombine.high %v1602_v56, %v1606_v15  ;;  %v1594_v25 = vld [vmem:[#allocation2 + $0x2d18] sm:$0xff] }
 0x618   :  { %v11002_v33 = vadd.f32 %v11001_v28, %v18679_v18  ;;  %11296 = vmatpush1.bf16.msra.mxu0 %v17210_v12  ;;  %11337 = vmatpush1.bf16.msra.mxu1 %v17338_v1  ;;  %v17315_v6 = vcombine.high %v1594_v25, %v1598_v9  ;;  %v1586_v43 = vld [vmem:[#allocation2 + $0x2cd8] sm:$0xff] }
 0x619   :  { %v11003_v22 = vpop.f32.mrf.mxu0  ;;  %11297 = vmatprep.subr.bf16.mxu0 %v17203_v7  ;;  %v11044_v58 = vpop.f32.mrf.mxu1  ;;  %11338 = vmatprep.subr.bf16.mxu1 %v17331_v50  ;;  %v1590_v29 = vld [vmem:[#allocation2 + $0x2cf8] sm:$0xff] }
 0x61a   :  { %v18688_v52 = vadd.f32 %v11042_v49, %v11002_v33  ;;  %v11004_v4 = vadd.f32 %v11003_v22, %v18683_v35  ;;  %11327 = vmatprep.mubr.bf16.mxu0 %v18479_v38  ;;  %11368 = vmatprep.mubr.bf16.mxu1 %v18482_v44  ;;  %v17322_v35 = vcombine.low %v1602_v56, %v1606_v15  ;;  %v1462_v38 = vld [vmem:[#allocation2 + $0x28f8] sm:$0xff] }
 0x61b   :  { %v11005_v18 = vpop.f32.mrf.mxu0  ;;  %v11046_v59 = vpop.f32.mrf.mxu1  ;;  %v17314_v44 = vcombine.low %v1594_v25, %v1598_v9  ;;  %v17179_v57 = vcombine.high %v1458_v11, %v1462_v38  ;;  %v17307_v0 = vcombine.high %v1586_v43, %v1590_v29  ;;  %v1450_v8 = vld [vmem:[#allocation2 + $0x2898] sm:$0xff]  ;;  %v17178_v62 = vcombine.low %v1458_v11, %v1462_v38 }
 0x61c   :  { %v18693_v27 = vadd.f32 %v11044_v58, %v11004_v4  ;;  %11298 = vmatpush1.bf16.msra.mxu0 %v17202_v31  ;;  %11339 = vmatpush1.bf16.msra.mxu1 %v17330_v5  ;;  %v1454_v39 = vld [vmem:[#allocation2 + $0x28b8] sm:$0xff]  ;;  %v17306_v47 = vcombine.low %v1586_v43, %v1590_v29 }
 0x61d   :  { %v11006_v30 = vpop.f32.mrf.mxu0  ;;  %11299 = vmatprep.subr.bf16.mxu0 %v17195_v42  ;;  %v11047_v20 = vpop.f32.mrf.mxu1  ;;  %11340 = vmatprep.subr.bf16.mxu1 %v17323_v21  ;;  %v1578_v63 = vld [vmem:[#allocation2 + $0x2c98] sm:$0xff]  ;;  %v17171_v40 = vcombine.high %v1450_v8, %v1454_v39  ;;  %v17170_v3 = vcombine.low %v1450_v8, %v1454_v39 }
 0x61e   :  { %v1582_v14 = vld [vmem:[#allocation2 + $0x2cb8] sm:$0xff] }
 0x61f   :  { %v17299_v12 = vcombine.high %v1578_v63, %v1582_v14  ;;  %v1442_v1 = vld [vmem:[#allocation2 + $0x2858] sm:$0xff]  ;;  %v17298_v28 = vcombine.low %v1578_v63, %v1582_v14 }
 0x620   :  { %11300 = vmatpush1.bf16.msra.mxu0 %v17194_v2  ;;  %11341 = vmatpush1.bf16.msra.mxu1 %v17322_v35  ;;  %v1446_v7 = vld [vmem:[#allocation2 + $0x2878] sm:$0xff] }
 0x621   :  { %11301 = vmatprep.subr.bf16.mxu0 %v17187_v55  ;;  %11342 = vmatprep.subr.bf16.mxu1 %v17315_v6  ;;  %v1570_v50 = vld [vmem:[#allocation2 + $0x2c58] sm:$0xff]  ;;  %v17163_v56 = vcombine.high %v1442_v1, %v1446_v7  ;;  %v17162_v5 = vcombine.low %v1442_v1, %v1446_v7 }
 0x622   :  { %v1574_v60 = vld [vmem:[#allocation2 + $0x2c78] sm:$0xff] }
 0x623   :  { %v17291_v15 = vcombine.high %v1570_v50, %v1574_v60  ;;  %v1434_v33 = vld [vmem:[#allocation2 + $0x2818] sm:$0xff]  ;;  %v17290_v42 = vcombine.low %v1570_v50, %v1574_v60 }
 0x624   :  { %11302 = vmatpush1.bf16.msra.mxu0 %v17186_v41  ;;  %11343 = vmatpush1.bf16.msra.mxu1 %v17314_v44  ;;  %v1438_v49 = vld [vmem:[#allocation2 + $0x2838] sm:$0xff] }
 0x625   :  { %11303 = vmatprep.subr.bf16.mxu0 %v17179_v57  ;;  %11344 = vmatprep.subr.bf16.mxu1 %v17307_v0  ;;  %v1562_v31 = vld [vmem:[#allocation2 + $0x2c18] sm:$0xff]  ;;  %v17155_v4 = vcombine.high %v1434_v33, %v1438_v49  ;;  %v17154_v25 = vcombine.low %v1434_v33, %v1438_v49 }
 0x626   :  { %v1566_v22 = vld [vmem:[#allocation2 + $0x2c38] sm:$0xff] }
 0x627   :  { %v17283_v58 = vcombine.high %v1562_v31, %v1566_v22  ;;  %v1554_v21 = vld [vmem:[#allocation2 + $0x2bd8] sm:$0xff]  ;;  %v17282_v9 = vcombine.low %v1562_v31, %v1566_v22 }
 0x628   :  { %11304 = vmatpush1.bf16.msra.mxu0 %v17178_v62  ;;  %11345 = vmatpush1.bf16.msra.mxu1 %v17306_v47  ;;  %v1558_v24 = vld [vmem:[#allocation2 + $0x2bf8] sm:$0xff] }
 0x629   :  { %11305 = vmatprep.subr.bf16.mxu0 %v17171_v40  ;;  %11346 = vmatprep.subr.bf16.mxu1 %v17299_v12  ;;  %v1682_v19 = vld [vmem:[#allocation2 + $0x2fd8] sm:$0xff]  ;;  %v17275_v59 = vcombine.high %v1554_v21, %v1558_v24  ;;  %v17274_v6 = vcombine.low %v1554_v21, %v1558_v24 }
 0x62a   :  { %v1686_v18 = vld [vmem:[#allocation2 + $0x2ff8] sm:$0xff] }
 0x62b   :  { %v17403_v2 = vcombine.high %v1682_v19, %v1686_v18  ;;  %v1546_v30 = vld [vmem:[#allocation2 + $0x2b98] sm:$0xff]  ;;  %v17402_v11 = vcombine.low %v1682_v19, %v1686_v18 }
 0x62c   :  { %11306 = vmatpush1.bf16.msra.mxu0 %v17170_v3  ;;  %11347 = vmatpush1.bf16.msra.mxu1 %v17298_v28  ;;  %v1550_v35 = vld [vmem:[#allocation2 + $0x2bb8] sm:$0xff] }
 0x62d   :  { %11307 = vmatprep.subr.bf16.mxu0 %v17163_v56  ;;  %11348 = vmatprep.subr.bf16.mxu1 %v17291_v15  ;;  %v1674_v55 = vld [vmem:[#allocation2 + $0x2f98] sm:$0xff]  ;;  %v17267_v38 = vcombine.high %v1546_v30, %v1550_v35  ;;  %v17266_v0 = vcombine.low %v1546_v30, %v1550_v35 }
 0x62e   :  { %v1678_v20 = vld [vmem:[#allocation2 + $0x2fb8] sm:$0xff] }
 0x62f   :  { %v17395_v43 = vcombine.high %v1674_v55, %v1678_v20  ;;  %v1538_v29 = vld [vmem:[#allocation2 + $0x2b58] sm:$0xff]  ;;  %v17394_v8 = vcombine.low %v1674_v55, %v1678_v20 }
 0x630   :  { %11308 = vmatpush1.bf16.msra.mxu0 %v17162_v5  ;;  %11349 = vmatpush1.bf16.msra.mxu1 %v17290_v42  ;;  %v1542_v41 = vld [vmem:[#allocation2 + $0x2b78] sm:$0xff] }
 0x631   :  { %11309 = vmatprep.subr.bf16.mxu0 %v17155_v4  ;;  %11350 = vmatprep.subr.bf16.mxu1 %v17283_v58  ;;  %v1666_v44 = vld [vmem:[#allocation2 + $0x2f58] sm:$0xff]  ;;  %v17259_v39 = vcombine.high %v1538_v29, %v1542_v41  ;;  %v17258_v12 = vcombine.low %v1538_v29, %v1542_v41 }
 0x632   :  { %v1670_v57 = vld [vmem:[#allocation2 + $0x2f78] sm:$0xff] }
 0x633   :  { %v17387_v63 = vcombine.high %v1666_v44, %v1670_v57  ;;  %v1530_v14 = vld [vmem:[#allocation2 + $0x2b18] sm:$0xff]  ;;  %v17386_v1 = vcombine.low %v1666_v44, %v1670_v57  ;;  %v11449_v57 = vld [vmem:[#allocation6 + $0x1c0] sm:$0xff] }
 0x634   :  { %11310 = vmatpush1.bf16.msra.mxu0 %v17154_v25  ;;  %11351 = vmatpush1.bf16.msra.mxu1 %v17282_v9  ;;  %v1534_v62 = vld [vmem:[#allocation2 + $0x2b38] sm:$0xff] }
 0x635   :  { %11311 = vmatprep.subr.bf16.mxu0 %v17275_v59  ;;  %11352 = vmatprep.subr.bf16.mxu1 %v17403_v2  ;;  %v1658_v47 = vld [vmem:[#allocation2 + $0x2f18] sm:$0xff]  ;;  %v17251_v7 = vcombine.high %v1530_v14, %v1534_v62  ;;  %v17250_v15 = vcombine.low %v1530_v14, %v1534_v62 }
 0x636   :  { %v1662_v40 = vld [vmem:[#allocation2 + $0x2f38] sm:$0xff] }
 0x637   :  { %v17379_v50 = vcombine.high %v1658_v47, %v1662_v40  ;;  %v1522_v60 = vld [vmem:[#allocation2 + $0x2ad8] sm:$0xff]  ;;  %v17378_v33 = vcombine.low %v1658_v47, %v1662_v40  ;;  %v11378_v40 = vmax.f32 %v18541_v53, 0.0 }
 0x638   :  { %11312 = vmatpush2.bf16.msra.mxu0 %v17274_v6  ;;  %11353 = vmatpush2.bf16.msra.mxu1 %v17402_v11  ;;  %v1526_v3 = vld [vmem:[#allocation2 + $0x2af8] sm:$0xff] }
 0x639   :  { %11313 = vmatprep.subr.bf16.mxu0 %v17267_v38  ;;  %11354 = vmatprep.subr.bf16.mxu1 %v17395_v43  ;;  %v1650_v28 = vld [vmem:[#allocation2 + $0x2ed8] sm:$0xff]  ;;  %v17243_v49 = vcombine.high %v1522_v60, %v1526_v3  ;;  %v17242_v58 = vcombine.low %v1522_v60, %v1526_v3  ;;  %v11569_v60 = vld [vmem:[#allocation6 + $0x580] sm:$0xff] }
 0x63a   :  { %v1654_v56 = vld [vmem:[#allocation2 + $0x2ef8] sm:$0xff]  ;;  %v11573_v3 = vld [vmem:[#allocation6 + $0x5a0] sm:$0xff] }
 0x63b   :  { %v17371_v31 = vcombine.high %v1650_v28, %v1654_v56  ;;  %v1514_v22 = vld [vmem:[#allocation2 + $0x2a98] sm:$0xff]  ;;  %v17370_v21 = vcombine.low %v1650_v28, %v1654_v56  ;;  %v17581_v53 = vcombine.high %v11569_v60, %v11573_v3 }
 0x63c   :  { %11314 = vmatpush2.bf16.msra.mxu0 %v17266_v0  ;;  %11355 = vmatpush2.bf16.msra.mxu1 %v17394_v8  ;;  %v1518_v5 = vld [vmem:[#allocation2 + $0x2ab8] sm:$0xff]  ;;  %v11453_v0 = vld [vmem:[#allocation6 + $0x1e0] sm:$0xff] }
 0x63d   :  { %11315 = vmatprep.subr.bf16.mxu0 %v17259_v39  ;;  %11356 = vmatprep.subr.bf16.mxu1 %v17387_v63  ;;  %v1642_v42 = vld [vmem:[#allocation2 + $0x2e98] sm:$0xff]  ;;  %v17235_v24 = vcombine.high %v1514_v22, %v1518_v5  ;;  %v17234_v2 = vcombine.low %v1514_v22, %v1518_v5  ;;  %v11577_v8 = vld [vmem:[#allocation6 + $0x5c0] sm:$0xff]  ;;  %v17461_v62 = vcombine.high %v11449_v57, %v11453_v0 }
 0x63e   :  { %v1646_v4 = vld [vmem:[#allocation2 + $0x2eb8] sm:$0xff]  ;;  %v11581_v39 = vld [vmem:[#allocation6 + $0x5e0] sm:$0xff] }
 0x63f   :  { %v17363_v19 = vcombine.high %v1642_v42, %v1646_v4  ;;  %v1506_v18 = vld [vmem:[#allocation2 + $0x2a58] sm:$0xff]  ;;  %v17362_v30 = vcombine.low %v1642_v42, %v1646_v4  ;;  %v17589_v47 = vcombine.high %v11577_v8, %v11581_v39  ;;  %v17588_v28 = vcombine.low %v11577_v8, %v11581_v39  ;;  %v11561_v22 = vld [vmem:[#allocation6 + $0x540] sm:$0xff] }
 0x640   :  { %11316 = vmatpush2.bf16.msra.mxu0 %v17258_v12  ;;  %11357 = vmatpush2.bf16.msra.mxu1 %v17386_v1  ;;  %v1510_v25 = vld [vmem:[#allocation2 + $0x2a78] sm:$0xff]  ;;  %v11441_v12 = vld [vmem:[#allocation6 + $0x180] sm:$0xff] }
 0x641   :  { %11317 = vmatprep.subr.bf16.mxu0 %v17251_v7  ;;  %11358 = vmatprep.subr.bf16.mxu1 %v17379_v50  ;;  %v1634_v9 = vld [vmem:[#allocation2 + $0x2e58] sm:$0xff]  ;;  %v17227_v35 = vcombine.high %v1506_v18, %v1510_v25  ;;  %v17226_v43 = vcombine.low %v1506_v18, %v1510_v25  ;;  %v11445_v1 = vld [vmem:[#allocation6 + $0x1a0] sm:$0xff]  ;;  %v11380_v7 = vmax.f32 %v18605_v32, 0.0  ;;  %v17460_v50 = vcombine.low %v11449_v57, %v11453_v0 }
 0x642   :  { %v1638_v59 = vld [vmem:[#allocation2 + $0x2e78] sm:$0xff]  ;;  %v17453_v56 = vcombine.high %v11441_v12, %v11445_v1  ;;  %v11565_v5 = vld [vmem:[#allocation6 + $0x560] sm:$0xff] }
 0x643   :  { %v17355_v55 = vcombine.high %v1634_v9, %v1638_v59  ;;  %v1498_v20 = vld [vmem:[#allocation2 + $0x2a18] sm:$0xff]  ;;  %v17354_v29 = vcombine.low %v1634_v9, %v1638_v59  ;;  %v18700_v32 = vpack.c.bf16 %v11380_v7, %v11380_v7  ;;  %v11425_v9 = vld [vmem:[#allocation6 + $0x100] sm:$0xff] }
 0x644   :  { %11318 = vmatpush2.bf16.msra.mxu0 %v17250_v15  ;;  %11359 = vmatpush2.bf16.msra.mxu1 %v17378_v33  ;;  %v1502_v6 = vld [vmem:[#allocation2 + $0x2a38] sm:$0xff]  ;;  %v11433_v15 = vld [vmem:[#allocation6 + $0x140] sm:$0xff] }
 0x645   :  { %11319 = vmatprep.subr.bf16.mxu0 %v17243_v49  ;;  %11360 = vmatprep.subr.bf16.mxu1 %v17371_v31  ;;  %v1626_v11 = vld [vmem:[#allocation2 + $0x2e18] sm:$0xff]  ;;  %v17219_v41 = vcombine.high %v1498_v20, %v1502_v6  ;;  %v17218_v63 = vcombine.low %v1498_v20, %v1502_v6  ;;  %v11437_v33 = vld [vmem:[#allocation6 + $0x160] sm:$0xff]  ;;  %v18697_v49 = vpack.c.bf16 %v11378_v40, %v11378_v40 }
 0x646   :  { %v1630_v38 = vld [vmem:[#allocation2 + $0x2e38] sm:$0xff]  ;;  %v11429_v59 = vld [vmem:[#allocation6 + $0x120] sm:$0xff]  ;;  %v17444_v20 = vcombine.low %v11433_v15, %v11437_v33 }
 0x647   :  { %v17347_v44 = vcombine.high %v1626_v11, %v1630_v38  ;;  %v17346_v14 = vcombine.low %v1626_v11, %v1630_v38  ;;  %v17572_v11 = vcombine.low %v11561_v22, %v11565_v5  ;;  %v17437_v38 = vcombine.high %v11425_v9, %v11429_v59  ;;  %v11549_v57 = vld [vmem:[#allocation6 + $0x4e0] sm:$0xff] }
 0x648   :  { %11320 = vmatpush2.bf16.msra.mxu0 %v17242_v58  ;;  %11361 = vmatpush2.bf16.msra.mxu1 %v17370_v21  ;;  %v17452_v58 = vcombine.low %v11441_v12, %v11445_v1  ;;  %v17436_v0 = vcombine.low %v11425_v9, %v11429_v59  ;;  %v11541_v40 = vld [vmem:[#allocation6 + $0x4a0] sm:$0xff] }
 0x649   :  { %11321 = vmatprep.subr.bf16.mxu0 %v17235_v24  ;;  %11362 = vmatprep.subr.bf16.mxu1 %v17363_v19  ;;  %v17580_v24 = vcombine.low %v11569_v60, %v11573_v3  ;;  %v17445_v19 = vcombine.high %v11433_v15, %v11437_v33  ;;  %v11401_v60 = vld [vmem:[#allocation6 + $0x40] sm:$0xff] }
 0x64a   :  { %v11405_v3 = vld [vmem:[#allocation6 + $0x60] sm:$0xff] }
 0x64b   :  { %v11645_v9 = vld [vmem:[#allocation6 + $0x7e0] sm:$0xff] }
 0x64c   :  { %11322 = vmatpush2.bf16.msra.mxu0 %v17234_v2  ;;  %11363 = vmatpush2.bf16.msra.mxu1 %v17362_v30  ;;  %v11553_v2 = vld [vmem:[#allocation6 + $0x500] sm:$0xff] }
 0x64d   :  { %11323 = vmatprep.subr.bf16.mxu0 %v17227_v35  ;;  %11364 = vmatprep.subr.bf16.mxu1 %v17355_v55  ;;  %v11557_v30 = vld [vmem:[#allocation6 + $0x520] sm:$0xff] }
 0x64e   :  { %v17564_v8 = vcombine.low %v11553_v2, %v11557_v30 }
 0x650   :  { %11324 = vmatpush2.bf16.msra.mxu0 %v17226_v43  ;;  %11365 = vmatpush2.bf16.msra.mxu1 %v17354_v29  ;;  %v17565_v43 = vcombine.high %v11553_v2, %v11557_v30  ;;  %v11417_v29 = vld [vmem:[#allocation6 + $0xc0] sm:$0xff] }
 0x651   :  { %11325 = vmatprep.subr.bf16.mxu0 %v17219_v41  ;;  %11366 = vmatprep.subr.bf16.mxu1 %v17347_v44  ;;  %v11421_v41 = vld [vmem:[#allocation6 + $0xe0] sm:$0xff] }
 0x652   :  { %v11545_v44 = vld [vmem:[#allocation6 + $0x4c0] sm:$0xff]  ;;  %v17429_v39 = vcombine.high %v11417_v29, %v11421_v41  ;;  %v17428_v12 = vcombine.low %v11417_v29, %v11421_v41 }
 0x653   :  { %v17556_v1 = vcombine.low %v11545_v44, %v11549_v57  ;;  %v11497_v41 = vld [vmem:[#allocation6 + $0x340] sm:$0xff] }
 0x654   :  { %11326 = vmatpush2.bf16.msra.mxu0 %v17218_v63  ;;  %11367 = vmatpush2.bf16.msra.mxu1 %v17346_v14  ;;  %v17557_v63 = vcombine.high %v11545_v44, %v11549_v57  ;;  %v11409_v14 = vld [vmem:[#allocation6 + $0x80] sm:$0xff] }
 0x655   :  { %14507 = vmatprep.subr.bf16.mxu0 %v17461_v62  ;;  %14548 = vmatprep.subr.bf16.mxu1 %v17589_v47  ;;  %v11413_v62 = vld [vmem:[#allocation6 + $0xa0] sm:$0xff] }
 0x656   :  { %v11537_v47 = vld [vmem:[#allocation6 + $0x480] sm:$0xff]  ;;  %v17421_v7 = vcombine.high %v11409_v14, %v11413_v62  ;;  %v17420_v15 = vcombine.low %v11409_v14, %v11413_v62 }
 0x657   :  { %v11083_v31 = vpop.f32.mrf.mxu0  ;;  %11328 = vmatmul.mubr.bf16.vlgmr.msra.gmra.mxu0 %v18499_v10  ;;  %v11124_v4 = vpop.f32.mrf.mxu1  ;;  %11369 = vmatmul.mubr.bf16.vlgmr.msra.gmra.mxu1 %v18501_v13  ;;  %v17548_v33 = vcombine.low %v11537_v47, %v11541_v40  ;;  %v11501_v44 = vld [vmem:[#allocation6 + $0x360] sm:$0xff] }
 0x658   :  { %v11084_v42 = vadd.f32 %v11083_v31, %v18688_v52  ;;  %14508 = vmatpush1.bf16.msra.mxu0 %v17460_v50  ;;  %14539 = vmatprep.mubr.bf16.mxu0 %v18697_v49  ;;  %v17573_v52 = vcombine.high %v11561_v22, %v11565_v5  ;;  %v17549_v50 = vcombine.high %v11537_v47, %v11541_v40  ;;  %v11393_v22 = vld [vmem:[#allocation6] sm:$0xff] }
 0x659   :  { %14549 = vmatpush1.bf16.msra.mxu1 %v17588_v28  ;;  %v11085_v21 = vpop.f32.mrf.mxu0  ;;  %14580 = vmatprep.mubr.bf16.mxu1 %v18700_v32  ;;  %v11126_v25 = vpop.f32.mrf.mxu1  ;;  %v11529_v28 = vld [vmem:[#allocation6 + $0x440] sm:$0xff]  ;;  %v17413_v31 = vcombine.high %v11401_v60, %v11405_v3 }
 0x65a   :  { %v18705_v18 = vadd.f32 %v11124_v4, %v11084_v42  ;;  %v11086_v10 = vadd.f32 %v11085_v21, %v18693_v27  ;;  %14509 = vmatprep.subr.bf16.mxu0 %v17453_v56  ;;  %14550 = vmatprep.subr.bf16.mxu1 %v17581_v53  ;;  %v11533_v56 = vld [vmem:[#allocation6 + $0x460] sm:$0xff] }
 0x65b   :  { %v11087_v13 = vpop.f32.mrf.mxu0  ;;  %v11128_v55 = vpop.f32.mrf.mxu1  ;;  %v17541_v53 = vcombine.high %v11529_v28, %v11533_v56  ;;  %v11397_v5 = vld [vmem:[#allocation6 + $0x20] sm:$0xff]  ;;  %v17540_v21 = vcombine.low %v11529_v28, %v11533_v56 }
 0x65c   :  { %v18709_v35 = vadd.f32 %v11126_v25, %v11086_v10  ;;  %14510 = vmatpush1.bf16.msra.mxu0 %v17452_v58  ;;  %v11521_v42 = vld [vmem:[#allocation6 + $0x400] sm:$0xff]  ;;  %v17412_v58 = vcombine.low %v11401_v60, %v11405_v3  ;;  %v17404_v59 = vcombine.low %v11393_v22, %v11397_v5 }
 0x65d   :  { %14551 = vmatpush1.bf16.msra.mxu1 %v17580_v24  ;;  %v11088_v6 = vpop.f32.mrf.mxu0  ;;  %14511 = vmatprep.subr.bf16.mxu0 %v17445_v19  ;;  %v11129_v27 = vpop.f32.mrf.mxu1  ;;  %v11525_v4 = vld [vmem:[#allocation6 + $0x420] sm:$0xff]  ;;  %v17405_v24 = vcombine.high %v11393_v22, %v11397_v5 }
 0x65e   :  { %14552 = vmatprep.subr.bf16.mxu1 %v17573_v52  ;;  %v17533_v19 = vcombine.high %v11521_v42, %v11525_v4  ;;  %v11513_v10 = vld [vmem:[#allocation6 + $0x3c0] sm:$0xff]  ;;  %v17532_v13 = vcombine.low %v11521_v42, %v11525_v4 }
 0x65f   :  { %v11517_v25 = vld [vmem:[#allocation6 + $0x3e0] sm:$0xff] }
 0x660   :  { %14512 = vmatpush1.bf16.msra.mxu0 %v17444_v20  ;;  %v11641_v52 = vld [vmem:[#allocation6 + $0x7c0] sm:$0xff]  ;;  %v17525_v2 = vcombine.high %v11513_v10, %v11517_v25 }
 0x661   :  { %14553 = vmatpush1.bf16.msra.mxu1 %v17572_v11  ;;  %14513 = vmatprep.subr.bf16.mxu0 %v17437_v38  ;;  %v17653_v30 = vcombine.high %v11641_v52, %v11645_v9  ;;  %v11505_v55 = vld [vmem:[#allocation6 + $0x380] sm:$0xff]  ;;  %v17524_v38 = vcombine.low %v11513_v10, %v11517_v25  ;;  %v17652_v27 = vcombine.low %v11641_v52, %v11645_v9 }
 0x662   :  { %14554 = vmatprep.subr.bf16.mxu1 %v17565_v43  ;;  %v11509_v20 = vld [vmem:[#allocation6 + $0x3a0] sm:$0xff] }
 0x663   :  { %v11633_v6 = vld [vmem:[#allocation6 + $0x780] sm:$0xff]  ;;  %v17517_v43 = vcombine.high %v11505_v55, %v11509_v20 }
 0x664   :  { %14514 = vmatpush1.bf16.msra.mxu0 %v17436_v0  ;;  %v11637_v11 = vld [vmem:[#allocation6 + $0x7a0] sm:$0xff] }
 0x665   :  { %14555 = vmatpush1.bf16.msra.mxu1 %v17564_v8  ;;  %14515 = vmatprep.subr.bf16.mxu0 %v17429_v39  ;;  %v17645_v29 = vcombine.high %v11633_v6, %v11637_v11  ;;  %v11625_v57 = vld [vmem:[#allocation6 + $0x740] sm:$0xff]  ;;  %v17516_v8 = vcombine.low %v11505_v55, %v11509_v20  ;;  %v17644_v39 = vcombine.low %v11633_v6, %v11637_v11 }
 0x666   :  { %14556 = vmatprep.subr.bf16.mxu1 %v17557_v63  ;;  %v11629_v0 = vld [vmem:[#allocation6 + $0x760] sm:$0xff]  ;;  %v17509_v63 = vcombine.high %v11497_v41, %v11501_v44 }
 0x667   :  { %v17637_v14 = vcombine.high %v11625_v57, %v11629_v0  ;;  %v11489_v62 = vld [vmem:[#allocation6 + $0x300] sm:$0xff] }
 0x668   :  { %14516 = vmatpush1.bf16.msra.mxu0 %v17428_v12  ;;  %v11493_v47 = vld [vmem:[#allocation6 + $0x320] sm:$0xff] }
 0x669   :  { %14557 = vmatpush1.bf16.msra.mxu1 %v17556_v1  ;;  %14517 = vmatprep.subr.bf16.mxu0 %v17421_v7  ;;  %v11617_v40 = vld [vmem:[#allocation6 + $0x700] sm:$0xff]  ;;  %v17508_v1 = vcombine.low %v11497_v41, %v11501_v44  ;;  %v17636_v7 = vcombine.low %v11625_v57, %v11629_v0 }
 0x66a   :  { %14558 = vmatprep.subr.bf16.mxu1 %v17549_v50  ;;  %v11621_v12 = vld [vmem:[#allocation6 + $0x720] sm:$0xff]  ;;  %v17501_v50 = vcombine.high %v11489_v62, %v11493_v47 }
 0x66b   :  { %v17629_v60 = vcombine.high %v11617_v40, %v11621_v12  ;;  %v11481_v3 = vld [vmem:[#allocation6 + $0x2c0] sm:$0xff] }
 0x66c   :  { %14518 = vmatpush1.bf16.msra.mxu0 %v17420_v15  ;;  %v11485_v28 = vld [vmem:[#allocation6 + $0x2e0] sm:$0xff] }
 0x66d   :  { %14559 = vmatpush1.bf16.msra.mxu1 %v17548_v33  ;;  %14519 = vmatprep.subr.bf16.mxu0 %v17413_v31  ;;  %v11609_v56 = vld [vmem:[#allocation6 + $0x6c0] sm:$0xff]  ;;  %v17500_v33 = vcombine.low %v11489_v62, %v11493_v47  ;;  %v17628_v31 = vcombine.low %v11617_v40, %v11621_v12  ;;  %v11379_v47 = vmax.f32 %v18600_v17, 0.0 }
 0x66e   :  { %14560 = vmatprep.subr.bf16.mxu1 %v17541_v53  ;;  %v11613_v15 = vld [vmem:[#allocation6 + $0x6e0] sm:$0xff]  ;;  %v17493_v53 = vcombine.high %v11481_v3, %v11485_v28 }
 0x66f   :  { %v17621_v22 = vcombine.high %v11609_v56, %v11613_v15  ;;  %v11473_v5 = vld [vmem:[#allocation6 + $0x280] sm:$0xff] }
 0x670   :  { %14520 = vmatpush1.bf16.msra.mxu0 %v17412_v58  ;;  %v11477_v42 = vld [vmem:[#allocation6 + $0x2a0] sm:$0xff] }
 0x671   :  { %14561 = vmatpush1.bf16.msra.mxu1 %v17540_v21  ;;  %14521 = vmatprep.subr.bf16.mxu0 %v17405_v24  ;;  %v11601_v4 = vld [vmem:[#allocation6 + $0x680] sm:$0xff]  ;;  %v17492_v21 = vcombine.low %v11481_v3, %v11485_v28  ;;  %v17620_v24 = vcombine.low %v11609_v56, %v11613_v15  ;;  %v18716_v56 = vpack.c.bf16 %v11379_v47, %v11379_v47 }
 0x672   :  { %14562 = vmatprep.subr.bf16.mxu1 %v17533_v19  ;;  %v11605_v58 = vld [vmem:[#allocation6 + $0x6a0] sm:$0xff]  ;;  %v17485_v19 = vcombine.high %v11473_v5, %v11477_v42 }
 0x673   :  { %v17613_v10 = vcombine.high %v11601_v4, %v11605_v58  ;;  %v11465_v25 = vld [vmem:[#allocation6 + $0x240] sm:$0xff] }
 0x674   :  { %14522 = vmatpush1.bf16.msra.mxu0 %v17404_v59  ;;  %v11469_v52 = vld [vmem:[#allocation6 + $0x260] sm:$0xff] }
 0x675   :  { %14563 = vmatpush1.bf16.msra.mxu1 %v17532_v13  ;;  %14523 = vmatprep.subr.bf16.mxu0 %v17525_v2  ;;  %v11593_v9 = vld [vmem:[#allocation6 + $0x640] sm:$0xff]  ;;  %v17484_v13 = vcombine.low %v11473_v5, %v11477_v42  ;;  %v17612_v2 = vcombine.low %v11601_v4, %v11605_v58 }
 0x676   :  { %14564 = vmatprep.subr.bf16.mxu1 %v17653_v30  ;;  %v11597_v59 = vld [vmem:[#allocation6 + $0x660] sm:$0xff]  ;;  %v17477_v30 = vcombine.high %v11465_v25, %v11469_v52 }
 0x677   :  { %v17605_v55 = vcombine.high %v11593_v9, %v11597_v59  ;;  %v11457_v20 = vld [vmem:[#allocation6 + $0x200] sm:$0xff] }
 0x678   :  { %14524 = vmatpush2.bf16.msra.mxu0 %v17524_v38  ;;  %v11461_v6 = vld [vmem:[#allocation6 + $0x220] sm:$0xff] }
 0x679   :  { %14565 = vmatpush2.bf16.msra.mxu1 %v17652_v27  ;;  %14525 = vmatprep.subr.bf16.mxu0 %v17517_v43  ;;  %v11585_v11 = vld [vmem:[#allocation6 + $0x600] sm:$0xff]  ;;  %v17476_v27 = vcombine.low %v11465_v25, %v11469_v52  ;;  %v17604_v43 = vcombine.low %v11593_v9, %v11597_v59 }
 0x67a   :  { %14566 = vmatprep.subr.bf16.mxu1 %v17645_v29  ;;  %v11589_v38 = vld [vmem:[#allocation6 + $0x620] sm:$0xff]  ;;  %v17469_v29 = vcombine.high %v11457_v20, %v11461_v6 }
 0x67b   :  { %v17597_v41 = vcombine.high %v11585_v11, %v11589_v38  ;;  %v11705_v44 = vld [vmem:[#allocation6 + $0x9c0] sm:$0xff] }
 0x67c   :  { %14526 = vmatpush2.bf16.msra.mxu0 %v17516_v8  ;;  %v11709_v57 = vld [vmem:[#allocation6 + $0x9e0] sm:$0xff] }
 0x67d   :  { %14567 = vmatpush2.bf16.msra.mxu1 %v17644_v39  ;;  %14527 = vmatprep.subr.bf16.mxu0 %v17509_v63  ;;  %v11833_v0 = vld [vmem:[#allocation6 + $0xdc0] sm:$0xff]  ;;  %v17468_v39 = vcombine.low %v11457_v20, %v11461_v6  ;;  %v11377_v63 = vmax.f32 %v18536_v34, 0.0  ;;  %v17717_v62 = vcombine.high %v11705_v44, %v11709_v57 }
 0x67e   :  { %14568 = vmatprep.subr.bf16.mxu1 %v17637_v14  ;;  %v11837_v8 = vld [vmem:[#allocation6 + $0xde0] sm:$0xff]  ;;  %v17596_v14 = vcombine.low %v11585_v11, %v11589_v38 }
 0x67f   :  { %v11697_v40 = vld [vmem:[#allocation6 + $0x980] sm:$0xff]  ;;  %v18714_v28 = vpack.c.bf16 %v11377_v63, %v11377_v63  ;;  %v17844_v17 = vcombine.low %v11833_v0, %v11837_v8  ;;  %v18731_v63 = vld [vmem:[#allocation6 + $0x5e8] sm:$0xff] }
 0x680   :  { %14528 = vmatpush2.bf16.msra.mxu0 %v17508_v1  ;;  %v11701_v12 = vld [vmem:[#allocation6 + $0x9a0] sm:$0xff]  ;;  %v17845_v1 = vcombine.high %v11833_v0, %v11837_v8 }
 0x681   :  { %14569 = vmatpush2.bf16.msra.mxu1 %v17636_v7  ;;  %14529 = vmatprep.subr.bf16.mxu0 %v17501_v50  ;;  %v11382_v7 = vmax.f32 %v18669_v16, 0.0  ;;  %v17716_v50 = vcombine.low %v11705_v44, %v11709_v57  ;;  %v11829_v3 = vld [vmem:[#allocation6 + $0xda0] sm:$0xff]  ;;  %v17709_v34 = vcombine.high %v11697_v40, %v11701_v12  ;;  %v17708_v42 = vcombine.low %v11697_v40, %v11701_v12 }
 0x682   :  { %14570 = vmatprep.subr.bf16.mxu1 %v17629_v60  ;;  %v11825_v60 = vld [vmem:[#allocation6 + $0xd80] sm:$0xff] }
 0x683   :  { %v11689_v15 = vld [vmem:[#allocation6 + $0x940] sm:$0xff]  ;;  %v17837_v16 = vcombine.high %v11825_v60, %v11829_v3 }
 0x684   :  { %14530 = vmatpush2.bf16.msra.mxu0 %v17500_v33  ;;  %v11693_v33 = vld [vmem:[#allocation6 + $0x960] sm:$0xff] }
 0x685   :  { %14571 = vmatpush2.bf16.msra.mxu1 %v17628_v31  ;;  %14531 = vmatprep.subr.bf16.mxu0 %v17493_v53  ;;  %v18718_v31 = vpack.c.bf16 %v11382_v7, %v11382_v7  ;;  %v11817_v4 = vld [vmem:[#allocation6 + $0xd40] sm:$0xff] }
 0x686   :  { %14572 = vmatprep.subr.bf16.mxu1 %v17621_v22  ;;  %v11821_v58 = vld [vmem:[#allocation6 + $0xd60] sm:$0xff] }
 0x687   :  { %v11681_v52 = vld [vmem:[#allocation6 + $0x900] sm:$0xff] }
 0x688   :  { %14532 = vmatpush2.bf16.msra.mxu0 %v17492_v21  ;;  %v11685_v9 = vld [vmem:[#allocation6 + $0x920] sm:$0xff] }
 0x689   :  { %14573 = vmatpush2.bf16.msra.mxu1 %v17620_v24  ;;  %14533 = vmatprep.subr.bf16.mxu0 %v17485_v19  ;;  %v17701_v24 = vcombine.high %v11689_v15, %v11693_v33  ;;  %v11809_v20 = vld [vmem:[#allocation6 + $0xd00] sm:$0xff]  ;;  %v17693_v38 = vcombine.high %v11681_v52, %v11685_v9  ;;  %v17692_v44 = vcombine.low %v11681_v52, %v11685_v9 }
 0x68a   :  { %14574 = vmatprep.subr.bf16.mxu1 %v17613_v10  ;;  %v11813_v6 = vld [vmem:[#allocation6 + $0xd20] sm:$0xff] }
 0x68b   :  { %v11801_v57 = vld [vmem:[#allocation6 + $0xcc0] sm:$0xff]  ;;  %v17820_v47 = vcombine.low %v11809_v20, %v11813_v6 }
 0x68c   :  { %14534 = vmatpush2.bf16.msra.mxu0 %v17484_v13  ;;  %v17829_v13 = vcombine.high %v11817_v4, %v11821_v58  ;;  %v11805_v0 = vld [vmem:[#allocation6 + $0xce0] sm:$0xff] }
 0x68d   :  { %14575 = vmatpush2.bf16.msra.mxu1 %v17612_v2  ;;  %14535 = vmatprep.subr.bf16.mxu0 %v17477_v30  ;;  %v17813_v12 = vcombine.high %v11801_v57, %v11805_v0  ;;  %v11793_v7 = vld [vmem:[#allocation6 + $0xc80] sm:$0xff] }
 0x68e   :  { %14576 = vmatprep.subr.bf16.mxu1 %v17605_v55  ;;  %v17700_v55 = vcombine.low %v11689_v15, %v11693_v33  ;;  %v17812_v15 = vcombine.low %v11801_v57, %v11805_v0  ;;  %v11769_v52 = vld [vmem:[#allocation6 + $0xbc0] sm:$0xff] }
 0x68f   :  { %v11773_v9 = vld [vmem:[#allocation6 + $0xbe0] sm:$0xff] }
 0x690   :  { %14536 = vmatpush2.bf16.msra.mxu0 %v17476_v27  ;;  %v11757_v57 = vld [vmem:[#allocation6 + $0xb60] sm:$0xff] }
 0x691   :  { %14577 = vmatpush2.bf16.msra.mxu1 %v17604_v43  ;;  %14537 = vmatprep.subr.bf16.mxu0 %v17469_v29  ;;  %v11677_v43 = vld [vmem:[#allocation6 + $0x8e0] sm:$0xff]  ;;  %v17828_v29 = vcombine.low %v11817_v4, %v11821_v58 }
 0x692   :  { %14578 = vmatprep.subr.bf16.mxu1 %v17597_v41  ;;  %v17821_v41 = vcombine.high %v11809_v20, %v11813_v6  ;;  %v17781_v20 = vcombine.high %v11769_v52, %v11773_v9  ;;  %v11761_v6 = vld [vmem:[#allocation6 + $0xb80] sm:$0xff] }
 0x694   :  { %14538 = vmatpush2.bf16.msra.mxu0 %v17468_v39  ;;  %v18729_v39 = vld [vmem:[#allocation6 + $0x5c8] sm:$0xff] }
 0x695   :  { %14579 = vmatpush2.bf16.msra.mxu1 %v17596_v14  ;;  %14589 = vmatprep.subr.bf16.mxu0 %v17717_v62  ;;  %v11665_v14 = vld [vmem:[#allocation6 + $0x880] sm:$0xff]  ;;  %v17590_v40 = vcombine.low %v18729_v39, %v18731_v63 }
 0x696   :  { %14630 = vmatprep.subr.bf16.mxu1 %v17845_v1  ;;  %v11669_v62 = vld [vmem:[#allocation6 + $0x8a0] sm:$0xff] }
 0x697   :  { %v11165_v53 = vpop.f32.mrf.mxu0  ;;  %14540 = vmatmul.mubr.bf16.vlgmr.msra.gmra.mxu0 %v18714_v28  ;;  %v11206_v5 = vpop.f32.mrf.mxu1 }
 0x698   :  { %v11166_v22 = vadd.f32 %v11165_v53, %v18705_v18  ;;  %14581 = vmatmul.mubr.bf16.vlgmr.msra.gmra.mxu1 %v18716_v56  ;;  %14590 = vmatpush1.bf16.msra.mxu0 %v17716_v50  ;;  %v17836_v18 = vcombine.low %v11825_v60, %v11829_v3  ;;  %v11797_v50 = vld [vmem:[#allocation6 + $0xca0] sm:$0xff]  ;;  %v17677_v60 = vcombine.high %v11665_v14, %v11669_v62 }
 0x699   :  { %14621 = vmatprep.mubr.bf16.mxu0 %v18718_v31  ;;  %v11167_v21 = vpop.f32.mrf.mxu0  ;;  %14591 = vmatprep.subr.bf16.mxu0 %v17709_v34  ;;  %v11208_v25 = vpop.f32.mrf.mxu1  ;;  %v11657_v3 = vld [vmem:[#allocation6 + $0x840] sm:$0xff]  ;;  %v17805_v33 = vcombine.high %v11793_v7, %v11797_v50  ;;  %v17804_v4 = vcombine.low %v11793_v7, %v11797_v50 }
 0x69a   :  { %v18724_v19 = vadd.f32 %v11206_v5, %v11166_v22  ;;  %v11168_v10 = vadd.f32 %v11167_v21, %v18709_v35  ;;  %14631 = vmatpush1.bf16.msra.mxu1 %v17844_v17  ;;  %v11673_v35 = vld [vmem:[#allocation6 + $0x8c0] sm:$0xff]  ;;  %v17676_v17 = vcombine.low %v11665_v14, %v11669_v62 }
 0x69b   :  { %v11169_v59 = vpop.f32.mrf.mxu0  ;;  %14632 = vmatprep.subr.bf16.mxu1 %v17837_v16  ;;  %v11210_v30 = vpop.f32.mrf.mxu1  ;;  %v17685_v8 = vcombine.high %v11673_v35, %v11677_v43  ;;  %v17684_v1 = vcombine.low %v11673_v35, %v11677_v43  ;;  %v11661_v34 = vld [vmem:[#allocation6 + $0x860] sm:$0xff]  ;;  %v17780_v35 = vcombine.low %v11769_v52, %v11773_v9 }
 0x69c   :  { %v18727_v2 = vadd.f32 %v11208_v25, %v11168_v10  ;;  %14592 = vmatpush1.bf16.msra.mxu0 %v17708_v42  ;;  %v11785_v53 = vld [vmem:[#allocation6 + $0xc40] sm:$0xff]  ;;  %v17669_v22 = vcombine.high %v11657_v3, %v11661_v34  ;;  %v17668_v21 = vcombine.low %v11657_v3, %v11661_v34 }
 0x69d   :  { %v11170_v11 = vpop.f32.mrf.mxu0  ;;  %14593 = vmatprep.subr.bf16.mxu0 %v17701_v24  ;;  %v11211_v27 = vpop.f32.mrf.mxu1  ;;  %v11789_v16 = vld [vmem:[#allocation6 + $0xc60] sm:$0xff] }
 0x69e   :  { %14633 = vmatpush1.bf16.msra.mxu1 %v17836_v18  ;;  %v11649_v5 = vld [vmem:[#allocation6 + $0x800] sm:$0xff]  ;;  %v17797_v58 = vcombine.high %v11785_v53, %v11789_v16  ;;  %v17796_v18 = vcombine.low %v11785_v53, %v11789_v16 }
 0x69f   :  { %14634 = vmatprep.subr.bf16.mxu1 %v17829_v13  ;;  %v11653_v42 = vld [vmem:[#allocation6 + $0x820] sm:$0xff] }
 0x6a0   :  { %14594 = vmatpush1.bf16.msra.mxu0 %v17700_v55  ;;  %v11777_v24 = vld [vmem:[#allocation6 + $0xc00] sm:$0xff]  ;;  %v17661_v25 = vcombine.high %v11649_v5, %v11653_v42  ;;  %v17660_v13 = vcombine.low %v11649_v5, %v11653_v42 }
 0x6a1   :  { %14595 = vmatprep.subr.bf16.mxu0 %v17693_v38  ;;  %v11781_v10 = vld [vmem:[#allocation6 + $0xc20] sm:$0xff] }
 0x6a2   :  { %14635 = vmatpush1.bf16.msra.mxu1 %v17828_v29  ;;  %v17789_v59 = vcombine.high %v11777_v24, %v11781_v10  ;;  %v11897_v30 = vld [vmem:[#allocation6 + $0xfc0] sm:$0xff]  ;;  %v17788_v38 = vcombine.low %v11777_v24, %v11781_v10 }
 0x6a3   :  { %14636 = vmatprep.subr.bf16.mxu1 %v17821_v41  ;;  %v11901_v55 = vld [vmem:[#allocation6 + $0xfe0] sm:$0xff] }
 0x6a4   :  { %14596 = vmatpush1.bf16.msra.mxu0 %v17692_v44  ;;  %v11765_v11 = vld [vmem:[#allocation6 + $0xba0] sm:$0xff]  ;;  %v17909_v27 = vcombine.high %v11897_v30, %v11901_v55  ;;  %v17908_v0 = vcombine.low %v11897_v30, %v11901_v55 }
 0x6a5   :  { %14597 = vmatprep.subr.bf16.mxu0 %v17685_v8  ;;  %v11889_v43 = vld [vmem:[#allocation6 + $0xf80] sm:$0xff]  ;;  %v17773_v41 = vcombine.high %v11761_v6, %v11765_v11  ;;  %v17772_v14 = vcombine.low %v11761_v6, %v11765_v11 }
 0x6a6   :  { %14637 = vmatpush1.bf16.msra.mxu1 %v17820_v47  ;;  %v11893_v29 = vld [vmem:[#allocation6 + $0xfa0] sm:$0xff] }
 0x6a7   :  { %14638 = vmatprep.subr.bf16.mxu1 %v17813_v12  ;;  %v11753_v44 = vld [vmem:[#allocation6 + $0xb40] sm:$0xff]  ;;  %v17901_v8 = vcombine.high %v11889_v43, %v11893_v29  ;;  %v17900_v50 = vcombine.low %v11889_v43, %v11893_v29 }
 0x6a8   :  { %14598 = vmatpush1.bf16.msra.mxu0 %v17684_v1  ;;  %v11881_v62 = vld [vmem:[#allocation6 + $0xf40] sm:$0xff]  ;;  %v17765_v12 = vcombine.high %v11753_v44, %v11757_v57  ;;  %v17764_v3 = vcombine.low %v11753_v44, %v11757_v57 }
 0x6a9   :  { %14599 = vmatprep.subr.bf16.mxu0 %v17677_v60  ;;  %v11885_v47 = vld [vmem:[#allocation6 + $0xf60] sm:$0xff] }
 0x6aa   :  { %14639 = vmatpush1.bf16.msra.mxu1 %v17812_v15  ;;  %v11745_v1 = vld [vmem:[#allocation6 + $0xb00] sm:$0xff]  ;;  %v17893_v60 = vcombine.high %v11881_v62, %v11885_v47  ;;  %v17892_v16 = vcombine.low %v11881_v62, %v11885_v47  ;;  %v11454_v62 = vld [vmem:[#allocation6 + $0x1e8] sm:$0xff] }
 0x6ab   :  { %14640 = vmatprep.subr.bf16.mxu1 %v17805_v33  ;;  %v11749_v7 = vld [vmem:[#allocation6 + $0xb20] sm:$0xff] }
 0x6ac   :  { %14600 = vmatpush1.bf16.msra.mxu0 %v17676_v17  ;;  %v11873_v34 = vld [vmem:[#allocation6 + $0xf00] sm:$0xff]  ;;  %v17757_v33 = vcombine.high %v11745_v1, %v11749_v7  ;;  %v17756_v5 = vcombine.low %v11745_v1, %v11749_v7  ;;  %v11381_v7 = vmax.f32 %v18664_v36, 0.0 }
 0x6ad   :  { %14601 = vmatprep.subr.bf16.mxu0 %v17669_v22  ;;  %v11877_v15 = vld [vmem:[#allocation6 + $0xf20] sm:$0xff] }
 0x6ae   :  { %14641 = vmatpush1.bf16.msra.mxu1 %v17804_v4  ;;  %v11737_v17 = vld [vmem:[#allocation6 + $0xac0] sm:$0xff]  ;;  %v17885_v22 = vcombine.high %v11873_v34, %v11877_v15  ;;  %v17884_v10 = vcombine.low %v11873_v34, %v11877_v15  ;;  %v17591_v15 = vcombine.high %v18729_v39, %v18731_v63 }
 0x6af   :  { %14642 = vmatprep.subr.bf16.mxu1 %v17797_v58  ;;  %v11741_v53 = vld [vmem:[#allocation6 + $0xae0] sm:$0xff] }
 0x6b0   :  { %14602 = vmatpush1.bf16.msra.mxu0 %v17668_v21  ;;  %v11865_v42 = vld [vmem:[#allocation6 + $0xec0] sm:$0xff]  ;;  %v17749_v58 = vcombine.high %v11737_v17, %v11741_v53  ;;  %v17748_v52 = vcombine.low %v11737_v17, %v11741_v53  ;;  %v18738_v17 = vpack.c.bf16 %v11381_v7, %v11381_v7 }
 0x6b1   :  { %14603 = vmatprep.subr.bf16.mxu0 %v17661_v25  ;;  %v11869_v4 = vld [vmem:[#allocation6 + $0xee0] sm:$0xff] }
 0x6b2   :  { %14643 = vmatpush1.bf16.msra.mxu1 %v17796_v18  ;;  %v11729_v21 = vld [vmem:[#allocation6 + $0xa80] sm:$0xff]  ;;  %v17877_v25 = vcombine.high %v11865_v42, %v11869_v4  ;;  %v17876_v55 = vcombine.low %v11865_v42, %v11869_v4 }
 0x6b3   :  { %14644 = vmatprep.subr.bf16.mxu1 %v17789_v59  ;;  %v11733_v24 = vld [vmem:[#allocation6 + $0xaa0] sm:$0xff] }
 0x6b4   :  { %14604 = vmatpush1.bf16.msra.mxu0 %v17660_v13  ;;  %v11857_v9 = vld [vmem:[#allocation6 + $0xe80] sm:$0xff]  ;;  %v17741_v59 = vcombine.high %v11729_v21, %v11733_v24  ;;  %v17740_v6 = vcombine.low %v11729_v21, %v11733_v24 }
 0x6b5   :  { %14605 = vmatprep.subr.bf16.mxu0 %v17781_v20  ;;  %v11861_v18 = vld [vmem:[#allocation6 + $0xea0] sm:$0xff] }
 0x6b6   :  { %14645 = vmatpush1.bf16.msra.mxu1 %v17788_v38  ;;  %v11721_v13 = vld [vmem:[#allocation6 + $0xa40] sm:$0xff]  ;;  %v17869_v20 = vcombine.high %v11857_v9, %v11861_v18  ;;  %v17868_v29 = vcombine.low %v11857_v9, %v11861_v18 }
 0x6b7   :  { %14646 = vmatprep.subr.bf16.mxu1 %v17909_v27  ;;  %v11725_v30 = vld [vmem:[#allocation6 + $0xa60] sm:$0xff] }
 0x6b8   :  { %14606 = vmatpush2.bf16.msra.mxu0 %v17780_v35  ;;  %v11849_v11 = vld [vmem:[#allocation6 + $0xe40] sm:$0xff]  ;;  %v17733_v27 = vcombine.high %v11721_v13, %v11725_v30  ;;  %v17732_v44 = vcombine.low %v11721_v13, %v11725_v30 }
 0x6b9   :  { %14607 = vmatprep.subr.bf16.mxu0 %v17773_v41  ;;  %v11853_v38 = vld [vmem:[#allocation6 + $0xe60] sm:$0xff] }
 0x6ba   :  { %14647 = vmatpush2.bf16.msra.mxu1 %v17908_v0  ;;  %v11713_v35 = vld [vmem:[#allocation6 + $0xa00] sm:$0xff]  ;;  %v17861_v41 = vcombine.high %v11849_v11, %v11853_v38  ;;  %v17860_v47 = vcombine.low %v11849_v11, %v11853_v38  ;;  %v11410_v38 = vld [vmem:[#allocation6 + $0x88] sm:$0xff] }
 0x6bb   :  { %14648 = vmatprep.subr.bf16.mxu1 %v17901_v8  ;;  %v11717_v43 = vld [vmem:[#allocation6 + $0xa20] sm:$0xff] }
 0x6bc   :  { %14608 = vmatpush2.bf16.msra.mxu0 %v17772_v14  ;;  %v11841_v57 = vld [vmem:[#allocation6 + $0xe00] sm:$0xff]  ;;  %v17725_v8 = vcombine.high %v11713_v35, %v11717_v43  ;;  %v11450_v14 = vld [vmem:[#allocation6 + $0x1c8] sm:$0xff]  ;;  %v17724_v1 = vcombine.low %v11713_v35, %v11717_v43 }
 0x6bd   :  { %14609 = vmatprep.subr.bf16.mxu0 %v17765_v12  ;;  %v11845_v0 = vld [vmem:[#allocation6 + $0xe20] sm:$0xff] }
 0x6be   :  { %14649 = vmatpush2.bf16.msra.mxu1 %v17900_v50  ;;  %v17853_v12 = vcombine.high %v11841_v57, %v11845_v0  ;;  %v17463_v50 = vcombine.high %v11450_v14, %v11454_v62  ;;  %v17852_v34 = vcombine.low %v11841_v57, %v11845_v0  ;;  %v11394_v0 = vld [vmem:[#allocation6 + $0x8] sm:$0xff] }
 0x6bf   :  { %14650 = vmatprep.subr.bf16.mxu1 %v17893_v60  ;;  %v11442_v60 = vld [vmem:[#allocation6 + $0x188] sm:$0xff] }
 0x6c0   :  { %14610 = vmatpush2.bf16.msra.mxu0 %v17764_v3  ;;  %v11446_v3 = vld [vmem:[#allocation6 + $0x1a8] sm:$0xff] }
 0x6c1   :  { %14611 = vmatprep.subr.bf16.mxu0 %v17757_v33  ;;  %v17462_v33 = vcombine.low %v11450_v14, %v11454_v62  ;;  %v17455_v53 = vcombine.high %v11442_v60, %v11446_v3  ;;  %v17454_v4 = vcombine.low %v11442_v60, %v11446_v3  ;;  %v11510_v60 = vld [vmem:[#allocation6 + $0x3a8] sm:$0xff] }
 0x6c2   :  { %14651 = vmatpush2.bf16.msra.mxu1 %v17892_v16  ;;  %v11434_v16 = vld [vmem:[#allocation6 + $0x148] sm:$0xff] }
 0x6c3   :  { %14652 = vmatprep.subr.bf16.mxu1 %v17885_v22  ;;  %v11438_v22 = vld [vmem:[#allocation6 + $0x168] sm:$0xff] }
 0x6c4   :  { %14612 = vmatpush2.bf16.msra.mxu0 %v17756_v5  ;;  %v17447_v21 = vcombine.high %v11434_v16, %v11438_v22 }
 0x6c5   :  { %14613 = vmatprep.subr.bf16.mxu0 %v17749_v58 }
 0x6c6   :  { %14653 = vmatpush2.bf16.msra.mxu1 %v17884_v10 }
 0x6c7   :  { %14654 = vmatprep.subr.bf16.mxu1 %v17877_v25  ;;  %v11426_v25 = vld [vmem:[#allocation6 + $0x108] sm:$0xff] }
 0x6c8   :  { %14614 = vmatpush2.bf16.msra.mxu0 %v17748_v52  ;;  %v11430_v52 = vld [vmem:[#allocation6 + $0x128] sm:$0xff] }
 0x6c9   :  { %14615 = vmatprep.subr.bf16.mxu0 %v17741_v59  ;;  %v17446_v59 = vcombine.low %v11434_v16, %v11438_v22  ;;  %v17439_v13 = vcombine.high %v11426_v25, %v11430_v52  ;;  %v11490_v22 = vld [vmem:[#allocation6 + $0x308] sm:$0xff] }
 0x6ca   :  { %14655 = vmatpush2.bf16.msra.mxu1 %v17876_v55  ;;  %v11418_v55 = vld [vmem:[#allocation6 + $0xc8] sm:$0xff] }
 0x6cb   :  { %14656 = vmatprep.subr.bf16.mxu1 %v17869_v20  ;;  %v11422_v20 = vld [vmem:[#allocation6 + $0xe8] sm:$0xff] }
 0x6cc   :  { %14616 = vmatpush2.bf16.msra.mxu0 %v17740_v6  ;;  %v17438_v6 = vcombine.low %v11426_v25, %v11430_v52  ;;  %v17431_v11 = vcombine.high %v11418_v55, %v11422_v20  ;;  %v17430_v35 = vcombine.low %v11418_v55, %v11422_v20 }
 0x6cd   :  { %14617 = vmatprep.subr.bf16.mxu0 %v17733_v27  ;;  %v11414_v27 = vld [vmem:[#allocation6 + $0xa8] sm:$0xff] }
 0x6ce   :  { %14657 = vmatpush2.bf16.msra.mxu1 %v17868_v29  ;;  %v17423_v43 = vcombine.high %v11410_v38, %v11414_v27  ;;  %v11402_v29 = vld [vmem:[#allocation6 + $0x48] sm:$0xff] }
 0x6cf   :  { %14658 = vmatprep.subr.bf16.mxu1 %v17861_v41  ;;  %v11406_v41 = vld [vmem:[#allocation6 + $0x68] sm:$0xff] }
 0x6d0   :  { %14618 = vmatpush2.bf16.msra.mxu0 %v17732_v44  ;;  %v17422_v44 = vcombine.low %v11410_v38, %v11414_v27  ;;  %v17415_v57 = vcombine.high %v11402_v29, %v11406_v41  ;;  %v17414_v14 = vcombine.low %v11402_v29, %v11406_v41 }
 0x6d1   :  { %14619 = vmatprep.subr.bf16.mxu0 %v17725_v8  ;;  %v11398_v8 = vld [vmem:[#allocation6 + $0x28] sm:$0xff] }
 0x6d2   :  { %14659 = vmatpush2.bf16.msra.mxu1 %v17860_v47  ;;  %v17407_v62 = vcombine.high %v11394_v0, %v11398_v8  ;;  %v11514_v47 = vld [vmem:[#allocation6 + $0x3c8] sm:$0xff] }
 0x6d3   :  { %14660 = vmatprep.subr.bf16.mxu1 %v17853_v12  ;;  %v11518_v12 = vld [vmem:[#allocation6 + $0x3e8] sm:$0xff] }
 0x6d4   :  { %14620 = vmatpush2.bf16.msra.mxu0 %v17724_v1  ;;  %v17406_v1 = vcombine.low %v11394_v0, %v11398_v8  ;;  %v17527_v7 = vcombine.high %v11514_v47, %v11518_v12  ;;  %v17526_v3 = vcombine.low %v11514_v47, %v11518_v12  ;;  %v11694_v47 = vld [vmem:[#allocation6 + $0x968] sm:$0xff] }
 0x6d5   :  { %14671 = vmatprep.subr.bf16.mxu0 %v17463_v50  ;;  %v11506_v50 = vld [vmem:[#allocation6 + $0x388] sm:$0xff] }
 0x6d6   :  { %14661 = vmatpush2.bf16.msra.mxu1 %v17852_v34  ;;  %v17519_v34 = vcombine.high %v11506_v50, %v11510_v60 }
 0x6d7   :  { %v11247_v36 = vpop.f32.mrf.mxu0  ;;  %14622 = vmatmul.mubr.bf16.vlgmr.msra.gmra.mxu0 %v18738_v17  ;;  %14712 = vmatprep.subr.bf16.mxu1 %v17591_v15  ;;  %v11288_v42 = vpop.f32.mrf.mxu1  ;;  %v11498_v15 = vld [vmem:[#allocation6 + $0x348] sm:$0xff] }
 0x6d8   :  { %v11248_v5 = vadd.f32 %v11247_v36, %v18724_v19  ;;  %14672 = vmatpush1.bf16.msra.mxu0 %v17462_v33  ;;  %14703 = vmatprep.mubr.bf16.mxu0 %v18697_v49  ;;  %v11502_v33 = vld [vmem:[#allocation6 + $0x368] sm:$0xff] }
 0x6d9   :  { %v18743_v58 = vpop.f32.mrf.mxu0  ;;  %14673 = vmatprep.subr.bf16.mxu0 %v17455_v53  ;;  %v18747_v10 = vpop.f32.mrf.mxu1  ;;  %v17518_v53 = vcombine.low %v11506_v50, %v11510_v60  ;;  %v17511_v16 = vcombine.high %v11498_v15, %v11502_v33  ;;  %v11494_v36 = vld [vmem:[#allocation6 + $0x328] sm:$0xff] }
 0x6da   :  { %v18745_v24 = vadd.f32 %v11288_v42, %v11248_v5  ;;  %v17510_v5 = vcombine.low %v11498_v15, %v11502_v33  ;;  %v17503_v42 = vcombine.high %v11490_v22, %v11494_v36  ;;  %v17502_v25 = vcombine.low %v11490_v22, %v11494_v36  ;;  %v11682_v33 = vld [vmem:[#allocation6 + $0x908] sm:$0xff] }
 0x6db   :  { %v11251_v9 = vpop.f32.mrf.mxu0  ;;  %v11292_v18 = vpop.f32.mrf.mxu1  ;;  %v11250_v0 = vadd.f32 %v18743_v58, %v18727_v2 }
 0x6dc   :  { %14674 = vmatpush1.bf16.msra.mxu0 %v17454_v4  ;;  %v11482_v4 = vld [vmem:[#allocation6 + $0x2c8] sm:$0xff] }
 0x6dd   :  { %v11252_v19 = vpop.f32.mrf.mxu0  ;;  %14675 = vmatprep.subr.bf16.mxu0 %v17447_v21  ;;  %v11293_v30 = vpop.f32.mrf.mxu1  ;;  %v11486_v21 = vld [vmem:[#allocation6 + $0x2e8] sm:$0xff] }
 0x6de   :  { %v17495_v52 = vcombine.high %v11482_v4, %v11486_v21  ;;  %v11474_v9 = vld [vmem:[#allocation6 + $0x288] sm:$0xff] }
 0x6df   :  { %v11478_v18 = vld [vmem:[#allocation6 + $0x2a8] sm:$0xff] }
 0x6e0   :  { %14676 = vmatpush1.bf16.msra.mxu0 %v17446_v59  ;;  %v17494_v59 = vcombine.low %v11482_v4, %v11486_v21  ;;  %v17487_v19 = vcombine.high %v11474_v9, %v11478_v18  ;;  %v11470_v30 = vld [vmem:[#allocation6 + $0x268] sm:$0xff]  ;;  %v17486_v55 = vcombine.low %v11474_v9, %v11478_v18 }
 0x6e1   :  { %14677 = vmatprep.subr.bf16.mxu0 %v17439_v13  ;;  %v11466_v13 = vld [vmem:[#allocation6 + $0x248] sm:$0xff] }
 0x6e2   :  { %v17479_v20 = vcombine.high %v11466_v13, %v11470_v30  ;;  %v17478_v38 = vcombine.low %v11466_v13, %v11470_v30  ;;  %v11674_v9 = vld [vmem:[#allocation6 + $0x8c8] sm:$0xff] }
 0x6e3   :  { %v11678_v18 = vld [vmem:[#allocation6 + $0x8e8] sm:$0xff] }
 0x6e4   :  { %14678 = vmatpush1.bf16.msra.mxu0 %v17438_v6  ;;  %v11458_v6 = vld [vmem:[#allocation6 + $0x208] sm:$0xff] }
 0x6e5   :  { %14679 = vmatprep.subr.bf16.mxu0 %v17431_v11  ;;  %v11462_v11 = vld [vmem:[#allocation6 + $0x228] sm:$0xff] }
 0x6e6   :  { %v17471_v27 = vcombine.high %v11458_v6, %v11462_v11  ;;  %v17470_v29 = vcombine.low %v11458_v6, %v11462_v11  ;;  %v11566_v6 = vld [vmem:[#allocation6 + $0x568] sm:$0xff] }
 0x6e7   :  { %v11666_v11 = vld [vmem:[#allocation6 + $0x888] sm:$0xff] }
 0x6e8   :  { %14680 = vmatpush1.bf16.msra.mxu0 %v17430_v35  ;;  %v11706_v35 = vld [vmem:[#allocation6 + $0x9c8] sm:$0xff] }
 0x6e9   :  { %14681 = vmatprep.subr.bf16.mxu0 %v17423_v43  ;;  %v11710_v43 = vld [vmem:[#allocation6 + $0x9e8] sm:$0xff] }
 0x6ea   :  { %v17719_v41 = vcombine.high %v11706_v35, %v11710_v43  ;;  %v17718_v8 = vcombine.low %v11706_v35, %v11710_v43  ;;  %v17686_v35 = vcombine.low %v11674_v9, %v11678_v18 }
 0x6ec   :  { %14682 = vmatpush1.bf16.msra.mxu0 %v17422_v44  ;;  %v11698_v44 = vld [vmem:[#allocation6 + $0x988] sm:$0xff] }
 0x6ed   :  { %14683 = vmatprep.subr.bf16.mxu0 %v17415_v57  ;;  %v11702_v57 = vld [vmem:[#allocation6 + $0x9a8] sm:$0xff] }
 0x6ee   :  { %v17710_v60 = vcombine.low %v11698_v44, %v11702_v57 }
 0x6f0   :  { %14684 = vmatpush1.bf16.msra.mxu0 %v17414_v14  ;;  %v17711_v14 = vcombine.high %v11698_v44, %v11702_v57  ;;  %v11558_v44 = vld [vmem:[#allocation6 + $0x528] sm:$0xff] }
 0x6f1   :  { %14685 = vmatprep.subr.bf16.mxu0 %v17407_v62  ;;  %v11690_v62 = vld [vmem:[#allocation6 + $0x948] sm:$0xff] }
 0x6f2   :  { %v17703_v2 = vcombine.high %v11690_v62, %v11694_v47  ;;  %v11658_v57 = vld [vmem:[#allocation6 + $0x848] sm:$0xff] }
 0x6f4   :  { %14686 = vmatpush1.bf16.msra.mxu0 %v17406_v1  ;;  %v11291_v1 = vadd.f32 %v18747_v10, %v11250_v0  ;;  %v17702_v10 = vcombine.low %v11690_v62, %v11694_v47  ;;  %v11662_v0 = vld [vmem:[#allocation6 + $0x868] sm:$0xff] }
 0x6f5   :  { %14687 = vmatprep.subr.bf16.mxu0 %v17527_v7  ;;  %v17671_v63 = vcombine.high %v11658_v57, %v11662_v0  ;;  %v11550_v62 = vld [vmem:[#allocation6 + $0x4e8] sm:$0xff] }
 0x6f6   :  { %v11650_v47 = vld [vmem:[#allocation6 + $0x808] sm:$0xff] }
 0x6f8   :  { %14688 = vmatpush2.bf16.msra.mxu0 %v17526_v3 }
 0x6f9   :  { %14689 = vmatprep.subr.bf16.mxu0 %v17519_v34 }
 0x6fc   :  { %14690 = vmatpush2.bf16.msra.mxu0 %v17518_v53  ;;  %v11686_v53 = vld [vmem:[#allocation6 + $0x928] sm:$0xff] }
 0x6fd   :  { %14691 = vmatprep.subr.bf16.mxu0 %v17511_v16  ;;  %v17694_v13 = vcombine.low %v11682_v33, %v11686_v53 }
 0x700   :  { %14692 = vmatpush2.bf16.msra.mxu0 %v17510_v5 }
 0x701   :  { %14693 = vmatprep.subr.bf16.mxu0 %v17503_v42  ;;  %v17695_v42 = vcombine.high %v11682_v33, %v11686_v53 }
 0x704   :  { %14694 = vmatpush2.bf16.msra.mxu0 %v17502_v25  ;;  %v11570_v25 = vld [vmem:[#allocation6 + $0x588] sm:$0xff] }
 0x705   :  { %14695 = vmatprep.subr.bf16.mxu0 %v17495_v52  ;;  %v11574_v52 = vld [vmem:[#allocation6 + $0x5a8] sm:$0xff] }
 0x706   :  { %v17583_v30 = vcombine.high %v11570_v25, %v11574_v52 }
 0x708   :  { %14696 = vmatpush2.bf16.msra.mxu0 %v17494_v59 }
 0x709   :  { %14697 = vmatprep.subr.bf16.mxu0 %v17487_v19 }
 0x70c   :  { %14698 = vmatpush2.bf16.msra.mxu0 %v17486_v55  ;;  %v17687_v55 = vcombine.high %v11674_v9, %v11678_v18  ;;  %v11754_v9 = vld [vmem:[#allocation6 + $0xb48] sm:$0xff] }
 0x70d   :  { %14699 = vmatprep.subr.bf16.mxu0 %v17479_v20  ;;  %v11562_v20 = vld [vmem:[#allocation6 + $0x548] sm:$0xff] }
 0x70e   :  { %v17575_v43 = vcombine.high %v11562_v20, %v11566_v6  ;;  %v11758_v18 = vld [vmem:[#allocation6 + $0xb68] sm:$0xff] }
 0x710   :  { %14700 = vmatpush2.bf16.msra.mxu0 %v17478_v38  ;;  %v11670_v38 = vld [vmem:[#allocation6 + $0x8a8] sm:$0xff] }
 0x711   :  { %14701 = vmatprep.subr.bf16.mxu0 %v17471_v27  ;;  %v17582_v27 = vcombine.low %v11570_v25, %v11574_v52  ;;  %v11522_v25 = vld [vmem:[#allocation6 + $0x408] sm:$0xff] }
 0x712   :  { %v11526_v52 = vld [vmem:[#allocation6 + $0x428] sm:$0xff] }
 0x714   :  { %14702 = vmatpush2.bf16.msra.mxu0 %v17470_v29  ;;  %v17679_v29 = vcombine.high %v11666_v11, %v11670_v38 }
 0x715   :  { %14753 = vmatprep.subr.bf16.mxu0 %v17719_v41  ;;  %v11554_v41 = vld [vmem:[#allocation6 + $0x508] sm:$0xff] }
 0x716   :  { %v17567_v39 = vcombine.high %v11554_v41, %v11558_v44 }
 0x717   :  { %v11329_v12 = vpop.f32.mrf.mxu0  ;;  %14704 = vmatmul.mubr.bf16.vlgmr.msra.gmra.mxu0 %v18714_v28  ;;  %v11370_v50 = vpop.f32.mrf.mxu1 }
 0x718   :  { %v11330_v7 = vadd.f32 %v11329_v12, %v18745_v24  ;;  %14754 = vmatpush1.bf16.msra.mxu0 %v17718_v8  ;;  %14785 = vmatprep.mubr.bf16.mxu0 %v18718_v31  ;;  %v17574_v8 = vcombine.low %v11562_v20, %v11566_v6  ;;  %v11654_v12 = vld [vmem:[#allocation6 + $0x828] sm:$0xff]  ;;  %v17767_v20 = vcombine.high %v11754_v9, %v11758_v18 }
 0x719   :  { %v11331_v3 = vpop.f32.mrf.mxu0  ;;  %14755 = vmatprep.subr.bf16.mxu0 %v17711_v14  ;;  %v11372_v15 = vpop.f32.mrf.mxu1  ;;  %v17678_v14 = vcombine.low %v11666_v11, %v11670_v38  ;;  %v17662_v33 = vcombine.low %v11650_v47, %v11654_v12  ;;  %v11642_v6 = vld [vmem:[#allocation6 + $0x7c8] sm:$0xff] }
 0x71a   :  { %v11371_v58 = vadd.f32 %v11370_v50, %v11330_v7  ;;  %v11332_v34 = vadd.f32 %v11331_v3, %v11291_v1  ;;  %v17566_v1 = vcombine.low %v11554_v41, %v11558_v44  ;;  %v17670_v7 = vcombine.low %v11658_v57, %v11662_v0  ;;  %v11538_v3 = vld [vmem:[#allocation6 + $0x488] sm:$0xff] }
 0x71b   :  { %v11333_v16 = vpop.f32.mrf.mxu0  ;;  %v11374_v36 = vpop.f32.mrf.mxu1  ;;  %v11646_v11 = vld [vmem:[#allocation6 + $0x7e8] sm:$0xff] }
 0x71c   :  { %v11373_v22 = vadd.f32 %v11372_v15, %v11332_v34  ;;  %14756 = vmatpush1.bf16.msra.mxu0 %v17710_v60  ;;  %v11383_v5 = vmax.f32 %v11371_v58, 0.0  ;;  %v17663_v60 = vcombine.high %v11650_v47, %v11654_v12  ;;  %v11770_v58 = vld [vmem:[#allocation6 + $0xbc8] sm:$0xff] }
 0x71d   :  { %v11334_v24 = vpop.f32.mrf.mxu0  ;;  %14757 = vmatprep.subr.bf16.mxu0 %v17703_v2  ;;  %v11375_v21 = vpop.f32.mrf.mxu1  ;;  %v11542_v2 = vld [vmem:[#allocation6 + $0x4a8] sm:$0xff] }
 0x71e   :  { %v11384_v4 = vmax.f32 %v11373_v22, 0.0  ;;  %v18757_v19 = vpack.c.bf16 %v11383_v5, %v11383_v5  ;;  %v11774_v34 = vld [vmem:[#allocation6 + $0xbe8] sm:$0xff]  ;;  %v17551_v53 = vcombine.high %v11538_v3, %v11542_v2  ;;  %v17550_v24 = vcombine.low %v11538_v3, %v11542_v2 }
 0x71f   :  { %v17783_v16 = vcombine.high %v11770_v58, %v11774_v34  ;;  %v11530_v22 = vld [vmem:[#allocation6 + $0x448] sm:$0xff] }
 0x720   :  { %v18755_v59 = vpack.c.bf16 %v11384_v4, %v11384_v4  ;;  %14758 = vmatpush1.bf16.msra.mxu0 %v17702_v10  ;;  %v11534_v36 = vld [vmem:[#allocation6 + $0x468] sm:$0xff] }
 0x721   :  { %14759 = vmatprep.subr.bf16.mxu0 %v17695_v42  ;;  %v11762_v10 = vld [vmem:[#allocation6 + $0xb88] sm:$0xff]  ;;  %v17782_v42 = vcombine.low %v11770_v58, %v11774_v34  ;;  %v17543_v4 = vcombine.high %v11530_v22, %v11534_v36 }
 0x722   :  { %14662 = vmatprep.mubr.bf16.mxu1 %v18755_v59  ;;  %v11766_v5 = vld [vmem:[#allocation6 + $0xba8] sm:$0xff] }
 0x723   :  { %14663 = vmatmul.mubr.bf16.vlgmr.msra.gmra.mxu1 %v18757_v19  ;;  %v17775_v21 = vcombine.high %v11762_v10, %v11766_v5  ;;  %v11746_v38 = vld [vmem:[#allocation6 + $0xb08] sm:$0xff] }
 0x724   :  { %14713 = vmatpush1.bf16.msra.mxu1 %v17590_v40  ;;  %14744 = vmatprep.mubr.bf16.mxu1 %v18700_v32  ;;  %v11546_v40 = vld [vmem:[#allocation6 + $0x4c8] sm:$0xff] }
 0x725   :  { %14760 = vmatpush1.bf16.msra.mxu0 %v17694_v13  ;;  %14714 = vmatprep.subr.bf16.mxu1 %v17583_v30  ;;  %v17559_v50 = vcombine.high %v11546_v40, %v11550_v62  ;;  %v17558_v15 = vcombine.low %v11546_v40, %v11550_v62  ;;  %v17542_v13 = vcombine.low %v11530_v22, %v11534_v36  ;;  %v11634_v44 = vld [vmem:[#allocation6 + $0x788] sm:$0xff] }
 0x726   :  { %14761 = vmatprep.subr.bf16.mxu0 %v17687_v55  ;;  %v17774_v30 = vcombine.low %v11762_v10, %v11766_v5  ;;  %v17535_v55 = vcombine.high %v11522_v25, %v11526_v52  ;;  %v11638_v57 = vld [vmem:[#allocation6 + $0x7a8] sm:$0xff] }
 0x727   :  { %v11738_v0 = vld [vmem:[#allocation6 + $0xac8] sm:$0xff] }
 0x728   :  { %14715 = vmatpush1.bf16.msra.mxu1 %v17582_v27  ;;  %v11750_v27 = vld [vmem:[#allocation6 + $0xb28] sm:$0xff] }
 0x729   :  { %14762 = vmatpush1.bf16.msra.mxu0 %v17686_v35  ;;  %14716 = vmatprep.subr.bf16.mxu1 %v17575_v43  ;;  %v17534_v35 = vcombine.low %v11522_v25, %v11526_v52  ;;  %v17766_v43 = vcombine.low %v11754_v9, %v11758_v18  ;;  %v17759_v41 = vcombine.high %v11746_v38, %v11750_v27  ;;  %v11626_v62 = vld [vmem:[#allocation6 + $0x748] sm:$0xff]  ;;  %v11451_v18 = vld [vmem:[#allocation6 + $0x1d0] sm:$0xff] }
 0x72a   :  { %14763 = vmatprep.subr.bf16.mxu0 %v17679_v29  ;;  %v17655_v29 = vcombine.high %v11642_v6, %v11646_v11  ;;  %v11630_v47 = vld [vmem:[#allocation6 + $0x768] sm:$0xff] }
 0x72b   :  { %v11730_v12 = vld [vmem:[#allocation6 + $0xa88] sm:$0xff] }
 0x72c   :  { %14717 = vmatpush1.bf16.msra.mxu1 %v17574_v8  ;;  %v11742_v8 = vld [vmem:[#allocation6 + $0xae8] sm:$0xff] }
 0x72d   :  { %14764 = vmatpush1.bf16.msra.mxu0 %v17678_v14  ;;  %14718 = vmatprep.subr.bf16.mxu1 %v17567_v39  ;;  %v17654_v14 = vcombine.low %v11642_v6, %v11646_v11  ;;  %v17758_v39 = vcombine.low %v11746_v38, %v11750_v27  ;;  %v17751_v40 = vcombine.high %v11738_v0, %v11742_v8  ;;  %v11618_v2 = vld [vmem:[#allocation6 + $0x708] sm:$0xff]  ;;  %v11905_v6 = vld [vmem:[#allocation7] sm:$0xff] }
 0x72e   :  { %14765 = vmatprep.subr.bf16.mxu0 %v17671_v63  ;;  %v17647_v63 = vcombine.high %v11634_v44, %v11638_v57  ;;  %v11622_v58 = vld [vmem:[#allocation6 + $0x728] sm:$0xff] }
 0x72f   :  { %v11722_v34 = vld [vmem:[#allocation6 + $0xa48] sm:$0xff] }
 0x730   :  { %14719 = vmatpush1.bf16.msra.mxu1 %v17566_v1  ;;  %v11734_v1 = vld [vmem:[#allocation6 + $0xaa8] sm:$0xff] }
 0x731   :  { %14766 = vmatpush1.bf16.msra.mxu0 %v17670_v7  ;;  %14720 = vmatprep.subr.bf16.mxu1 %v17559_v50  ;;  %v17646_v7 = vcombine.low %v11634_v44, %v11638_v57  ;;  %v17750_v50 = vcombine.low %v11738_v0, %v11742_v8  ;;  %v17743_v3 = vcombine.high %v11730_v12, %v11734_v1  ;;  %v11610_v36 = vld [vmem:[#allocation6 + $0x6c8] sm:$0xff] }
 0x732   :  { %14767 = vmatprep.subr.bf16.mxu0 %v17663_v60  ;;  %v17639_v60 = vcombine.high %v11626_v62, %v11630_v47  ;;  %v11614_v10 = vld [vmem:[#allocation6 + $0x6e8] sm:$0xff]  ;;  %v11914_v57 = vrot.slane %v11905_v6, %v1695_v46 }
 0x733   :  { %v11714_v5 = vld [vmem:[#allocation6 + $0xa08] sm:$0xff] }
 0x734   :  { %14721 = vmatpush1.bf16.msra.mxu1 %v17558_v15  ;;  %v11726_v15 = vld [vmem:[#allocation6 + $0xa68] sm:$0xff] }
 0x735   :  { %14768 = vmatpush1.bf16.msra.mxu0 %v17662_v33  ;;  %14722 = vmatprep.subr.bf16.mxu1 %v17551_v53  ;;  %v17638_v33 = vcombine.low %v11626_v62, %v11630_v47  ;;  %v17742_v53 = vcombine.low %v11730_v12, %v11734_v1  ;;  %v17735_v22 = vcombine.high %v11722_v34, %v11726_v15  ;;  %v11602_v52 = vld [vmem:[#allocation6 + $0x688] sm:$0xff]  ;;  %v11439_v62 = vld [vmem:[#allocation6 + $0x170] sm:$0xff] }
 0x736   :  { %14769 = vmatprep.subr.bf16.mxu0 %v17783_v16  ;;  %v17631_v16 = vcombine.high %v11618_v2, %v11622_v58  ;;  %v11606_v9 = vld [vmem:[#allocation6 + $0x6a8] sm:$0xff] }
 0x737   :  { %v11594_v38 = vld [vmem:[#allocation6 + $0x648] sm:$0xff] }
 0x738   :  { %14723 = vmatpush1.bf16.msra.mxu1 %v17550_v24  ;;  %v11718_v24 = vld [vmem:[#allocation6 + $0xa28] sm:$0xff] }
 0x739   :  { %14770 = vmatpush2.bf16.msra.mxu0 %v17782_v42  ;;  %14724 = vmatprep.subr.bf16.mxu1 %v17543_v4  ;;  %v17630_v42 = vcombine.low %v11618_v2, %v11622_v58  ;;  %v17734_v4 = vcombine.low %v11722_v34, %v11726_v15  ;;  %v17727_v25 = vcombine.high %v11714_v5, %v11718_v24  ;;  %v11598_v27 = vld [vmem:[#allocation6 + $0x668] sm:$0xff] }
 0x73a   :  { %14771 = vmatprep.subr.bf16.mxu0 %v17775_v21  ;;  %v17623_v21 = vcombine.high %v11610_v36, %v11614_v10  ;;  %v17607_v0 = vcombine.high %v11594_v38, %v11598_v27  ;;  %v11834_v58 = vld [vmem:[#allocation6 + $0xdc8] sm:$0xff] }
 0x73b   :  { %v11838_v34 = vld [vmem:[#allocation6 + $0xde8] sm:$0xff] }
 0x73c   :  { %14725 = vmatpush1.bf16.msra.mxu1 %v17542_v13  ;;  %v11455_v13 = vld [vmem:[#allocation6 + $0x1f0] sm:$0xff] }
 0x73d   :  { %14772 = vmatpush2.bf16.msra.mxu0 %v17774_v30  ;;  %14726 = vmatprep.subr.bf16.mxu1 %v17535_v55  ;;  %v17622_v30 = vcombine.low %v11610_v36, %v11614_v10  ;;  %v17726_v55 = vcombine.low %v11714_v5, %v11718_v24  ;;  %v17465_v11 = vcombine.high %v11451_v18, %v11455_v13 }
 0x73e   :  { %14773 = vmatprep.subr.bf16.mxu0 %v17767_v20  ;;  %v17615_v20 = vcombine.high %v11602_v52, %v11606_v9  ;;  %v17464_v44 = vcombine.low %v11451_v18, %v11455_v13  ;;  %v17847_v24 = vcombine.high %v11834_v58, %v11838_v34  ;;  %v17846_v18 = vcombine.low %v11834_v58, %v11838_v34  ;;  %v11519_v58 = vld [vmem:[#allocation6 + $0x3f0] sm:$0xff] }
 0x740   :  { %14727 = vmatpush1.bf16.msra.mxu1 %v17534_v35  ;;  %v11443_v35 = vld [vmem:[#allocation6 + $0x190] sm:$0xff] }
 0x741   :  { %14774 = vmatpush2.bf16.msra.mxu0 %v17766_v43  ;;  %14728 = vmatprep.subr.bf16.mxu1 %v17655_v29  ;;  %v11447_v43 = vld [vmem:[#allocation6 + $0x1b0] sm:$0xff]  ;;  %v17614_v29 = vcombine.low %v11602_v52, %v11606_v9 }
 0x742   :  { %14775 = vmatprep.subr.bf16.mxu0 %v17759_v41  ;;  %v11910_v41 = vrot.slane %v11905_v6, %v1691_v37  ;;  %v17457_v8 = vcombine.high %v11443_v35, %v11447_v43  ;;  %v17606_v37 = vcombine.low %v11594_v38, %v11598_v27  ;;  %v11419_v52 = vld [vmem:[#allocation6 + $0xd0] sm:$0xff]  ;;  %v11822_v6 = vld [vmem:[#allocation6 + $0xd68] sm:$0xff] }
 0x743   :  { %v11423_v9 = vld [vmem:[#allocation6 + $0xf0] sm:$0xff] }
 0x744   :  { %14729 = vmatpush2.bf16.msra.mxu1 %v17654_v14  ;;  %v11586_v14 = vld [vmem:[#allocation6 + $0x608] sm:$0xff]  ;;  %v11415_v38 = vld [vmem:[#allocation6 + $0xb0] sm:$0xff] }
 0x745   :  { %14776 = vmatpush2.bf16.msra.mxu0 %v17758_v39  ;;  %14730 = vmatprep.subr.bf16.mxu1 %v17647_v63  ;;  %v11590_v39 = vld [vmem:[#allocation6 + $0x628] sm:$0xff] }
 0x746   :  { %14777 = vmatprep.subr.bf16.mxu0 %v17751_v40  ;;  %v11435_v40 = vld [vmem:[#allocation6 + $0x150] sm:$0xff]  ;;  %v17598_v36 = vcombine.low %v11586_v14, %v11590_v39 }
 0x747   :  { %v17449_v2 = vcombine.high %v11435_v40, %v11439_v62  ;;  %v17448_v5 = vcombine.low %v11435_v40, %v11439_v62  ;;  %v11802_v40 = vld [vmem:[#allocation6 + $0xcc8] sm:$0xff] }
 0x748   :  { %14731 = vmatpush2.bf16.msra.mxu1 %v17646_v7  ;;  %v17456_v7 = vcombine.low %v11443_v35, %v11447_v43  ;;  %v17432_v35 = vcombine.low %v11419_v52, %v11423_v9  ;;  %v11806_v62 = vld [vmem:[#allocation6 + $0xce8] sm:$0xff] }
 0x749   :  { %14778 = vmatpush2.bf16.msra.mxu0 %v17750_v50  ;;  %14732 = vmatprep.subr.bf16.mxu1 %v17639_v60  ;;  %v17599_v50 = vcombine.high %v11586_v14, %v11590_v39  ;;  %v17814_v34 = vcombine.low %v11802_v40, %v11806_v62 }
 0x74a   :  { %14779 = vmatprep.subr.bf16.mxu0 %v17743_v3 }
 0x74c   :  { %14733 = vmatpush2.bf16.msra.mxu1 %v17638_v33  ;;  %v11427_v33 = vld [vmem:[#allocation6 + $0x110] sm:$0xff] }
 0x74d   :  { %14780 = vmatpush2.bf16.msra.mxu0 %v17742_v53  ;;  %14734 = vmatprep.subr.bf16.mxu1 %v17631_v16  ;;  %v11431_v53 = vld [vmem:[#allocation6 + $0x130] sm:$0xff] }
 0x74e   :  { %14781 = vmatprep.subr.bf16.mxu0 %v17735_v22  ;;  %v17440_v13 = vcombine.low %v11427_v33, %v11431_v53 }
 0x750   :  { %14735 = vmatpush2.bf16.msra.mxu1 %v17630_v42 }
 0x751   :  { %14782 = vmatpush2.bf16.msra.mxu0 %v17734_v4  ;;  %14736 = vmatprep.subr.bf16.mxu1 %v17623_v21  ;;  %v17441_v4 = vcombine.high %v11427_v33, %v11431_v53  ;;  %v11826_v21 = vld [vmem:[#allocation6 + $0xd88] sm:$0xff] }
 0x752   :  { %14783 = vmatprep.subr.bf16.mxu0 %v17727_v25  ;;  %v11830_v25 = vld [vmem:[#allocation6 + $0xda8] sm:$0xff] }
 0x753   :  { %v17838_v27 = vcombine.low %v11826_v21, %v11830_v25 }
 0x754   :  { %14737 = vmatpush2.bf16.msra.mxu1 %v17622_v30  ;;  %v17839_v30 = vcombine.high %v11826_v21, %v11830_v25  ;;  %v11778_v25 = vld [vmem:[#allocation6 + $0xc08] sm:$0xff] }
 0x755   :  { %14784 = vmatpush2.bf16.msra.mxu0 %v17726_v55  ;;  %14738 = vmatprep.subr.bf16.mxu1 %v17615_v20  ;;  %v17433_v55 = vcombine.high %v11419_v52, %v11423_v9  ;;  %v11818_v20 = vld [vmem:[#allocation6 + $0xd48] sm:$0xff]  ;;  %v11499_v9 = vld [vmem:[#allocation6 + $0x350] sm:$0xff] }
 0x756   :  { %14835 = vmatprep.subr.bf16.mxu0 %v17465_v11  ;;  %v11411_v11 = vld [vmem:[#allocation6 + $0x90] sm:$0xff]  ;;  %v17831_v43 = vcombine.high %v11818_v20, %v11822_v6  ;;  %v11782_v52 = vld [vmem:[#allocation6 + $0xc28] sm:$0xff] }
 0x757   :  { %v14541_v63 = vpop.f32.mrf.mxu0  ;;  %v17424_v14 = vcombine.low %v11411_v11, %v11415_v38 }
 0x758   :  { %v14542_v47 = vadd.f32 %v14541_v63, %v11910_v41  ;;  %v14582_v12 = vpop.f32.mrf.mxu1  ;;  %14739 = vmatpush2.bf16.msra.mxu1 %v17614_v29  ;;  %14786 = vmatmul.mubr.bf16.vlgmr.msra.gmra.mxu0 %v18738_v17  ;;  %v17425_v29 = vcombine.high %v11411_v11, %v11415_v38  ;;  %v11810_v41 = vld [vmem:[#allocation6 + $0xd08] sm:$0xff]  ;;  %v11491_v38 = vld [vmem:[#allocation6 + $0x310] sm:$0xff] }
 0x759   :  { %14836 = vmatpush1.bf16.msra.mxu0 %v17464_v44  ;;  %14867 = vmatprep.mubr.bf16.mxu0 %v18697_v49  ;;  %v14543_v1 = vpop.f32.mrf.mxu0  ;;  %v11814_v44 = vld [vmem:[#allocation6 + $0xd28] sm:$0xff] }
 0x75a   :  { %v18771_v46 = vadd.f32 %v14582_v12, %v14542_v47  ;;  %v14544_v60 = vadd.f32 %v14543_v1, %v11914_v57  ;;  %v14584_v3 = vpop.f32.mrf.mxu1  ;;  %14740 = vmatprep.subr.bf16.mxu1 %v17607_v0  ;;  %14837 = vmatprep.subr.bf16.mxu0 %v17457_v8  ;;  %v11403_v57 = vld [vmem:[#allocation6 + $0x50] sm:$0xff]  ;;  %v17830_v8 = vcombine.low %v11818_v20, %v11822_v6  ;;  %v11898_v6 = vld [vmem:[#allocation6 + $0xfc8] sm:$0xff] }
 0x75b   :  { %v14545_v15 = vpop.f32.mrf.mxu0  ;;  %v11407_v0 = vld [vmem:[#allocation6 + $0x70] sm:$0xff]  ;;  %v17823_v39 = vcombine.high %v11810_v41, %v11814_v44  ;;  %v11902_v11 = vld [vmem:[#allocation6 + $0xfe8] sm:$0xff] }
 0x75c   :  { %v18773_v16 = vadd.f32 %v14584_v3, %v14544_v60  ;;  %v14586_v22 = vpop.f32.mrf.mxu1  ;;  %14741 = vmatpush2.bf16.msra.mxu1 %v17606_v37  ;;  %v17417_v63 = vcombine.high %v11403_v57, %v11407_v0  ;;  %v11395_v47 = vld [vmem:[#allocation6 + $0x10] sm:$0xff]  ;;  %v17822_v37 = vcombine.low %v11810_v41, %v11814_v44  ;;  %v17416_v1 = vcombine.low %v11403_v57, %v11407_v0  ;;  %v11794_v60 = vld [vmem:[#allocation6 + $0xc88] sm:$0xff] }
 0x75d   :  { %14838 = vmatpush1.bf16.msra.mxu0 %v17456_v7  ;;  %v14546_v10 = vpop.f32.mrf.mxu0  ;;  %14742 = vmatprep.subr.bf16.mxu1 %v17599_v50  ;;  %v11399_v12 = vld [vmem:[#allocation6 + $0x30] sm:$0xff]  ;;  %v17815_v7 = vcombine.high %v11802_v40, %v11806_v62  ;;  %v11798_v3 = vld [vmem:[#allocation6 + $0xca8] sm:$0xff] }
 0x75e   :  { %v14587_v42 = vpop.f32.mrf.mxu1  ;;  %14839 = vmatprep.subr.bf16.mxu0 %v17449_v2  ;;  %v17409_v50 = vcombine.high %v11395_v47, %v11399_v12  ;;  %v11515_v2 = vld [vmem:[#allocation6 + $0x3d0] sm:$0xff]  ;;  %v17408_v15 = vcombine.low %v11395_v47, %v11399_v12  ;;  %v17807_v33 = vcombine.high %v11794_v60, %v11798_v3  ;;  %v11786_v22 = vld [vmem:[#allocation6 + $0xc48] sm:$0xff] }
 0x75f   :  { %v17529_v53 = vcombine.high %v11515_v2, %v11519_v58  ;;  %v11507_v10 = vld [vmem:[#allocation6 + $0x390] sm:$0xff]  ;;  %v17528_v42 = vcombine.low %v11515_v2, %v11519_v58  ;;  %v11890_v44 = vld [vmem:[#allocation6 + $0xf88] sm:$0xff] }
 0x760   :  { %14743 = vmatpush2.bf16.msra.mxu1 %v17598_v36  ;;  %v11790_v36 = vld [vmem:[#allocation6 + $0xc68] sm:$0xff]  ;;  %v11483_v0 = vld [vmem:[#allocation6 + $0x2d0] sm:$0xff] }
 0x761   :  { %14840 = vmatpush1.bf16.msra.mxu0 %v17448_v5  ;;  %14794 = vmatprep.subr.bf16.mxu1 %v17847_v24  ;;  %v11511_v5 = vld [vmem:[#allocation6 + $0x3b0] sm:$0xff]  ;;  %v17806_v24 = vcombine.low %v11794_v60, %v11798_v3  ;;  %v11894_v57 = vld [vmem:[#allocation6 + $0xfa8] sm:$0xff] }
 0x762   :  { %14841 = vmatprep.subr.bf16.mxu0 %v17441_v4  ;;  %v17799_v4 = vcombine.high %v11786_v22, %v11790_v36  ;;  %v17521_v21 = vcombine.high %v11507_v10, %v11511_v5  ;;  %v11882_v62 = vld [vmem:[#allocation6 + $0xf48] sm:$0xff]  ;;  %v11475_v12 = vld [vmem:[#allocation6 + $0x290] sm:$0xff] }
 0x763   :  { %14745 = vmatmul.mubr.bf16.vlgmr.msra.gmra.mxu1 %v18716_v56  ;;  %v11886_v47 = vld [vmem:[#allocation6 + $0xf68] sm:$0xff]  ;;  %v11467_v58 = vld [vmem:[#allocation6 + $0x250] sm:$0xff] }
 0x764   :  { %14795 = vmatpush1.bf16.msra.mxu1 %v17846_v18  ;;  %14826 = vmatprep.mubr.bf16.mxu1 %v18755_v59  ;;  %v11503_v18 = vld [vmem:[#allocation6 + $0x370] sm:$0xff]  ;;  %v11874_v3 = vld [vmem:[#allocation6 + $0xf08] sm:$0xff] }
 0x765   :  { %14842 = vmatpush1.bf16.msra.mxu0 %v17440_v13  ;;  %14796 = vmatprep.subr.bf16.mxu1 %v17839_v30  ;;  %v17798_v13 = vcombine.low %v11786_v22, %v11790_v36  ;;  %v17520_v30 = vcombine.low %v11507_v10, %v11511_v5  ;;  %v17513_v20 = vcombine.high %v11499_v9, %v11503_v18  ;;  %v11878_v2 = vld [vmem:[#allocation6 + $0xf28] sm:$0xff]  ;;  %v11459_v5 = vld [vmem:[#allocation6 + $0x210] sm:$0xff] }
 0x766   :  { %14843 = vmatprep.subr.bf16.mxu0 %v17433_v55  ;;  %v17791_v55 = vcombine.high %v11778_v25, %v11782_v52  ;;  %v11866_v36 = vld [vmem:[#allocation6 + $0xec8] sm:$0xff] }
 0x767   :  { %v11870_v10 = vld [vmem:[#allocation6 + $0xee8] sm:$0xff] }
 0x768   :  { %14797 = vmatpush1.bf16.msra.mxu1 %v17838_v27  ;;  %v11495_v27 = vld [vmem:[#allocation6 + $0x330] sm:$0xff] }
 0x769   :  { %14844 = vmatpush1.bf16.msra.mxu0 %v17432_v35  ;;  %14798 = vmatprep.subr.bf16.mxu1 %v17831_v43  ;;  %v17790_v35 = vcombine.low %v11778_v25, %v11782_v52  ;;  %v17512_v43 = vcombine.low %v11499_v9, %v11503_v18  ;;  %v17505_v41 = vcombine.high %v11491_v38, %v11495_v27  ;;  %v11858_v52 = vld [vmem:[#allocation6 + $0xe88] sm:$0xff]  ;;  %v11707_v18 = vld [vmem:[#allocation6 + $0x9d0] sm:$0xff] }
 0x76a   :  { %14845 = vmatprep.subr.bf16.mxu0 %v17425_v29  ;;  %v17911_v29 = vcombine.high %v11898_v6, %v11902_v11  ;;  %v11862_v9 = vld [vmem:[#allocation6 + $0xea8] sm:$0xff] }
 0x76c   :  { %14799 = vmatpush1.bf16.msra.mxu1 %v17830_v8  ;;  %v11487_v8 = vld [vmem:[#allocation6 + $0x2f0] sm:$0xff] }
 0x76d   :  { %14846 = vmatpush1.bf16.msra.mxu0 %v17424_v14  ;;  %14800 = vmatprep.subr.bf16.mxu1 %v17823_v39  ;;  %v17910_v14 = vcombine.low %v11898_v6, %v11902_v11  ;;  %v17504_v39 = vcombine.low %v11491_v38, %v11495_v27  ;;  %v17497_v40 = vcombine.high %v11483_v0, %v11487_v8  ;;  %v11850_v11 = vld [vmem:[#allocation6 + $0xe48] sm:$0xff]  ;;  %v11699_v27 = vld [vmem:[#allocation6 + $0x990] sm:$0xff] }
 0x76e   :  { %14847 = vmatprep.subr.bf16.mxu0 %v17417_v63  ;;  %v17903_v63 = vcombine.high %v11890_v44, %v11894_v57  ;;  %v11854_v38 = vld [vmem:[#allocation6 + $0xe68] sm:$0xff] }
 0x770   :  { %14801 = vmatpush1.bf16.msra.mxu1 %v17822_v37  ;;  %v11479_v37 = vld [vmem:[#allocation6 + $0x2b0] sm:$0xff] }
 0x771   :  { %14848 = vmatpush1.bf16.msra.mxu0 %v17416_v1  ;;  %14802 = vmatprep.subr.bf16.mxu1 %v17815_v7  ;;  %v17902_v1 = vcombine.low %v11890_v44, %v11894_v57  ;;  %v17496_v7 = vcombine.low %v11483_v0, %v11487_v8  ;;  %v17489_v60 = vcombine.high %v11475_v12, %v11479_v37  ;;  %v11842_v57 = vld [vmem:[#allocation6 + $0xe08] sm:$0xff] }
 0x772   :  { %14849 = vmatprep.subr.bf16.mxu0 %v17409_v50  ;;  %v17895_v50 = vcombine.high %v11882_v62, %v11886_v47  ;;  %v11846_v0 = vld [vmem:[#allocation6 + $0xe28] sm:$0xff] }
 0x774   :  { %14803 = vmatpush1.bf16.msra.mxu1 %v17814_v34  ;;  %v11471_v34 = vld [vmem:[#allocation6 + $0x270] sm:$0xff] }
 0x775   :  { %14850 = vmatpush1.bf16.msra.mxu0 %v17408_v15  ;;  %14804 = vmatprep.subr.bf16.mxu1 %v17807_v33  ;;  %v17894_v15 = vcombine.low %v11882_v62, %v11886_v47  ;;  %v17488_v33 = vcombine.low %v11475_v12, %v11479_v37  ;;  %v17481_v22 = vcombine.high %v11467_v58, %v11471_v34 }
 0x776   :  { %14851 = vmatprep.subr.bf16.mxu0 %v17529_v53  ;;  %v17887_v53 = vcombine.high %v11874_v3, %v11878_v2  ;;  %v17855_v12 = vcombine.high %v11842_v57, %v11846_v0 }
 0x778   :  { %14805 = vmatpush1.bf16.msra.mxu1 %v17806_v24  ;;  %v11463_v24 = vld [vmem:[#allocation6 + $0x230] sm:$0xff] }
 0x779   :  { %14852 = vmatpush2.bf16.msra.mxu0 %v17528_v42  ;;  %14806 = vmatprep.subr.bf16.mxu1 %v17799_v4  ;;  %v17886_v42 = vcombine.low %v11874_v3, %v11878_v2  ;;  %v17480_v4 = vcombine.low %v11467_v58, %v11471_v34  ;;  %v17473_v25 = vcombine.high %v11459_v5, %v11463_v24  ;;  %v11687_v3 = vld [vmem:[#allocation6 + $0x930] sm:$0xff] }
 0x77a   :  { %14853 = vmatprep.subr.bf16.mxu0 %v17521_v21  ;;  %v17879_v21 = vcombine.high %v11866_v36, %v11870_v10  ;;  %v17854_v2 = vcombine.low %v11842_v57, %v11846_v0  ;;  %v11655_v57 = vld [vmem:[#allocation6 + $0x830] sm:$0xff] }
 0x77c   :  { %14807 = vmatpush1.bf16.msra.mxu1 %v17798_v13  ;;  %v11711_v13 = vld [vmem:[#allocation6 + $0x9f0] sm:$0xff] }
 0x77d   :  { %14854 = vmatpush2.bf16.msra.mxu0 %v17520_v30  ;;  %14808 = vmatprep.subr.bf16.mxu1 %v17791_v55  ;;  %v17878_v30 = vcombine.low %v11866_v36, %v11870_v10  ;;  %v17472_v55 = vcombine.low %v11459_v5, %v11463_v24  ;;  %v17721_v6 = vcombine.high %v11707_v18, %v11711_v13  ;;  %v11679_v36 = vld [vmem:[#allocation6 + $0x8f0] sm:$0xff] }
 0x77e   :  { %14855 = vmatprep.subr.bf16.mxu0 %v17513_v20  ;;  %v17871_v20 = vcombine.high %v11858_v52, %v11862_v9 }
 0x780   :  { %14809 = vmatpush1.bf16.msra.mxu1 %v17790_v35  ;;  %v11703_v35 = vld [vmem:[#allocation6 + $0x9b0] sm:$0xff] }
 0x781   :  { %14856 = vmatpush2.bf16.msra.mxu0 %v17512_v43  ;;  %14810 = vmatprep.subr.bf16.mxu1 %v17911_v29  ;;  %v17870_v43 = vcombine.low %v11858_v52, %v11862_v9  ;;  %v17720_v29 = vcombine.low %v11707_v18, %v11711_v13  ;;  %v17713_v44 = vcombine.high %v11699_v27, %v11703_v35  ;;  %v11671_v52 = vld [vmem:[#allocation6 + $0x8b0] sm:$0xff] }
 0x782   :  { %14857 = vmatprep.subr.bf16.mxu0 %v17505_v41  ;;  %v17863_v41 = vcombine.high %v11850_v11, %v11854_v38  ;;  %v17712_v47 = vcombine.low %v11699_v27, %v11703_v35 }
 0x784   :  { %14811 = vmatpush2.bf16.msra.mxu1 %v17910_v14  ;;  %v11691_v14 = vld [vmem:[#allocation6 + $0x950] sm:$0xff] }
 0x785   :  { %14858 = vmatpush2.bf16.msra.mxu0 %v17504_v39  ;;  %14812 = vmatprep.subr.bf16.mxu1 %v17903_v63  ;;  %v11695_v39 = vld [vmem:[#allocation6 + $0x970] sm:$0xff] }
 0x786   :  { %14859 = vmatprep.subr.bf16.mxu0 %v17497_v40  ;;  %v17862_v40 = vcombine.low %v11850_v11, %v11854_v38  ;;  %v17704_v34 = vcombine.low %v11691_v14, %v11695_v39  ;;  %v11663_v11 = vld [vmem:[#allocation6 + $0x870] sm:$0xff] }
 0x788   :  { %14813 = vmatpush2.bf16.msra.mxu1 %v17902_v1  ;;  %v17705_v1 = vcombine.high %v11691_v14, %v11695_v39 }
 0x789   :  { %14860 = vmatpush2.bf16.msra.mxu0 %v17496_v7  ;;  %14814 = vmatprep.subr.bf16.mxu1 %v17895_v50  ;;  %v11579_v7 = vld [vmem:[#allocation6 + $0x5d0] sm:$0xff] }
 0x78a   :  { %14861 = vmatprep.subr.bf16.mxu0 %v17489_v60  ;;  %v11583_v50 = vld [vmem:[#allocation6 + $0x5f0] sm:$0xff] }
 0x78b   :  { %v11683_v60 = vld [vmem:[#allocation6 + $0x910] sm:$0xff]  ;;  %v17592_v10 = vcombine.low %v11579_v7, %v11583_v50 }
 0x78c   :  { %14815 = vmatpush2.bf16.msra.mxu1 %v17894_v15  ;;  %v17593_v15 = vcombine.high %v11579_v7, %v11583_v50  ;;  %v17696_v5 = vcombine.low %v11683_v60, %v11687_v3 }
 0x78d   :  { %14862 = vmatpush2.bf16.msra.mxu0 %v17488_v33  ;;  %14816 = vmatprep.subr.bf16.mxu1 %v17887_v53  ;;  %v17697_v33 = vcombine.high %v11683_v60, %v11687_v3  ;;  %v11571_v53 = vld [vmem:[#allocation6 + $0x590] sm:$0xff] }
 0x78e   :  { %14863 = vmatprep.subr.bf16.mxu0 %v17481_v22  ;;  %v11675_v22 = vld [vmem:[#allocation6 + $0x8d0] sm:$0xff] }
 0x78f   :  { %v17688_v18 = vcombine.low %v11675_v22, %v11679_v36  ;;  %v11531_v60 = vld [vmem:[#allocation6 + $0x450] sm:$0xff] }
 0x790   :  { %14817 = vmatpush2.bf16.msra.mxu1 %v17886_v42  ;;  %v17689_v42 = vcombine.high %v11675_v22, %v11679_v36  ;;  %v11535_v3 = vld [vmem:[#allocation6 + $0x470] sm:$0xff] }
 0x791   :  { %14864 = vmatpush2.bf16.msra.mxu0 %v17480_v4  ;;  %14818 = vmatprep.subr.bf16.mxu1 %v17879_v21  ;;  %v11563_v4 = vld [vmem:[#allocation6 + $0x550] sm:$0xff] }
 0x792   :  { %14865 = vmatprep.subr.bf16.mxu0 %v17473_v25  ;;  %v11567_v21 = vld [vmem:[#allocation6 + $0x570] sm:$0xff] }
 0x793   :  { %v11667_v25 = vld [vmem:[#allocation6 + $0x890] sm:$0xff]  ;;  %v17577_v13 = vcombine.high %v11563_v4, %v11567_v21  ;;  %v17576_v38 = vcombine.low %v11563_v4, %v11567_v21 }
 0x794   :  { %14819 = vmatpush2.bf16.msra.mxu1 %v17878_v30  ;;  %v17681_v30 = vcombine.high %v11667_v25, %v11671_v52  ;;  %v17680_v27 = vcombine.low %v11667_v25, %v11671_v52  ;;  %v11527_v22 = vld [vmem:[#allocation6 + $0x430] sm:$0xff] }
 0x795   :  { %14866 = vmatpush2.bf16.msra.mxu0 %v17472_v55  ;;  %14820 = vmatprep.subr.bf16.mxu1 %v17871_v20  ;;  %v11555_v55 = vld [vmem:[#allocation6 + $0x510] sm:$0xff] }
 0x796   :  { %14917 = vmatprep.subr.bf16.mxu0 %v17721_v6  ;;  %v11559_v20 = vld [vmem:[#allocation6 + $0x530] sm:$0xff] }
 0x797   :  { %v14623_v8 = vpop.f32.mrf.mxu0  ;;  %v11659_v6 = vld [vmem:[#allocation6 + $0x850] sm:$0xff]  ;;  %v17569_v35 = vcombine.high %v11555_v55, %v11559_v20  ;;  %v17568_v0 = vcombine.low %v11555_v55, %v11559_v20 }
 0x798   :  { %v18778_v63 = vadd.f32 %v14623_v8, %v18771_v46  ;;  %14821 = vmatpush2.bf16.msra.mxu1 %v17870_v43  ;;  %14868 = vmatmul.mubr.bf16.vlgmr.msra.gmra.mxu0 %v18714_v28  ;;  %v17673_v43 = vcombine.high %v11659_v6, %v11663_v11  ;;  %v17672_v8 = vcombine.low %v11659_v6, %v11663_v11  ;;  %v11755_v36 = vld [vmem:[#allocation6 + $0xb50] sm:$0xff] }
 0x799   :  { %14918 = vmatpush1.bf16.msra.mxu0 %v17720_v29  ;;  %14949 = vmatprep.mubr.bf16.mxu0 %v18718_v31  ;;  %v14625_v62 = vpop.f32.mrf.mxu0  ;;  %v11547_v29 = vld [vmem:[#allocation6 + $0x4d0] sm:$0xff] }
 0x79a   :  { %v18783_v37 = vadd.f32 %v14625_v62, %v18773_v16  ;;  %14822 = vmatprep.subr.bf16.mxu1 %v17863_v41  ;;  %14919 = vmatprep.subr.bf16.mxu0 %v17713_v44  ;;  %v11575_v16 = vld [vmem:[#allocation6 + $0x5b0] sm:$0xff] }
 0x79b   :  { %v14627_v46 = vpop.f32.mrf.mxu0  ;;  %v17585_v24 = vcombine.high %v11571_v53, %v11575_v16  ;;  %v17584_v9 = vcombine.low %v11571_v53, %v11575_v16  ;;  %v11551_v41 = vld [vmem:[#allocation6 + $0x4f0] sm:$0xff] }
 0x79c   :  { %14823 = vmatpush2.bf16.msra.mxu1 %v17862_v40  ;;  %v11651_v44 = vld [vmem:[#allocation6 + $0x810] sm:$0xff]  ;;  %v17561_v14 = vcombine.high %v11547_v29, %v11551_v41 }
 0x79d   :  { %14920 = vmatpush1.bf16.msra.mxu0 %v17712_v47  ;;  %v14628_v58 = vpop.f32.mrf.mxu0  ;;  %14824 = vmatprep.subr.bf16.mxu1 %v17855_v12  ;;  %v17665_v39 = vcombine.high %v11651_v44, %v11655_v57  ;;  %v11539_v40 = vld [vmem:[#allocation6 + $0x490] sm:$0xff]  ;;  %v17664_v7 = vcombine.low %v11651_v44, %v11655_v57 }
 0x79e   :  { %14921 = vmatprep.subr.bf16.mxu0 %v17705_v1  ;;  %v11543_v62 = vld [vmem:[#allocation6 + $0x4b0] sm:$0xff]  ;;  %v17560_v1 = vcombine.low %v11547_v29, %v11551_v41 }
 0x79f   :  { %v11771_v47 = vld [vmem:[#allocation6 + $0xbd0] sm:$0xff]  ;;  %v17553_v50 = vcombine.high %v11539_v40, %v11543_v62 }
 0x7a0   :  { %14825 = vmatpush2.bf16.msra.mxu1 %v17854_v2  ;;  %v11775_v12 = vld [vmem:[#allocation6 + $0xbf0] sm:$0xff] }
 0x7a1   :  { %14922 = vmatpush1.bf16.msra.mxu0 %v17704_v34  ;;  %14876 = vmatprep.subr.bf16.mxu1 %v17593_v15  ;;  %v17785_v46 = vcombine.high %v11771_v47, %v11775_v12  ;;  %v11763_v2 = vld [vmem:[#allocation6 + $0xb90] sm:$0xff]  ;;  %v17552_v34 = vcombine.low %v11539_v40, %v11543_v62  ;;  %v17784_v15 = vcombine.low %v11771_v47, %v11775_v12 }
 0x7a2   :  { %14923 = vmatprep.subr.bf16.mxu0 %v17697_v33  ;;  %v11767_v58 = vld [vmem:[#allocation6 + $0xbb0] sm:$0xff]  ;;  %v17545_v33 = vcombine.high %v11531_v60, %v11535_v3 }
 0x7a3   :  { %14827 = vmatmul.mubr.bf16.vlgmr.msra.gmra.mxu1 %v18757_v19  ;;  %v17777_v53 = vcombine.high %v11763_v2, %v11767_v58  ;;  %v11523_v16 = vld [vmem:[#allocation6 + $0x410] sm:$0xff] }
 0x7a4   :  { %14877 = vmatpush1.bf16.msra.mxu1 %v17592_v10  ;;  %14908 = vmatprep.mubr.bf16.mxu1 %v18700_v32  ;;  %v11759_v10 = vld [vmem:[#allocation6 + $0xb70] sm:$0xff] }
 0x7a5   :  { %14924 = vmatpush1.bf16.msra.mxu0 %v17696_v5  ;;  %14878 = vmatprep.subr.bf16.mxu1 %v17585_v24  ;;  %v17544_v5 = vcombine.low %v11531_v60, %v11535_v3  ;;  %v17776_v24 = vcombine.low %v11763_v2, %v11767_v58  ;;  %v17769_v4 = vcombine.high %v11755_v36, %v11759_v10  ;;  %v11643_v21 = vld [vmem:[#allocation6 + $0x7d0] sm:$0xff] }
 0x7a6   :  { %14925 = vmatprep.subr.bf16.mxu0 %v17689_v42  ;;  %v17537_v42 = vcombine.high %v11523_v16, %v11527_v22  ;;  %v11647_v25 = vld [vmem:[#allocation6 + $0x7f0] sm:$0xff] }
 0x7a7   :  { %v11747_v52 = vld [vmem:[#allocation6 + $0xb10] sm:$0xff] }
 0x7a8   :  { %14879 = vmatpush1.bf16.msra.mxu1 %v17584_v9  ;;  %v11751_v9 = vld [vmem:[#allocation6 + $0xb30] sm:$0xff] }
 0x7a9   :  { %14926 = vmatpush1.bf16.msra.mxu0 %v17688_v18  ;;  %14880 = vmatprep.subr.bf16.mxu1 %v17577_v13  ;;  %v17536_v18 = vcombine.low %v11523_v16, %v11527_v22  ;;  %v17768_v13 = vcombine.low %v11755_v36, %v11759_v10  ;;  %v17761_v55 = vcombine.high %v11747_v52, %v11751_v9  ;;  %v11635_v20 = vld [vmem:[#allocation6 + $0x790] sm:$0xff]  ;;  %v11452_v10 = vld [vmem:[#allocation6 + $0x1d8] sm:$0xff] }
 0x7aa   :  { %14927 = vmatprep.subr.bf16.mxu0 %v17681_v30  ;;  %v17657_v30 = vcombine.high %v11643_v21, %v11647_v25  ;;  %v11639_v6 = vld [vmem:[#allocation6 + $0x7b0] sm:$0xff] }
 0x7ab   :  { %v11739_v11 = vld [vmem:[#allocation6 + $0xad0] sm:$0xff] }
 0x7ac   :  { %14881 = vmatpush1.bf16.msra.mxu1 %v17576_v38  ;;  %v11743_v38 = vld [vmem:[#allocation6 + $0xaf0] sm:$0xff] }
 0x7ad   :  { %14928 = vmatpush1.bf16.msra.mxu0 %v17680_v27  ;;  %14882 = vmatprep.subr.bf16.mxu1 %v17569_v35  ;;  %v17656_v27 = vcombine.low %v11643_v21, %v11647_v25  ;;  %v17760_v35 = vcombine.low %v11747_v52, %v11751_v9  ;;  %v17753_v29 = vcombine.high %v11739_v11, %v11743_v38  ;;  %v11627_v41 = vld [vmem:[#allocation6 + $0x750] sm:$0xff]  ;;  %v11444_v9 = vld [vmem:[#allocation6 + $0x198] sm:$0xff] }
 0x7ae   :  { %14929 = vmatprep.subr.bf16.mxu0 %v17673_v43  ;;  %v17649_v43 = vcombine.high %v11635_v20, %v11639_v6  ;;  %v11631_v44 = vld [vmem:[#allocation6 + $0x770] sm:$0xff] }
 0x7af   :  { %v11731_v57 = vld [vmem:[#allocation6 + $0xa90] sm:$0xff] }
 0x7b0   :  { %14883 = vmatpush1.bf16.msra.mxu1 %v17568_v0  ;;  %v11735_v0 = vld [vmem:[#allocation6 + $0xab0] sm:$0xff] }
 0x7b1   :  { %14930 = vmatpush1.bf16.msra.mxu0 %v17672_v8  ;;  %14884 = vmatprep.subr.bf16.mxu1 %v17561_v14  ;;  %v17648_v8 = vcombine.low %v11635_v20, %v11639_v6  ;;  %v17752_v14 = vcombine.low %v11739_v11, %v11743_v38  ;;  %v17745_v40 = vcombine.high %v11731_v57, %v11735_v0  ;;  %v11619_v62 = vld [vmem:[#allocation6 + $0x710] sm:$0xff] }
 0x7b2   :  { %14931 = vmatprep.subr.bf16.mxu0 %v17665_v39  ;;  %v17641_v39 = vcombine.high %v11627_v41, %v11631_v44  ;;  %v11623_v47 = vld [vmem:[#allocation6 + $0x730] sm:$0xff] }
 0x7b3   :  { %v11723_v12 = vld [vmem:[#allocation6 + $0xa50] sm:$0xff] }
 0x7b4   :  { %14885 = vmatpush1.bf16.msra.mxu1 %v17560_v1  ;;  %v11727_v1 = vld [vmem:[#allocation6 + $0xa70] sm:$0xff] }
 0x7b5   :  { %14932 = vmatpush1.bf16.msra.mxu0 %v17664_v7  ;;  %14886 = vmatprep.subr.bf16.mxu1 %v17553_v50  ;;  %v17640_v7 = vcombine.low %v11627_v41, %v11631_v44  ;;  %v17744_v50 = vcombine.low %v11731_v57, %v11735_v0  ;;  %v17737_v60 = vcombine.high %v11723_v12, %v11727_v1  ;;  %v11611_v3 = vld [vmem:[#allocation6 + $0x6d0] sm:$0xff] }
 0x7b6   :  { %14933 = vmatprep.subr.bf16.mxu0 %v17785_v46  ;;  %v17633_v46 = vcombine.high %v11619_v62, %v11623_v47  ;;  %v11615_v2 = vld [vmem:[#allocation6 + $0x6f0] sm:$0xff] }
 0x7b7   :  { %v11715_v58 = vld [vmem:[#allocation6 + $0xa10] sm:$0xff] }
 0x7b8   :  { %14887 = vmatpush1.bf16.msra.mxu1 %v17552_v34  ;;  %v11719_v34 = vld [vmem:[#allocation6 + $0xa30] sm:$0xff] }
 0x7b9   :  { %14934 = vmatpush2.bf16.msra.mxu0 %v17784_v15  ;;  %14888 = vmatprep.subr.bf16.mxu1 %v17545_v33  ;;  %v17632_v15 = vcombine.low %v11619_v62, %v11623_v47  ;;  %v17736_v33 = vcombine.low %v11723_v12, %v11727_v1  ;;  %v17729_v16 = vcombine.high %v11715_v58, %v11719_v34  ;;  %v11603_v22 = vld [vmem:[#allocation6 + $0x690] sm:$0xff] }
 0x7ba   :  { %14935 = vmatprep.subr.bf16.mxu0 %v17777_v53  ;;  %v17625_v53 = vcombine.high %v11611_v3, %v11615_v2  ;;  %v11607_v36 = vld [vmem:[#allocation6 + $0x6b0] sm:$0xff] }
 0x7bb   :  { %v11595_v25 = vld [vmem:[#allocation6 + $0x650] sm:$0xff] }
 0x7bc   :  { %14889 = vmatpush1.bf16.msra.mxu1 %v17544_v5  ;;  %v11456_v5 = vld [vmem:[#allocation6 + $0x1f8] sm:$0xff]  ;;  %v11599_v52 = vld [vmem:[#allocation6 + $0x670] sm:$0xff] }
 0x7bd   :  { %14936 = vmatpush2.bf16.msra.mxu0 %v17776_v24  ;;  %14890 = vmatprep.subr.bf16.mxu1 %v17537_v42  ;;  %v17624_v24 = vcombine.low %v11611_v3, %v11615_v2  ;;  %v17728_v42 = vcombine.low %v11715_v58, %v11719_v34  ;;  %v17467_v21 = vcombine.high %v11452_v10, %v11456_v5  ;;  %v11587_v6 = vld [vmem:[#allocation6 + $0x610] sm:$0xff] }
 0x7be   :  { %14937 = vmatprep.subr.bf16.mxu0 %v17769_v4  ;;  %v17617_v4 = vcombine.high %v11603_v22, %v11607_v36  ;;  %v11591_v11 = vld [vmem:[#allocation6 + $0x630] sm:$0xff] }
 0x7bf   :  { %v17601_v44 = vcombine.high %v11587_v6, %v11591_v11  ;;  %v11835_v0 = vld [vmem:[#allocation6 + $0xdd0] sm:$0xff]  ;;  %v17600_v62 = vcombine.low %v11587_v6, %v11591_v11 }
 0x7c0   :  { %14891 = vmatpush1.bf16.msra.mxu1 %v17536_v18  ;;  %v11448_v18 = vld [vmem:[#allocation6 + $0x1b8] sm:$0xff]  ;;  %v11803_v11 = vld [vmem:[#allocation6 + $0xcd0] sm:$0xff] }
 0x7c1   :  { %14938 = vmatpush2.bf16.msra.mxu0 %v17768_v13  ;;  %14892 = vmatprep.subr.bf16.mxu1 %v17657_v30  ;;  %v17616_v13 = vcombine.low %v11603_v22, %v11607_v36  ;;  %v17466_v30 = vcombine.low %v11452_v10, %v11456_v5  ;;  %v17459_v20 = vcombine.high %v11444_v9, %v11448_v18  ;;  %v11416_v22 = vld [vmem:[#allocation6 + $0xb8] sm:$0xff] }
 0x7c2   :  { %14939 = vmatprep.subr.bf16.mxu0 %v17761_v55  ;;  %v17609_v55 = vcombine.high %v11595_v25, %v11599_v52  ;;  %v17458_v41 = vcombine.low %v11444_v9, %v11448_v18  ;;  %v11404_v18 = vld [vmem:[#allocation6 + $0x58] sm:$0xff] }
 0x7c4   :  { %14893 = vmatpush2.bf16.msra.mxu1 %v17656_v27  ;;  %v11436_v27 = vld [vmem:[#allocation6 + $0x158] sm:$0xff] }
 0x7c5   :  { %14940 = vmatpush2.bf16.msra.mxu0 %v17760_v35  ;;  %14894 = vmatprep.subr.bf16.mxu1 %v17649_v43  ;;  %v11440_v35 = vld [vmem:[#allocation6 + $0x178] sm:$0xff]  ;;  %v17608_v43 = vcombine.low %v11595_v25, %v11599_v52  ;;  %v11811_v25 = vld [vmem:[#allocation6 + $0xd10] sm:$0xff] }
 0x7c6   :  { %14941 = vmatprep.subr.bf16.mxu0 %v17753_v29  ;;  %v17451_v57 = vcombine.high %v11436_v27, %v11440_v35  ;;  %v17450_v12 = vcombine.low %v11436_v27, %v11440_v35  ;;  %v11815_v52 = vld [vmem:[#allocation6 + $0xd30] sm:$0xff]  ;;  %v11400_v35 = vld [vmem:[#allocation6 + $0x38] sm:$0xff] }
 0x7c7   :  { %v11807_v27 = vld [vmem:[#allocation6 + $0xcf0] sm:$0xff] }
 0x7c8   :  { %14895 = vmatpush2.bf16.msra.mxu1 %v17648_v8  ;;  %v11839_v8 = vld [vmem:[#allocation6 + $0xdf0] sm:$0xff] }
 0x7c9   :  { %14942 = vmatpush2.bf16.msra.mxu0 %v17752_v14  ;;  %14896 = vmatprep.subr.bf16.mxu1 %v17641_v39  ;;  %v11428_v39 = vld [vmem:[#allocation6 + $0x118] sm:$0xff]  ;;  %v17849_v1 = vcombine.high %v11835_v0, %v11839_v8  ;;  %v17848_v3 = vcombine.low %v11835_v0, %v11839_v8  ;;  %v11795_v0 = vld [vmem:[#allocation6 + $0xc90] sm:$0xff] }
 0x7ca   :  { %14943 = vmatprep.subr.bf16.mxu0 %v17745_v40  ;;  %v11432_v40 = vld [vmem:[#allocation6 + $0x138] sm:$0xff]  ;;  %v11799_v8 = vld [vmem:[#allocation6 + $0xcb0] sm:$0xff] }
 0x7cb   :  { %v17442_v2 = vcombine.low %v11428_v39, %v11432_v40 }
 0x7cc   :  { %14897 = vmatpush2.bf16.msra.mxu1 %v17640_v7  ;;  %v11827_v7 = vld [vmem:[#allocation6 + $0xd90] sm:$0xff] }
 0x7cd   :  { %14944 = vmatpush2.bf16.msra.mxu0 %v17744_v50  ;;  %14898 = vmatprep.subr.bf16.mxu1 %v17633_v46  ;;  %v11831_v50 = vld [vmem:[#allocation6 + $0xdb0] sm:$0xff]  ;;  %v11420_v46 = vld [vmem:[#allocation6 + $0xd8] sm:$0xff] }
 0x7ce   :  { %14945 = vmatprep.subr.bf16.mxu0 %v17737_v60  ;;  %v11424_v60 = vld [vmem:[#allocation6 + $0xf8] sm:$0xff]  ;;  %v17841_v58 = vcombine.high %v11827_v7, %v11831_v50  ;;  %v17840_v10 = vcombine.low %v11827_v7, %v11831_v50 }
 0x7cf   :  { %v17435_v34 = vcombine.high %v11420_v46, %v11424_v60  ;;  %v11508_v7 = vld [vmem:[#allocation6 + $0x398] sm:$0xff] }
 0x7d0   :  { %14899 = vmatpush2.bf16.msra.mxu1 %v17632_v15  ;;  %v11819_v15 = vld [vmem:[#allocation6 + $0xd50] sm:$0xff]  ;;  %v11512_v50 = vld [vmem:[#allocation6 + $0x3b8] sm:$0xff] }
 0x7d1   :  { %14946 = vmatpush2.bf16.msra.mxu0 %v17736_v33  ;;  %14900 = vmatprep.subr.bf16.mxu1 %v17625_v53  ;;  %v11823_v33 = vld [vmem:[#allocation6 + $0xd70] sm:$0xff] }
 0x7d2   :  { %14947 = vmatprep.subr.bf16.mxu0 %v17729_v16  ;;  %v11412_v16 = vld [vmem:[#allocation6 + $0x98] sm:$0xff] }
 0x7d4   :  { %14901 = vmatpush2.bf16.msra.mxu1 %v17624_v24  ;;  %v17434_v24 = vcombine.low %v11420_v46, %v11424_v60  ;;  %v17808_v46 = vcombine.low %v11795_v0, %v11799_v8 }
 0x7d5   :  { %14948 = vmatpush2.bf16.msra.mxu0 %v17728_v42  ;;  %14902 = vmatprep.subr.bf16.mxu1 %v17617_v4  ;;  %v17833_v42 = vcombine.high %v11819_v15, %v11823_v33 }
 0x7d6   :  { %14999 = vmatprep.subr.bf16.mxu0 %v17467_v21  ;;  %v17427_v21 = vcombine.high %v11412_v16, %v11416_v22 }
 0x7d7   :  { %v18787_v38 = vpop.f32.mrf.mxu0 }
 0x7d8   :  { %14903 = vmatpush2.bf16.msra.mxu1 %v17616_v13  ;;  %14950 = vmatmul.mubr.bf16.vlgmr.msra.gmra.mxu0 %v18738_v17  ;;  %v17832_v13 = vcombine.low %v11819_v15, %v11823_v33  ;;  %v11500_v15 = vld [vmem:[#allocation6 + $0x358] sm:$0xff] }
 0x7d9   :  { %15000 = vmatpush1.bf16.msra.mxu0 %v17466_v30  ;;  %15031 = vmatprep.mubr.bf16.mxu0 %v18697_v49  ;;  %v18791_v29 = vpop.f32.mrf.mxu0  ;;  %v17443_v49 = vcombine.high %v11428_v39, %v11432_v40  ;;  %v11520_v39 = vld [vmem:[#allocation6 + $0x3f8] sm:$0xff]  ;;  %v17816_v40 = vcombine.low %v11803_v11, %v11807_v27 }
 0x7da   :  { %14904 = vmatprep.subr.bf16.mxu1 %v17609_v55  ;;  %15001 = vmatprep.subr.bf16.mxu0 %v17459_v20  ;;  %v17426_v55 = vcombine.low %v11412_v16, %v11416_v22  ;;  %v17825_v20 = vcombine.high %v11811_v25, %v11815_v52  ;;  %v11504_v33 = vld [vmem:[#allocation6 + $0x378] sm:$0xff]  ;;  %v17522_v16 = vcombine.low %v11508_v7, %v11512_v50 }
 0x7db   :  { %v14709_v14 = vpop.f32.mrf.mxu0 }
 0x7dc   :  { %14905 = vmatpush2.bf16.msra.mxu1 %v17608_v43  ;;  %v17824_v43 = vcombine.low %v11811_v25, %v11815_v52  ;;  %v11516_v14 = vld [vmem:[#allocation6 + $0x3d8] sm:$0xff]  ;;  %v17514_v52 = vcombine.low %v11500_v15, %v11504_v33 }
 0x7dd   :  { %15002 = vmatpush1.bf16.msra.mxu0 %v17458_v41  ;;  %v14710_v47 = vpop.f32.mrf.mxu0  ;;  %14906 = vmatprep.subr.bf16.mxu1 %v17601_v44  ;;  %v17817_v44 = vcombine.high %v11803_v11, %v11807_v27  ;;  %v17530_v60 = vcombine.low %v11516_v14, %v11520_v39 }
 0x7de   :  { %15003 = vmatprep.subr.bf16.mxu0 %v17451_v57  ;;  %v17809_v47 = vcombine.high %v11795_v0, %v11799_v8 }
 0x7e0   :  { %14907 = vmatpush2.bf16.msra.mxu1 %v17600_v62 }
 0x7e1   :  { %15004 = vmatpush1.bf16.msra.mxu0 %v17450_v12  ;;  %14958 = vmatprep.subr.bf16.mxu1 %v17849_v1  ;;  %v17531_v12 = vcombine.high %v11516_v14, %v11520_v39  ;;  %v11787_v1 = vld [vmem:[#allocation6 + $0xc50] sm:$0xff] }
 0x7e2   :  { %15005 = vmatprep.subr.bf16.mxu0 %v17443_v49  ;;  %v11791_v49 = vld [vmem:[#allocation6 + $0xc70] sm:$0xff] }
 0x7e3   :  { %14909 = vmatmul.mubr.bf16.vlgmr.msra.gmra.mxu1 %v18716_v56  ;;  %v14664_v53 = vpop.f32.mrf.mxu1  ;;  %v11875_v14 = vld [vmem:[#allocation6 + $0xf10] sm:$0xff] }
 0x7e4   :  { %v18795_v36 = vadd.f32 %v14664_v53, %v18778_v63  ;;  %14959 = vmatpush1.bf16.msra.mxu1 %v17848_v3  ;;  %14990 = vmatprep.mubr.bf16.mxu1 %v18755_v59  ;;  %v11408_v63 = vld [vmem:[#allocation6 + $0x78] sm:$0xff]  ;;  %v17801_v3 = vcombine.high %v11787_v1, %v11791_v49  ;;  %v17800_v53 = vcombine.low %v11787_v1, %v11791_v49  ;;  %v11879_v39 = vld [vmem:[#allocation6 + $0xf30] sm:$0xff] }
 0x7e5   :  { %15006 = vmatpush1.bf16.msra.mxu0 %v17442_v2  ;;  %v14666_v5 = vpop.f32.mrf.mxu1  ;;  %14960 = vmatprep.subr.bf16.mxu1 %v17841_v58  ;;  %v17419_v6 = vcombine.high %v11404_v18, %v11408_v63  ;;  %v17418_v41 = vcombine.low %v11404_v18, %v11408_v63  ;;  %v17523_v2 = vcombine.high %v11508_v7, %v11512_v50  ;;  %v11779_v58 = vld [vmem:[#allocation6 + $0xc10] sm:$0xff] }
 0x7e6   :  { %v18799_v4 = vadd.f32 %v14666_v5, %v18783_v37  ;;  %15007 = vmatprep.subr.bf16.mxu0 %v17435_v34  ;;  %v11396_v37 = vld [vmem:[#allocation6 + $0x18] sm:$0xff]  ;;  %v11783_v34 = vld [vmem:[#allocation6 + $0xc30] sm:$0xff]  ;;  %v17889_v1 = vcombine.high %v11875_v14, %v11879_v39 }
 0x7e7   :  { %v14668_v9 = vpop.f32.mrf.mxu1  ;;  %v17411_v57 = vcombine.high %v11396_v37, %v11400_v35  ;;  %v17410_v62 = vcombine.low %v11396_v37, %v11400_v35  ;;  %v17793_v22 = vcombine.high %v11779_v58, %v11783_v34  ;;  %v11899_v5 = vld [vmem:[#allocation6 + $0xfd0] sm:$0xff]  ;;  %v17792_v25 = vcombine.low %v11779_v58, %v11783_v34 }
 0x7e8   :  { %14961 = vmatpush1.bf16.msra.mxu1 %v17840_v10  ;;  %v17515_v10 = vcombine.high %v11500_v15, %v11504_v33  ;;  %v11891_v63 = vld [vmem:[#allocation6 + $0xf90] sm:$0xff] }
 0x7e9   :  { %15008 = vmatpush1.bf16.msra.mxu0 %v17434_v24  ;;  %v14669_v30 = vpop.f32.mrf.mxu1  ;;  %14962 = vmatprep.subr.bf16.mxu1 %v17833_v42  ;;  %v11903_v24 = vld [vmem:[#allocation6 + $0xff0] sm:$0xff]  ;;  %v11492_v42 = vld [vmem:[#allocation6 + $0x318] sm:$0xff] }
 0x7ea   :  { %15009 = vmatprep.subr.bf16.mxu0 %v17427_v21  ;;  %v11496_v21 = vld [vmem:[#allocation6 + $0x338] sm:$0xff]  ;;  %v17913_v9 = vcombine.high %v11899_v5, %v11903_v24  ;;  %v11883_v37 = vld [vmem:[#allocation6 + $0xf50] sm:$0xff] }
 0x7eb   :  { %v17507_v18 = vcombine.high %v11492_v42, %v11496_v21  ;;  %v11484_v30 = vld [vmem:[#allocation6 + $0x2d8] sm:$0xff]  ;;  %v11887_v35 = vld [vmem:[#allocation6 + $0xf70] sm:$0xff] }
 0x7ec   :  { %14963 = vmatpush1.bf16.msra.mxu1 %v17832_v13  ;;  %v11895_v13 = vld [vmem:[#allocation6 + $0xfb0] sm:$0xff]  ;;  %v17897_v0 = vcombine.high %v11883_v37, %v11887_v35 }
 0x7ed   :  { %15010 = vmatpush1.bf16.msra.mxu0 %v17426_v55  ;;  %14964 = vmatprep.subr.bf16.mxu1 %v17825_v20  ;;  %v11488_v55 = vld [vmem:[#allocation6 + $0x2f8] sm:$0xff]  ;;  %v17912_v20 = vcombine.low %v11899_v5, %v11903_v24  ;;  %v17905_v11 = vcombine.high %v11891_v63, %v11895_v13  ;;  %v11867_v7 = vld [vmem:[#allocation6 + $0xed0] sm:$0xff] }
 0x7ee   :  { %15011 = vmatprep.subr.bf16.mxu0 %v17419_v6  ;;  %v17506_v6 = vcombine.low %v11492_v42, %v11496_v21  ;;  %v17499_v27 = vcombine.high %v11484_v30, %v11488_v55  ;;  %v11871_v50 = vld [vmem:[#allocation6 + $0xef0] sm:$0xff] }
 0x7ef   :  { %v17881_v58 = vcombine.high %v11867_v7, %v11871_v50  ;;  %v11859_v15 = vld [vmem:[#allocation6 + $0xe90] sm:$0xff] }
 0x7f0   :  { %14965 = vmatpush1.bf16.msra.mxu1 %v17824_v43  ;;  %v11476_v43 = vld [vmem:[#allocation6 + $0x298] sm:$0xff]  ;;  %v11863_v33 = vld [vmem:[#allocation6 + $0xeb0] sm:$0xff] }
 0x7f1   :  { %15012 = vmatpush1.bf16.msra.mxu0 %v17418_v41  ;;  %14966 = vmatprep.subr.bf16.mxu1 %v17817_v44  ;;  %v11480_v41 = vld [vmem:[#allocation6 + $0x2b8] sm:$0xff]  ;;  %v17904_v44 = vcombine.low %v11891_v63, %v11895_v13  ;;  %v17873_v5 = vcombine.high %v11859_v15, %v11863_v33  ;;  %v11851_v42 = vld [vmem:[#allocation6 + $0xe50] sm:$0xff] }
 0x7f2   :  { %15013 = vmatprep.subr.bf16.mxu0 %v17411_v57  ;;  %v17498_v57 = vcombine.low %v11484_v30, %v11488_v55  ;;  %v17491_v8 = vcombine.high %v11476_v43, %v11480_v41  ;;  %v11855_v21 = vld [vmem:[#allocation6 + $0xe70] sm:$0xff] }
 0x7f3   :  { %v17865_v63 = vcombine.high %v11851_v42, %v11855_v21  ;;  %v11843_v30 = vld [vmem:[#allocation6 + $0xe10] sm:$0xff] }
 0x7f4   :  { %14967 = vmatpush1.bf16.msra.mxu1 %v17816_v40  ;;  %v11468_v40 = vld [vmem:[#allocation6 + $0x258] sm:$0xff]  ;;  %v11847_v55 = vld [vmem:[#allocation6 + $0xe30] sm:$0xff] }
 0x7f5   :  { %15014 = vmatpush1.bf16.msra.mxu0 %v17410_v62  ;;  %14968 = vmatprep.subr.bf16.mxu1 %v17809_v47  ;;  %v11472_v62 = vld [vmem:[#allocation6 + $0x278] sm:$0xff]  ;;  %v17896_v47 = vcombine.low %v11883_v37, %v11887_v35  ;;  %v17857_v35 = vcombine.high %v11843_v30, %v11847_v55 }
 0x7f6   :  { %15015 = vmatprep.subr.bf16.mxu0 %v17531_v12  ;;  %v17490_v12 = vcombine.low %v11476_v43, %v11480_v41  ;;  %v17483_v49 = vcombine.high %v11468_v40, %v11472_v62 }
 0x7f8   :  { %14969 = vmatpush1.bf16.msra.mxu1 %v17808_v46  ;;  %v11460_v46 = vld [vmem:[#allocation6 + $0x218] sm:$0xff] }
 0x7f9   :  { %15016 = vmatpush2.bf16.msra.mxu0 %v17530_v60  ;;  %14970 = vmatprep.subr.bf16.mxu1 %v17801_v3  ;;  %v11464_v60 = vld [vmem:[#allocation6 + $0x238] sm:$0xff]  ;;  %v17888_v3 = vcombine.low %v11875_v14, %v11879_v39  ;;  %v17856_v39 = vcombine.low %v11843_v30, %v11847_v55 }
 0x7fa   :  { %15017 = vmatprep.subr.bf16.mxu0 %v17523_v2  ;;  %v17482_v2 = vcombine.low %v11468_v40, %v11472_v62  ;;  %v17475_v34 = vcombine.high %v11460_v46, %v11464_v60  ;;  %v18805_v62 = vld [vmem:[#allocation7] sm:$0xff] }
 0x7fc   :  { %14971 = vmatpush1.bf16.msra.mxu1 %v17800_v53  ;;  %v11708_v53 = vld [vmem:[#allocation6 + $0x9d8] sm:$0xff] }
 0x7fd   :  { %15018 = vmatpush2.bf16.msra.mxu0 %v17522_v16  ;;  %14972 = vmatprep.subr.bf16.mxu1 %v17793_v22  ;;  %v11712_v16 = vld [vmem:[#allocation6 + $0x9f8] sm:$0xff]  ;;  %v17880_v22 = vcombine.low %v11867_v7, %v11871_v50 }
 0x7fe   :  { %15019 = vmatprep.subr.bf16.mxu0 %v17515_v10  ;;  %v17474_v10 = vcombine.low %v11460_v46, %v11464_v60  ;;  %v17723_v24 = vcombine.high %v11708_v53, %v11712_v16  ;;  %v11676_v7 = vld [vmem:[#allocation6 + $0x8d8] sm:$0xff]  ;;  %v11922_v46 = vrot.slane %v18805_v62, %v1703_v61 }
 0x7ff   :  { %v11680_v50 = vld [vmem:[#allocation6 + $0x8f8] sm:$0xff] }
 0x800   :  { %14973 = vmatpush1.bf16.msra.mxu1 %v17792_v25  ;;  %v11700_v25 = vld [vmem:[#allocation6 + $0x998] sm:$0xff] }
 0x801   :  { %15020 = vmatpush2.bf16.msra.mxu0 %v17514_v52  ;;  %14974 = vmatprep.subr.bf16.mxu1 %v17913_v9  ;;  %v11704_v52 = vld [vmem:[#allocation6 + $0x9b8] sm:$0xff]  ;;  %v17872_v9 = vcombine.low %v11859_v15, %v11863_v33 }
 0x802   :  { %15021 = vmatprep.subr.bf16.mxu0 %v17507_v18  ;;  %v17722_v18 = vcombine.low %v11708_v53, %v11712_v16  ;;  %v17715_v13 = vcombine.high %v11700_v25, %v11704_v52  ;;  %v17714_v37 = vcombine.low %v11700_v25, %v11704_v52  ;;  %v11568_v15 = vld [vmem:[#allocation6 + $0x578] sm:$0xff] }
 0x803   :  { %v11668_v53 = vld [vmem:[#allocation6 + $0x898] sm:$0xff] }
 0x804   :  { %14975 = vmatpush2.bf16.msra.mxu1 %v17912_v20  ;;  %v11692_v20 = vld [vmem:[#allocation6 + $0x958] sm:$0xff] }
 0x805   :  { %15022 = vmatpush2.bf16.msra.mxu0 %v17506_v6  ;;  %14976 = vmatprep.subr.bf16.mxu1 %v17905_v11  ;;  %v11696_v6 = vld [vmem:[#allocation6 + $0x978] sm:$0xff] }
 0x806   :  { %15023 = vmatprep.subr.bf16.mxu0 %v17499_v27  ;;  %v17864_v27 = vcombine.low %v11851_v42, %v11855_v21  ;;  %v17707_v41 = vcombine.high %v11692_v20, %v11696_v6  ;;  %v11672_v16 = vld [vmem:[#allocation6 + $0x8b8] sm:$0xff] }
 0x807   :  { %v17683_v21 = vcombine.high %v11668_v53, %v11672_v16  ;;  %v11556_v25 = vld [vmem:[#allocation6 + $0x518] sm:$0xff]  ;;  %v17682_v55 = vcombine.low %v11668_v53, %v11672_v16 }
 0x808   :  { %14977 = vmatpush2.bf16.msra.mxu1 %v17904_v44  ;;  %v11580_v44 = vld [vmem:[#allocation6 + $0x5d8] sm:$0xff] }
 0x809   :  { %15024 = vmatpush2.bf16.msra.mxu0 %v17498_v57  ;;  %14978 = vmatprep.subr.bf16.mxu1 %v17897_v0  ;;  %v11584_v57 = vld [vmem:[#allocation6 + $0x5f8] sm:$0xff] }
 0x80a   :  { %15025 = vmatprep.subr.bf16.mxu0 %v17491_v8  ;;  %v11684_v0 = vld [vmem:[#allocation6 + $0x918] sm:$0xff]  ;;  %v17595_v40 = vcombine.high %v11580_v44, %v11584_v57  ;;  %v17594_v60 = vcombine.low %v11580_v44, %v11584_v57 }
 0x80b   :  { %v11688_v8 = vld [vmem:[#allocation6 + $0x938] sm:$0xff] }
 0x80c   :  { %14979 = vmatpush2.bf16.msra.mxu1 %v17896_v47  ;;  %v11560_v52 = vld [vmem:[#allocation6 + $0x538] sm:$0xff] }
 0x80d   :  { %15026 = vmatpush2.bf16.msra.mxu0 %v17490_v12  ;;  %14980 = vmatprep.subr.bf16.mxu1 %v17889_v1  ;;  %v17699_v12 = vcombine.high %v11684_v0, %v11688_v8  ;;  %v11572_v1 = vld [vmem:[#allocation6 + $0x598] sm:$0xff] }
 0x80e   :  { %15027 = vmatprep.subr.bf16.mxu0 %v17483_v49  ;;  %v11576_v49 = vld [vmem:[#allocation6 + $0x5b8] sm:$0xff] }
 0x810   :  { %14981 = vmatpush2.bf16.msra.mxu1 %v17888_v3  ;;  %v17698_v3 = vcombine.low %v11684_v0, %v11688_v8  ;;  %v11540_v0 = vld [vmem:[#allocation6 + $0x498] sm:$0xff] }
 0x811   :  { %15028 = vmatpush2.bf16.msra.mxu0 %v17482_v2  ;;  %14982 = vmatprep.subr.bf16.mxu1 %v17881_v58  ;;  %v17587_v2 = vcombine.high %v11572_v1, %v11576_v49  ;;  %v11544_v8 = vld [vmem:[#allocation6 + $0x4b8] sm:$0xff] }
 0x812   :  { %15029 = vmatprep.subr.bf16.mxu0 %v17475_v34  ;;  %v11564_v34 = vld [vmem:[#allocation6 + $0x558] sm:$0xff] }
 0x814   :  { %14983 = vmatpush2.bf16.msra.mxu1 %v17880_v22  ;;  %v14708_v22 = vadd.f32 %v18791_v29, %v11922_v46  ;;  %v11660_v29 = vld [vmem:[#allocation6 + $0x858] sm:$0xff] }
 0x815   :  { %15030 = vmatpush2.bf16.msra.mxu0 %v17474_v10  ;;  %14984 = vmatprep.subr.bf16.mxu1 %v17873_v5  ;;  %v17586_v10 = vcombine.low %v11572_v1, %v11576_v49  ;;  %v11536_v1 = vld [vmem:[#allocation6 + $0x478] sm:$0xff] }
 0x816   :  { %15081 = vmatprep.subr.bf16.mxu0 %v17723_v24  ;;  %v17579_v24 = vcombine.high %v11564_v34, %v11568_v15  ;;  %v11764_v49 = vld [vmem:[#allocation6 + $0xb98] sm:$0xff] }
 0x818   :  { %v18801_v11 = vpop.f32.mrf.mxu0  ;;  %14985 = vmatpush2.bf16.msra.mxu1 %v17872_v9  ;;  %15032 = vmatmul.mubr.bf16.vlgmr.msra.gmra.mxu0 %v18714_v28  ;;  %v17706_v28 = vcombine.low %v11692_v20, %v11696_v6  ;;  %v17571_v20 = vcombine.high %v11556_v25, %v11560_v52 }
 0x819   :  { %15082 = vmatpush1.bf16.msra.mxu0 %v17722_v18  ;;  %15113 = vmatprep.mubr.bf16.mxu0 %v18718_v31  ;;  %v11918_v31 = vrot.slane %v18805_v62, %v1699_v54  ;;  %v17691_v54 = vcombine.high %v11676_v7, %v11680_v50 }
 0x81a   :  { %v14789_v43 = vpop.f32.mrf.mxu0  ;;  %14986 = vmatprep.subr.bf16.mxu1 %v17865_v63  ;;  %15083 = vmatprep.subr.bf16.mxu0 %v17715_v13  ;;  %v11664_v63 = vld [vmem:[#allocation6 + $0x878] sm:$0xff]  ;;  %v17578_v13 = vcombine.low %v11564_v34, %v11568_v15 }
 0x81b   :  { %v14706_v58 = vadd.f32 %v18787_v38, %v11918_v31  ;;  %v17690_v38 = vcombine.low %v11676_v7, %v11680_v50  ;;  %v17675_v6 = vcombine.high %v11660_v29, %v11664_v63  ;;  %v17674_v44 = vcombine.low %v11660_v29, %v11664_v63  ;;  %v11768_v7 = vld [vmem:[#allocation6 + $0xbb8] sm:$0xff] }
 0x81c   :  { %v14791_v14 = vpop.f32.mrf.mxu0  ;;  %14987 = vmatpush2.bf16.msra.mxu1 %v17864_v27  ;;  %v11548_v27 = vld [vmem:[#allocation6 + $0x4d8] sm:$0xff]  ;;  %v17555_v31 = vcombine.high %v11540_v0, %v11544_v8  ;;  %v17554_v50 = vcombine.low %v11540_v0, %v11544_v8 }
 0x81d   :  { %15084 = vmatpush1.bf16.msra.mxu0 %v17714_v37  ;;  %14988 = vmatprep.subr.bf16.mxu1 %v17857_v35  ;;  %v11552_v37 = vld [vmem:[#allocation6 + $0x4f8] sm:$0xff] }
 0x81e   :  { %v14792_v47 = vpop.f32.mrf.mxu0  ;;  %15085 = vmatprep.subr.bf16.mxu0 %v17707_v41  ;;  %v11652_v35 = vld [vmem:[#allocation6 + $0x818] sm:$0xff]  ;;  %v17563_v57 = vcombine.high %v11548_v27, %v11552_v37 }
 0x81f   :  { %v11656_v41 = vld [vmem:[#allocation6 + $0x838] sm:$0xff] }
 0x820   :  { %14989 = vmatpush2.bf16.msra.mxu1 %v17856_v39  ;;  %v11772_v14 = vld [vmem:[#allocation6 + $0xbd8] sm:$0xff] }
 0x821   :  { %15086 = vmatpush1.bf16.msra.mxu0 %v17706_v28  ;;  %15040 = vmatprep.subr.bf16.mxu1 %v17595_v40  ;;  %v11776_v39 = vld [vmem:[#allocation6 + $0xbf8] sm:$0xff]  ;;  %v17562_v28 = vcombine.low %v11548_v27, %v11552_v37  ;;  %v17666_v40 = vcombine.low %v11652_v35, %v11656_v41 }
 0x822   :  { %15087 = vmatprep.subr.bf16.mxu0 %v17699_v12  ;;  %v17787_v47 = vcombine.high %v11772_v14, %v11776_v39  ;;  %v11532_v12 = vld [vmem:[#allocation6 + $0x458] sm:$0xff]  ;;  %v17786_v46 = vcombine.low %v11772_v14, %v11776_v39 }
 0x823   :  { %v14746_v33 = vpop.f32.mrf.mxu1  ;;  %14991 = vmatmul.mubr.bf16.vlgmr.msra.gmra.mxu1 %v18757_v19  ;;  %v11760_v34 = vld [vmem:[#allocation6 + $0xb78] sm:$0xff]  ;;  %v17546_v15 = vcombine.low %v11532_v12, %v11536_v1 }
 0x824   :  { %v14747_v61 = vadd.f32 %v14746_v33, %v14706_v58  ;;  %15041 = vmatpush1.bf16.msra.mxu1 %v17594_v60  ;;  %15072 = vmatprep.mubr.bf16.mxu1 %v18700_v32  ;;  %v17547_v60 = vcombine.high %v11532_v12, %v11536_v1  ;;  %v11528_v58 = vld [vmem:[#allocation6 + $0x438] sm:$0xff]  ;;  %v17778_v33 = vcombine.low %v11764_v49, %v11768_v7 }
 0x825   :  { %v14748_v5 = vpop.f32.mrf.mxu1  ;;  %15088 = vmatpush1.bf16.msra.mxu0 %v17698_v3  ;;  %15042 = vmatprep.subr.bf16.mxu1 %v17587_v2  ;;  %v17779_v3 = vcombine.high %v11764_v49, %v11768_v7  ;;  %v11524_v2 = vld [vmem:[#allocation6 + $0x418] sm:$0xff] }
 0x826   :  { %v14749_v42 = vadd.f32 %v14748_v5, %v14708_v22  ;;  %15089 = vmatprep.subr.bf16.mxu0 %v17691_v54  ;;  %v18818_v9 = vadd.f32 %v18801_v11, %v14747_v61  ;;  %v17570_v11 = vcombine.low %v11556_v25, %v11560_v52  ;;  %v11756_v54 = vld [vmem:[#allocation6 + $0xb58] sm:$0xff]  ;;  %v17539_v53 = vcombine.high %v11524_v2, %v11528_v58 }
 0x827   :  { %v14750_v18 = vpop.f32.mrf.mxu1  ;;  %v17771_v16 = vcombine.high %v11756_v54, %v11760_v34  ;;  %v11644_v22 = vld [vmem:[#allocation6 + $0x7d8] sm:$0xff] }
 0x828   :  { %15043 = vmatpush1.bf16.msra.mxu1 %v17586_v10  ;;  %v18820_v32 = vadd.f32 %v14789_v43, %v14749_v42  ;;  %v17667_v43 = vcombine.high %v11652_v35, %v11656_v41  ;;  %v11648_v61 = vld [vmem:[#allocation6 + $0x7f8] sm:$0xff] }
 0x829   :  { %v14751_v30 = vpop.f32.mrf.mxu1  ;;  %15090 = vmatpush1.bf16.msra.mxu0 %v17690_v38  ;;  %15044 = vmatprep.subr.bf16.mxu1 %v17579_v24  ;;  %v11748_v10 = vld [vmem:[#allocation6 + $0xb18] sm:$0xff]  ;;  %v17538_v38 = vcombine.low %v11524_v2, %v11528_v58  ;;  %v17770_v24 = vcombine.low %v11756_v54, %v11760_v34  ;;  %v17659_v42 = vcombine.high %v11644_v22, %v11648_v61  ;;  %v18079_v34 = vld [vmem:[#allocation9 + $0x78] sm:$0xff]  }
 0x82a   :  { %15091 = vmatprep.subr.bf16.mxu0 %v17683_v21  ;;  %v11752_v5 = vld [vmem:[#allocation6 + $0xb38] sm:$0xff]  ;;  %v17658_v63 = vcombine.low %v11644_v22, %v11648_v61  ;;  %v18080_v22 = vld [vmem:[#allocation9 + $0x38] sm:$0xff]  }
 0x82b   :  { %v17763_v21 = vcombine.high %v11748_v10, %v11752_v5  ;;  %v11636_v25 = vld [vmem:[#allocation6 + $0x798] sm:$0xff] }
 0x82c   :  { %15045 = vmatpush1.bf16.msra.mxu1 %v17578_v13  ;;  %v11640_v52 = vld [vmem:[#allocation6 + $0x7b8] sm:$0xff]  ;;  %v17762_v13 = vcombine.low %v11748_v10, %v11752_v5 }
 0x82d   :  { %15092 = vmatpush1.bf16.msra.mxu0 %v17682_v55  ;;  %15046 = vmatprep.subr.bf16.mxu1 %v17571_v20  ;;  %v11740_v18 = vld [vmem:[#allocation6 + $0xad8] sm:$0xff]  ;;  %v17651_v30 = vcombine.high %v11636_v25, %v11640_v52  ;;  %v17650_v35 = vcombine.low %v11636_v25, %v11640_v52 }
 0x82e   :  { %15093 = vmatprep.subr.bf16.mxu0 %v17675_v6  ;;  %v11744_v29 = vld [vmem:[#allocation6 + $0xaf8] sm:$0xff] }
 0x82f   :  { %v17755_v55 = vcombine.high %v11740_v18, %v11744_v29  ;;  %v11628_v20 = vld [vmem:[#allocation6 + $0x758] sm:$0xff]  ;;  %v17754_v41 = vcombine.low %v11740_v18, %v11744_v29  ;;  %v18083_v18 = vld [vmem:[#allocation9 + $0x68] sm:$0xff]  }
 0x830   :  { %15047 = vmatpush1.bf16.msra.mxu1 %v17570_v11  ;;  %v11632_v6 = vld [vmem:[#allocation6 + $0x778] sm:$0xff] }
 0x831   :  { %15094 = vmatpush1.bf16.msra.mxu0 %v17674_v44  ;;  %15048 = vmatprep.subr.bf16.mxu1 %v17563_v57  ;;  %v11732_v27 = vld [vmem:[#allocation6 + $0xa98] sm:$0xff]  ;;  %v17643_v11 = vcombine.high %v11628_v20, %v11632_v6  ;;  %v17642_v14 = vcombine.low %v11628_v20, %v11632_v6  ;;  %v18085_v6 = vld [vmem:[#allocation9 + $0x60] sm:$0xff]  }
 0x832   :  { %15095 = vmatprep.subr.bf16.mxu0 %v17667_v43  ;;  %v11736_v37 = vld [vmem:[#allocation6 + $0xab8] sm:$0xff] }
 0x833   :  { %v17747_v44 = vcombine.high %v11732_v27, %v11736_v37  ;;  %v11620_v57 = vld [vmem:[#allocation6 + $0x718] sm:$0xff]  ;;  %v17746_v39 = vcombine.low %v11732_v27, %v11736_v37 }
 0x834   :  { %15049 = vmatpush1.bf16.msra.mxu1 %v17562_v28  ;;  %v11624_v43 = vld [vmem:[#allocation6 + $0x738] sm:$0xff] }
 0x835   :  { %15096 = vmatpush1.bf16.msra.mxu0 %v17666_v40  ;;  %15050 = vmatprep.subr.bf16.mxu1 %v17555_v31  ;;  %v11724_v0 = vld [vmem:[#allocation6 + $0xa58] sm:$0xff]  ;;  %v17635_v28 = vcombine.high %v11620_v57, %v11624_v43  ;;  %v17634_v49 = vcombine.low %v11620_v57, %v11624_v43 }
 0x836   :  { %15097 = vmatprep.subr.bf16.mxu0 %v17787_v47  ;;  %v11728_v8 = vld [vmem:[#allocation6 + $0xa78] sm:$0xff] }
 0x837   :  { %v17739_v40 = vcombine.high %v11724_v0, %v11728_v8  ;;  %v11612_v31 = vld [vmem:[#allocation6 + $0x6d8] sm:$0xff]  ;;  %v17738_v7 = vcombine.low %v11724_v0, %v11728_v8 }
 0x838   :  { %15051 = vmatpush1.bf16.msra.mxu1 %v17554_v50  ;;  %v11616_v47 = vld [vmem:[#allocation6 + $0x6f8] sm:$0xff] }
 0x839   :  { %15098 = vmatpush2.bf16.msra.mxu0 %v17786_v46  ;;  %15052 = vmatprep.subr.bf16.mxu1 %v17547_v60  ;;  %v11716_v12 = vld [vmem:[#allocation6 + $0xa18] sm:$0xff]  ;;  %v17627_v50 = vcombine.high %v11612_v31, %v11616_v47  ;;  %v17626_v2 = vcombine.low %v11612_v31, %v11616_v47 }
 0x83a   :  { %15099 = vmatprep.subr.bf16.mxu0 %v17779_v3  ;;  %v11720_v1 = vld [vmem:[#allocation6 + $0xa38] sm:$0xff] }
 0x83b   :  { %v17731_v46 = vcombine.high %v11716_v12, %v11720_v1  ;;  %v11604_v60 = vld [vmem:[#allocation6 + $0x698] sm:$0xff]  ;;  %v17730_v58 = vcombine.low %v11716_v12, %v11720_v1 }
 0x83c   :  { %15053 = vmatpush1.bf16.msra.mxu1 %v17546_v15  ;;  %v11608_v3 = vld [vmem:[#allocation6 + $0x6b8] sm:$0xff]  ;;  %v15164_v15 = vmax.f32 %v18799_v4, 0.0 }
 0x83d   :  { %15100 = vmatpush2.bf16.msra.mxu0 %v17778_v33  ;;  %15054 = vmatprep.subr.bf16.mxu1 %v17539_v53  ;;  %v17619_v54 = vcombine.high %v11604_v60, %v11608_v3  ;;  %v11596_v33 = vld [vmem:[#allocation6 + $0x658] sm:$0xff] }
 0x83e   :  { %15101 = vmatprep.subr.bf16.mxu0 %v17771_v16  ;;  %v11600_v53 = vld [vmem:[#allocation6 + $0x678] sm:$0xff]  ;;  %v17618_v16 = vcombine.low %v11604_v60, %v11608_v3  ;;  %v18092_v3 = vld [vmem:[#allocation9 + $0x8] sm:$0xff]  }
 0x83f   :  { %v17611_v61 = vcombine.high %v11596_v33, %v11600_v53  ;;  %v18081_v10 = vld [vmem:[#allocation9 + $0x70] sm:$0xff]  }
 0x840   :  { %15055 = vmatpush1.bf16.msra.mxu1 %v17538_v38  ;;  %v11588_v5 = vld [vmem:[#allocation6 + $0x618] sm:$0xff] }
 0x841   :  { %15102 = vmatpush2.bf16.msra.mxu0 %v17770_v24  ;;  %15056 = vmatprep.subr.bf16.mxu1 %v17659_v42  ;;  %v11592_v38 = vld [vmem:[#allocation6 + $0x638] sm:$0xff]  ;;  %v15172_v24 = vpack.c.bf16 %v15164_v15, %v15164_v15 }
 0x842   :  { %15103 = vmatprep.subr.bf16.mxu0 %v17763_v21  ;;  %v17610_v21 = vcombine.low %v11596_v33, %v11600_v53  ;;  %v18082_v4 = vld [vmem:[#allocation9 + $0x30] sm:$0xff]   ;;  %v17603_v25 = vcombine.high %v11588_v5, %v11592_v38  ;;  %v18094_v33 = vld [vmem:[#allocation9] sm:$0xff]  }
 0x843   :  { %v11836_v29 = vld [vmem:[#allocation6 + $0xdd8] sm:$0xff] }
 0x844   :  { %15057 = vmatpush2.bf16.msra.mxu1 %v17658_v63  ;;  %v11840_v63 = vld [vmem:[#allocation6 + $0xdf8] sm:$0xff] }
 0x845   :  { %15104 = vmatpush2.bf16.msra.mxu0 %v17762_v13  ;;  %15058 = vmatprep.subr.bf16.mxu1 %v17651_v30  ;;  %v17602_v30 = vcombine.low %v11588_v5, %v11592_v38  ;;  %v17851_v20 = vcombine.high %v11836_v29, %v11840_v63  ;;  %v11828_v27 = vld [vmem:[#allocation6 + $0xd98] sm:$0xff] }
 0x846   :  { %15105 = vmatprep.subr.bf16.mxu0 %v17755_v55  ;;  %v18084_v55 = vld [vmem:[#allocation9 + $0x28] sm:$0xff]   ;;  %v11832_v37 = vld [vmem:[#allocation6 + $0xdb8] sm:$0xff] }
 0x847   :  { %v11820_v57 = vld [vmem:[#allocation6 + $0xd58] sm:$0xff] }
 0x848   :  { %15059 = vmatpush2.bf16.msra.mxu1 %v17650_v35  ;;  %v17850_v35 = vcombine.low %v11836_v29, %v11840_v63  ;;  %v11824_v43 = vld [vmem:[#allocation6 + $0xd78] sm:$0xff] }
 0x849   :  { %15106 = vmatpush2.bf16.msra.mxu0 %v17754_v41  ;;  %15060 = vmatprep.subr.bf16.mxu1 %v17643_v11  ;;  %v18086_v41 = vld [vmem:[#allocation9 + $0x20] sm:$0xff]   ;;  %v17843_v11 = vcombine.high %v11828_v27, %v11832_v37  ;;  %v18089_v31 = vld [vmem:[#allocation9 + $0x50] sm:$0xff]  }
 0x84a   :  { %15107 = vmatprep.subr.bf16.mxu0 %v17747_v44  ;;  %v18087_v44 = vld [vmem:[#allocation9 + $0x58] sm:$0xff]   ;;  %v11812_v47 = vld [vmem:[#allocation6 + $0xd18] sm:$0xff] }
 0x84b   :  { %v11816_v12 = vld [vmem:[#allocation6 + $0xd38] sm:$0xff] }
 0x84c   :  { %15061 = vmatpush2.bf16.msra.mxu1 %v17642_v14  ;;  %v17842_v14 = vcombine.low %v11828_v27, %v11832_v37  ;;  %v17826_v60 = vcombine.low %v11812_v47, %v11816_v12  ;;  %v18114_v63 = vld [vmem:[#allocation9 + $0x130] sm:$0xff]  }
 0x84d   :  { %15108 = vmatpush2.bf16.msra.mxu0 %v17746_v39  ;;  %15062 = vmatprep.subr.bf16.mxu1 %v17635_v28  ;;  %v18088_v28 = vld [vmem:[#allocation9 + $0x18] sm:$0xff]   ;;  %v11892_v27 = vld [vmem:[#allocation6 + $0xf98] sm:$0xff] }
 0x84e   :  { %15109 = vmatprep.subr.bf16.mxu0 %v17739_v40  ;;  %v17835_v40 = vcombine.high %v11820_v57, %v11824_v43  ;;  %v11896_v37 = vld [vmem:[#allocation6 + $0xfb8] sm:$0xff] }
 0x850   :  { %15063 = vmatpush2.bf16.msra.mxu1 %v17634_v49 }
 0x851   :  { %15110 = vmatpush2.bf16.msra.mxu0 %v17738_v7  ;;  %15064 = vmatprep.subr.bf16.mxu1 %v17627_v50  ;;  %v17827_v7 = vcombine.high %v11812_v47, %v11816_v12  ;;  %v11804_v50 = vld [vmem:[#allocation6 + $0xcd8] sm:$0xff] }
 0x852   :  { %15111 = vmatprep.subr.bf16.mxu0 %v17731_v46  ;;  %v11808_v46 = vld [vmem:[#allocation6 + $0xcf8] sm:$0xff] }
 0x853   :  { %v17818_v15 = vcombine.low %v11804_v50, %v11808_v46  ;;  %v11880_v47 = vld [vmem:[#allocation6 + $0xf38] sm:$0xff] }
 0x854   :  { %15065 = vmatpush2.bf16.msra.mxu1 %v17626_v2  ;;  %v17819_v2 = vcombine.high %v11804_v50, %v11808_v46  ;;  %v18121_v12 = vld [vmem:[#allocation9 + $0x150] sm:$0xff]  }
 0x855   :  { %15112 = vmatpush2.bf16.msra.mxu0 %v17730_v58  ;;  %15066 = vmatprep.subr.bf16.mxu1 %v17619_v54  ;;  %v18093_v58 = vld [vmem:[#allocation9 + $0x40] sm:$0xff]   ;;  %v11796_v54 = vld [vmem:[#allocation6 + $0xc98] sm:$0xff] }
 0x856   :  { %17981 = vmatprep.subr.bf16.mxu0 %v18079_v34  ;;  %v11800_v34 = vld [vmem:[#allocation6 + $0xcb8] sm:$0xff] }
 0x857   :  { %v17811_v53 = vcombine.high %v11796_v54, %v11800_v34  ;;  %v17810_v5 = vcombine.low %v11796_v54, %v11800_v34 }
 0x858   :  { %v18823_v42 = vpop.f32.mrf.mxu0  ;;  %15067 = vmatpush2.bf16.msra.mxu1 %v17618_v16  ;;  %15114 = vmatmul.mubr.bf16.vlgmr.msra.gmra.mxu0 %v18738_v17  ;;  %v15163_v16 = vmax.f32 %v18795_v36, 0.0 }
 0x859   :  { %17982 = vmatpush3.bf16.msra.mxu0 %v18080_v22  ;;  %15730 = vmatprep.mubr.bf16.mxu0 %v15172_v24  ;;  %v11788_v22 = vld [vmem:[#allocation6 + $0xc58] sm:$0xff]  ;;  %v18112_v24 = vld [vmem:[#allocation9 + $0x138] sm:$0xff]  }
 0x85a   :  { %v18826_v52 = vpop.f32.mrf.mxu0  ;;  %15068 = vmatprep.subr.bf16.mxu1 %v17611_v61  ;;  %17983 = vmatprep.subr.bf16.mxu0 %v18081_v10  ;;  %v11792_v61 = vld [vmem:[#allocation6 + $0xc78] sm:$0xff]  ;;  %v18111_v10 = vld [vmem:[#allocation9 + $0x178] sm:$0xff]  }
 0x85b   :  { %v17803_v38 = vcombine.high %v11788_v22, %v11792_v61  ;;  %v17802_v29 = vcombine.low %v11788_v22, %v11792_v61  ;;  %v11844_v61 = vld [vmem:[#allocation6 + $0xe18] sm:$0xff] }
 0x85c   :  { %v14873_v13 = vpop.f32.mrf.mxu0  ;;  %15069 = vmatpush2.bf16.msra.mxu1 %v17610_v21  ;;  %v15171_v21 = vpack.c.bf16 %v15163_v16, %v15163_v16 }
 0x85d   :  { %17984 = vmatpush3.bf16.msra.mxu0 %v18082_v4  ;;  %15070 = vmatprep.subr.bf16.mxu1 %v17603_v25  ;;  %v11780_v4 = vld [vmem:[#allocation6 + $0xc18] sm:$0xff] }
 0x85e   :  { %v14874_v17 = vpop.f32.mrf.mxu0  ;;  %17985 = vmatprep.subr.bf16.mxu0 %v18083_v18  ;;  %v11784_v25 = vld [vmem:[#allocation6 + $0xc38] sm:$0xff] }
 0x85f   :  { %v18113_v18 = vld [vmem:[#allocation9 + $0x170] sm:$0xff]   ;;  %v17795_v36 = vcombine.high %v11780_v4, %v11784_v25 }
 0x860   :  { %15071 = vmatpush2.bf16.msra.mxu1 %v17602_v30  ;;  %v11900_v13 = vld [vmem:[#allocation6 + $0xfd8] sm:$0xff] }
 0x861   :  { %17986 = vmatpush3.bf16.msra.mxu0 %v18084_v55  ;;  %15122 = vmatprep.subr.bf16.mxu1 %v17851_v20  ;;  %v11904_v30 = vld [vmem:[#allocation6 + $0xff8] sm:$0xff]  ;;  %v18115_v55 = vld [vmem:[#allocation9 + $0x168] sm:$0xff]   ;;  %v17794_v20 = vcombine.low %v11780_v4, %v11784_v25 }
 0x862   :  { %17987 = vmatprep.subr.bf16.mxu0 %v18085_v6  ;;  %v17915_v17 = vcombine.high %v11900_v13, %v11904_v30  ;;  %v18116_v6 = vld [vmem:[#allocation9 + $0x128] sm:$0xff]  }
 0x863   :  { %v14828_v0 = vpop.f32.mrf.mxu1  ;;  %15073 = vmatmul.mubr.bf16.vlgmr.msra.gmra.mxu1 %v18716_v56  ;;  %v17834_v56 = vcombine.low %v11820_v57, %v11824_v43  ;;  %v11884_v57 = vld [vmem:[#allocation6 + $0xf58] sm:$0xff] }
 0x864   :  { %v18830_v8 = vadd.f32 %v14828_v0, %v18818_v9  ;;  %15123 = vmatpush1.bf16.msra.mxu1 %v17850_v35  ;;  %15154 = vmatprep.mubr.bf16.mxu1 %v18755_v59  ;;  %v18090_v9 = vld [vmem:[#allocation9 + $0x10] sm:$0xff]   ;;  %v18091_v59 = vld [vmem:[#allocation9 + $0x48] sm:$0xff]   ;;  %v18117_v35 = vld [vmem:[#allocation9 + $0x160] sm:$0xff]  }
 0x865   :  { %v18833_v39 = vpop.f32.mrf.mxu1  ;;  %17988 = vmatpush3.bf16.msra.mxu0 %v18086_v41  ;;  %15124 = vmatprep.subr.bf16.mxu1 %v17843_v11  ;;  %v17914_v41 = vcombine.low %v11900_v13, %v11904_v30  ;;  %v17907_v11 = vcombine.high %v11892_v27, %v11896_v37  ;;  %v11888_v43 = vld [vmem:[#allocation6 + $0xf78] sm:$0xff]  ;;  %v18119_v0 = vld [vmem:[#allocation9 + $0x158] sm:$0xff]   ;;  %v11930_v30 = vrot.slane %v18805_v62, %v1711_v45 }
 0x866   :  { %17989 = vmatprep.subr.bf16.mxu0 %v18087_v44  ;;  %v18118_v44 = vld [vmem:[#allocation9 + $0x120] sm:$0xff]  }
 0x867   :  { %v14832_v1 = vpop.f32.mrf.mxu1 }
 0x868   :  { %15125 = vmatpush1.bf16.msra.mxu1 %v17842_v14  ;;  %v17906_v14 = vcombine.low %v11892_v27, %v11896_v37  ;;  %v17898_v1 = vcombine.low %v11884_v57, %v11888_v43 }
 0x869   :  { %v14833_v49 = vpop.f32.mrf.mxu1  ;;  %17990 = vmatpush3.bf16.msra.mxu0 %v18088_v28  ;;  %15126 = vmatprep.subr.bf16.mxu1 %v17835_v40  ;;  %v17899_v28 = vcombine.high %v11884_v57, %v11888_v43  ;;  %v18120_v40 = vld [vmem:[#allocation9 + $0x118] sm:$0xff]   ;;  %v18101_v43 = vld [vmem:[#allocation9 + $0xe0] sm:$0xff]  }
 0x86a   :  { %17991 = vmatprep.subr.bf16.mxu0 %v18089_v31  ;;  %v11876_v31 = vld [vmem:[#allocation6 + $0xf18] sm:$0xff] }
 0x86b   :  { %v18122_v49 = vld [vmem:[#allocation9 + $0x110] sm:$0xff]   ;;  %v17890_v50 = vcombine.low %v11876_v31, %v11880_v47 }
 0x86c   :  { %15127 = vmatpush1.bf16.msra.mxu1 %v17834_v56  ;;  %v17891_v56 = vcombine.high %v11876_v31, %v11880_v47  ;;  %v18108_v31 = vld [vmem:[#allocation9 + $0x88] sm:$0xff]   ;;  %v18109_v47 = vld [vmem:[#allocation9 + $0xc0] sm:$0xff]  }
 0x86d   :  { %17992 = vmatpush3.bf16.msra.mxu0 %v18090_v9  ;;  %15128 = vmatprep.subr.bf16.mxu1 %v17827_v7  ;;  %v11868_v9 = vld [vmem:[#allocation6 + $0xed8] sm:$0xff] }
 0x86e   :  { %17993 = vmatprep.subr.bf16.mxu0 %v18091_v59  ;;  %v11872_v7 = vld [vmem:[#allocation6 + $0xef8] sm:$0xff]  ;;  %v18123_v59 = vld [vmem:[#allocation9 + $0x148] sm:$0xff]  }
 0x86f   :  { %v17883_v46 = vcombine.high %v11868_v9, %v11872_v7  ;;  %v17882_v54 = vcombine.low %v11868_v9, %v11872_v7  ;;  %v18129_v7 = vld [vmem:[#allocation9 + $0x1f0] sm:$0xff]  }
 0x870   :  { %15129 = vmatpush1.bf16.msra.mxu1 %v17826_v60  ;;  %v18124_v60 = vld [vmem:[#allocation9 + $0x108] sm:$0xff]  }
 0x871   :  { %17994 = vmatpush3.bf16.msra.mxu0 %v18092_v3  ;;  %15130 = vmatprep.subr.bf16.mxu1 %v17819_v2  ;;  %v11860_v3 = vld [vmem:[#allocation6 + $0xe98] sm:$0xff] }
 0x872   :  { %17995 = vmatprep.subr.bf16.mxu0 %v18093_v58  ;;  %v11864_v2 = vld [vmem:[#allocation6 + $0xeb8] sm:$0xff]  ;;  %v18125_v58 = vld [vmem:[#allocation9 + $0x140] sm:$0xff]  }
 0x873   :  { %v17875_v34 = vcombine.high %v11860_v3, %v11864_v2  ;;  %v17874_v16 = vcombine.low %v11860_v3, %v11864_v2  ;;  %v18134_v3 = vld [vmem:[#allocation9 + $0x1a0] sm:$0xff]   ;;  %v18136_v2 = vld [vmem:[#allocation9 + $0x198] sm:$0xff]  }
 0x874   :  { %15131 = vmatpush1.bf16.msra.mxu1 %v17818_v15  ;;  %v18126_v15 = vld [vmem:[#allocation9 + $0x100] sm:$0xff]  }
 0x875   :  { %17996 = vmatpush3.bf16.msra.mxu0 %v18094_v33  ;;  %15132 = vmatprep.subr.bf16.mxu1 %v17811_v53  ;;  %v11852_v33 = vld [vmem:[#allocation6 + $0xe58] sm:$0xff] }
 0x876   :  { %18025 = vmatprep.subr.bf16.mxu0 %v18111_v10  ;;  %v11856_v53 = vld [vmem:[#allocation6 + $0xe78] sm:$0xff] }
 0x877   :  { %v17867_v22 = vcombine.high %v11852_v33, %v11856_v53  ;;  %v11848_v10 = vld [vmem:[#allocation6 + $0xe38] sm:$0xff] }
 0x878   :  { %15133 = vmatpush1.bf16.msra.mxu1 %v17810_v5  ;;  %15731 = vmatmul.mubr.bf16.vlgmr.msra.gmra.mxu0 %v15171_v21  ;;  %v14831_v21 = vadd.f32 %v18833_v39, %v18820_v32  ;;  %v18097_v32 = vld [vmem:[#allocation9 + $0xf0] sm:$0xff]  }
 0x879   :  { %15134 = vmatprep.subr.bf16.mxu1 %v17803_v38  ;;  %18026 = vmatpush3.bf16.msra.mxu0 %v18112_v24  ;;  %v17866_v38 = vcombine.low %v11852_v33, %v11856_v53  ;;  %v17859_v24 = vcombine.high %v11844_v61, %v11848_v10 }
 0x87a   :  { %18027 = vmatprep.subr.bf16.mxu0 %v18113_v18  ;;  %v17858_v18 = vcombine.low %v11844_v61, %v11848_v10  ;;  %v18139_v61 = vld [vmem:[#allocation9 + $0x1c8] sm:$0xff]  }
 0x87c   :  { %15135 = vmatpush1.bf16.msra.mxu1 %v17802_v29  ;;  %v18095_v29 = vld [vmem:[#allocation9 + $0xf8] sm:$0xff]  }
 0x87d   :  { %15136 = vmatprep.subr.bf16.mxu1 %v17795_v36  ;;  %18028 = vmatpush3.bf16.msra.mxu0 %v18114_v63  ;;  %v11926_v36 = vrot.slane %v18805_v62, %v1707_v48  ;;  %v15166_v63 = vmax.f32 %v14831_v21, 0.0  ;;  %v18098_v48 = vld [vmem:[#allocation9 + $0xb0] sm:$0xff]  }
 0x87e   :  { %18029 = vmatprep.subr.bf16.mxu0 %v18115_v55  ;;  %v18096_v55 = vld [vmem:[#allocation9 + $0xb8] sm:$0xff]  }
 0x87f   :  { %v14870_v39 = vadd.f32 %v18823_v42, %v11926_v36 }
 0x880   :  { %15137 = vmatpush1.bf16.msra.mxu1 %v17794_v20  ;;  %v15174_v20 = vpack.c.bf16 %v15166_v63, %v15166_v63 }
 0x881   :  { %15138 = vmatprep.subr.bf16.mxu1 %v17915_v17  ;;  %18030 = vmatpush3.bf16.msra.mxu0 %v18116_v6  ;;  %v14872_v6 = vadd.f32 %v18826_v52, %v11930_v30  ;;  %v18103_v52 = vld [vmem:[#allocation9 + $0xd8] sm:$0xff]  }
 0x882   :  { %18031 = vmatprep.subr.bf16.mxu0 %v18117_v35  ;;  %v18099_v35 = vld [vmem:[#allocation9 + $0xe8] sm:$0xff]  }
 0x884   :  { %15139 = vmatpush2.bf16.msra.mxu1 %v17914_v41 }
 0x885   :  { %15140 = vmatprep.subr.bf16.mxu1 %v17907_v11  ;;  %18032 = vmatpush3.bf16.msra.mxu0 %v18118_v44  ;;  %v18100_v44 = vld [vmem:[#allocation9 + $0xa8] sm:$0xff]  }
 0x886   :  { %18033 = vmatprep.subr.bf16.mxu0 %v18119_v0  ;;  %v18104_v0 = vld [vmem:[#allocation9 + $0x98] sm:$0xff]  }
 0x888   :  { %15141 = vmatpush2.bf16.msra.mxu1 %v17906_v14  ;;  %v18105_v14 = vld [vmem:[#allocation9 + $0xd0] sm:$0xff]  }
 0x889   :  { %15142 = vmatprep.subr.bf16.mxu1 %v17899_v28  ;;  %18034 = vmatpush3.bf16.msra.mxu0 %v18120_v40  ;;  %v18106_v28 = vld [vmem:[#allocation9 + $0x90] sm:$0xff]   ;;  %v18107_v40 = vld [vmem:[#allocation9 + $0xc8] sm:$0xff]  }
 0x88a   :  { %18035 = vmatprep.subr.bf16.mxu0 %v18121_v12  ;;  %v18110_v12 = vld [vmem:[#allocation9 + $0x80] sm:$0xff]  }
 0x88c   :  { %15143 = vmatpush2.bf16.msra.mxu1 %v17898_v1  ;;  %v15165_v1 = vmax.f32 %v18830_v8, 0.0  ;;  %v18135_v8 = vld [vmem:[#allocation9 + $0x1d8] sm:$0xff]  }
 0x88d   :  { %15144 = vmatprep.subr.bf16.mxu1 %v17891_v56  ;;  %18036 = vmatpush3.bf16.msra.mxu0 %v18122_v49  ;;  %v18127_v56 = vld [vmem:[#allocation9 + $0x1f8] sm:$0xff]  }
 0x88e   :  { %18037 = vmatprep.subr.bf16.mxu0 %v18123_v59  ;;  %v18128_v49 = vld [vmem:[#allocation9 + $0x1b8] sm:$0xff]   ;;  %v15173_v9 = vpack.c.bf16 %v15165_v1, %v15165_v1  ;;  %v18130_v59 = vld [vmem:[#allocation9 + $0x1b0] sm:$0xff]  }
 0x890   :  { %15145 = vmatpush2.bf16.msra.mxu1 %v17890_v50  ;;  %v18131_v50 = vld [vmem:[#allocation9 + $0x1e8] sm:$0xff]  }
 0x891   :  { %15146 = vmatprep.subr.bf16.mxu1 %v17883_v46  ;;  %18038 = vmatpush3.bf16.msra.mxu0 %v18124_v60  ;;  %v18132_v46 = vld [vmem:[#allocation9 + $0x1a8] sm:$0xff]   ;;  %v18133_v60 = vld [vmem:[#allocation9 + $0x1e0] sm:$0xff]  }
 0x892   :  { %18039 = vmatprep.subr.bf16.mxu0 %v18125_v58  ;;  %v18137_v58 = vld [vmem:[#allocation9 + $0x1d0] sm:$0xff]  }
 0x894   :  { %15147 = vmatpush2.bf16.msra.mxu1 %v17882_v54  ;;  %v18138_v54 = vld [vmem:[#allocation9 + $0x190] sm:$0xff]  }
 0x895   :  { %15148 = vmatprep.subr.bf16.mxu1 %v17875_v34  ;;  %18040 = vmatpush3.bf16.msra.mxu0 %v18126_v15 }
 0x898   :  { %v14951_v5 = vpop.f32.mrf.mxu0  ;;  %15149 = vmatpush2.bf16.msra.mxu1 %v17874_v16 }
 0x899   :  { %15150 = vmatprep.subr.bf16.mxu1 %v17867_v22 }
 0x89a   :  { %v14953_v4 = vpop.f32.mrf.mxu0 }
 0x89c   :  { %v14955_v25 = vpop.f32.mrf.mxu0  ;;  %15151 = vmatpush2.bf16.msra.mxu1 %v17866_v38 }
 0x89d   :  { %15152 = vmatprep.subr.bf16.mxu1 %v17859_v24  ;;  %v18141_v25 = vld [vmem:[#allocation9 + $0x1c0] sm:$0xff]  }
 0x89e   :  { %v14956_v13 = vpop.f32.mrf.mxu0 }
 0x8a0   :  { %15153 = vmatpush2.bf16.msra.mxu1 %v17858_v18 }
 0x8a1   :  { %18003 = vmatprep.subr.bf16.mxu1 %v18095_v29  ;;  %v18142_v29 = vld [vmem:[#allocation9 + $0x180] sm:$0xff]  }
 0x8a3   :  { %v14910_v17 = vpop.f32.mrf.mxu1  ;;  %15155 = vmatmul.mubr.bf16.vlgmr.msra.gmra.mxu1 %v18757_v19  ;;  %v18102_v19 = vld [vmem:[#allocation9 + $0xa0] sm:$0xff]  }
 0x8a4   :  { %v14911_v27 = vadd.f32 %v14910_v17, %v14870_v39  ;;  %18004 = vmatpush3.bf16.msra.mxu1 %v18096_v55  ;;  %15770 = vmatprep.mubr.bf16.mxu1 %v15174_v20  ;;  %v11938_v20 = vrot.slane %v18805_v62, %v1719_v23 }
 0x8a5   :  { %v14912_v37 = vpop.f32.mrf.mxu1  ;;  %18005 = vmatprep.subr.bf16.mxu1 %v18097_v32  ;;  %v11934_v32 = vrot.slane %v18805_v62, %v1715_v51 }
 0x8a6   :  { %v14913_v45 = vadd.f32 %v14912_v37, %v14872_v6  ;;  %v14952_v41 = vadd.f32 %v14951_v5, %v14911_v27  ;;  %v18140_v5 = vld [vmem:[#allocation9 + $0x188] sm:$0xff]  }
 0x8a7   :  { %v14914_v11 = vpop.f32.mrf.mxu1 }
 0x8a8   :  { %18006 = vmatpush3.bf16.msra.mxu1 %v18098_v48  ;;  %v14954_v57 = vadd.f32 %v14953_v4, %v14913_v45 }
 0x8a9   :  { %v14915_v42 = vpop.f32.mrf.mxu1  ;;  %18007 = vmatprep.subr.bf16.mxu1 %v18099_v35 }
 0x8ac   :  { %18008 = vmatpush3.bf16.msra.mxu1 %v18100_v44 }
 0x8ad   :  { %18009 = vmatprep.subr.bf16.mxu1 %v18101_v43 }
 0x8b0   :  { %18010 = vmatpush3.bf16.msra.mxu1 %v18102_v19 }
 0x8b1   :  { %18011 = vmatprep.subr.bf16.mxu1 %v18103_v52 }
 0x8b4   :  { %18012 = vmatpush3.bf16.msra.mxu1 %v18104_v0 }
 0x8b5   :  { %18013 = vmatprep.subr.bf16.mxu1 %v18105_v14 }
 0x8b8   :  { %18014 = vmatpush3.bf16.msra.mxu1 %v18106_v28 }
 0x8b9   :  { %18015 = vmatprep.subr.bf16.mxu1 %v18107_v40 }
 0x8bc   :  { %18016 = vmatpush3.bf16.msra.mxu1 %v18108_v31 }
 0x8bd   :  { %18017 = vmatprep.subr.bf16.mxu1 %v18109_v47 }
 0x8c0   :  { %18018 = vmatpush3.bf16.msra.mxu1 %v18110_v12  ;;  %v17916_v12 = vld [vmem:[#allocation10] ss:$0 sm:$0xff] }
 0x8c1   :  { %18047 = vmatprep.subr.bf16.mxu1 %v18127_v56 }
 0x8c3   :  { %15771 = vmatmul.mubr.bf16.vlgmr.msra.gmra.mxu1 %v15173_v9 }
 0x8c4   :  { %18048 = vmatpush3.bf16.msra.mxu1 %v18128_v49 }
 0x8c5   :  { %18049 = vmatprep.subr.bf16.mxu1 %v18129_v7 }
 0x8c8   :  { %18050 = vmatpush3.bf16.msra.mxu1 %v18130_v59 }
 0x8c9   :  { %18051 = vmatprep.subr.bf16.mxu1 %v18131_v50 }
 0x8cc   :  { %18052 = vmatpush3.bf16.msra.mxu1 %v18132_v46 }
 0x8cd   :  { %18053 = vmatprep.subr.bf16.mxu1 %v18133_v60 }
 0x8d0   :  { %18054 = vmatpush3.bf16.msra.mxu1 %v18134_v3 }
 0x8d1   :  { %18055 = vmatprep.subr.bf16.mxu1 %v18135_v8 }
 0x8d4   :  { %18056 = vmatpush3.bf16.msra.mxu1 %v18136_v2 }
 0x8d5   :  { %18057 = vmatprep.subr.bf16.mxu1 %v18137_v58 }
 0x8d8   :  { %v15033_v34 = vpop.f32.mrf.mxu0  ;;  %18058 = vmatpush3.bf16.msra.mxu1 %v18138_v54 }
 0x8d9   :  { %18059 = vmatprep.subr.bf16.mxu1 %v18139_v61  ;;  %v15034_v17 = vadd.f32 %v15033_v34, %v11934_v32 }
 0x8da   :  { %v15035_v15 = vpop.f32.mrf.mxu0 }
 0x8db   :  { %v15036_v27 = vadd.f32 %v15035_v15, %v11938_v20 }
 0x8dc   :  { %v15037_v33 = vpop.f32.mrf.mxu0  ;;  %18060 = vmatpush3.bf16.msra.mxu1 %v18140_v5 }
 0x8dd   :  { %18061 = vmatprep.subr.bf16.mxu1 %v18141_v25 }
 0x8de   :  { %v15038_v53 = vpop.f32.mrf.mxu0 }
 0x8e0   :  { %18062 = vmatpush3.bf16.msra.mxu1 %v18142_v29 }
 0x8e3   :  { %v14992_v16 = vpop.f32.mrf.mxu1 }
 0x8e4   :  { %v14993_v22 = vadd.f32 %v14992_v16, %v14952_v41 }
 0x8e5   :  { %v14994_v10 = vpop.f32.mrf.mxu1 }
 0x8e6   :  { %v14995_v38 = vadd.f32 %v14994_v10, %v14954_v57  ;;  %v15167_v24 = vmax.f32 %v14993_v22, 0.0 }
 0x8e7   :  { %v14996_v21 = vpop.f32.mrf.mxu1 }
 0x8e8   :  { %v15168_v4 = vmax.f32 %v14995_v38, 0.0  ;;  %v15175_v63 = vpack.c.bf16 %v15167_v24, %v15167_v24 }
 0x8e9   :  { %v14997_v18 = vpop.f32.mrf.mxu1 }
 0x8ea   :  { %v15176_v36 = vpack.c.bf16 %v15168_v4, %v15168_v4 }
 0x8ec   :  { %15810 = vmatprep.mubr.bf16.mxu0 %v15176_v36 }
 0x8ed   :  { %15811 = vmatmul.mubr.bf16.vlgmr.msra.gmra.mxu0 %v15175_v63 }
 0x918   :  { %v15115_v13 = vpop.f32.mrf.mxu0 }
 0x91a   :  { %v15117_v30 = vpop.f32.mrf.mxu0 }
 0x91c   :  { %v15119_v55 = vpop.f32.mrf.mxu0 }
 0x91e   :  { %v15120_v39 = vpop.f32.mrf.mxu0 }
 0x923   :  { %v15074_v6 = vpop.f32.mrf.mxu1 }
 0x924   :  { %v15075_v48 = vadd.f32 %v15074_v6, %v15034_v17 }
 0x925   :  { %v15076_v37 = vpop.f32.mrf.mxu1 }
 0x926   :  { %v15077_v35 = vadd.f32 %v15076_v37, %v15036_v27  ;;  %v15116_v45 = vadd.f32 %v15115_v13, %v15075_v48 }
 0x927   :  { %v15078_v41 = vpop.f32.mrf.mxu1 }
 0x928   :  { %v15118_v11 = vadd.f32 %v15117_v30, %v15077_v35 }
 0x929   :  { %v15079_v44 = vpop.f32.mrf.mxu1 }
 0x938   :  { %v17997_v57 = vpop.f32.mrf.mxu0 }
 0x93a   :  { %v17998_v42 = vpop.f32.mrf.mxu0 }
 0x93b   :  { %v17999_v43 = vadd.f32 %v17998_v42, %v17997_v57 }
 0x93c   :  { %v18000_v19 = vpop.f32.mrf.mxu0 }
 0x93d   :  { %v15733_v49 = vadd.f32 %v17999_v43, %v17916_v12 }
 0x93e   :  { %v18001_v51 = vpop.f32.mrf.mxu0 }
 0x963   :  { %v15156_v52 = vpop.f32.mrf.mxu1 }
 0x964   :  { %v15157_v0 = vadd.f32 %v15156_v52, %v15116_v45 }
 0x965   :  { %v15158_v26 = vpop.f32.mrf.mxu1 }
 0x966   :  { %v15159_v14 = vadd.f32 %v15158_v26, %v15118_v11  ;;  %v15169_v23 = vmax.f32 %v15157_v0, 0.0 }
 0x967   :  { %v15160_v62 = vpop.f32.mrf.mxu1 }
 0x968   :  { %v15170_v28 = vmax.f32 %v15159_v14, 0.0  ;;  %v15177_v47 = vpack.c.bf16 %v15169_v23, %v15169_v23 }
 0x969   :  { %v15161_v40 = vpop.f32.mrf.mxu1 }
 0x96a   :  { %v15178_v31 = vpack.c.bf16 %v15170_v28, %v15170_v28 }
 0x96c   :  { %15850 = vmatprep.mubr.bf16.mxu1 %v15178_v31 }
 0x96d   :  { %15851 = vmatmul.mubr.bf16.vlgmr.msra.gmra.mxu1 %v15177_v47 }
 0x983   :  { %v18019_v1 = vpop.f32.mrf.mxu1 }
 0x985   :  { %v18020_v56 = vpop.f32.mrf.mxu1 }
 0x986   :  { %v18021_v9 = vadd.f32 %v18020_v56, %v18019_v1 }
 0x987   :  { %v18022_v7 = vpop.f32.mrf.mxu1 }
 0x988   :  { %v15773_v59 = vadd.f32 %v18021_v9, %v15733_v49 }
 0x989   :  { %v18023_v50 = vpop.f32.mrf.mxu1 }
 0x9ad   :  { %v18041_v46 = vpop.f32.mrf.mxu0 }
 0x9af   :  { %v18042_v60 = vpop.f32.mrf.mxu0 }
 0x9b0   :  { %v18043_v3 = vadd.f32 %v18042_v60, %v18041_v46 }
 0x9b1   :  { %v18044_v8 = vpop.f32.mrf.mxu0 }
 0x9b2   :  { %v15813_v2 = vadd.f32 %v18043_v3, %v15773_v59 }
 0x9b3   :  { %v18045_v58 = vpop.f32.mrf.mxu0 }
 0xa2d   :  { %v18063_v54 = vpop.f32.mrf.mxu1 }
 0xa2f   :  { %v18064_v34 = vpop.f32.mrf.mxu1 }
 0xa30   :  { %v18065_v15 = vadd.f32 %v18064_v34, %v18063_v54 }
 0xa31   :  { %v18066_v33 = vpop.f32.mrf.mxu1 }
 0xa32   :  { %v15853_v53 = vadd.f32 %v18065_v15, %v15813_v2 }
 0xa33   :  { %v18067_v16 = vpop.f32.mrf.mxu1 }
 0xa34   :  { %v15858_v22 = vmax.f32 %v15853_v53, 0.0 }
 0xa36   :  { %15859 = vst [vmem:[%s18864_s7] sm:$0xff] %v15858_v22 }
 0xa37   :  { %15864 = vsyncpa [#allocation3], 1 }
 0xa38   :  { %15865 = vsyncpa [#allocation5], 1 }
 0xa39   :  { %15866 = vsyncpa [#allocation8], 1 }
 0xa3a   :  { %15867 = vsyncpa [#allocation11], 1 }

</bundles_post_ra>
